<compile_context>
chip_gen: v7x
topology: tpu7x:2x2x1
jax: 0.10.0
libtpu: 0.0.40
codegen_flags: <defaults>
</compile_context>

<pallas_src>
import functools
import math
import numpy as np

import jax
import jax.numpy as jnp
from jax.experimental import pallas as pl
from jax.experimental.pallas import tpu as pltpu


def _round_up(x, m):
    return (x + m - 1) // m * m


@functools.lru_cache(maxsize=None)
def _vmem_limit():
    """Half of physical VMEM, clamped to [32 MiB, 64 MiB].

    v5e/v6e (128 MiB physical) -> 64 MiB; v7x (64 MiB physical) -> 32 MiB, so
    one code path stays portable across generations.
    """
    try:
        cap = int(pltpu.get_tpu_info().vmem_capacity_bytes)
    except Exception:
        cap = 64 * 1024 * 1024
    return max(32 * 1024 * 1024, min(cap // 2, 64 * 1024 * 1024))


@functools.lru_cache(maxsize=None)
def _lane_fold_supported():
    """Probe whether Mosaic supports the in-kernel (tb, n*d) <-> (tb, n, d)
    lane<->sublane reshapes used by the lane-dense attention layout."""
    def probe(x_ref, o_ref):
        x = x_ref[...].reshape(8, 16, 8)
        o_ref[...] = (x + 1.0).reshape(8, 128)

    try:
        fn = pl.pallas_call(
            probe, out_shape=jax.ShapeDtypeStruct((8, 128), jnp.float32))
        jax.jit(fn).lower(jnp.zeros((8, 128), jnp.float32)).compile()
        return True
    except Exception:
        return False


# ----------------------------- Pallas kernels ------------------------------

def _matmul_bias_kernel(x_ref, w_ref, b_ref, o_ref):
    # x: (TM, Cin) bf16, w: (Cin, Cout) bf16 resident, b: (1, Cout) f32 resident.
    o_ref[...] = (
        jnp.dot(x_ref[...], w_ref[...], preferred_element_type=jnp.float32)
        + b_ref[...]
    )


def _choose_tm(m, cout, tm=2048, min_steps=4):
    """Row tile: as large as possible (amortize ~0.35 us/step), bounded so the
    f32 out block stays ~<=8 MiB, multiple of 16 (bf16 sublane packing), and
    preferring >= min_steps grid steps when m is large (v7x megacore)."""
    row_cap = max(256, (8 * 1024 * 1024) // (max(cout, 128) * 4))
    tm = min(tm, row_cap, _round_up(m, 16))
    tm = max(16, tm // 16 * 16)
    while tm >= 1024 and pl.cdiv(m, tm) < min_steps:
        tm //= 2
    return max(16, tm // 16 * 16)


def matmul_bias(x, w, b, tm=2048):
    """y = x @ w + b with the row dimension tiled.

    Operands are cast to bf16 (halves HBM traffic on these bandwidth-bound
    1x1 convs); the MXU accumulates in f32.  Weights/bias use a constant
    index_map so they stay resident in VMEM.
    """
    m, cin = x.shape
    cout = w.shape[1]
    tm = _choose_tm(m, cout, tm=tm)
    mp = _round_up(m, tm)
    if mp != m:
        x = jnp.pad(x, ((0, mp - m), (0, 0)))
    xb = x.astype(jnp.bfloat16)
    wb = w.astype(jnp.bfloat16)
    out = pl.pallas_call(
        _matmul_bias_kernel,
        out_shape=jax.ShapeDtypeStruct((mp, cout), jnp.float32),
        grid=(mp // tm,),
        in_specs=[
            pl.BlockSpec((tm, cin), lambda i: (i, 0)),
            pl.BlockSpec((cin, cout), lambda i: (0, 0)),   # resident weights
            pl.BlockSpec((1, cout), lambda i: (0, 0)),     # resident bias
        ],
        out_specs=pl.BlockSpec((tm, cout), lambda i: (i, 0)),
        compiler_params=pltpu.CompilerParams(
            dimension_semantics=("parallel",),
            vmem_limit_bytes=_vmem_limit()),
    )(xb, wb, b.reshape(1, cout).astype(jnp.float32))
    return out[:m] if mp != m else out


def conv1x1(x_nchw, weight, bias, tm=2048):
    """1x1 Conv2d on NCHW input via the tiled Pallas matmul."""
    b, cin, h, w = x_nchw.shape
    cout = weight.shape[0]
    x_flat = x_nchw.transpose(0, 2, 3, 1).reshape(b * h * w, cin)
    out = matmul_bias(x_flat, weight.T, bias, tm=tm)
    return out.reshape(b, h, w, cout).transpose(0, 3, 1, 2)


def _dual_window_attn_kernel(bias_ref, q_lms_ref, q_pan_ref, k_ref, v_ref,
                             out_lms_ref, out_pan_ref, *, scale, lane_dense):
    # bias: (nh, ws2, aws2) resident.
    # lane_dense:  q/out blocks (tb, ws2*hd), k/v blocks (tb, aws2*hd)
    # fallback:    q/out blocks (tb, ws2, hd), k/v blocks (tb, aws2, hd)
    nh, ws2, aws2 = bias_ref.shape
    tb = q_lms_ref.shape[0]
    hd = (k_ref.shape[-1] // aws2) if lane_dense else k_ref.shape[-1]

    def unfold(t, n2):
        return t.reshape(tb, n2, hd) if lane_dense else t

    k = unfold(k_ref[...], aws2)
    v = unfold(v_ref[...], aws2)

    # Heads are the fastest-varying index of the flattened (window, head) batch
    # axis and tb % nh == 0 (asserted in the wrapper), so broadcasting the
    # resident (nh, ws2, aws2) bias over tb // nh replicas indexes the right
    # head per row.  Only leading dims change -> layout-free reshape.
    bias = jnp.broadcast_to(bias_ref[...][None], (tb // nh, nh, ws2, aws2))
    bias = bias.reshape(tb, ws2, aws2)

    def attend(q_raw):
        q = unfold(q_raw, ws2)
        dots = jnp.einsum('bqd,bkd->bqk', q, k,
                          preferred_element_type=jnp.float32) * scale + bias
        m = jnp.max(dots, axis=-1, keepdims=True)
        e = jnp.exp(dots - m)
        s = jnp.sum(e, axis=-1, keepdims=True)
        out = jnp.einsum('bqk,bkd->bqd', e / s, v,   # exact softmax (parity)
                         preferred_element_type=jnp.float32)
        return out.reshape(tb, ws2 * hd) if lane_dense else out

    out_lms_ref[...] = attend(q_lms_ref[...])
    out_pan_ref[...] = attend(q_pan_ref[...])


def _pick_tb(b2, nh, cap=128, min_steps=4):
    """Window-head batch per attention grid step: a multiple of nh and of 8,
    <= cap, preferring >= min_steps grid steps (feeds both v7x TCs)."""
    step = nh * 8 // math.gcd(nh, 8)             # multiple of nh and of 8
    cap = max(step, cap // step * step)
    tb = min(cap, _round_up(b2, step))
    while tb > step and pl.cdiv(b2, tb) < min_steps:
        tb = max(step, tb // 2 // step * step)
    return tb


def dual_window_attention(q_lms, q_pan, k, v, rel_bias, scale):
    """q_*: (NW, nh, ws2, hd); k, v: (NW, nh, aws2, hd); rel_bias: (nh, ws2, aws2)."""
    nw, nh, ws2, hd = q_lms.shape
    aws2 = k.shape[2]
    b2 = nw * nh
    tb = _pick_tb(b2, nh)
    assert tb % nh == 0, "window-head batch must be a multiple of num_heads"
    b2p = _round_up(b2, tb)                      # pad batch instead of tiny tb
    lane_dense = _lane_fold_supported()

    def prep(t, n2):
        # Lane-dense layout folds (n2, hd) into the minor axis (= 128 here) so
        # DMA/VMEM blocks are not lane-padded and stores are unmasked.
        t = t.reshape(b2, n2 * hd) if lane_dense else t.reshape(b2, n2, hd)
        if b2p != b2:
            t = jnp.pad(t, [(0, b2p - b2)] + [(0, 0)] * (t.ndim - 1))
        return t

    qs_lms, qs_pan = prep(q_lms, ws2), prep(q_pan, ws2)
    ks, vs = prep(k, aws2), prep(v, aws2)

    if lane_dense:
        qspec = pl.BlockSpec((tb, ws2 * hd), lambda i: (i, 0))
        kspec = pl.BlockSpec((tb, aws2 * hd), lambda i: (i, 0))
        out_sds = jax.ShapeDtypeStruct((b2p, ws2 * hd), jnp.float32)
    else:
        qspec = pl.BlockSpec((tb, ws2, hd), lambda i: (i, 0, 0))
        kspec = pl.BlockSpec((tb, aws2, hd), lambda i: (i, 0, 0))
        out_sds = jax.ShapeDtypeStruct((b2p, ws2, hd), jnp.float32)

    kernel = functools.partial(_dual_window_attn_kernel, scale=scale,
                               lane_dense=lane_dense)
    out_lms, out_pan = pl.pallas_call(
        kernel,
        out_shape=(out_sds, out_sds),
        grid=(b2p // tb,),
        in_specs=[
            pl.BlockSpec((nh, ws2, aws2), lambda i: (0, 0, 0)),  # resident bias
            qspec, qspec, kspec, kspec,
        ],
        out_specs=(qspec, qspec),
        compiler_params=pltpu.CompilerParams(
            dimension_semantics=("parallel",),
            vmem_limit_bytes=_vmem_limit()),
    )(rel_bias, qs_lms, qs_pan, ks, vs)
    out_lms = out_lms[:b2].reshape(nw, nh, ws2, hd)
    out_pan = out_pan[:b2].reshape(nw, nh, ws2, hd)
    return out_lms, out_pan


# ------------------------------ JAX glue ops --------------------------------

def grid_sample_bilinear_zeros_cl(img, grid):
    """F.grid_sample(..., mode='bilinear', padding_mode='zeros',
    align_corners=True), channels-last.

    img: (N, H, W, C); grid: (N, Hg, Wg, 2) with (x, y) in [-1, 1].
    Returns (N, Hg, Wg, C).  Channels-last so each gathered element is C
    contiguous floats (per-row gather) instead of C strided scalars.
    """
    # TODO(synk): move this data-dependent bilinear gather into a Pallas kernel
    # (scalar-prefetch / pl.Element row gathers) if it dominates at full size.
    n, h, w, c = img.shape
    hg, wg = grid.shape[1], grid.shape[2]
    x = grid[..., 0]
    y = grid[..., 1]
    ix = (x + 1.0) * 0.5 * (w - 1)
    iy = (y + 1.0) * 0.5 * (h - 1)
    ix0 = jnp.floor(ix)
    iy0 = jnp.floor(iy)
    ix1 = ix0 + 1.0
    iy1 = iy0 + 1.0
    wx1 = ix - ix0
    wx0 = 1.0 - wx1
    wy1 = iy - iy0
    wy0 = 1.0 - wy1
    flat = img.reshape(n, h * w, c)

    def gather(iyc, ixc, wgt):
        valid = (ixc >= 0) & (ixc <= w - 1) & (iyc >= 0) & (iyc <= h - 1)
        xi = jnp.clip(ixc, 0, w - 1).astype(jnp.int32)
        yi = jnp.clip(iyc, 0, h - 1).astype(jnp.int32)
        idx = (yi * w + xi).reshape(n, hg * wg)
        g = jax.vmap(lambda f, i: jnp.take(f, i, axis=0))(flat, idx)  # (n,hg*wg,c)
        wv = (wgt * valid.astype(img.dtype)).reshape(n, hg * wg, 1)
        return g * wv

    out = (gather(iy0, ix0, wy0 * wx0) + gather(iy0, ix1, wy0 * wx1)
           + gather(iy1, ix0, wy1 * wx0) + gather(iy1, ix1, wy1 * wx1))
    return out.reshape(n, hg, wg, c)


def make_relative_position_index(aws):
    coords_h = np.arange(aws)
    coords_w = np.arange(aws)
    ch, cw = np.meshgrid(coords_h, coords_w, indexing='ij')
    coords_flatten = np.stack([ch.reshape(-1), cw.reshape(-1)], 0)  # (2, aws^2)
    rel = coords_flatten[:, :, None] - coords_flatten[:, None, :]
    rel = rel.transpose(1, 2, 0).copy()
    rel[:, :, 0] += aws - 1
    rel[:, :, 1] += aws - 1
    rel[:, :, 0] *= 2 * aws - 1
    return rel.sum(-1)  # (aws^2, aws^2)


def deformable_window_attention(params, x, lms, cfg):
    nh = cfg['num_heads']
    ws = cfg['ws']
    aws = cfg['attn_ws']
    b, dim, h, w = x.shape
    hd = dim // nh
    scale = hd ** (-0.5)

    pad_td = (ws - h % ws) % ws
    pad_lr = (ws - w % ws) % ws
    pt = pad_td // 2
    pdn = pad_td - pt
    pleft = pad_lr // 2
    pright = pad_lr - pleft
    eh = h + pad_td
    ew = w + pad_lr
    wnh = eh // ws
    wnw = ew // ws

    # ---- reference / base coordinates ------------------------------------
    iw = jnp.linspace(-1.0, 1.0, ew)
    ih = jnp.linspace(-1.0, 1.0, eh)
    image_reference = jnp.stack(
        [jnp.broadcast_to(iw[None, :], (eh, ew)),
         jnp.broadcast_to(ih[:, None], (eh, ew))], 0)[None]     # (1,2,eh,ew)
    base_coords = image_reference.reshape(1, 2, wnh, ws, wnw, ws)

    bch = jnp.arange(aws, dtype=jnp.float32) * 2 * ws / aws / (eh - 1)
    bch = bch - bch.mean()
    bcw = jnp.arange(aws, dtype=jnp.float32) * 2 * ws / aws / (ew - 1)
    bcw = bcw - bcw.mean()
    exp_h = jnp.tile(bch, wnh)                                   # (wnh*aws,)
    exp_w = jnp.tile(bcw, wnw)                                   # (wnw*aws,)
    wc = jnp.stack(
        [jnp.broadcast_to(exp_w[None, :], (wnh * aws, wnw * aws)),
         jnp.broadcast_to(exp_h[:, None], (wnh * aws, wnw * aws))], 0)
    window_coords = wc.reshape(1, 2, wnh, aws, wnw, aws)
    coords = wc.reshape(1, 2, wnh, ws, wnw, ws)

    x_pad = jnp.pad(x, ((0, 0), (0, 0), (pt, pdn), (pleft, pright)))

    if cfg['restart_regression']:
        coords = jnp.broadcast_to(base_coords, (b * nh, 2, wnh, ws, wnw, ws))

    if cfg['learnable']:
        pooled = x_pad.reshape(b, dim, wnh, ws, wnw, ws).mean(axis=(3, 5))
        pooled = jnp.where(pooled >= 0, pooled, 0.01 * pooled)   # LeakyReLU
        pooled_flat = pooled.transpose(0, 2, 3, 1).reshape(b * wnh * wnw, dim)
        # offsets + scales share the pooled input -> fuse into one matmul.
        # Pad the output channels (4*nh) up to 128 lanes so stores are unmasked.
        w_cat = jnp.concatenate([params['off_w'], params['scl_w']], axis=0).T
        b_cat = jnp.concatenate([params['off_b'], params['scl_b']], axis=0)
        n_out = w_cat.shape[1]
        cpad = _round_up(max(n_out, 128), 128) - n_out
        w_cat = jnp.pad(w_cat, ((0, 0), (0, cpad)))
        b_cat = jnp.pad(b_cat, ((0, cpad),))
        off_scl = matmul_bias(pooled_flat, w_cat, b_cat)[:, :n_out]

        def to_bnh2(t):
            t = t.reshape(b, wnh, wnw, nh, 2).transpose(0, 3, 4, 1, 2)
            return t.reshape(b * nh, 2, wnh, wnw)

        off = to_bnh2(off_scl[:, :2 * nh])
        scl = to_bnh2(off_scl[:, 2 * nh:])
        off = off / jnp.array([ew // ws, eh // ws],
                              jnp.float32).reshape(1, 2, 1, 1)
        coords = (coords
                  + window_coords * scl[:, :, :, None, :, None]
                  + off[:, :, :, None, :, None])

    sample_coords = coords.transpose(0, 2, 3, 4, 5, 1).reshape(
        b * nh, aws * wnh, aws * wnw, 2)

    # ---- qkv: x and lms share the conv weights -> one fused Pallas matmul ---
    m = b * h * w
    x_flat = x.transpose(0, 2, 3, 1).reshape(m, dim)
    lms_flat = lms.transpose(0, 2, 3, 1).reshape(m, dim)
    qkv_both = matmul_bias(jnp.concatenate([x_flat, lms_flat], axis=0),
                           params['qkv_w'].T, params['qkv_b'])   # (2m, 3*dim)

    def split_pad_cl(flat):
        # (m, 3*dim) channels-last -> (3, b*nh, eh, ew, hd), spatially padded.
        t = flat.reshape(b, h, w, 3, nh, hd).transpose(3, 0, 4, 1, 2, 5)
        t = t.reshape(3, b * nh, h, w, hd)
        t = jnp.pad(t, ((0, 0), (0, 0), (pt, pdn), (pleft, pright), (0, 0)))
        return t

    qkv_x = split_pad_cl(qkv_both[:m])
    qkv_l = split_pad_cl(qkv_both[m:])
    q_pan, k, v = qkv_x[0], qkv_x[1], qkv_x[2]
    q_lms = qkv_l[0]

    k_sel = grid_sample_bilinear_zeros_cl(k, sample_coords)
    v_sel = grid_sample_bilinear_zeros_cl(v, sample_coords)

    def to_windows_cl(t, win):
        # (b*nh, wn_h*win, wn_w*win, hd) -> (b*wnh*wnw, nh, win*win, hd)
        t = t.reshape(b, nh, wnh, win, wnw, win, hd)
        t = t.transpose(0, 2, 4, 1, 3, 5, 6)
        return t.reshape(b * wnh * wnw, nh, win * win, hd)

    q_pan_w = to_windows_cl(q_pan, ws)
    q_lms_w = to_windows_cl(q_lms, ws)
    k_w = to_windows_cl(k_sel, aws)
    v_w = to_windows_cl(v_sel, aws)

    rel_bias = params['rpb_table'][cfg['rel_index'].reshape(-1)]
    rel_bias = rel_bias.reshape(ws * ws, aws * aws, nh).transpose(2, 0, 1)

    out_lms_w, out_pan_w = dual_window_attention(
        q_lms_w, q_pan_w, k_w, v_w, rel_bias, scale)

    def from_windows(t):
        t = t.reshape(b, wnh, wnw, nh, ws, ws, hd)
        t = t.transpose(0, 3, 6, 1, 4, 2, 5)   # b, nh, hd, wnh, ws, wnw, ws
        t = t.reshape(b, nh * hd, eh, ew)
        return t[:, :, pt:h + pt, pleft:w + pleft]

    # Matching the PyTorch code: the returned lms output is NOT projected
    # (proj(out_lms) is written to a dead variable there); the pan output IS.
    out_lms = from_windows(out_lms_w)
    out_pan = from_windows(out_pan_w)
    out_pan = conv1x1(out_pan, params['proj_w'], params['proj_b'])
    return out_pan, out_lms


# ------------------------------- main ---------------------------------------

if __name__ == "__main__":
    # Small config consistent with the module: dim divisible by num_heads,
    # img_size divisible by window_size (=> zero padding in this example).
    dim, num_heads, ws = 32, 4, 4
    b, h, w = 2, 16, 16
    cfg = dict(
        num_heads=num_heads, ws=ws, attn_ws=ws,
        restart_regression=True, learnable=True,
        rel_index=make_relative_position_index(ws),
    )

    key = jax.random.PRNGKey(0)
    ks = jax.random.split(key, 10)

    def nrm(k, shape):
        return jax.random.normal(k, shape, jnp.float32) * 0.02

    params = {
        'qkv_w': nrm(ks[0], (3 * dim, dim)),
        'qkv_b': nrm(ks[1], (3 * dim,)),
        'proj_w': nrm(ks[2], (dim, dim)),
        'proj_b': nrm(ks[3], (dim,)),
        'off_w': nrm(ks[4], (num_heads * 2, dim)),
        'off_b': jnp.zeros((num_heads * 2,), jnp.float32),
        'scl_w': nrm(ks[5], (num_heads * 2, dim)),
        'scl_b': jnp.zeros((num_heads * 2,), jnp.float32),
        'rpb_table': (jax.random.truncated_normal(
            ks[6], -2.0, 2.0, ((2 * ws - 1) ** 2, num_heads), jnp.float32) * 0.02),
    }

    x = jax.random.normal(ks[7], (b, dim, h, w), jnp.float32)
    lms = jax.random.normal(ks[8], (b, dim, h, w), jnp.float32)

    # Prime the layout probe and VMEM query once, outside of tracing.
    _ = _lane_fold_supported()
    _ = _vmem_limit()

    # jit the whole forward so the (HBM-bound) layout glue around the Pallas
    # kernels is fused by XLA instead of dispatched op-by-op.
    fwd = jax.jit(lambda p, xx, ll: deformable_window_attention(p, xx, ll, cfg))
    out_pan, out_lms = fwd(params, x, lms)
    out_pan = jax.block_until_ready(out_pan)
    out_lms = jax.block_until_ready(out_lms)

    assert out_pan.shape == (b, dim, h, w)
    assert out_lms.shape == (b, dim, h, w)
    assert bool(jnp.all(jnp.isfinite(out_pan)))
    assert bool(jnp.all(jnp.isfinite(out_lms)))
    print("KERNEL_OK")
</pallas_src>

<mosaic_0001>
module attributes {stable_mosaic.version = 11 : i64} {
  func.func private @main(%arg0: i32) attributes {dimension_semantics = [#tpu.dimension_semantics<core_parallel>], iteration_bounds = array<i64: 2>, tpu.core_type = #tpu.core_type<sc_scalar_subcore>, window_params = []} {
    return
  }
}

module attributes {stable_mosaic.version = 11 : i64} {
  func.func private @main(%arg0: i32) attributes {dimension_semantics = [#tpu.dimension_semantics<core_parallel>], iteration_bounds = array<i64: 2>, tpu.core_type = #tpu.core_type<sc_scalar_subcore>, window_params = []} {
    return
  }
}

module attributes {stable_mosaic.version = 11 : i64} {
  func.func @_matmul_bias_kernel(%arg0: i32, %arg1: memref<32x32xbf16, #tpu.memory_space<vmem>>, %arg2: memref<32x128xbf16, #tpu.memory_space<vmem>>, %arg3: memref<1x128xf32, #tpu.memory_space<vmem>>, %arg4: memref<32x128xf32, #tpu.memory_space<vmem>>) attributes {dimension_semantics = [#tpu.dimension_semantics<parallel>], iteration_bounds = array<i64: 1>, scalar_prefetch = 0 : i64, scratch_operands = 0 : i64, tpu.core_type = #tpu.core_type<tc>, window_params = [{transform_indices = @transform_0, window_bounds = array<i64: 32, 32>}, {pipeline_mode = #tpu.pipeline_mode<synchronous>, transform_indices = @transform_1, window_bounds = array<i64: 32, 128>}, {pipeline_mode = #tpu.pipeline_mode<synchronous>, transform_indices = @transform_2, window_bounds = array<i64: 1, 128>}, {transform_indices = @transform_3, window_bounds = array<i64: 32, 128>}]} {
    %c0 = arith.constant 0 : index
    %c0_0 = arith.constant 0 : index
    %0 = vector.load %arg1[%c0, %c0_0] : memref<32x32xbf16, #tpu.memory_space<vmem>>, vector<32x32xbf16>
    %c0_1 = arith.constant 0 : index
    %c0_2 = arith.constant 0 : index
    %1 = vector.load %arg2[%c0_1, %c0_2] : memref<32x128xbf16, #tpu.memory_space<vmem>>, vector<32x128xbf16>
    %cst = arith.constant dense<0.000000e+00> : vector<32x128xf32>
    %2 = tpu.matmul %0, %1, %cst {dimension_numbers = #tpu.dot_dimension_numbers<[1], [0], [0], [1], [0, 0, 1, 1], [], []>} : vector<32x32xbf16>, vector<32x128xbf16>, vector<32x128xf32> -> vector<32x128xf32>
    %c0_3 = arith.constant 0 : index
    %c0_4 = arith.constant 0 : index
    %3 = vector.load %arg3[%c0_3, %c0_4] : memref<1x128xf32, #tpu.memory_space<vmem>>, vector<1x128xf32>
    %4 = vector.broadcast %3 : vector<1x128xf32> to vector<32x128xf32>
    %5 = arith.addf %2, %4 : vector<32x128xf32>
    %c0_5 = arith.constant 0 : index
    %c0_6 = arith.constant 0 : index
    %6 = vector.load %arg4[%c0_5, %c0_6] : memref<32x128xf32, #tpu.memory_space<vmem>>, vector<32x128xf32>
    tpu.vector_store %arg4[%c0_5, %c0_6], %5 {strides = array<i32>} : memref<32x128xf32, #tpu.memory_space<vmem>>, vector<32x128xf32>,
    return
  }
  func.func @transform_0(%arg0: i32) -> (i32, i32) {
    %c0_i32 = arith.constant 0 : i32
    %c0_i32_0 = arith.constant 0 : i32
    return %arg0, %c0_i32 : i32, i32
  }
  func.func @transform_1(%arg0: i32) -> (i32, i32) {
    %c0_i32 = arith.constant 0 : i32
    %c0_i32_0 = arith.constant 0 : i32
    %c0_i32_1 = arith.constant 0 : i32
    return %c0_i32, %c0_i32_0 : i32, i32
  }
  func.func @transform_2(%arg0: i32) -> (i32, i32) {
    %c0_i32 = arith.constant 0 : i32
    %c0_i32_0 = arith.constant 0 : i32
    %c0_i32_1 = arith.constant 0 : i32
    return %c0_i32, %c0_i32_0 : i32, i32
  }
  func.func @transform_3(%arg0: i32) -> (i32, i32) {
    %c0_i32 = arith.constant 0 : i32
    %c0_i32_0 = arith.constant 0 : i32
    return %arg0, %c0_i32 : i32, i32
  }
}

module attributes {stable_mosaic.version = 11 : i64} {
  func.func @_matmul_bias_kernel(%arg0: i32, %arg1: memref<512x32xbf16, #tpu.memory_space<vmem>>, %arg2: memref<32x96xbf16, #tpu.memory_space<vmem>>, %arg3: memref<1x96xf32, #tpu.memory_space<vmem>>, %arg4: memref<512x96xf32, #tpu.memory_space<vmem>>) attributes {dimension_semantics = [#tpu.dimension_semantics<parallel>], iteration_bounds = array<i64: 2>, scalar_prefetch = 0 : i64, scratch_operands = 0 : i64, tpu.core_type = #tpu.core_type<tc>, window_params = [{transform_indices = @transform_0, window_bounds = array<i64: 512, 32>}, {pipeline_mode = #tpu.pipeline_mode<synchronous>, transform_indices = @transform_1, window_bounds = array<i64: 32, 96>}, {pipeline_mode = #tpu.pipeline_mode<synchronous>, transform_indices = @transform_2, window_bounds = array<i64: 1, 96>}, {transform_indices = @transform_3, window_bounds = array<i64: 512, 96>}]} {
    %c0 = arith.constant 0 : index
    %c0_0 = arith.constant 0 : index
    %0 = vector.load %arg1[%c0, %c0_0] : memref<512x32xbf16, #tpu.memory_space<vmem>>, vector<512x32xbf16>
    %c0_1 = arith.constant 0 : index
    %c0_2 = arith.constant 0 : index
    %1 = vector.load %arg2[%c0_1, %c0_2] : memref<32x96xbf16, #tpu.memory_space<vmem>>, vector<32x96xbf16>
    %cst = arith.constant dense<0.000000e+00> : vector<512x96xf32>
    %2 = tpu.matmul %0, %1, %cst {dimension_numbers = #tpu.dot_dimension_numbers<[1], [0], [0], [1], [0, 0, 1, 1], [], []>} : vector<512x32xbf16>, vector<32x96xbf16>, vector<512x96xf32> -> vector<512x96xf32>
    %c0_3 = arith.constant 0 : index
    %c0_4 = arith.constant 0 : index
    %3 = vector.load %arg3[%c0_3, %c0_4] : memref<1x96xf32, #tpu.memory_space<vmem>>, vector<1x96xf32>
    %4 = vector.broadcast %3 : vector<1x96xf32> to vector<512x96xf32>
    %5 = arith.addf %2, %4 : vector<512x96xf32>
    %c0_5 = arith.constant 0 : index
    %c0_6 = arith.constant 0 : index
    %6 = vector.load %arg4[%c0_5, %c0_6] : memref<512x96xf32, #tpu.memory_space<vmem>>, vector<512x96xf32>
    tpu.vector_store %arg4[%c0_5, %c0_6], %5 {strides = array<i32>} : memref<512x96xf32, #tpu.memory_space<vmem>>, vector<512x96xf32>,
    return
  }
  func.func @transform_0(%arg0: i32) -> (i32, i32) {
    %c0_i32 = arith.constant 0 : i32
    %c0_i32_0 = arith.constant 0 : i32
    return %arg0, %c0_i32 : i32, i32
  }
  func.func @transform_1(%arg0: i32) -> (i32, i32) {
    %c0_i32 = arith.constant 0 : i32
    %c0_i32_0 = arith.constant 0 : i32
    %c0_i32_1 = arith.constant 0 : i32
    return %c0_i32, %c0_i32_0 : i32, i32
  }
  func.func @transform_2(%arg0: i32) -> (i32, i32) {
    %c0_i32 = arith.constant 0 : i32
    %c0_i32_0 = arith.constant 0 : i32
    %c0_i32_1 = arith.constant 0 : i32
    return %c0_i32, %c0_i32_0 : i32, i32
  }
  func.func @transform_3(%arg0: i32) -> (i32, i32) {
    %c0_i32 = arith.constant 0 : i32
    %c0_i32_0 = arith.constant 0 : i32
    return %arg0, %c0_i32 : i32, i32
  }
}

module attributes {stable_mosaic.version = 11 : i64} {
  func.func @_dual_window_attn_kernel(%arg0: i32, %arg1: memref<4x16x16xf32, #tpu.memory_space<vmem>>, %arg2: memref<32x16x8xf32, #tpu.memory_space<vmem>>, %arg3: memref<32x16x8xf32, #tpu.memory_space<vmem>>, %arg4: memref<32x16x8xf32, #tpu.memory_space<vmem>>, %arg5: memref<32x16x8xf32, #tpu.memory_space<vmem>>, %arg6: memref<32x16x8xf32, #tpu.memory_space<vmem>>, %arg7: memref<32x16x8xf32, #tpu.memory_space<vmem>>) attributes {dimension_semantics = [#tpu.dimension_semantics<parallel>], iteration_bounds = array<i64: 4>, scalar_prefetch = 0 : i64, scratch_operands = 0 : i64, tpu.core_type = #tpu.core_type<tc>, window_params = [{pipeline_mode = #tpu.pipeline_mode<synchronous>, transform_indices = @transform_0, window_bounds = array<i64: 4, 16, 16>}, {transform_indices = @transform_1, window_bounds = array<i64: 32, 16, 8>}, {transform_indices = @transform_2, window_bounds = array<i64: 32, 16, 8>}, {transform_indices = @transform_3, window_bounds = array<i64: 32, 16, 8>}, {transform_indices = @transform_4, window_bounds = array<i64: 32, 16, 8>}, {transform_indices = @transform_5, window_bounds = array<i64: 32, 16, 8>}, {transform_indices = @transform_6, window_bounds = array<i64: 32, 16, 8>}]} {
    %c0 = arith.constant 0 : index
    %c0_0 = arith.constant 0 : index
    %c0_1 = arith.constant 0 : index
    %0 = vector.load %arg4[%c0, %c0_0, %c0_1] : memref<32x16x8xf32, #tpu.memory_space<vmem>>, vector<32x16x8xf32>
    %c0_2 = arith.constant 0 : index
    %c0_3 = arith.constant 0 : index
    %c0_4 = arith.constant 0 : index
    %1 = vector.load %arg5[%c0_2, %c0_3, %c0_4] : memref<32x16x8xf32, #tpu.memory_space<vmem>>, vector<32x16x8xf32>
    %c0_5 = arith.constant 0 : index
    %c0_6 = arith.constant 0 : index
    %c0_7 = arith.constant 0 : index
    %2 = vector.load %arg1[%c0_5, %c0_6, %c0_7] : memref<4x16x16xf32, #tpu.memory_space<vmem>>, vector<4x16x16xf32>
    %3 = vector.shape_cast %2 : vector<4x16x16xf32> to vector<1x4x16x16xf32>
    %4 = vector.shape_cast %3 : vector<1x4x16x16xf32> to vector<1x4x16x16xf32>
    %5 = vector.broadcast %4 : vector<1x4x16x16xf32> to vector<8x4x16x16xf32>
    %6 = vector.shape_cast %5 : vector<8x4x16x16xf32> to vector<32x16x16xf32>
    %c0_8 = arith.constant 0 : index
    %c0_9 = arith.constant 0 : index
    %c0_10 = arith.constant 0 : index
    %7 = vector.load %arg2[%c0_8, %c0_9, %c0_10] : memref<32x16x8xf32, #tpu.memory_space<vmem>>, vector<32x16x8xf32>
    "tpu.trace_start"() <{level = 10 : i32, message = "bqd,bkd->bqk"}> : () -> ()
    %cst = arith.constant dense<0.000000e+00> : vector<32x16x16xf32>
    %8 = tpu.matmul %7, %0, %cst {dimension_numbers = #tpu.dot_dimension_numbers<[2], [2], [1], [1], [0, 0, 0, 1, 1, 1], [0], [0]>} : vector<32x16x8xf32>, vector<32x16x8xf32>, vector<32x16x16xf32> -> vector<32x16x16xf32>
    "tpu.trace_stop"() : () -> ()
    %cst_11 = arith.constant 0.353553385 : f32
    %9 = vector.broadcast %cst_11 : f32 to vector<32x16x16xf32>
    %10 = arith.mulf %8, %9 : vector<32x16x16xf32>
    %11 = arith.addf %10, %6 : vector<32x16x16xf32>
    %cst_12 = arith.constant dense<0xFF800000> : vector<32x16xf32>
    %12 = vector.multi_reduction <maximumf>, %11, %cst_12 [2] : vector<32x16x16xf32> to vector<32x16xf32>
    %13 = vector.shape_cast %12 : vector<32x16xf32> to vector<32x16x1xf32>
    %14 = vector.broadcast %13 : vector<32x16x1xf32> to vector<32x16x16xf32>
    %15 = arith.subf %11, %14 : vector<32x16x16xf32>
    %16 = math.exp %15 : vector<32x16x16xf32>
    %cst_13 = arith.constant dense<0.000000e+00> : vector<32x16xf32>
    %17 = vector.multi_reduction <add>, %16, %cst_13 [2] : vector<32x16x16xf32> to vector<32x16xf32>
    %18 = vector.shape_cast %17 : vector<32x16xf32> to vector<32x16x1xf32>
    %19 = vector.broadcast %18 : vector<32x16x1xf32> to vector<32x16x16xf32>
    %20 = arith.divf %16, %19 : vector<32x16x16xf32>
    "tpu.trace_start"() <{level = 10 : i32, message = "bqk,bkd->bqd"}> : () -> ()
    %cst_14 = arith.constant dense<0.000000e+00> : vector<32x16x8xf32>
    %21 = tpu.matmul %20, %1, %cst_14 {dimension_numbers = #tpu.dot_dimension_numbers<[2], [1], [1], [2], [0, 0, 0, 1, 1, 2], [0], [0]>} : vector<32x16x16xf32>, vector<32x16x8xf32>, vector<32x16x8xf32> -> vector<32x16x8xf32>
    "tpu.trace_stop"() : () -> ()
    %c0_15 = arith.constant 0 : index
    %c0_16 = arith.constant 0 : index
    %c0_17 = arith.constant 0 : index
    %22 = vector.load %arg6[%c0_15, %c0_16, %c0_17] : memref<32x16x8xf32, #tpu.memory_space<vmem>>, vector<32x16x8xf32>
    tpu.vector_store %arg6[%c0_15, %c0_16, %c0_17], %21 {strides = array<i32>} : memref<32x16x8xf32, #tpu.memory_space<vmem>>, vector<32x16x8xf32>,
    %c0_18 = arith.constant 0 : index
    %c0_19 = arith.constant 0 : index
    %c0_20 = arith.constant 0 : index
    %23 = vector.load %arg3[%c0_18, %c0_19, %c0_20] : memref<32x16x8xf32, #tpu.memory_space<vmem>>, vector<32x16x8xf32>
    "tpu.trace_start"() <{level = 10 : i32, message = "bqd,bkd->bqk"}> : () -> ()
    %cst_21 = arith.constant dense<0.000000e+00> : vector<32x16x16xf32>
    %24 = tpu.matmul %23, %0, %cst_21 {dimension_numbers = #tpu.dot_dimension_numbers<[2], [2], [1], [1], [0, 0, 0, 1, 1, 1], [0], [0]>} : vector<32x16x8xf32>, vector<32x16x8xf32>, vector<32x16x16xf32> -> vector<32x16x16xf32>
    "tpu.trace_stop"() : () -> ()
    %cst_22 = arith.constant 0.353553385 : f32
    %25 = vector.broadcast %cst_22 : f32 to vector<32x16x16xf32>
    %26 = arith.mulf %24, %25 : vector<32x16x16xf32>
    %27 = arith.addf %26, %6 : vector<32x16x16xf32>
    %cst_23 = arith.constant dense<0xFF800000> : vector<32x16xf32>
    %28 = vector.multi_reduction <maximumf>, %27, %cst_23 [2] : vector<32x16x16xf32> to vector<32x16xf32>
    %29 = vector.shape_cast %28 : vector<32x16xf32> to vector<32x16x1xf32>
    %30 = vector.broadcast %29 : vector<32x16x1xf32> to vector<32x16x16xf32>
    %31 = arith.subf %27, %30 : vector<32x16x16xf32>
    %32 = math.exp %31 : vector<32x16x16xf32>
    %cst_24 = arith.constant dense<0.000000e+00> : vector<32x16xf32>
    %33 = vector.multi_reduction <add>, %32, %cst_24 [2] : vector<32x16x16xf32> to vector<32x16xf32>
    %34 = vector.shape_cast %33 : vector<32x16xf32> to vector<32x16x1xf32>
    %35 = vector.broadcast %34 : vector<32x16x1xf32> to vector<32x16x16xf32>
    %36 = arith.divf %32, %35 : vector<32x16x16xf32>
    "tpu.trace_start"() <{level = 10 : i32, message = "bqk,bkd->bqd"}> : () -> ()
    %cst_25 = arith.constant dense<0.000000e+00> : vector<32x16x8xf32>
    %37 = tpu.matmul %36, %1, %cst_25 {dimension_numbers = #tpu.dot_dimension_numbers<[2], [1], [1], [2], [0, 0, 0, 1, 1, 2], [0], [0]>} : vector<32x16x16xf32>, vector<32x16x8xf32>, vector<32x16x8xf32> -> vector<32x16x8xf32>
    "tpu.trace_stop"() : () -> ()
    %c0_26 = arith.constant 0 : index
    %c0_27 = arith.constant 0 : index
    %c0_28 = arith.constant 0 : index
    %38 = vector.load %arg7[%c0_26, %c0_27, %c0_28] : memref<32x16x8xf32, #tpu.memory_space<vmem>>, vector<32x16x8xf32>
    tpu.vector_store %arg7[%c0_26, %c0_27, %c0_28], %37 {strides = array<i32>} : memref<32x16x8xf32, #tpu.memory_space<vmem>>, vector<32x16x8xf32>,
    return
  }
  func.func @transform_0(%arg0: i32) -> (i32, i32, i32) {
    %c0_i32 = arith.constant 0 : i32
    %c0_i32_0 = arith.constant 0 : i32
    %c0_i32_1 = arith.constant 0 : i32
    %c0_i32_2 = arith.constant 0 : i32
    return %c0_i32, %c0_i32_0, %c0_i32_1 : i32, i32, i32
  }
  func.func @transform_1(%arg0: i32) -> (i32, i32, i32) {
    %c0_i32 = arith.constant 0 : i32
    %c0_i32_0 = arith.constant 0 : i32
    %c0_i32_1 = arith.constant 0 : i32
    return %arg0, %c0_i32, %c0_i32_0 : i32, i32, i32
  }
  func.func @transform_2(%arg0: i32) -> (i32, i32, i32) {
    %c0_i32 = arith.constant 0 : i32
    %c0_i32_0 = arith.constant 0 : i32
    %c0_i32_1 = arith.constant 0 : i32
    return %arg0, %c0_i32, %c0_i32_0 : i32, i32, i32
  }
  func.func @transform_3(%arg0: i32) -> (i32, i32, i32) {
    %c0_i32 = arith.constant 0 : i32
    %c0_i32_0 = arith.constant 0 : i32
    %c0_i32_1 = arith.constant 0 : i32
    return %arg0, %c0_i32, %c0_i32_0 : i32, i32, i32
  }
  func.func @transform_4(%arg0: i32) -> (i32, i32, i32) {
    %c0_i32 = arith.constant 0 : i32
    %c0_i32_0 = arith.constant 0 : i32
    %c0_i32_1 = arith.constant 0 : i32
    return %arg0, %c0_i32, %c0_i32_0 : i32, i32, i32
  }
  func.func @transform_5(%arg0: i32) -> (i32, i32, i32) {
    %c0_i32 = arith.constant 0 : i32
    %c0_i32_0 = arith.constant 0 : i32
    %c0_i32_1 = arith.constant 0 : i32
    return %arg0, %c0_i32, %c0_i32_0 : i32, i32, i32
  }
  func.func @transform_6(%arg0: i32) -> (i32, i32, i32) {
    %c0_i32 = arith.constant 0 : i32
    %c0_i32_0 = arith.constant 0 : i32
    %c0_i32_1 = arith.constant 0 : i32
    return %arg0, %c0_i32, %c0_i32_0 : i32, i32, i32
  }
}

module attributes {stable_mosaic.version = 11 : i64} {
  func.func @_matmul_bias_kernel(%arg0: i32, %arg1: memref<512x32xbf16, #tpu.memory_space<vmem>>, %arg2: memref<32x32xbf16, #tpu.memory_space<vmem>>, %arg3: memref<1x32xf32, #tpu.memory_space<vmem>>, %arg4: memref<512x32xf32, #tpu.memory_space<vmem>>) attributes {dimension_semantics = [#tpu.dimension_semantics<parallel>], iteration_bounds = array<i64: 1>, scalar_prefetch = 0 : i64, scratch_operands = 0 : i64, tpu.core_type = #tpu.core_type<tc>, window_params = [{transform_indices = @transform_0, window_bounds = array<i64: 512, 32>}, {pipeline_mode = #tpu.pipeline_mode<synchronous>, transform_indices = @transform_1, window_bounds = array<i64: 32, 32>}, {pipeline_mode = #tpu.pipeline_mode<synchronous>, transform_indices = @transform_2, window_bounds = array<i64: 1, 32>}, {transform_indices = @transform_3, window_bounds = array<i64: 512, 32>}]} {
    %c0 = arith.constant 0 : index
    %c0_0 = arith.constant 0 : index
    %0 = vector.load %arg1[%c0, %c0_0] : memref<512x32xbf16, #tpu.memory_space<vmem>>, vector<512x32xbf16>
    %c0_1 = arith.constant 0 : index
    %c0_2 = arith.constant 0 : index
    %1 = vector.load %arg2[%c0_1, %c0_2] : memref<32x32xbf16, #tpu.memory_space<vmem>>, vector<32x32xbf16>
    %cst = arith.constant dense<0.000000e+00> : vector<512x32xf32>
    %2 = tpu.matmul %0, %1, %cst {dimension_numbers = #tpu.dot_dimension_numbers<[1], [0], [0], [1], [0, 0, 1, 1], [], []>} : vector<512x32xbf16>, vector<32x32xbf16>, vector<512x32xf32> -> vector<512x32xf32>
    %c0_3 = arith.constant 0 : index
    %c0_4 = arith.constant 0 : index
    %3 = vector.load %arg3[%c0_3, %c0_4] : memref<1x32xf32, #tpu.memory_space<vmem>>, vector<1x32xf32>
    %4 = vector.broadcast %3 : vector<1x32xf32> to vector<512x32xf32>
    %5 = arith.addf %2, %4 : vector<512x32xf32>
    %c0_5 = arith.constant 0 : index
    %c0_6 = arith.constant 0 : index
    %6 = vector.load %arg4[%c0_5, %c0_6] : memref<512x32xf32, #tpu.memory_space<vmem>>, vector<512x32xf32>
    tpu.vector_store %arg4[%c0_5, %c0_6], %5 {strides = array<i32>} : memref<512x32xf32, #tpu.memory_space<vmem>>, vector<512x32xf32>,
    return
  }
  func.func @transform_0(%arg0: i32) -> (i32, i32) {
    %c0_i32 = arith.constant 0 : i32
    %c0_i32_0 = arith.constant 0 : i32
    return %arg0, %c0_i32 : i32, i32
  }
  func.func @transform_1(%arg0: i32) -> (i32, i32) {
    %c0_i32 = arith.constant 0 : i32
    %c0_i32_0 = arith.constant 0 : i32
    %c0_i32_1 = arith.constant 0 : i32
    return %c0_i32, %c0_i32_0 : i32, i32
  }
  func.func @transform_2(%arg0: i32) -> (i32, i32) {
    %c0_i32 = arith.constant 0 : i32
    %c0_i32_0 = arith.constant 0 : i32
    %c0_i32_1 = arith.constant 0 : i32
    return %c0_i32, %c0_i32_0 : i32, i32
  }
  func.func @transform_3(%arg0: i32) -> (i32, i32) {
    %c0_i32 = arith.constant 0 : i32
    %c0_i32_0 = arith.constant 0 : i32
    return %arg0, %c0_i32 : i32, i32
  }
}

</mosaic_0001>

<bundles_post_ra>
// kernel: tile.17
= control target key start
LH: loop header
LB: loop body
LE: loop exit
PB: predicated region body
PF: predicated region fallthrough
CT: control target
= control target key end

     0   :  { %s22_s0 = inlined_call_operand.vmem [shape: f32[4], index: 0, kind: input, shape index: {}]   ;;  %s23_s1 = inlined_call_operand.vmem [shape: f32[4,4], index: 1, kind: output, shape index: {}]  }
   0x1   :  { %v4_v0 = vld [vmem:[%s22_s0] ss:$0 sm:$0xff] }
   0x2   :  { %5 = vst [vmem:[%s23_s1] sm:$0xf] %v4_v0 }

// kernel: mul.100
= control target key start
LH: loop header
LB: loop body
LE: loop exit
PB: predicated region body
PF: predicated region fallthrough
CT: control target
= control target key end

     0   :  { %vm161_vm0 = vcmask 1047556   ;;  %vm81_vm1 = vcmask 31744   ;;  %s596_s9 = smov 120   ;;  %s597_s10 = smov 116   ;;  %s796_s0 = inlined_call_operand.vmem [shape: f32[2,16,16], index: 0, kind: input, shape index: {}]   ;;  %s797_s1 = inlined_call_operand.vmem [shape: f32[2,4,4,4,4], index: 1, kind: output, shape index: {}]  }
   0x1   :  { %v558_v0 = vld [vmem:[%s796_s0 + $0x6] sm:$0x3]  ;;  %v559_v1 = vld [vmem:[%s796_s0 + $0x4] sm:$0x3]  ;;  %v560_v2 = vld [vmem:[%s796_s0 + $0x2] sm:$0x3] }
   0x2   :  { %68 = vst [vmem:[#allocation1 + $0x18] sm:$0x3] %v558_v0  ;;  %73 = vst [vmem:[#allocation1 + $0x10] sm:$0x3] %v559_v1  ;;  %v78_v3 = vld [vmem:[%s796_s0] sm:$0x3] }
   0x3   :  { %77 = vst [vmem:[#allocation1 + $0x8] sm:$0x3] %v560_v2  ;;  %v550_v4 = vld [vmem:[%s796_s0 + $0x16] sm:$0x3]  ;;  %79 = vst [vmem:[#allocation1] sm:$0x3] %v78_v3 }
   0x4   :  { %28 = vst [vmem:[#allocation1 + $0x58] sm:$0x3] %v550_v4  ;;  %v551_v5 = vld [vmem:[%s796_s0 + $0x14] sm:$0x3]  ;;  %v552_v6 = vld [vmem:[%s796_s0 + $0x12] sm:$0x3] }
   0x5   :  { %v553_v7 = vld [vmem:[%s796_s0 + $0x10] sm:$0x3]  ;;  %33 = vst [vmem:[#allocation1 + $0x50] sm:$0x3] %v551_v5  ;;  %38 = vst [vmem:[#allocation1 + $0x48] sm:$0x3] %v552_v6 }
   0x6   :  { %43 = vst [vmem:[#allocation1 + $0x40] sm:$0x3] %v553_v7  ;;  %v554_v8 = vld [vmem:[%s796_s0 + $0xe] sm:$0x3]  ;;  %v555_v9 = vld [vmem:[%s796_s0 + $0xc] sm:$0x3] }
   0x7   :  { %v556_v10 = vld [vmem:[%s796_s0 + $0xa] sm:$0x3]  ;;  %48 = vst [vmem:[#allocation1 + $0x38] sm:$0x3] %v554_v8  ;;  %53 = vst [vmem:[#allocation1 + $0x30] sm:$0x3] %v555_v9 }
   0x8   :  { %58 = vst [vmem:[#allocation1 + $0x28] sm:$0x3] %v556_v10  ;;  %v557_v11 = vld [vmem:[%s796_s0 + $0x8] sm:$0x3]  ;;  %v546_v12 = vld [vmem:[%s796_s0 + $0x1e] sm:$0x3] }
   0x9   :  { %v547_v13 = vld [vmem:[%s796_s0 + $0x1c] sm:$0x3]  ;;  %63 = vst [vmem:[#allocation1 + $0x20] sm:$0x3] %v557_v11  ;;  %8 = vst [vmem:[#allocation1 + $0x78] sm:$0x3] %v546_v12 }
   0xa   :  { %13 = vst [vmem:[#allocation1 + $0x70] sm:$0x3] %v547_v13  ;;  %v548_v14 = vld [vmem:[%s796_s0 + $0x1a] sm:$0x3]  ;;  %v549_v15 = vld [vmem:[%s796_s0 + $0x18] sm:$0x3] }
   0xb   :  { %18 = vst [vmem:[#allocation1 + $0x68] sm:$0x3] %v548_v14  ;;  %23 = vst [vmem:[#allocation1 + $0x60] sm:$0x3] %v549_v15  ;;  %v84_v16 = vld [vmem:[#allocation1 + $0x8] sm:$0x3]  }
   0xc   :  { %v89_v17 = vld [vmem:[#allocation1 + $0x10] sm:$0x3]   ;;  %v94_v18 = vld [vmem:[#allocation1 + $0x18] sm:$0x3]   ;;  %v80_v19 = vld [vmem:[#allocation1] sm:$0x3]  }
   0xd   :  { %v158_v20 = vld.sshfl [vmem:[#allocation1] sm:$0xff pattern:$0x99999810]   ;;  %87 = vst.msk [vmem:[#allocation0 + $0x10] ss:$8 sm:$0x3] %vm81_vm1, %v84_v16  }
   0xe   :  { %92 = vst.msk [vmem:[#allocation0 + $0x20] ss:$8 sm:$0x3] %vm81_vm1, %v89_v17   ;;  %97 = vst.msk [vmem:[#allocation0 + $0x30] ss:$8 sm:$0x3] %vm81_vm1, %v94_v18  }
   0xf   :  { %v160_v21 = vld.sshfl [vmem:[#allocation1 + $0x10] sm:$0xff pattern:$0x98100000]   ;;  %v184_v22 = vld.sshfl [vmem:[#allocation1 + $0x40] sm:$0xff pattern:$0x99999810]  }
  0x10   :  { %82 = vst.msk [vmem:[#allocation0] ss:$8 sm:$0x3] %vm81_vm1, %v80_v19   ;;  %v162_v23 = vsel %vm161_vm0, %v160_v21, %v158_v20  ;;  %v186_v24 = vld.sshfl [vmem:[#allocation1 + $0x50] sm:$0xff pattern:$0x98100000]  }
  0x11   :  { %v173_v25 = vld.sshfl [vmem:[#allocation1 + $0x30] sm:$0xff pattern:$0x98100000]   ;;  %s595_s0 = smov 124   ;;  %v188_v26 = vsel %vm161_vm0, %v186_v24, %v184_v22  ;;  %v99_v32 = vld [vmem:[#allocation1 + $0x20] sm:$0x3]  }
  0x12   :  { %163 = vrot.lane.b32.xlu0 %v162_v23, %s595_s0  ;;  %v171_v27 = vld.sshfl [vmem:[#allocation1 + $0x20] sm:$0xff pattern:$0x99999810]   ;;  %v199_v28 = vld.sshfl [vmem:[#allocation1 + $0x70] sm:$0xff pattern:$0x98100000]   ;;  %189 = vrot.lane.b32.xlu1 %v188_v26, %s595_s0 }
  0x13   :  { %v175_v29 = vsel %vm161_vm0, %v173_v25, %v171_v27  ;;  %v197_v30 = vld.sshfl [vmem:[#allocation1 + $0x60] sm:$0xff pattern:$0x99999810]   ;;  %v109_v34 = vld [vmem:[#allocation1 + $0x30] sm:$0x3]  }
  0x14   :  { %v201_v31 = vsel %vm161_vm0, %v199_v28, %v197_v30  ;;  %v104_v33 = vld [vmem:[#allocation1 + $0x28] sm:$0x3]   ;;  %102 = vst.msk [vmem:[#allocation0 + $0x40] ss:$8 sm:$0x3] %vm81_vm1, %v99_v32  }
  0x15   :  { %107 = vst.msk [vmem:[#allocation0 + $0x50] ss:$8 sm:$0x3] %vm81_vm1, %v104_v33   ;;  %112 = vst.msk [vmem:[#allocation0 + $0x60] ss:$8 sm:$0x3] %vm81_vm1, %v109_v34  }
  0x16   :  { %176 = vrot.lane.b32.xlu0 %v175_v29, %s595_s0  ;;  %202 = vrot.lane.b32.xlu1 %v201_v31, %s595_s0  ;;  %v114_v35 = vld [vmem:[#allocation1 + $0x38] sm:$0x3]   ;;  %v119_v36 = vld [vmem:[#allocation1 + $0x40] sm:$0x3]   ;;  %v124_v37 = vld [vmem:[#allocation1 + $0x48] sm:$0x3]  }
  0x17   :  { %117 = vst.msk [vmem:[#allocation0 + $0x70] ss:$8 sm:$0x3] %vm81_vm1, %v114_v35   ;;  %v129_v38 = vld [vmem:[#allocation1 + $0x50] sm:$0x3]  }
  0x18   :  { %122 = vst.msk [vmem:[#allocation0 + $0x80] ss:$8 sm:$0x3] %vm81_vm1, %v119_v36   ;;  %127 = vst.msk [vmem:[#allocation0 + $0x90] ss:$8 sm:$0x3] %vm81_vm1, %v124_v37  }
  0x19   :  { %132 = vst.msk [vmem:[#allocation0 + $0xa0] ss:$8 sm:$0x3] %vm81_vm1, %v129_v38   ;;  %v134_v39 = vld [vmem:[#allocation1 + $0x58] sm:$0x3]  }
  0x1a   :  { %214 = vrot.lane.b32.xlu0 %v162_v23, %s596_s9  ;;  %227 = vrot.lane.b32.xlu1 %v175_v29, %s596_s9  ;;  %v139_v40 = vld [vmem:[#allocation1 + $0x60] sm:$0x3]   ;;  %v144_v41 = vld [vmem:[#allocation1 + $0x68] sm:$0x3]   ;;  %v149_v42 = vld [vmem:[#allocation1 + $0x70] sm:$0x3]  }
  0x1b   :  { %137 = vst.msk [vmem:[#allocation0 + $0xb0] ss:$8 sm:$0x3] %vm81_vm1, %v134_v39   ;;  %142 = vst.msk [vmem:[#allocation0 + $0xc0] ss:$8 sm:$0x3] %vm81_vm1, %v139_v40  }
  0x1c   :  { %147 = vst.msk [vmem:[#allocation0 + $0xd0] ss:$8 sm:$0x3] %vm81_vm1, %v144_v41   ;;  %v154_v43 = vld [vmem:[#allocation1 + $0x78] sm:$0x3]  }
  0x1d   :  { %152 = vst.msk [vmem:[#allocation0 + $0xe0] ss:$8 sm:$0x3] %vm81_vm1, %v149_v42   ;;  %157 = vst.msk [vmem:[#allocation0 + $0xf0] ss:$8 sm:$0x3] %vm81_vm1, %v154_v43  }
  0x1e   :  { %240 = vrot.lane.b32.xlu0 %v188_v26, %s596_s9  ;;  %253 = vrot.lane.b32.xlu1 %v201_v31, %s596_s9 }
  0x22   :  { %265 = vrot.lane.b32.xlu0 %v162_v23, %s597_s10  ;;  %278 = vrot.lane.b32.xlu1 %v175_v29, %s597_s10 }
  0x26   :  { %291 = vrot.lane.b32.xlu0 %v188_v26, %s597_s10  ;;  %304 = vrot.lane.b32.xlu1 %v201_v31, %s597_s10 }
  0x84   :  { %v164_v44 = vpop.permute.xlu0 %163   ;;  %v190_v45 = vpop.permute.xlu1 %189  }
  0x85   :  { %167 = vst.msk [vmem:[#allocation0 + $0x1] ss:$8 sm:$0xf] %vm81_vm1, %v164_v44   ;;  %169 = vst.msk [vmem:[#allocation0 + $0x1] ss:$8 sm:$0xf0] %vm81_vm1, %v164_v44  }
  0x86   :  { %193 = vst.msk [vmem:[#allocation0 + $0x81] ss:$8 sm:$0xf] %vm81_vm1, %v190_v45   ;;  %195 = vst.msk [vmem:[#allocation0 + $0x81] ss:$8 sm:$0xf0] %vm81_vm1, %v190_v45  }
  0x88   :  { %v177_v46 = vpop.permute.xlu0 %176   ;;  %v203_v47 = vpop.permute.xlu1 %202  }
  0x89   :  { %180 = vst.msk [vmem:[#allocation0 + $0x41] ss:$8 sm:$0xf] %vm81_vm1, %v177_v46   ;;  %182 = vst.msk [vmem:[#allocation0 + $0x41] ss:$8 sm:$0xf0] %vm81_vm1, %v177_v46  }
  0x8a   :  { %206 = vst.msk [vmem:[#allocation0 + $0xc1] ss:$8 sm:$0xf] %vm81_vm1, %v203_v47   ;;  %208 = vst.msk [vmem:[#allocation0 + $0xc1] ss:$8 sm:$0xf0] %vm81_vm1, %v203_v47  }
  0x8c   :  { %v215_v48 = vpop.permute.xlu0 %214   ;;  %v228_v49 = vpop.permute.xlu1 %227  }
  0x8d   :  { %218 = vst.msk [vmem:[#allocation0 + $0x2] ss:$8 sm:$0xf] %vm81_vm1, %v215_v48   ;;  %220 = vst.msk [vmem:[#allocation0 + $0x2] ss:$8 sm:$0xf0] %vm81_vm1, %v215_v48  }
  0x8e   :  { %231 = vst.msk [vmem:[#allocation0 + $0x42] ss:$8 sm:$0xf] %vm81_vm1, %v228_v49   ;;  %233 = vst.msk [vmem:[#allocation0 + $0x42] ss:$8 sm:$0xf0] %vm81_vm1, %v228_v49  }
  0x90   :  { %v241_v50 = vpop.permute.xlu0 %240   ;;  %v254_v51 = vpop.permute.xlu1 %253  }
  0x91   :  { %244 = vst.msk [vmem:[#allocation0 + $0x82] ss:$8 sm:$0xf] %vm81_vm1, %v241_v50   ;;  %246 = vst.msk [vmem:[#allocation0 + $0x82] ss:$8 sm:$0xf0] %vm81_vm1, %v241_v50  }
  0x92   :  { %257 = vst.msk [vmem:[#allocation0 + $0xc2] ss:$8 sm:$0xf] %vm81_vm1, %v254_v51   ;;  %259 = vst.msk [vmem:[#allocation0 + $0xc2] ss:$8 sm:$0xf0] %vm81_vm1, %v254_v51  }
  0x94   :  { %v266_v52 = vpop.permute.xlu0 %265   ;;  %v279_v53 = vpop.permute.xlu1 %278  }
  0x95   :  { %269 = vst.msk [vmem:[#allocation0 + $0x3] ss:$8 sm:$0xf] %vm81_vm1, %v266_v52   ;;  %271 = vst.msk [vmem:[#allocation0 + $0x3] ss:$8 sm:$0xf0] %vm81_vm1, %v266_v52  }
  0x96   :  { %282 = vst.msk [vmem:[#allocation0 + $0x43] ss:$8 sm:$0xf] %vm81_vm1, %v279_v53   ;;  %284 = vst.msk [vmem:[#allocation0 + $0x43] ss:$8 sm:$0xf0] %vm81_vm1, %v279_v53  }
  0x98   :  { %v292_v54 = vpop.permute.xlu0 %291   ;;  %v305_v55 = vpop.permute.xlu1 %304  }
  0x99   :  { %295 = vst.msk [vmem:[#allocation0 + $0x83] ss:$8 sm:$0xf] %vm81_vm1, %v292_v54   ;;  %297 = vst.msk [vmem:[#allocation0 + $0x83] ss:$8 sm:$0xf0] %vm81_vm1, %v292_v54  }
  0x9a   :  { %308 = vst.msk [vmem:[#allocation0 + $0xc3] ss:$8 sm:$0xf] %vm81_vm1, %v305_v55   ;;  %310 = vst.msk [vmem:[#allocation0 + $0xc3] ss:$8 sm:$0xf0] %vm81_vm1, %v305_v55  }
  0x9c   :  { %v314_v56 = vld [vmem:[#allocation0] sm:$0xf]  ;;  %v318_v57 = vld [vmem:[#allocation0 + $0x8] sm:$0xf]  ;;  %v323_v58 = vld [vmem:[#allocation0 + $0x10] sm:$0xf] }
  0x9d   :  { %316 = vst [vmem:[%s797_s1] sm:$0xf] %v314_v56  ;;  %561 = vst [vmem:[%s797_s1 + $0x4] sm:$0xf] %v318_v57  ;;  %v329_v59 = vld [vmem:[#allocation0 + $0x18] sm:$0xf] }
  0x9e   :  { %562 = vst [vmem:[%s797_s1 + $0x8] sm:$0xf] %v323_v58  ;;  %v335_v60 = vld [vmem:[#allocation0 + $0x20] sm:$0xf]  ;;  %v341_v61 = vld [vmem:[#allocation0 + $0x28] sm:$0xf] }
  0x9f   :  { %563 = vst [vmem:[%s797_s1 + $0xc] sm:$0xf] %v329_v59  ;;  %v347_v62 = vld [vmem:[#allocation0 + $0x30] sm:$0xf]  ;;  %v353_v63 = vld [vmem:[#allocation0 + $0x38] sm:$0xf] }
  0xa0   :  { %v359_v0 = vld [vmem:[#allocation0 + $0x40] sm:$0xf]  ;;  %564 = vst [vmem:[%s797_s1 + $0x10] sm:$0xf] %v335_v60  ;;  %565 = vst [vmem:[%s797_s1 + $0x14] sm:$0xf] %v341_v61 }
  0xa1   :  { %568 = vst [vmem:[%s797_s1 + $0x20] sm:$0xf] %v359_v0  ;;  %v365_v1 = vld [vmem:[#allocation0 + $0x48] sm:$0xf]  ;;  %v371_v2 = vld [vmem:[#allocation0 + $0x50] sm:$0xf] }
  0xa2   :  { %v377_v3 = vld [vmem:[#allocation0 + $0x58] sm:$0xf]  ;;  %566 = vst [vmem:[%s797_s1 + $0x18] sm:$0xf] %v347_v62  ;;  %567 = vst [vmem:[%s797_s1 + $0x1c] sm:$0xf] %v353_v63 }
  0xa3   :  { %569 = vst [vmem:[%s797_s1 + $0x24] sm:$0xf] %v365_v1  ;;  %570 = vst [vmem:[%s797_s1 + $0x28] sm:$0xf] %v371_v2  ;;  %v383_v4 = vld [vmem:[#allocation0 + $0x60] sm:$0xf] }
  0xa4   :  { %571 = vst [vmem:[%s797_s1 + $0x2c] sm:$0xf] %v377_v3  ;;  %v389_v5 = vld [vmem:[#allocation0 + $0x68] sm:$0xf]  ;;  %v395_v6 = vld [vmem:[#allocation0 + $0x70] sm:$0xf] }
  0xa5   :  { %572 = vst [vmem:[%s797_s1 + $0x30] sm:$0xf] %v383_v4  ;;  %573 = vst [vmem:[%s797_s1 + $0x34] sm:$0xf] %v389_v5  ;;  %v401_v7 = vld [vmem:[#allocation0 + $0x78] sm:$0xf] }
  0xa6   :  { %574 = vst [vmem:[%s797_s1 + $0x38] sm:$0xf] %v395_v6  ;;  %v407_v8 = vld [vmem:[#allocation0 + $0x80] sm:$0xf]  ;;  %v413_v9 = vld [vmem:[#allocation0 + $0x88] sm:$0xf] }
  0xa7   :  { %575 = vst [vmem:[%s797_s1 + $0x3c] sm:$0xf] %v401_v7  ;;  %576 = vst [vmem:[%s797_s1 + $0x40] sm:$0xf] %v407_v8  ;;  %v419_v10 = vld [vmem:[#allocation0 + $0x90] sm:$0xf] }
  0xa8   :  { %577 = vst [vmem:[%s797_s1 + $0x44] sm:$0xf] %v413_v9  ;;  %v425_v11 = vld [vmem:[#allocation0 + $0x98] sm:$0xf]  ;;  %v431_v12 = vld [vmem:[#allocation0 + $0xa0] sm:$0xf] }
  0xa9   :  { %578 = vst [vmem:[%s797_s1 + $0x48] sm:$0xf] %v419_v10  ;;  %579 = vst [vmem:[%s797_s1 + $0x4c] sm:$0xf] %v425_v11  ;;  %v437_v13 = vld [vmem:[#allocation0 + $0xa8] sm:$0xf] }
  0xaa   :  { %580 = vst [vmem:[%s797_s1 + $0x50] sm:$0xf] %v431_v12  ;;  %v443_v14 = vld [vmem:[#allocation0 + $0xb0] sm:$0xf]  ;;  %v449_v15 = vld [vmem:[#allocation0 + $0xb8] sm:$0xf] }
  0xab   :  { %581 = vst [vmem:[%s797_s1 + $0x54] sm:$0xf] %v437_v13  ;;  %582 = vst [vmem:[%s797_s1 + $0x58] sm:$0xf] %v443_v14  ;;  %v455_v16 = vld [vmem:[#allocation0 + $0xc0] sm:$0xf] }
  0xac   :  { %583 = vst [vmem:[%s797_s1 + $0x5c] sm:$0xf] %v449_v15  ;;  %v461_v17 = vld [vmem:[#allocation0 + $0xc8] sm:$0xf]  ;;  %v467_v18 = vld [vmem:[#allocation0 + $0xd0] sm:$0xf] }
  0xad   :  { %584 = vst [vmem:[%s797_s1 + $0x60] sm:$0xf] %v455_v16  ;;  %585 = vst [vmem:[%s797_s1 + $0x64] sm:$0xf] %v461_v17  ;;  %v473_v19 = vld [vmem:[#allocation0 + $0xd8] sm:$0xf] }
  0xae   :  { %586 = vst [vmem:[%s797_s1 + $0x68] sm:$0xf] %v467_v18  ;;  %v479_v20 = vld [vmem:[#allocation0 + $0xe0] sm:$0xf]  ;;  %v485_v21 = vld [vmem:[#allocation0 + $0xe8] sm:$0xf] }
  0xaf   :  { %587 = vst [vmem:[%s797_s1 + $0x6c] sm:$0xf] %v473_v19  ;;  %588 = vst [vmem:[%s797_s1 + $0x70] sm:$0xf] %v479_v20  ;;  %v491_v22 = vld [vmem:[#allocation0 + $0xf0] sm:$0xf] }
  0xb0   :  { %589 = vst [vmem:[%s797_s1 + $0x74] sm:$0xf] %v485_v21  ;;  %v497_v23 = vld [vmem:[#allocation0 + $0xf8] sm:$0xf]  ;;  %590 = vst [vmem:[%s797_s1 + $0x78] sm:$0xf] %v491_v22 }
  0xb1   :  { %591 = vst [vmem:[%s797_s1 + $0x7c] sm:$0xf] %v497_v23 }

// kernel: mul.103
= control target key start
LH: loop header
LB: loop body
LE: loop exit
PB: predicated region body
PF: predicated region fallthrough
CT: control target
= control target key end

     0   :  { %vm162_vm0 = vcmask 1047556   ;;  %s374_s10 = smov 4   ;;  %vm164_vm1 = vcmask 31744   ;;  %vm209_vm2 = vcmask 64544   ;;  %s533_s0 = inlined_call_operand.vmem [shape: f32[2,4,2,4,4], index: 0, kind: input, shape index: {}]   ;;  %s534_s1 = inlined_call_operand.vmem [shape: f32[8,2,4,4], index: 1, kind: output, shape index: {}]  }
   0x1   :  { %v359_v0 = vld [vmem:[%s533_s0 + $0xe] sm:$0x3]  ;;  %v360_v1 = vld [vmem:[%s533_s0 + $0xc] sm:$0x3]  ;;  %v361_v2 = vld [vmem:[%s533_s0 + $0xa] sm:$0x3] }
   0x2   :  { %128 = vst [vmem:[#allocation1 + $0x38] sm:$0x3] %v359_v0  ;;  %133 = vst [vmem:[#allocation1 + $0x30] sm:$0x3] %v360_v1  ;;  %v362_v3 = vld [vmem:[%s533_s0 + $0x8] sm:$0x3] }
   0x3   :  { %138 = vst [vmem:[#allocation1 + $0x28] sm:$0x3] %v361_v2  ;;  %v363_v4 = vld [vmem:[%s533_s0 + $0x6] sm:$0x3]  ;;  %v364_v5 = vld [vmem:[%s533_s0 + $0x4] sm:$0x3] }
   0x4   :  { %143 = vst [vmem:[#allocation1 + $0x20] sm:$0x3] %v362_v3  ;;  %148 = vst [vmem:[#allocation1 + $0x18] sm:$0x3] %v363_v4  ;;  %v365_v6 = vld [vmem:[%s533_s0 + $0x2] sm:$0x3] }
   0x5   :  { %153 = vst [vmem:[#allocation1 + $0x10] sm:$0x3] %v364_v5  ;;  %v158_v7 = vld [vmem:[%s533_s0] sm:$0x3]  ;;  %157 = vst [vmem:[#allocation1 + $0x8] sm:$0x3] %v365_v6 }
   0x6   :  { %159 = vst [vmem:[#allocation1] sm:$0x3] %v158_v7  ;;  %v351_v8 = vld [vmem:[%s533_s0 + $0x1e] sm:$0x3]  ;;  %v352_v9 = vld [vmem:[%s533_s0 + $0x1c] sm:$0x3] }
   0x7   :  { %v353_v10 = vld [vmem:[%s533_s0 + $0x1a] sm:$0x3]  ;;  %88 = vst [vmem:[#allocation1 + $0x78] sm:$0x3] %v351_v8  ;;  %93 = vst [vmem:[#allocation1 + $0x70] sm:$0x3] %v352_v9 }
   0x8   :  { %98 = vst [vmem:[#allocation1 + $0x68] sm:$0x3] %v353_v10  ;;  %v354_v11 = vld [vmem:[%s533_s0 + $0x18] sm:$0x3]  ;;  %v355_v12 = vld [vmem:[%s533_s0 + $0x16] sm:$0x3] }
   0x9   :  { %v356_v13 = vld [vmem:[%s533_s0 + $0x14] sm:$0x3]  ;;  %103 = vst [vmem:[#allocation1 + $0x60] sm:$0x3] %v354_v11  ;;  %108 = vst [vmem:[#allocation1 + $0x58] sm:$0x3] %v355_v12 }
   0xa   :  { %113 = vst [vmem:[#allocation1 + $0x50] sm:$0x3] %v356_v13  ;;  %v357_v14 = vld [vmem:[%s533_s0 + $0x12] sm:$0x3]  ;;  %v358_v15 = vld [vmem:[%s533_s0 + $0x10] sm:$0x3] }
   0xb   :  { %v343_v16 = vld [vmem:[%s533_s0 + $0x2e] sm:$0x3]  ;;  %118 = vst [vmem:[#allocation1 + $0x48] sm:$0x3] %v357_v14  ;;  %123 = vst [vmem:[#allocation1 + $0x40] sm:$0x3] %v358_v15 }
   0xc   :  { %48 = vst [vmem:[#allocation1 + $0xb8] sm:$0x3] %v343_v16  ;;  %v344_v17 = vld [vmem:[%s533_s0 + $0x2c] sm:$0x3]  ;;  %v345_v18 = vld [vmem:[%s533_s0 + $0x2a] sm:$0x3] }
   0xd   :  { %v346_v19 = vld [vmem:[%s533_s0 + $0x28] sm:$0x3]  ;;  %53 = vst [vmem:[#allocation1 + $0xb0] sm:$0x3] %v344_v17  ;;  %58 = vst [vmem:[#allocation1 + $0xa8] sm:$0x3] %v345_v18 }
   0xe   :  { %63 = vst [vmem:[#allocation1 + $0xa0] sm:$0x3] %v346_v19  ;;  %v347_v20 = vld [vmem:[%s533_s0 + $0x26] sm:$0x3]  ;;  %v348_v21 = vld [vmem:[%s533_s0 + $0x24] sm:$0x3] }
   0xf   :  { %v349_v22 = vld [vmem:[%s533_s0 + $0x22] sm:$0x3]  ;;  %68 = vst [vmem:[#allocation1 + $0x98] sm:$0x3] %v347_v20  ;;  %73 = vst [vmem:[#allocation1 + $0x90] sm:$0x3] %v348_v21 }
  0x10   :  { %78 = vst [vmem:[#allocation1 + $0x88] sm:$0x3] %v349_v22  ;;  %v350_v23 = vld [vmem:[%s533_s0 + $0x20] sm:$0x3]  ;;  %v335_v24 = vld [vmem:[%s533_s0 + $0x3e] sm:$0x3] }
  0x11   :  { %v336_v25 = vld [vmem:[%s533_s0 + $0x3c] sm:$0x3]  ;;  %v204_v26 = vld [vmem:[#allocation1 + $0x1] ss:$8 sm:$0xf0]  }
  0x12   :  { %83 = vst [vmem:[#allocation1 + $0x80] sm:$0x3] %v350_v23  ;;  %8 = vst [vmem:[#allocation1 + $0xf8] sm:$0x3] %v335_v24  ;;  %v337_v27 = vld [vmem:[%s533_s0 + $0x3a] sm:$0x3] }
  0x13   :  { %13 = vst [vmem:[#allocation1 + $0xf0] sm:$0x3] %v336_v25  ;;  %v202_v28 = vld [vmem:[#allocation1 + $0x1] ss:$8 sm:$0xf]  }
  0x14   :  { %18 = vst [vmem:[#allocation1 + $0xe8] sm:$0x3] %v337_v27  ;;  %v338_v29 = vld [vmem:[%s533_s0 + $0x38] sm:$0x3]  ;;  %v206_v30 = vsel %vm162_vm0, %v204_v26, %v202_v28  ;;  %v339_v31 = vld [vmem:[%s533_s0 + $0x36] sm:$0x3] }
  0x15   :  { %23 = vst [vmem:[#allocation1 + $0xe0] sm:$0x3] %v338_v29  ;;  %v340_v32 = vld [vmem:[%s533_s0 + $0x34] sm:$0x3]  ;;  %v341_v33 = vld [vmem:[%s533_s0 + $0x32] sm:$0x3]  ;;  %207 = vrot.lane.b32.xlu0 %v206_v30, %s374_s10 }
  0x16   :  { %v229_v34 = vld [vmem:[#allocation1 + $0x41] ss:$8 sm:$0xf0]   ;;  %28 = vst [vmem:[#allocation1 + $0xd8] sm:$0x3] %v339_v31 }
  0x17   :  { %33 = vst [vmem:[#allocation1 + $0xd0] sm:$0x3] %v340_v32  ;;  %38 = vst [vmem:[#allocation1 + $0xc8] sm:$0x3] %v341_v33  ;;  %v342_v35 = vld [vmem:[%s533_s0 + $0x30] sm:$0x3] }
  0x18   :  { %v227_v36 = vld [vmem:[#allocation1 + $0x41] ss:$8 sm:$0xf]   ;;  %43 = vst [vmem:[#allocation1 + $0xc0] sm:$0x3] %v342_v35 }
  0x19   :  { %v160_v37 = vld [vmem:[#allocation1] ss:$8 sm:$0xf]   ;;  %v231_v38 = vsel %vm162_vm0, %v229_v34, %v227_v36  ;;  %v216_v39 = vld [vmem:[#allocation1 + $0x81] ss:$8 sm:$0xf0]  }
  0x1a   :  { %v161_v40 = vld [vmem:[#allocation1] ss:$8 sm:$0xf0]   ;;  %232 = vrot.lane.b32.xlu1 %v231_v38, %s374_s10  ;;  %v214_v44 = vld [vmem:[#allocation1 + $0x81] ss:$8 sm:$0xf]  }
  0x1b   :  { %v163_v41 = vsel %vm162_vm0, %v161_v40, %v160_v37  ;;  %v169_v42 = vld [vmem:[#allocation1 + $0x40] ss:$8 sm:$0xf]   ;;  %v218_v47 = vsel %vm162_vm0, %v216_v39, %v214_v44 }
  0x1c   :  { %v171_v43 = vld [vmem:[#allocation1 + $0x40] ss:$8 sm:$0xf0]   ;;  %165 = vst.msk [vmem:[#allocation0] sm:$0xf] %vm164_vm1, %v163_v41   ;;  %219 = vrot.lane.b32.xlu0 %v218_v47, %s374_s10 }
  0x1d   :  { %167 = vst.msk [vmem:[#allocation0 + $0x4] sm:$0xf0] %vm164_vm1, %v163_v41   ;;  %v173_v45 = vsel %vm162_vm0, %v171_v43, %v169_v42  ;;  %v180_v46 = vld [vmem:[#allocation1 + $0x80] ss:$8 sm:$0xf]  }
  0x1e   :  { %176 = vst.msk [vmem:[#allocation0 + $0x10] sm:$0xf] %vm164_vm1, %v173_v45   ;;  %178 = vst.msk [vmem:[#allocation0 + $0x14] sm:$0xf0] %vm164_vm1, %v173_v45  }
  0x1f   :  { %v182_v48 = vld [vmem:[#allocation1 + $0x80] ss:$8 sm:$0xf0]   ;;  %v242_v49 = vld [vmem:[#allocation1 + $0xc1] ss:$8 sm:$0xf0]  }
  0x20   :  { %v184_v50 = vsel %vm162_vm0, %v182_v48, %v180_v46  ;;  %v193_v51 = vld [vmem:[#allocation1 + $0xc0] ss:$8 sm:$0xf0]   ;;  %v240_v52 = vld [vmem:[#allocation1 + $0xc1] ss:$8 sm:$0xf]  }
  0x21   :  { %187 = vst.msk [vmem:[#allocation0 + $0x20] sm:$0xf] %vm164_vm1, %v184_v50   ;;  %189 = vst.msk [vmem:[#allocation0 + $0x24] sm:$0xf0] %vm164_vm1, %v184_v50   ;;  %v244_v54 = vsel %vm162_vm0, %v242_v49, %v240_v52 }
  0x22   :  { %v191_v53 = vld [vmem:[#allocation1 + $0xc0] ss:$8 sm:$0xf]   ;;  %245 = vrot.lane.b32.xlu1 %v244_v54, %s374_s10 }
  0x23   :  { %v195_v55 = vsel %vm162_vm0, %v193_v51, %v191_v53 }
  0x24   :  { %198 = vst.msk [vmem:[#allocation0 + $0x30] sm:$0xf] %vm164_vm1, %v195_v55   ;;  %200 = vst.msk [vmem:[#allocation0 + $0x34] sm:$0xf0] %vm164_vm1, %v195_v55  }
  0x87   :  { %v208_v56 = vpop.permute.xlu0 %207  }
  0x88   :  { %210 = vst.msk [vmem:[#allocation0] sm:$0xf] %vm209_vm2, %v208_v56   ;;  %212 = vst.msk [vmem:[#allocation0 + $0x4] sm:$0xf0] %vm209_vm2, %v208_v56  }
  0x8c   :  { %v233_v57 = vpop.permute.xlu1 %232  }
  0x8d   :  { %236 = vst.msk [vmem:[#allocation0 + $0x10] sm:$0xf] %vm209_vm2, %v233_v57   ;;  %238 = vst.msk [vmem:[#allocation0 + $0x14] sm:$0xf0] %vm209_vm2, %v233_v57  }
  0x8e   :  { %v220_v58 = vpop.permute.xlu0 %219  }
  0x8f   :  { %223 = vst.msk [vmem:[#allocation0 + $0x20] sm:$0xf] %vm209_vm2, %v220_v58   ;;  %225 = vst.msk [vmem:[#allocation0 + $0x24] sm:$0xf0] %vm209_vm2, %v220_v58   ;;  %v255_v59 = vld [vmem:[#allocation0] sm:$0xf] }
  0x90   :  { %v259_v60 = vld [vmem:[#allocation0 + $0x8] sm:$0xf]  ;;  %257 = vst [vmem:[%s534_s1] sm:$0xf] %v255_v59 }
  0x91   :  { %366 = vst [vmem:[%s534_s1 + $0x4] sm:$0xf] %v259_v60 }
  0x94   :  { %v246_v61 = vpop.permute.xlu1 %245   ;;  %v264_v62 = vld [vmem:[#allocation0 + $0x10] sm:$0xf]  ;;  %v270_v63 = vld [vmem:[#allocation0 + $0x18] sm:$0xf] }
  0x95   :  { %249 = vst.msk [vmem:[#allocation0 + $0x30] sm:$0xf] %vm209_vm2, %v246_v61   ;;  %251 = vst.msk [vmem:[#allocation0 + $0x34] sm:$0xf0] %vm209_vm2, %v246_v61  }
  0x96   :  { %367 = vst [vmem:[%s534_s1 + $0x8] sm:$0xf] %v264_v62  ;;  %368 = vst [vmem:[%s534_s1 + $0xc] sm:$0xf] %v270_v63  ;;  %v276_v0 = vld [vmem:[#allocation0 + $0x20] sm:$0xf] }
  0x97   :  { %v282_v1 = vld [vmem:[#allocation0 + $0x28] sm:$0xf]  ;;  %369 = vst [vmem:[%s534_s1 + $0x10] sm:$0xf] %v276_v0 }
  0x98   :  { %370 = vst [vmem:[%s534_s1 + $0x14] sm:$0xf] %v282_v1 }
  0x9c   :  { %v288_v2 = vld [vmem:[#allocation0 + $0x30] sm:$0xf]  ;;  %v294_v3 = vld [vmem:[#allocation0 + $0x38] sm:$0xf] }
  0x9d   :  { %371 = vst [vmem:[%s534_s1 + $0x18] sm:$0xf] %v288_v2  ;;  %372 = vst [vmem:[%s534_s1 + $0x1c] sm:$0xf] %v294_v3 }

// kernel: _lambda_.4
= control target key start
LH: loop header
LB: loop body
LE: loop exit
PB: predicated region body
PF: predicated region fallthrough
CT: control target
= control target key end

     0   :  { %vm52_vm0 = vcmask 261120   ;;  %s186_s1 = inlined_call_operand.vmem [shape: bf16[32,128], index: 1, kind: input, shape index: {}]   ;;  %s187_s0 = inlined_call_operand.vmem [shape: bf16[32,32], index: 0, kind: input, shape index: {}]   ;;  %s188_s2 = inlined_call_operand.vmem [shape: f32[1,128], index: 2, kind: input, shape index: {}]   ;;  %s189_s3 = inlined_call_operand.vmem [shape: f32[32,128], index: 3, kind: output, shape index: {}]  }
   0x1   :  { %v135_v0 = vld [vmem:[%s186_s1] sm:$0xff]   ;;  %v136_v1 = vld [vmem:[%s186_s1 + $0x8] sm:$0xff]  }
   0x2   :  { %127 = vmatprep.subr.bf16.mxu0 %v135_v0  ;;  %v137_v2 = vld [vmem:[%s187_s0] sm:$0xff]   ;;  %v138_v3 = vld [vmem:[%s187_s0 + $0x8] sm:$0xff]  }
   0x3   :  { %128 = vmatpush3.bf16.msra.mxu0 %v135_v0  ;;  %131 = vmatprep.mubr.msk.bf16.mxu0 %vm52_vm0, %v137_v2  ;;  %v116_v4 = vld [vmem:[%s188_s2] ss:$0 sm:$0xff] }
   0x4   :  { %129 = vmatprep.subr.bf16.mxu0 %v136_v1 }
   0x7   :  { %130 = vmatpush3.bf16.msra.mxu0 %v136_v1 }
   0xa   :  { %132 = vmatmul.mubr.msk.bf16.vlgmr.msra.gmra.mrb[0].mxu0 %vm52_vm0, %v138_v3 }
  0xdd   :  { %v133_v5 = vpop.f32.mrb[0].mxu0 }
  0xde   :  { %v102_v6 = vadd.f32 %v133_v5, %v116_v4  ;;  %v93_v7 = vpop.f32.mrb[1].mxu0 }
  0xdf   :  { %v94_v8 = vadd.f32 %v116_v4, %v93_v7  ;;  %v134_v9 = vpop.f32.mrb[2].mxu0 }
  0xe0   :  { %110 = vst [vmem:[%s189_s3 + $0x10] sm:$0xff] %v102_v6  ;;  %v105_v10 = vadd.f32 %v134_v9, %v116_v4  ;;  %v96_v11 = vpop.f32.mrb[3].mxu0 }
  0xe1   :  { %108 = vst [vmem:[%s189_s3] sm:$0xff] %v94_v8  ;;  %v97_v12 = vadd.f32 %v116_v4, %v96_v11 }
  0xe2   :  { %111 = vst [vmem:[%s189_s3 + $0x18] sm:$0xff] %v105_v10 }
  0xe3   :  { %109 = vst [vmem:[%s189_s3 + $0x8] sm:$0xff] %v97_v12 }

// kernel: _lambda_.5
= control target key start
LH: loop header
LB: loop body
LE: loop exit
PB: predicated region body
PF: predicated region fallthrough
CT: control target
= control target key end

     0   :  { %s1183_s12 = smov 0   ;;  %s1475_s0 = inlined_call_operand.vmem [shape: bf16[1024,32], index: 0, kind: input, shape index: {}]   ;;  %s1476_s1 = inlined_call_operand.vmem [shape: bf16[32,96], index: 1, kind: input, shape index: {}]   ;;  %s1477_s2 = inlined_call_operand.vmem [shape: f32[1,96], index: 2, kind: input, shape index: {}]   ;;  %s1478_s3 = inlined_call_operand.vmem [shape: f32[1024,96], index: 3, kind: output, shape index: {}]  }
   0x1 LB: > { %s929_s13 = sadd.s32 4294967295, %s1161_s12   ;;  %p933_p0 = scmp.ge.s32.totalorder %s1161_s12, 1  ;;  %s1161_s12 = sphi %s1183_s12, %s13_s12  }
   0x2   : > { %p138_p1 = scmp.lt.s32.totalorder %s1161_s12, 3 }
   0x4   : > { %p139_p2 = pnand %p933_p0, %p138_p1 }
   0x5   : > { %v1121_v0 = vld [vmem:[%s1476_s1] sm:$0xff] (!%p139_p2)   ;;  %s934_s16 = sshll.u32 (!%p139_p2), %s929_s13, 6  ;;  %v1122_v1 = vld [vmem:[%s1476_s1 + $0x8] sm:$0xff] (!%p139_p2)   ;;  %vm422_vm0 = vcmask (!%p139_p2), 261120   ;;  %vm808_vm1 = vcmask (!%p139_p2), 785408  }
   0x6   : > { %142 = sbr.rel (%p139_p2) target bundleno = 293 (0x125), region = 32  ;;  %p163_p3 = scmp.lt.s32.totalorder (!%p139_p2), %s934_s16, 127  ;;  %1041 = vmatprep.subr.bf16.mxu0 (!%p139_p2), %v1121_v0  ;;  %1109 = vmatprep.subr.bf16.mxu1 (!%p139_p2), %v1121_v0  ;;  %v1273_v34 = vld [vmem:[%s1477_s2] ss:$0 sm:$0xff] (!%p139_p2) }
   0x7   : > { %1042 = vmatpush3.bf16.msra.mxu0 (!%p139_p2), %v1121_v0  ;;  %1111 = vmatpush3.bf16.msra.mxu1 (!%p139_p2), %v1121_v0 }
   0x8   : > { %1043 = vmatprep.subr.bf16.mxu0 (!%p139_p2), %v1122_v1  ;;  %1110 = vmatprep.subr.bf16.mxu1 (!%p139_p2), %v1122_v1 }
   0xb   : > { %1044 = vmatpush3.bf16.msra.mxu0 (!%p139_p2), %v1122_v1  ;;  %1112 = vmatpush3.bf16.msra.mxu1 (!%p139_p2), %v1122_v1 }
   0xd   : > { %s1480_s16 = smov (!%p163_p3, %s934_s16), 127 }
   0xe   : > { %s935_s19 = sshll.u32 %s1480_s16, 2  ;;  %s937_s23 = sshll.u32 %s1480_s16, 3 }
   0xf   : > { %s1203_s22 = scalar_lea.vmem %s1475_s0, %s935_s19  ;;  %s1278_s28 = scalar_lea.vmem %s1478_s3, %s937_s23 }
  0x10   : > { %v1123_v2 = vld [vmem:[%s1203_s22] sm:$0xff]   ;;  %v1125_v4 = vld [vmem:[%s1203_s22 + $0x8] sm:$0xff]   ;;  %v1127_v6 = vld [vmem:[%s1203_s22 + $0x10] sm:$0xff]  }
  0x11   : > { %v1124_v3 = vld [vmem:[%s1203_s22 + $0x80] sm:$0xff]   ;;  %1045 = vmatprep.mubr.msk.bf16.mxu0 %vm422_vm0, %v1123_v2  ;;  %v1126_v5 = vld [vmem:[%s1203_s22 + $0x88] sm:$0xff]   ;;  %v1128_v7 = vld [vmem:[%s1203_s22 + $0x90] sm:$0xff]  }
  0x12   : > { %1077 = vmatprep.mubr.msk.bf16.mxu1 %vm422_vm0, %v1124_v3  ;;  %1046 = vmatmul.mubr.msk.bf16.vlgmr.msra.gmra.mrb[0].mxu0 %vm422_vm0, %v1125_v4  ;;  %v1129_v8 = vld [vmem:[%s1203_s22 + $0x18] sm:$0xff]   ;;  %v1131_v10 = vld [vmem:[%s1203_s22 + $0x20] sm:$0xff]   ;;  %v1133_v12 = vld [vmem:[%s1203_s22 + $0x28] sm:$0xff]  }
  0x13   : > { %1078 = vmatmul.mubr.msk.bf16.vlgmr.msra.gmra.mrb[0].mxu1 %vm422_vm0, %v1126_v5  ;;  %1049 = vmatprep.mubr.msk.bf16.mxu0 %vm422_vm0, %v1127_v6  ;;  %v1130_v9 = vld [vmem:[%s1203_s22 + $0x98] sm:$0xff]   ;;  %v1132_v11 = vld [vmem:[%s1203_s22 + $0xa0] sm:$0xff]   ;;  %v1134_v13 = vld [vmem:[%s1203_s22 + $0xa8] sm:$0xff]  }
  0x14   : > { %1081 = vmatprep.mubr.msk.bf16.mxu1 %vm422_vm0, %v1128_v7  ;;  %v1135_v14 = vld [vmem:[%s1203_s22 + $0x30] sm:$0xff]   ;;  %v1137_v16 = vld [vmem:[%s1203_s22 + $0x38] sm:$0xff]   ;;  %v1139_v18 = vld [vmem:[%s1203_s22 + $0x40] sm:$0xff]  }
  0x15   : > { %v1136_v15 = vld [vmem:[%s1203_s22 + $0xb0] sm:$0xff]   ;;  %v1138_v17 = vld [vmem:[%s1203_s22 + $0xb8] sm:$0xff]   ;;  %v1140_v19 = vld [vmem:[%s1203_s22 + $0xc0] sm:$0xff]  }
  0x16   : > { %v1141_v20 = vld [vmem:[%s1203_s22 + $0x48] sm:$0xff]   ;;  %v1143_v22 = vld [vmem:[%s1203_s22 + $0x50] sm:$0xff]   ;;  %v1145_v24 = vld [vmem:[%s1203_s22 + $0x58] sm:$0xff]  }
  0x17   : > { %v1142_v21 = vld [vmem:[%s1203_s22 + $0xc8] sm:$0xff]   ;;  %v1144_v23 = vld [vmem:[%s1203_s22 + $0xd0] sm:$0xff]   ;;  %v1146_v25 = vld [vmem:[%s1203_s22 + $0xd8] sm:$0xff]  }
  0x18   : > { %v1147_v26 = vld [vmem:[%s1203_s22 + $0x60] sm:$0xff]   ;;  %v1149_v28 = vld [vmem:[%s1203_s22 + $0x68] sm:$0xff]   ;;  %v1151_v30 = vld [vmem:[%s1203_s22 + $0x70] sm:$0xff]  }
  0x19   : > { %v1148_v27 = vld [vmem:[%s1203_s22 + $0xe0] sm:$0xff]   ;;  %v1150_v29 = vld [vmem:[%s1203_s22 + $0xe8] sm:$0xff]   ;;  %v1152_v31 = vld [vmem:[%s1203_s22 + $0xf0] sm:$0xff]  }
  0x1a   : > { %1050 = vmatmul.mubr.msk.bf16.gmra.mrb[4].mxu0 %vm422_vm0, %v1129_v8  ;;  %v1153_v32 = vld [vmem:[%s1203_s22 + $0x78] sm:$0xff]  }
  0x1b   : > { %1082 = vmatmul.mubr.msk.bf16.gmra.mrb[4].mxu1 %vm422_vm0, %v1130_v9  ;;  %1053 = vmatprep.mubr.msk.bf16.mxu0 %vm422_vm0, %v1131_v10  ;;  %v1154_v33 = vld [vmem:[%s1203_s22 + $0xf8] sm:$0xff]  }
  0x1c   : > { %1085 = vmatprep.mubr.msk.bf16.mxu1 %vm422_vm0, %v1132_v11 }
  0x22   : > { %1054 = vmatmul.mubr.msk.bf16.gmra.mrb[8].mxu0 %vm422_vm0, %v1133_v12 }
  0x23   : > { %1086 = vmatmul.mubr.msk.bf16.gmra.mrb[8].mxu1 %vm422_vm0, %v1134_v13  ;;  %1057 = vmatprep.mubr.msk.bf16.mxu0 %vm422_vm0, %v1135_v14 }
  0x24   : > { %1089 = vmatprep.mubr.msk.bf16.mxu1 %vm422_vm0, %v1136_v15 }
  0x2a   : > { %1058 = vmatmul.mubr.msk.bf16.gmra.mrb[12].mxu0 %vm422_vm0, %v1137_v16 }
  0x2b   : > { %1090 = vmatmul.mubr.msk.bf16.gmra.mrb[12].mxu1 %vm422_vm0, %v1138_v17  ;;  %1061 = vmatprep.mubr.msk.bf16.mxu0 %vm422_vm0, %v1139_v18 }
  0x2c   : > { %1093 = vmatprep.mubr.msk.bf16.mxu1 %vm422_vm0, %v1140_v19 }
  0x32   : > { %1062 = vmatmul.mubr.msk.bf16.gmra.mrb[16].mxu0 %vm422_vm0, %v1141_v20 }
  0x33   : > { %1094 = vmatmul.mubr.msk.bf16.gmra.mrb[16].mxu1 %vm422_vm0, %v1142_v21  ;;  %1065 = vmatprep.mubr.msk.bf16.mxu0 %vm422_vm0, %v1143_v22 }
  0x34   : > { %1097 = vmatprep.mubr.msk.bf16.mxu1 %vm422_vm0, %v1144_v23 }
  0x3a   : > { %1066 = vmatmul.mubr.msk.bf16.gmra.mrb[20].mxu0 %vm422_vm0, %v1145_v24 }
  0x3b   : > { %1098 = vmatmul.mubr.msk.bf16.gmra.mrb[20].mxu1 %vm422_vm0, %v1146_v25  ;;  %1069 = vmatprep.mubr.msk.bf16.mxu0 %vm422_vm0, %v1147_v26 }
  0x3c   : > { %1101 = vmatprep.mubr.msk.bf16.mxu1 %vm422_vm0, %v1148_v27 }
  0x42   : > { %1070 = vmatmul.mubr.msk.bf16.gmra.mrb[24].mxu0 %vm422_vm0, %v1149_v28 }
  0x43   : > { %1102 = vmatmul.mubr.msk.bf16.gmra.mrb[24].mxu1 %vm422_vm0, %v1150_v29  ;;  %1073 = vmatprep.mubr.msk.bf16.mxu0 %vm422_vm0, %v1151_v30 }
  0x44   : > { %1105 = vmatprep.mubr.msk.bf16.mxu1 %vm422_vm0, %v1152_v31 }
  0x4a   : > { %1074 = vmatmul.mubr.msk.bf16.gmra.mrb[28].mxu0 %vm422_vm0, %v1153_v32 }
  0x4b   : > { %1106 = vmatmul.mubr.msk.bf16.gmra.mrb[28].mxu1 %vm422_vm0, %v1154_v33 }
  0xe5   : > { %v1047_v35 = vpop.f32.mrb[0].mxu0 }
  0xe6   : > { %v562_v36 = vadd.f32 %v1047_v35, %v1273_v34  ;;  %v1079_v37 = vpop.f32.mrb[0].mxu1  ;;  %v553_v38 = vpop.f32.mrb[1].mxu0 }
  0xe7   : > { %v690_v39 = vadd.f32 %v1079_v37, %v1273_v34  ;;  %v554_v40 = vadd.f32 %v1273_v34, %v553_v38  ;;  %v681_v41 = vpop.f32.mrb[1].mxu1  ;;  %v1048_v42 = vpop.f32.mrb[2].mxu0 }
  0xe8   : > { %811 = vst.msk [vmem:[%s1278_s28 + $0x10] sm:$0xff] %vm808_vm1, %v562_v36  ;;  %v682_v43 = vadd.f32 %v1273_v34, %v681_v41  ;;  %v565_v44 = vadd.f32 %v1048_v42, %v1273_v34  ;;  %v1080_v45 = vpop.f32.mrb[2].mxu1  ;;  %v556_v46 = vpop.f32.mrb[3].mxu0 }
  0xe9   : > { %843 = vst.msk [vmem:[%s1278_s28 + $0x110] sm:$0xff] %vm808_vm1, %v690_v39  ;;  %809 = vst.msk [vmem:[%s1278_s28] sm:$0xff] %vm808_vm1, %v554_v40  ;;  %v693_v47 = vadd.f32 %v1080_v45, %v1273_v34  ;;  %v557_v48 = vadd.f32 %v1273_v34, %v556_v46  ;;  %v684_v49 = vpop.f32.mrb[3].mxu1 }
  0xea   : > { %841 = vst.msk [vmem:[%s1278_s28 + $0x100] sm:$0xff] %vm808_vm1, %v682_v43  ;;  %812 = vst.msk [vmem:[%s1278_s28 + $0x18] sm:$0xff] %vm808_vm1, %v565_v44  ;;  %v685_v50 = vadd.f32 %v1273_v34, %v684_v49 }
  0xeb   : > { %844 = vst.msk [vmem:[%s1278_s28 + $0x118] sm:$0xff] %vm808_vm1, %v693_v47  ;;  %810 = vst.msk [vmem:[%s1278_s28 + $0x8] sm:$0xff] %vm808_vm1, %v557_v48 }
  0xec   : > { %842 = vst.msk [vmem:[%s1278_s28 + $0x108] sm:$0xff] %vm808_vm1, %v685_v50 }
  0xed   : > { %v1051_v51 = vpop.f32.mrb[4].mxu0 }
  0xee   : > { %v578_v52 = vadd.f32 %v1051_v51, %v1273_v34  ;;  %v1083_v53 = vpop.f32.mrb[4].mxu1  ;;  %v569_v54 = vpop.f32.mrb[5].mxu0 }
  0xef   : > { %v706_v55 = vadd.f32 %v1083_v53, %v1273_v34  ;;  %v570_v56 = vadd.f32 %v1273_v34, %v569_v54  ;;  %v697_v57 = vpop.f32.mrb[5].mxu1  ;;  %v1052_v58 = vpop.f32.mrb[6].mxu0 }
  0xf0   : > { %815 = vst.msk [vmem:[%s1278_s28 + $0x30] sm:$0xff] %vm808_vm1, %v578_v52  ;;  %v698_v59 = vadd.f32 %v1273_v34, %v697_v57  ;;  %v581_v60 = vadd.f32 %v1052_v58, %v1273_v34  ;;  %v1084_v61 = vpop.f32.mrb[6].mxu1  ;;  %v572_v62 = vpop.f32.mrb[7].mxu0 }
  0xf1   : > { %847 = vst.msk [vmem:[%s1278_s28 + $0x130] sm:$0xff] %vm808_vm1, %v706_v55  ;;  %813 = vst.msk [vmem:[%s1278_s28 + $0x20] sm:$0xff] %vm808_vm1, %v570_v56  ;;  %v709_v63 = vadd.f32 %v1084_v61, %v1273_v34  ;;  %v573_v0 = vadd.f32 %v1273_v34, %v572_v62  ;;  %v700_v1 = vpop.f32.mrb[7].mxu1 }
  0xf2   : > { %845 = vst.msk [vmem:[%s1278_s28 + $0x120] sm:$0xff] %vm808_vm1, %v698_v59  ;;  %816 = vst.msk [vmem:[%s1278_s28 + $0x38] sm:$0xff] %vm808_vm1, %v581_v60  ;;  %v701_v2 = vadd.f32 %v1273_v34, %v700_v1 }
  0xf3   : > { %848 = vst.msk [vmem:[%s1278_s28 + $0x138] sm:$0xff] %vm808_vm1, %v709_v63  ;;  %814 = vst.msk [vmem:[%s1278_s28 + $0x28] sm:$0xff] %vm808_vm1, %v573_v0 }
  0xf4   : > { %846 = vst.msk [vmem:[%s1278_s28 + $0x128] sm:$0xff] %vm808_vm1, %v701_v2 }
  0xf5   : > { %v1055_v3 = vpop.f32.mrb[8].mxu0 }
  0xf6   : > { %v594_v4 = vadd.f32 %v1055_v3, %v1273_v34  ;;  %v1087_v5 = vpop.f32.mrb[8].mxu1  ;;  %v585_v6 = vpop.f32.mrb[9].mxu0 }
  0xf7   : > { %v722_v7 = vadd.f32 %v1087_v5, %v1273_v34  ;;  %v586_v8 = vadd.f32 %v1273_v34, %v585_v6  ;;  %v713_v9 = vpop.f32.mrb[9].mxu1  ;;  %v1056_v10 = vpop.f32.mrb[10].mxu0 }
  0xf8   : > { %819 = vst.msk [vmem:[%s1278_s28 + $0x50] sm:$0xff] %vm808_vm1, %v594_v4  ;;  %v714_v11 = vadd.f32 %v1273_v34, %v713_v9  ;;  %v597_v12 = vadd.f32 %v1056_v10, %v1273_v34  ;;  %v1088_v13 = vpop.f32.mrb[10].mxu1  ;;  %v588_v14 = vpop.f32.mrb[11].mxu0 }
  0xf9   : > { %851 = vst.msk [vmem:[%s1278_s28 + $0x150] sm:$0xff] %vm808_vm1, %v722_v7  ;;  %817 = vst.msk [vmem:[%s1278_s28 + $0x40] sm:$0xff] %vm808_vm1, %v586_v8  ;;  %v725_v15 = vadd.f32 %v1088_v13, %v1273_v34  ;;  %v589_v16 = vadd.f32 %v1273_v34, %v588_v14  ;;  %v716_v17 = vpop.f32.mrb[11].mxu1 }
  0xfa   : > { %849 = vst.msk [vmem:[%s1278_s28 + $0x140] sm:$0xff] %vm808_vm1, %v714_v11  ;;  %820 = vst.msk [vmem:[%s1278_s28 + $0x58] sm:$0xff] %vm808_vm1, %v597_v12  ;;  %v717_v18 = vadd.f32 %v1273_v34, %v716_v17 }
  0xfb   : > { %852 = vst.msk [vmem:[%s1278_s28 + $0x158] sm:$0xff] %vm808_vm1, %v725_v15  ;;  %818 = vst.msk [vmem:[%s1278_s28 + $0x48] sm:$0xff] %vm808_vm1, %v589_v16 }
  0xfc   : > { %850 = vst.msk [vmem:[%s1278_s28 + $0x148] sm:$0xff] %vm808_vm1, %v717_v18 }
  0xfd   : > { %v1059_v19 = vpop.f32.mrb[12].mxu0 }
  0xfe   : > { %v610_v20 = vadd.f32 %v1059_v19, %v1273_v34  ;;  %v1091_v21 = vpop.f32.mrb[12].mxu1  ;;  %v601_v22 = vpop.f32.mrb[13].mxu0 }
  0xff   : > { %v738_v23 = vadd.f32 %v1091_v21, %v1273_v34  ;;  %v602_v24 = vadd.f32 %v1273_v34, %v601_v22  ;;  %v729_v25 = vpop.f32.mrb[13].mxu1  ;;  %v1060_v26 = vpop.f32.mrb[14].mxu0 }
 0x100   : > { %823 = vst.msk [vmem:[%s1278_s28 + $0x70] sm:$0xff] %vm808_vm1, %v610_v20  ;;  %v730_v27 = vadd.f32 %v1273_v34, %v729_v25  ;;  %v613_v28 = vadd.f32 %v1060_v26, %v1273_v34  ;;  %v1092_v29 = vpop.f32.mrb[14].mxu1  ;;  %v604_v30 = vpop.f32.mrb[15].mxu0 }
 0x101   : > { %855 = vst.msk [vmem:[%s1278_s28 + $0x170] sm:$0xff] %vm808_vm1, %v738_v23  ;;  %821 = vst.msk [vmem:[%s1278_s28 + $0x60] sm:$0xff] %vm808_vm1, %v602_v24  ;;  %v741_v31 = vadd.f32 %v1092_v29, %v1273_v34  ;;  %v605_v32 = vadd.f32 %v1273_v34, %v604_v30  ;;  %v732_v33 = vpop.f32.mrb[15].mxu1 }
 0x102   : > { %853 = vst.msk [vmem:[%s1278_s28 + $0x160] sm:$0xff] %vm808_vm1, %v730_v27  ;;  %824 = vst.msk [vmem:[%s1278_s28 + $0x78] sm:$0xff] %vm808_vm1, %v613_v28  ;;  %v733_v35 = vadd.f32 %v1273_v34, %v732_v33 }
 0x103   : > { %856 = vst.msk [vmem:[%s1278_s28 + $0x178] sm:$0xff] %vm808_vm1, %v741_v31  ;;  %822 = vst.msk [vmem:[%s1278_s28 + $0x68] sm:$0xff] %vm808_vm1, %v605_v32 }
 0x104   : > { %854 = vst.msk [vmem:[%s1278_s28 + $0x168] sm:$0xff] %vm808_vm1, %v733_v35 }
 0x105   : > { %v1063_v36 = vpop.f32.mrb[16].mxu0 }
 0x106   : > { %v626_v37 = vadd.f32 %v1063_v36, %v1273_v34  ;;  %v1095_v38 = vpop.f32.mrb[16].mxu1  ;;  %v617_v39 = vpop.f32.mrb[17].mxu0 }
 0x107   : > { %v754_v40 = vadd.f32 %v1095_v38, %v1273_v34  ;;  %v618_v41 = vadd.f32 %v1273_v34, %v617_v39  ;;  %v745_v42 = vpop.f32.mrb[17].mxu1  ;;  %v1064_v43 = vpop.f32.mrb[18].mxu0 }
 0x108   : > { %827 = vst.msk [vmem:[%s1278_s28 + $0x90] sm:$0xff] %vm808_vm1, %v626_v37  ;;  %v746_v44 = vadd.f32 %v1273_v34, %v745_v42  ;;  %v629_v45 = vadd.f32 %v1064_v43, %v1273_v34  ;;  %v1096_v46 = vpop.f32.mrb[18].mxu1  ;;  %v620_v47 = vpop.f32.mrb[19].mxu0 }
 0x109   : > { %859 = vst.msk [vmem:[%s1278_s28 + $0x190] sm:$0xff] %vm808_vm1, %v754_v40  ;;  %825 = vst.msk [vmem:[%s1278_s28 + $0x80] sm:$0xff] %vm808_vm1, %v618_v41  ;;  %v757_v48 = vadd.f32 %v1096_v46, %v1273_v34  ;;  %v621_v49 = vadd.f32 %v1273_v34, %v620_v47  ;;  %v748_v50 = vpop.f32.mrb[19].mxu1 }
 0x10a   : > { %857 = vst.msk [vmem:[%s1278_s28 + $0x180] sm:$0xff] %vm808_vm1, %v746_v44  ;;  %828 = vst.msk [vmem:[%s1278_s28 + $0x98] sm:$0xff] %vm808_vm1, %v629_v45  ;;  %v749_v51 = vadd.f32 %v1273_v34, %v748_v50 }
 0x10b   : > { %860 = vst.msk [vmem:[%s1278_s28 + $0x198] sm:$0xff] %vm808_vm1, %v757_v48  ;;  %826 = vst.msk [vmem:[%s1278_s28 + $0x88] sm:$0xff] %vm808_vm1, %v621_v49 }
 0x10c   : > { %858 = vst.msk [vmem:[%s1278_s28 + $0x188] sm:$0xff] %vm808_vm1, %v749_v51 }
 0x10d   : > { %v1067_v52 = vpop.f32.mrb[20].mxu0 }
 0x10e   : > { %v642_v53 = vadd.f32 %v1067_v52, %v1273_v34  ;;  %v1099_v54 = vpop.f32.mrb[20].mxu1  ;;  %v633_v55 = vpop.f32.mrb[21].mxu0 }
 0x10f   : > { %v770_v56 = vadd.f32 %v1099_v54, %v1273_v34  ;;  %v634_v57 = vadd.f32 %v1273_v34, %v633_v55  ;;  %v761_v58 = vpop.f32.mrb[21].mxu1  ;;  %v1068_v59 = vpop.f32.mrb[22].mxu0 }
 0x110   : > { %831 = vst.msk [vmem:[%s1278_s28 + $0xb0] sm:$0xff] %vm808_vm1, %v642_v53  ;;  %v762_v60 = vadd.f32 %v1273_v34, %v761_v58  ;;  %v645_v61 = vadd.f32 %v1068_v59, %v1273_v34  ;;  %v1100_v62 = vpop.f32.mrb[22].mxu1  ;;  %v636_v63 = vpop.f32.mrb[23].mxu0 }
 0x111   : > { %863 = vst.msk [vmem:[%s1278_s28 + $0x1b0] sm:$0xff] %vm808_vm1, %v770_v56  ;;  %829 = vst.msk [vmem:[%s1278_s28 + $0xa0] sm:$0xff] %vm808_vm1, %v634_v57  ;;  %v773_v0 = vadd.f32 %v1100_v62, %v1273_v34  ;;  %v637_v1 = vadd.f32 %v1273_v34, %v636_v63  ;;  %v764_v2 = vpop.f32.mrb[23].mxu1 }
 0x112   : > { %861 = vst.msk [vmem:[%s1278_s28 + $0x1a0] sm:$0xff] %vm808_vm1, %v762_v60  ;;  %832 = vst.msk [vmem:[%s1278_s28 + $0xb8] sm:$0xff] %vm808_vm1, %v645_v61  ;;  %v765_v3 = vadd.f32 %v1273_v34, %v764_v2 }
 0x113   : > { %864 = vst.msk [vmem:[%s1278_s28 + $0x1b8] sm:$0xff] %vm808_vm1, %v773_v0  ;;  %830 = vst.msk [vmem:[%s1278_s28 + $0xa8] sm:$0xff] %vm808_vm1, %v637_v1 }
 0x114   : > { %862 = vst.msk [vmem:[%s1278_s28 + $0x1a8] sm:$0xff] %vm808_vm1, %v765_v3 }
 0x115   : > { %v1071_v4 = vpop.f32.mrb[24].mxu0 }
 0x116   : > { %v658_v5 = vadd.f32 %v1071_v4, %v1273_v34  ;;  %v1103_v6 = vpop.f32.mrb[24].mxu1  ;;  %v649_v7 = vpop.f32.mrb[25].mxu0 }
 0x117   : > { %v786_v8 = vadd.f32 %v1103_v6, %v1273_v34  ;;  %v650_v9 = vadd.f32 %v1273_v34, %v649_v7  ;;  %v777_v10 = vpop.f32.mrb[25].mxu1  ;;  %v1072_v11 = vpop.f32.mrb[26].mxu0 }
 0x118   : > { %835 = vst.msk [vmem:[%s1278_s28 + $0xd0] sm:$0xff] %vm808_vm1, %v658_v5  ;;  %v778_v12 = vadd.f32 %v1273_v34, %v777_v10  ;;  %v661_v13 = vadd.f32 %v1072_v11, %v1273_v34  ;;  %v1104_v14 = vpop.f32.mrb[26].mxu1  ;;  %v652_v15 = vpop.f32.mrb[27].mxu0 }
 0x119   : > { %867 = vst.msk [vmem:[%s1278_s28 + $0x1d0] sm:$0xff] %vm808_vm1, %v786_v8  ;;  %833 = vst.msk [vmem:[%s1278_s28 + $0xc0] sm:$0xff] %vm808_vm1, %v650_v9  ;;  %v789_v16 = vadd.f32 %v1104_v14, %v1273_v34  ;;  %v653_v17 = vadd.f32 %v1273_v34, %v652_v15  ;;  %v780_v18 = vpop.f32.mrb[27].mxu1 }
 0x11a   : > { %865 = vst.msk [vmem:[%s1278_s28 + $0x1c0] sm:$0xff] %vm808_vm1, %v778_v12  ;;  %836 = vst.msk [vmem:[%s1278_s28 + $0xd8] sm:$0xff] %vm808_vm1, %v661_v13  ;;  %v781_v19 = vadd.f32 %v1273_v34, %v780_v18 }
 0x11b   : > { %868 = vst.msk [vmem:[%s1278_s28 + $0x1d8] sm:$0xff] %vm808_vm1, %v789_v16  ;;  %834 = vst.msk [vmem:[%s1278_s28 + $0xc8] sm:$0xff] %vm808_vm1, %v653_v17 }
 0x11c   : > { %866 = vst.msk [vmem:[%s1278_s28 + $0x1c8] sm:$0xff] %vm808_vm1, %v781_v19 }
 0x11d   : > { %v1075_v20 = vpop.f32.mrb[28].mxu0 }
 0x11e   : > { %v674_v21 = vadd.f32 %v1075_v20, %v1273_v34  ;;  %v1107_v22 = vpop.f32.mrb[28].mxu1  ;;  %v665_v23 = vpop.f32.mrb[29].mxu0 }
 0x11f   : > { %v802_v24 = vadd.f32 %v1107_v22, %v1273_v34  ;;  %v666_v25 = vadd.f32 %v1273_v34, %v665_v23  ;;  %v793_v26 = vpop.f32.mrb[29].mxu1  ;;  %v1076_v27 = vpop.f32.mrb[30].mxu0 }
 0x120   : > { %839 = vst.msk [vmem:[%s1278_s28 + $0xf0] sm:$0xff] %vm808_vm1, %v674_v21  ;;  %v794_v28 = vadd.f32 %v1273_v34, %v793_v26  ;;  %v677_v29 = vadd.f32 %v1076_v27, %v1273_v34  ;;  %v1108_v30 = vpop.f32.mrb[30].mxu1  ;;  %v668_v31 = vpop.f32.mrb[31].mxu0 }
 0x121   : > { %871 = vst.msk [vmem:[%s1278_s28 + $0x1f0] sm:$0xff] %vm808_vm1, %v802_v24  ;;  %837 = vst.msk [vmem:[%s1278_s28 + $0xe0] sm:$0xff] %vm808_vm1, %v666_v25  ;;  %v805_v32 = vadd.f32 %v1108_v30, %v1273_v34  ;;  %v669_v33 = vadd.f32 %v1273_v34, %v668_v31  ;;  %v796_v35 = vpop.f32.mrb[31].mxu1 }
 0x122   : > { %869 = vst.msk [vmem:[%s1278_s28 + $0x1e0] sm:$0xff] %vm808_vm1, %v794_v28  ;;  %840 = vst.msk [vmem:[%s1278_s28 + $0xf8] sm:$0xff] %vm808_vm1, %v677_v29  ;;  %v797_v36 = vadd.f32 %v1273_v34, %v796_v35 }
 0x123   : > { %872 = vst.msk [vmem:[%s1278_s28 + $0x1f8] sm:$0xff] %vm808_vm1, %v805_v32  ;;  %838 = vst.msk [vmem:[%s1278_s28 + $0xe8] sm:$0xff] %vm808_vm1, %v669_v33 }
 0x124   : > { %870 = vst.msk [vmem:[%s1278_s28 + $0x1e8] sm:$0xff] %vm808_vm1, %v797_v36 }
 0x125 PF: > { %s13_s12 = sadd.s32 1, %s1161_s12  }
 0x126   : > { %p10_p4 = scmp.ge.s32.totalorder %s13_s12, 4  }
 0x128   :  { %12 = sbr.rel (!%p10_p4) target bundleno = 1 (0x1), region = 62 }

// kernel: _lambda_.6
= control target key start
LH: loop header
LB: loop body
LE: loop exit
PB: predicated region body
PF: predicated region fallthrough
CT: control target
= control target key end

     0   :  { %s16133_s21 = smov 0   ;;  %s19084_s0 = inlined_call_operand.vmem [shape: f32[4,16,16], index: 0, kind: input, shape index: {}]   ;;  %s19085_s1 = inlined_call_operand.vmem [shape: f32[128,16,8], index: 1, kind: input, shape index: {}]   ;;  %s19086_s2 = inlined_call_operand.vmem [shape: f32[128,16,8], index: 2, kind: input, shape index: {}]   ;;  %s19087_s3 = inlined_call_operand.vmem [shape: f32[128,16,8], index: 3, kind: input, shape index: {}]   ;;  %s19088_s4 = inlined_call_operand.vmem [shape: f32[128,16,8], index: 4, kind: input, shape index: {}]   ;;  %s19089_s5 = inlined_call_operand.vmem [shape: f32[128,16,8], index: 5, kind: output, shape index: {0}]   ;;  %s19090_s6 = inlined_call_operand.vmem [shape: f32[128,16,8], index: 6, kind: output, shape index: {1}]  }
   0x1 LB: > { %s13099_s22 = sadd.s32 4294967295, %s16096_s21   ;;  %p13103_p0 = scmp.ge.s32.totalorder %s16096_s21, 1  ;;  %s16096_s21 = sphi %s16133_s21, %s17_s21  }
   0x2   : > { %p253_p1 = scmp.lt.s32.totalorder %s16096_s21, 5 }
   0x4   : > { %p254_p2 = pnand %p13103_p0, %p253_p1 }
   0x6   : > { %257 = sbr.rel (%p254_p2) target bundleno = 1571 (0x623), region = 40 }
   0xd   : > { %s13104_s23 = sshll.u32 %s13099_s22, 5  ;;  %vm551_vm0 = vcmask 64512   ;;  %v19278_v0 = vmov 0  ;;  %vm3464_vm2 = vcmask 130048  }
   0xe   : > { %p310_p3 = scmp.lt.s32.totalorder %s13104_s23, 127  ;;  %vm16151_vm1 = vmpackc.low %vm551_vm0, %vm551_vm0 }
   0xf   : > { %v19279_v0 = vsel %vm16151_vm1, 4294967295, %v19278_v0 }
  0x10   : > { %s19529_s23 = smov (!%p310_p3, %s13104_s23), 127  ;;  %19280 = vst [vmem:[#allocation2_spill] sm:$0xff] %v19279_v0 }
  0x11   : > { %s16141_s24 = sshll.u32 %s19529_s23, 4 }
  0x12   : > { %s16147_s27 = scalar_lea.vmem %s19087_s3, %s16141_s24  ;;  %s16159_s30 = scalar_lea.vmem %s19085_s1, %s16141_s24 }
  0x13   : > { %v351_v1 = vld [vmem:[%s16147_s27] sm:$0xff]  ;;  %v352_v2 = vld [vmem:[%s16147_s27 + $0x8] sm:$0xff]  ;;  %v353_v3 = vld [vmem:[%s16147_s27 + $0x10] sm:$0xff]  ;;  %s17847_s9 = scalar_lea.vmem %s19089_s5, %s16141_s24 }
  0x14   : > { %v16164_v4 = vpack.c.bf16 %v352_v2, %v351_v1  ;;  %v354_v5 = vld [vmem:[%s16147_s27 + $0x18] sm:$0xff]  ;;  %v487_v6 = vld [vmem:[%s16159_s30] sm:$0xff]  ;;  %v489_v8 = vld [vmem:[%s16159_s30 + $0x10] sm:$0xff] }
  0x15   : > { %v16168_v7 = vpack.c.bf16 %v354_v5, %v353_v3  ;;  %14030 = vmatprep.mubr.msk.f32.mxu0 %vm551_vm0, %v487_v6  ;;  %v355_v9 = vld [vmem:[%s16147_s27 + $0x20] sm:$0xff]  ;;  %v356_v10 = vld [vmem:[%s16147_s27 + $0x28] sm:$0xff]  ;;  %14037 = vmatprep.mubr.msk.f32.mxu1 %vm551_vm0, %v489_v8  ;;  %v357_v12 = vld [vmem:[%s16147_s27 + $0x30] sm:$0xff] }
  0x16   : > { %19281 = vst [vmem:[#allocation3_spill] sm:$0xff] %v16164_v4  ;;  %14924 = vmatprep.subr.msk.bf16.mxu0 %vm16151_vm1, %v16164_v4  ;;  %v16178_v11 = vpack.c.bf16 %v356_v10, %v355_v9  ;;  %v358_v13 = vld [vmem:[%s16147_s27 + $0x38] sm:$0xff]  ;;  %v359_v15 = vld [vmem:[%s16147_s27 + $0x40] sm:$0xff]  ;;  %v360_v16 = vld [vmem:[%s16147_s27 + $0x48] sm:$0xff] }
  0x17   : > { %19282 = vst [vmem:[#allocation4_spill] sm:$0xff] %v16168_v7  ;;  %14930 = vmatprep.subr.msk.bf16.mxu1 %vm16151_vm1, %v16168_v7  ;;  %14927 = vmatpush3.bf16.xpose.msk.msra.mxu0 %vm16151_vm1, %v16164_v4  ;;  %v16188_v14 = vpack.c.bf16 %v358_v13, %v357_v12  ;;  %v488_v17 = vld [vmem:[%s16159_s30 + $0x8] sm:$0xff]  ;;  %v361_v18 = vld [vmem:[%s16147_s27 + $0x50] sm:$0xff]  ;;  %v362_v19 = vld [vmem:[%s16147_s27 + $0x58] sm:$0xff]  ;;  %v16206_v22 = vpack.c.bf16 %v360_v16, %v359_v15 }
  0x18   : > { %19283 = vst [vmem:[#allocation5_spill] sm:$0xff] %v16178_v11  ;;  %14933 = vmatpush3.bf16.xpose.msk.msra.mxu1 %vm16151_vm1, %v16168_v7  ;;  %14936 = vmatprep.subr.msk.bf16.mxu0 %vm16151_vm1, %v16178_v11  ;;  %v490_v20 = vld [vmem:[%s16159_s30 + $0x18] sm:$0xff]  ;;  %v491_v21 = vld [vmem:[%s16159_s30 + $0x20] sm:$0xff]  ;;  %v493_v23 = vld [vmem:[%s16159_s30 + $0x30] sm:$0xff]  ;;  %v16210_v24 = vpack.c.bf16 %v362_v19, %v361_v18 }
  0x19   : > { %19284 = vst [vmem:[#allocation6_spill] sm:$0xff] %v16188_v14  ;;  %14942 = vmatprep.subr.msk.bf16.mxu1 %vm16151_vm1, %v16188_v14  ;;  %19285 = vst [vmem:[#allocation7_spill] sm:$0xff] %v16206_v22  ;;  %v363_v25 = vld [vmem:[%s16147_s27 + $0x60] sm:$0xff]  ;;  %v364_v26 = vld [vmem:[%s16147_s27 + $0x68] sm:$0xff] }
  0x1a   : > { %19286 = vst [vmem:[#allocation8_spill] sm:$0xff] %v16210_v24  ;;  %v492_v27 = vld [vmem:[%s16159_s30 + $0x28] sm:$0xff]  ;;  %v365_v28 = vld [vmem:[%s16147_s27 + $0x70] sm:$0xff]  ;;  %v366_v29 = vld [vmem:[%s16147_s27 + $0x78] sm:$0xff]  ;;  %v16234_v32 = vpack.c.bf16 %v364_v26, %v363_v25 }
  0x1b   : > { %v494_v30 = vld [vmem:[%s16159_s30 + $0x38] sm:$0xff]  ;;  %v495_v31 = vld [vmem:[%s16159_s30 + $0x40] sm:$0xff]  ;;  %v497_v33 = vld [vmem:[%s16159_s30 + $0x50] sm:$0xff]  ;;  %v16238_v34 = vpack.c.bf16 %v366_v29, %v365_v28 }
  0x1c   : > { %19287 = vst [vmem:[#allocation9_spill] sm:$0xff] %v16234_v32  ;;  %v367_v35 = vld [vmem:[%s16147_s27 + $0x80] sm:$0xff]  ;;  %v368_v36 = vld [vmem:[%s16147_s27 + $0x88] sm:$0xff]  ;;  %v369_v38 = vld [vmem:[%s16147_s27 + $0x90] sm:$0xff] }
  0x1d   : > { %19288 = vst [vmem:[#allocation10_spill] sm:$0xff] %v16238_v34  ;;  %v496_v37 = vld [vmem:[%s16159_s30 + $0x48] sm:$0xff]  ;;  %v370_v39 = vld [vmem:[%s16147_s27 + $0x98] sm:$0xff]  ;;  %v499_v41 = vld [vmem:[%s16159_s30 + $0x60] sm:$0xff]  ;;  %v16262_v42 = vpack.c.bf16 %v368_v36, %v367_v35 }
  0x1e   : > { %14031 = vmatmul.mubr.msk.f32.vlgmr.msra.gmra.mrb[0].mxu0 %vm551_vm0, %v488_v17  ;;  %v498_v40 = vld [vmem:[%s16159_s30 + $0x58] sm:$0xff]  ;;  %v501_v43 = vld [vmem:[%s16159_s30 + $0x70] sm:$0xff]  ;;  %v16266_v44 = vpack.c.bf16 %v370_v39, %v369_v38  ;;  %v371_v45 = vld [vmem:[%s16147_s27 + $0xa0] sm:$0xff] }
  0x1f   : > { %14038 = vmatmul.mubr.msk.f32.vlgmr.msra.gmra.mrb[0].mxu1 %vm551_vm0, %v490_v20  ;;  %14939 = vmatpush3.bf16.xpose.msk.msra.mxu0 %vm16151_vm1, %v16178_v11  ;;  %19289 = vst [vmem:[#allocation11_spill] sm:$0xff] %v16262_v42  ;;  %v372_v46 = vld [vmem:[%s16147_s27 + $0xa8] sm:$0xff]  ;;  %v373_v48 = vld [vmem:[%s16147_s27 + $0xb0] sm:$0xff]  ;;  %v374_v49 = vld [vmem:[%s16147_s27 + $0xb8] sm:$0xff] }
  0x20   : > { %14945 = vmatpush3.bf16.xpose.msk.msra.mxu1 %vm16151_vm1, %v16188_v14  ;;  %14044 = vmatprep.mubr.msk.f32.mxu0 %vm551_vm0, %v491_v21  ;;  %19290 = vst [vmem:[#allocation12_spill] sm:$0xff] %v16266_v44  ;;  %v500_v47 = vld [vmem:[%s16159_s30 + $0x68] sm:$0xff]  ;;  %v502_v50 = vld [vmem:[%s16159_s30 + $0x78] sm:$0xff]  ;;  %v503_v51 = vld [vmem:[%s16159_s30 + $0x80] sm:$0xff]  ;;  %v16290_v52 = vpack.c.bf16 %v372_v46, %v371_v45  ;;  %v16294_v54 = vpack.c.bf16 %v374_v49, %v373_v48 }
  0x21   : > { %14051 = vmatprep.mubr.msk.f32.mxu1 %vm551_vm0, %v493_v23  ;;  %14948 = vmatprep.subr.msk.bf16.mxu0 %vm16151_vm1, %v16206_v22  ;;  %v505_v53 = vld [vmem:[%s16159_s30 + $0x90] sm:$0xff]  ;;  %v375_v55 = vld [vmem:[%s16147_s27 + $0xc0] sm:$0xff]  ;;  %v376_v56 = vld [vmem:[%s16147_s27 + $0xc8] sm:$0xff] }
  0x22   : > { %14954 = vmatprep.subr.msk.bf16.mxu1 %vm16151_vm1, %v16210_v24  ;;  %19291 = vst [vmem:[#allocation13_spill] sm:$0xff] %v16290_v52  ;;  %19292 = vst [vmem:[#allocation14_spill] sm:$0xff] %v16294_v54  ;;  %v504_v57 = vld [vmem:[%s16159_s30 + $0x88] sm:$0xff]  ;;  %v377_v58 = vld [vmem:[%s16147_s27 + $0xd0] sm:$0xff]  ;;  %v16318_v62 = vpack.c.bf16 %v376_v56, %v375_v55 }
  0x23   : > { %v378_v59 = vld [vmem:[%s16147_s27 + $0xd8] sm:$0xff]  ;;  %v507_v61 = vld [vmem:[%s16159_s30 + $0xa0] sm:$0xff]  ;;  %v509_v63 = vld [vmem:[%s16159_s30 + $0xb0] sm:$0xff] }
  0x24   : > { %v506_v60 = vld [vmem:[%s16159_s30 + $0x98] sm:$0xff]  ;;  %19293 = vst [vmem:[#allocation15_spill] sm:$0xff] %v16318_v62  ;;  %v16322_v1 = vpack.c.bf16 %v378_v59, %v377_v58  ;;  %v379_v2 = vld [vmem:[%s16147_s27 + $0xe0] sm:$0xff]  ;;  %v380_v3 = vld [vmem:[%s16147_s27 + $0xe8] sm:$0xff] }
  0x25   : > { %v508_v5 = vld [vmem:[%s16159_s30 + $0xa8] sm:$0xff]  ;;  %v381_v6 = vld [vmem:[%s16147_s27 + $0xf0] sm:$0xff]  ;;  %v382_v8 = vld [vmem:[%s16147_s27 + $0xf8] sm:$0xff]  ;;  %v16346_v12 = vpack.c.bf16 %v380_v3, %v379_v2 }
  0x26   : > { %14045 = vmatmul.mubr.msk.f32.vlgmr.msra.gmra.mrb[2].mxu0 %vm551_vm0, %v492_v27  ;;  %19294 = vst [vmem:[#allocation16_spill] sm:$0xff] %v16322_v1  ;;  %v510_v9 = vld [vmem:[%s16159_s30 + $0xb8] sm:$0xff]  ;;  %v511_v10 = vld [vmem:[%s16159_s30 + $0xc0] sm:$0xff]  ;;  %v513_v13 = vld [vmem:[%s16159_s30 + $0xd0] sm:$0xff]  ;;  %v16350_v15 = vpack.c.bf16 %v382_v8, %v381_v6 }
  0x27   : > { %14052 = vmatmul.mubr.msk.f32.vlgmr.msra.gmra.mrb[2].mxu1 %vm551_vm0, %v494_v30  ;;  %14951 = vmatpush3.bf16.xpose.msk.msra.mxu0 %vm16151_vm1, %v16206_v22  ;;  %19295 = vst [vmem:[#allocation17_spill] sm:$0xff] %v16346_v12  ;;  %v383_v16 = vld [vmem:[%s16147_s27 + $0x100] sm:$0xff]  ;;  %v384_v17 = vld [vmem:[%s16147_s27 + $0x108] sm:$0xff]  ;;  %v385_v19 = vld [vmem:[%s16147_s27 + $0x110] sm:$0xff] }
  0x28   : > { %14957 = vmatpush3.bf16.xpose.msk.msra.mxu1 %vm16151_vm1, %v16210_v24  ;;  %14058 = vmatprep.mubr.msk.f32.mxu0 %vm551_vm0, %v495_v31  ;;  %19296 = vst [vmem:[#allocation18_spill] sm:$0xff] %v16350_v15  ;;  %v512_v18 = vld [vmem:[%s16159_s30 + $0xc8] sm:$0xff]  ;;  %v386_v20 = vld [vmem:[%s16147_s27 + $0x118] sm:$0xff]  ;;  %v515_v23 = vld [vmem:[%s16159_s30 + $0xe0] sm:$0xff]  ;;  %v16374_v25 = vpack.c.bf16 %v384_v17, %v383_v16 }
  0x29   : > { %14065 = vmatprep.mubr.msk.f32.mxu1 %vm551_vm0, %v497_v33  ;;  %14960 = vmatprep.subr.msk.bf16.mxu0 %vm16151_vm1, %v16234_v32  ;;  %v514_v21 = vld [vmem:[%s16159_s30 + $0xd8] sm:$0xff]  ;;  %v517_v26 = vld [vmem:[%s16159_s30 + $0xf0] sm:$0xff]  ;;  %v16378_v27 = vpack.c.bf16 %v386_v20, %v385_v19  ;;  %v387_v28 = vld [vmem:[%s16147_s27 + $0x120] sm:$0xff] }
  0x2a   : > { %14966 = vmatprep.subr.msk.bf16.mxu1 %vm16151_vm1, %v16238_v34  ;;  %19297 = vst [vmem:[#allocation19_spill] sm:$0xff] %v16374_v25  ;;  %v388_v29 = vld [vmem:[%s16147_s27 + $0x128] sm:$0xff]  ;;  %v389_v31 = vld [vmem:[%s16147_s27 + $0x130] sm:$0xff]  ;;  %v390_v33 = vld [vmem:[%s16147_s27 + $0x138] sm:$0xff] }
  0x2b   : > { %19298 = vst [vmem:[#allocation20_spill] sm:$0xff] %v16378_v27  ;;  %v516_v30 = vld [vmem:[%s16159_s30 + $0xe8] sm:$0xff]  ;;  %v518_v35 = vld [vmem:[%s16159_s30 + $0xf8] sm:$0xff]  ;;  %v519_v36 = vld [vmem:[%s16159_s30 + $0x100] sm:$0xff]  ;;  %v16406_v39 = vpack.c.bf16 %v390_v33, %v389_v31 }
  0x2c   : > { %v521_v38 = vld [vmem:[%s16159_s30 + $0x110] sm:$0xff]  ;;  %v394_v46 = vld [vmem:[%s16147_s27 + $0x158] sm:$0xff]  ;;  %v523_v48 = vld [vmem:[%s16159_s30 + $0x120] sm:$0xff] }
  0x2d   : > { %19300 = vst [vmem:[#allocation22_spill] sm:$0xff] %v16406_v39  ;;  %v393_v45 = vld [vmem:[%s16147_s27 + $0x150] sm:$0xff]  ;;  %v396_v55 = vld [vmem:[%s16147_s27 + $0x168] sm:$0xff]  ;;  %v398_v58 = vld [vmem:[%s16147_s27 + $0x178] sm:$0xff] }
  0x2e   : > { %14059 = vmatmul.mubr.msk.f32.vlgmr.msra.gmra.mrb[4].mxu0 %vm551_vm0, %v496_v37  ;;  %v16402_v37 = vpack.c.bf16 %v388_v29, %v387_v28  ;;  %v524_v56 = vld [vmem:[%s16159_s30 + $0x128] sm:$0xff]  ;;  %v526_v59 = vld [vmem:[%s16159_s30 + $0x138] sm:$0xff]  ;;  %v399_v3 = vld [vmem:[%s16147_s27 + $0x180] sm:$0xff] }
  0x2f   : > { %14066 = vmatmul.mubr.msk.f32.vlgmr.msra.gmra.mrb[4].mxu1 %vm551_vm0, %v498_v40  ;;  %14963 = vmatpush3.bf16.xpose.msk.msra.mxu0 %vm16151_vm1, %v16234_v32  ;;  %v391_v40 = vld [vmem:[%s16147_s27 + $0x140] sm:$0xff]  ;;  %v528_v6 = vld [vmem:[%s16159_s30 + $0x148] sm:$0xff]  ;;  %v401_v8 = vld [vmem:[%s16147_s27 + $0x190] sm:$0xff] }
  0x30   : > { %14969 = vmatpush3.bf16.xpose.msk.msra.mxu1 %vm16151_vm1, %v16238_v34  ;;  %14072 = vmatprep.mubr.msk.f32.mxu0 %vm551_vm0, %v499_v41  ;;  %19299 = vst [vmem:[#allocation21_spill] sm:$0xff] %v16402_v37  ;;  %v392_v41 = vld [vmem:[%s16147_s27 + $0x148] sm:$0xff]  ;;  %v533_v17 = vld [vmem:[%s16159_s30 + $0x170] sm:$0xff]  ;;  %v403_v19 = vld [vmem:[%s16147_s27 + $0x1a0] sm:$0xff] }
  0x31   : > { %14079 = vmatprep.mubr.msk.f32.mxu1 %vm551_vm0, %v501_v43  ;;  %14972 = vmatprep.subr.msk.bf16.mxu0 %vm16151_vm1, %v16262_v42  ;;  %v520_v43 = vld [vmem:[%s16159_s30 + $0x108] sm:$0xff]  ;;  %v16430_v49 = vpack.c.bf16 %v392_v41, %v391_v40  ;;  %v534_v28 = vld [vmem:[%s16159_s30 + $0x178] sm:$0xff]  ;;  %v535_v29 = vld [vmem:[%s16159_s30 + $0x180] sm:$0xff] }
  0x32   : > { %14978 = vmatprep.subr.msk.bf16.mxu1 %vm16151_vm1, %v16266_v44  ;;  %v404_v20 = vld [vmem:[%s16147_s27 + $0x1a8] sm:$0xff]  ;;  %v537_v31 = vld [vmem:[%s16159_s30 + $0x190] sm:$0xff]  ;;  %v410_v41 = vld [vmem:[%s16147_s27 + $0x1d8] sm:$0xff] }
  0x33   : > { %19301 = vst [vmem:[#allocation23_spill] sm:$0xff] %v16430_v49  ;;  %v409_v40 = vld [vmem:[%s16147_s27 + $0x1d0] sm:$0xff] }
  0x36   : > { %14073 = vmatmul.mubr.msk.f32.vlgmr.msra.gmra.mrb[6].mxu0 %vm551_vm0, %v500_v47  ;;  %v522_v47 = vld [vmem:[%s16159_s30 + $0x118] sm:$0xff] }
  0x37   : > { %14080 = vmatmul.mubr.msk.f32.vlgmr.msra.gmra.mrb[6].mxu1 %vm551_vm0, %v502_v50  ;;  %14975 = vmatpush3.bf16.xpose.msk.msra.mxu0 %vm16151_vm1, %v16262_v42  ;;  %v525_v50 = vld [vmem:[%s16159_s30 + $0x130] sm:$0xff] }
  0x38   : > { %14981 = vmatpush3.bf16.xpose.msk.msra.mxu1 %vm16151_vm1, %v16266_v44  ;;  %14086 = vmatprep.mubr.msk.f32.mxu0 %vm551_vm0, %v503_v51  ;;  %v16434_v51 = vpack.c.bf16 %v394_v46, %v393_v45  ;;  %v539_v45 = vld [vmem:[%s16159_s30 + $0x1a0] sm:$0xff] }
  0x39   : > { %14093 = vmatprep.mubr.msk.f32.mxu1 %vm551_vm0, %v505_v53  ;;  %14984 = vmatprep.subr.msk.bf16.mxu0 %vm16151_vm1, %v16290_v52  ;;  %v395_v53 = vld [vmem:[%s16147_s27 + $0x160] sm:$0xff] }
  0x3a   : > { %14990 = vmatprep.subr.msk.bf16.mxu1 %vm16151_vm1, %v16294_v54  ;;  %19302 = vst [vmem:[#allocation24_spill] sm:$0xff] %v16434_v51 }
  0x3e   : > { %14087 = vmatmul.mubr.msk.f32.vlgmr.msra.gmra.mrb[8].mxu0 %vm551_vm0, %v504_v57  ;;  %v397_v57 = vld [vmem:[%s16147_s27 + $0x170] sm:$0xff] }
  0x3f   : > { %14094 = vmatmul.mubr.msk.f32.vlgmr.msra.gmra.mrb[8].mxu1 %vm551_vm0, %v506_v60  ;;  %14987 = vmatpush3.bf16.xpose.msk.msra.mxu0 %vm16151_vm1, %v16290_v52  ;;  %v527_v60 = vld [vmem:[%s16159_s30 + $0x140] sm:$0xff]  ;;  %v16462_v2 = vpack.c.bf16 %v398_v58, %v397_v57  ;;  %v412_v57 = vld [vmem:[%s16147_s27 + $0x1e8] sm:$0xff]  ;;  %v542_v58 = vld [vmem:[%s16159_s30 + $0x1b8] sm:$0xff] }
  0x40   : > { %14993 = vmatpush3.bf16.xpose.msk.msra.mxu1 %vm16151_vm1, %v16294_v54  ;;  %14100 = vmatprep.mubr.msk.f32.mxu0 %vm551_vm0, %v507_v61  ;;  %v16458_v61 = vpack.c.bf16 %v396_v55, %v395_v53  ;;  %v414_v53 = vld [vmem:[%s16147_s27 + $0x1f8] sm:$0xff]  ;;  %v540_v55 = vld [vmem:[%s16159_s30 + $0x1a8] sm:$0xff] }
  0x41   : > { %14107 = vmatprep.mubr.msk.f32.mxu1 %vm551_vm0, %v509_v63  ;;  %14996 = vmatprep.subr.msk.bf16.mxu0 %vm16151_vm1, %v16318_v62  ;;  %v529_v63 = vld [vmem:[%s16159_s30 + $0x150] sm:$0xff]  ;;  %19304 = vst [vmem:[#allocation26_spill] sm:$0xff] %v16462_v2 }
  0x42   : > { %15002 = vmatprep.subr.msk.bf16.mxu1 %vm16151_vm1, %v16322_v1  ;;  %19303 = vst [vmem:[#allocation25_spill] sm:$0xff] %v16458_v61 }
  0x46   : > { %14101 = vmatmul.mubr.msk.f32.vlgmr.msra.gmra.mrb[10].mxu0 %vm551_vm0, %v508_v5  ;;  %v400_v5 = vld [vmem:[%s16147_s27 + $0x188] sm:$0xff] }
  0x47   : > { %14108 = vmatmul.mubr.msk.f32.vlgmr.msra.gmra.mrb[10].mxu1 %vm551_vm0, %v510_v9  ;;  %14999 = vmatpush3.bf16.xpose.msk.msra.mxu0 %vm16151_vm1, %v16318_v62  ;;  %v402_v9 = vld [vmem:[%s16147_s27 + $0x198] sm:$0xff]  ;;  %v16486_v16 = vpack.c.bf16 %v400_v5, %v399_v3  ;;  %v544_v5 = vld [vmem:[%s16159_s30 + $0x1c8] sm:$0xff] }
  0x48   : > { %15005 = vmatpush3.bf16.xpose.msk.msra.mxu1 %vm16151_vm1, %v16322_v1  ;;  %14114 = vmatprep.mubr.msk.f32.mxu0 %vm551_vm0, %v511_v10  ;;  %v530_v10 = vld [vmem:[%s16159_s30 + $0x158] sm:$0xff] }
  0x49   : > { %14121 = vmatprep.mubr.msk.f32.mxu1 %vm551_vm0, %v513_v13  ;;  %15008 = vmatprep.subr.msk.bf16.mxu0 %vm16151_vm1, %v16346_v12  ;;  %v531_v13 = vld [vmem:[%s16159_s30 + $0x160] sm:$0xff]  ;;  %19305 = vst [vmem:[#allocation27_spill] sm:$0xff] %v16486_v16 }
  0x4a   : > { %15014 = vmatprep.subr.msk.bf16.mxu1 %vm16151_vm1, %v16350_v15 }
  0x4e   : > { %14115 = vmatmul.mubr.msk.f32.vlgmr.msra.gmra.mrb[12].mxu0 %vm551_vm0, %v512_v18  ;;  %v16490_v18 = vpack.c.bf16 %v402_v9, %v401_v8  ;;  %v549_v8 = vld [vmem:[%s16159_s30 + $0x1f0] sm:$0xff]  ;;  %v547_v9 = vld [vmem:[%s16159_s30 + $0x1e0] sm:$0xff] }
  0x4f   : > { %14122 = vmatmul.mubr.msk.f32.vlgmr.msra.gmra.mrb[12].mxu1 %vm551_vm0, %v514_v21  ;;  %15011 = vmatpush3.bf16.xpose.msk.msra.mxu0 %vm16151_vm1, %v16346_v12  ;;  %v532_v21 = vld [vmem:[%s16159_s30 + $0x168] sm:$0xff] }
  0x50   : > { %15017 = vmatpush3.bf16.xpose.msk.msra.mxu1 %vm16151_vm1, %v16350_v15  ;;  %14128 = vmatprep.mubr.msk.f32.mxu0 %vm551_vm0, %v515_v23  ;;  %19306 = vst [vmem:[#allocation28_spill] sm:$0xff] %v16490_v18  ;;  %v405_v23 = vld [vmem:[%s16147_s27 + $0x1b0] sm:$0xff] }
  0x51   : > { %14135 = vmatprep.mubr.msk.f32.mxu1 %vm551_vm0, %v517_v26  ;;  %15020 = vmatprep.subr.msk.bf16.mxu0 %vm16151_vm1, %v16374_v25  ;;  %v406_v26 = vld [vmem:[%s16147_s27 + $0x1b8] sm:$0xff] }
  0x52   : > { %15026 = vmatprep.subr.msk.bf16.mxu1 %vm16151_vm1, %v16378_v27  ;;  %v16518_v33 = vpack.c.bf16 %v406_v26, %v405_v23  ;;  %v16617_v26 = vld [vmem:[%s19084_s0] sm:$0xff] }
  0x54   : > { %19308 = vst [vmem:[#allocation30_spill] sm:$0xff] %v16518_v33 }
  0x56   : > { %14129 = vmatmul.mubr.msk.f32.vlgmr.msra.gmra.mrb[14].mxu0 %vm551_vm0, %v516_v30  ;;  %v16514_v30 = vpack.c.bf16 %v404_v20, %v403_v19  ;;  %v16612_v19 = vld [vmem:[%s19084_s0 + $0x8] sm:$0xff] }
  0x57   : > { %14136 = vmatmul.mubr.msk.f32.vlgmr.msra.gmra.mrb[14].mxu1 %vm551_vm0, %v518_v35  ;;  %15023 = vmatpush3.bf16.xpose.msk.msra.mxu0 %vm16151_vm1, %v16374_v25  ;;  %v407_v35 = vld [vmem:[%s16147_s27 + $0x1c0] sm:$0xff] }
  0x58   : > { %15029 = vmatpush3.bf16.xpose.msk.msra.mxu1 %vm16151_vm1, %v16378_v27  ;;  %14142 = vmatprep.mubr.msk.f32.mxu0 %vm551_vm0, %v519_v36  ;;  %19307 = vst [vmem:[#allocation29_spill] sm:$0xff] %v16514_v30  ;;  %v408_v36 = vld [vmem:[%s16147_s27 + $0x1c8] sm:$0xff] }
  0x59   : > { %14149 = vmatprep.mubr.msk.f32.mxu1 %vm551_vm0, %v521_v38  ;;  %15032 = vmatprep.subr.msk.bf16.mxu0 %vm16151_vm1, %v16402_v37  ;;  %v536_v38 = vld [vmem:[%s16159_s30 + $0x188] sm:$0xff]  ;;  %v16542_v46 = vpack.c.bf16 %v408_v36, %v407_v35  ;;  %v16622_v35 = vld [vmem:[%s19084_s0 + $0x18] sm:$0xff] }
  0x5a   : > { %15038 = vmatprep.subr.msk.bf16.mxu1 %vm16151_vm1, %v16406_v39 }
  0x5b   : > { %19309 = vst [vmem:[#allocation31_spill] sm:$0xff] %v16542_v46 }
  0x5e   : > { %14143 = vmatmul.mubr.msk.f32.vlgmr.msra.gmra.mrb[16].mxu0 %vm551_vm0, %v520_v43  ;;  %v538_v43 = vld [vmem:[%s16159_s30 + $0x198] sm:$0xff] }
  0x5f   : > { %14150 = vmatmul.mubr.msk.f32.vlgmr.msra.gmra.mrb[16].mxu1 %vm551_vm0, %v522_v47  ;;  %15035 = vmatpush3.bf16.xpose.msk.msra.mxu0 %vm16151_vm1, %v16402_v37  ;;  %v541_v47 = vld [vmem:[%s16159_s30 + $0x1b0] sm:$0xff] }
  0x60   : > { %15041 = vmatpush3.bf16.xpose.msk.msra.mxu1 %vm16151_vm1, %v16406_v39  ;;  %14156 = vmatprep.mubr.msk.f32.mxu0 %vm551_vm0, %v523_v48  ;;  %v16546_v48 = vpack.c.bf16 %v410_v41, %v409_v40  ;;  %v16630_v40 = vld [vmem:[%s19084_s0 + $0x10] sm:$0xff] }
  0x61   : > { %14163 = vmatprep.mubr.msk.f32.mxu1 %vm551_vm0, %v525_v50  ;;  %15044 = vmatprep.subr.msk.bf16.mxu0 %vm16151_vm1, %v16430_v49  ;;  %v413_v50 = vld [vmem:[%s16147_s27 + $0x1f0] sm:$0xff] }
  0x62   : > { %15050 = vmatprep.subr.msk.bf16.mxu1 %vm16151_vm1, %v16434_v51  ;;  %19310 = vst [vmem:[#allocation32_spill] sm:$0xff] %v16546_v48 }
  0x66   : > { %14157 = vmatmul.mubr.msk.f32.vlgmr.msra.gmra.mrb[18].mxu0 %vm551_vm0, %v524_v56  ;;  %v411_v56 = vld [vmem:[%s16147_s27 + $0x1e0] sm:$0xff]  ;;  %s17049_s27 = scalar_lea.vmem %s19088_s4, %s16141_s24 }
  0x67   : > { %14164 = vmatmul.mubr.msk.f32.vlgmr.msra.gmra.mrb[18].mxu1 %vm551_vm0, %v526_v59  ;;  %15047 = vmatpush3.bf16.xpose.msk.msra.mxu0 %vm16151_vm1, %v16430_v49  ;;  %v543_v59 = vld [vmem:[%s16159_s30 + $0x1c0] sm:$0xff]  ;;  %v16574_v3 = vpack.c.bf16 %v412_v57, %v411_v56  ;;  %v16653_v56 = vld [vmem:[%s19084_s0 + $0x28] sm:$0xff] }
  0x68   : > { %15053 = vmatpush3.bf16.xpose.msk.msra.mxu1 %vm16151_vm1, %v16434_v51  ;;  %14170 = vmatprep.mubr.msk.f32.mxu0 %vm551_vm0, %v527_v60  ;;  %v16570_v60 = vpack.c.bf16 %v414_v53, %v413_v50 }
  0x69   : > { %14177 = vmatprep.mubr.msk.f32.mxu1 %vm551_vm0, %v529_v63  ;;  %15056 = vmatprep.subr.msk.bf16.mxu0 %vm16151_vm1, %v16458_v61  ;;  %v545_v63 = vld [vmem:[%s16159_s30 + $0x1d0] sm:$0xff]  ;;  %19312 = vst [vmem:[#allocation34_spill] sm:$0xff] %v16574_v3 }
  0x6a   : > { %15062 = vmatprep.subr.msk.bf16.mxu1 %vm16151_vm1, %v16462_v2  ;;  %19311 = vst [vmem:[#allocation33_spill] sm:$0xff] %v16570_v60 }
  0x6e   : > { %14171 = vmatmul.mubr.msk.f32.vlgmr.msra.gmra.mrb[20].mxu0 %vm551_vm0, %v528_v6  ;;  %v546_v6 = vld [vmem:[%s16159_s30 + $0x1d8] sm:$0xff] }
  0x6f   : > { %14178 = vmatmul.mubr.msk.f32.vlgmr.msra.gmra.mrb[20].mxu1 %vm551_vm0, %v530_v10  ;;  %15059 = vmatpush3.bf16.xpose.msk.msra.mxu0 %vm16151_vm1, %v16458_v61  ;;  %v548_v10 = vld [vmem:[%s16159_s30 + $0x1e8] sm:$0xff] }
  0x70   : > { %15065 = vmatpush3.bf16.xpose.msk.msra.mxu1 %vm16151_vm1, %v16462_v2  ;;  %14184 = vmatprep.mubr.msk.f32.mxu0 %vm551_vm0, %v531_v13  ;;  %v550_v13 = vld [vmem:[%s16159_s30 + $0x1f8] sm:$0xff]  ;;  %s17619_s30 = scalar_lea.vmem %s19086_s2, %s16141_s24 }
  0x71   : > { %14191 = vmatprep.mubr.msk.f32.mxu1 %vm551_vm0, %v533_v17  ;;  %15068 = vmatprep.subr.msk.bf16.mxu0 %vm16151_vm1, %v16486_v16 }
  0x72   : > { %15074 = vmatprep.subr.msk.bf16.mxu1 %vm16151_vm1, %v16490_v18 }
  0x76   : > { %14185 = vmatmul.mubr.msk.f32.vlgmr.msra.gmra.mrb[22].mxu0 %vm551_vm0, %v532_v21 }
  0x77   : > { %14192 = vmatmul.mubr.msk.f32.vlgmr.msra.gmra.mrb[22].mxu1 %vm551_vm0, %v534_v28  ;;  %15071 = vmatpush3.bf16.xpose.msk.msra.mxu0 %vm16151_vm1, %v16486_v16 }
  0x78   : > { %15077 = vmatpush3.bf16.xpose.msk.msra.mxu1 %vm16151_vm1, %v16490_v18  ;;  %14198 = vmatprep.mubr.msk.f32.mxu0 %vm551_vm0, %v535_v29 }
  0x79   : > { %14205 = vmatprep.mubr.msk.f32.mxu1 %vm551_vm0, %v537_v31  ;;  %15080 = vmatprep.subr.msk.bf16.mxu0 %vm16151_vm1, %v16514_v30 }
  0x7a   : > { %15086 = vmatprep.subr.msk.bf16.mxu1 %vm16151_vm1, %v16518_v33 }
  0x7e   : > { %14199 = vmatmul.mubr.msk.f32.vlgmr.msra.gmra.mrb[24].mxu0 %vm551_vm0, %v536_v38 }
  0x7f   : > { %14206 = vmatmul.mubr.msk.f32.vlgmr.msra.gmra.mrb[24].mxu1 %vm551_vm0, %v538_v43  ;;  %15083 = vmatpush3.bf16.xpose.msk.msra.mxu0 %vm16151_vm1, %v16514_v30 }
  0x80   : > { %15089 = vmatpush3.bf16.xpose.msk.msra.mxu1 %vm16151_vm1, %v16518_v33  ;;  %14212 = vmatprep.mubr.msk.f32.mxu0 %vm551_vm0, %v539_v45 }
  0x81   : > { %14219 = vmatprep.mubr.msk.f32.mxu1 %vm551_vm0, %v541_v47  ;;  %15092 = vmatprep.subr.msk.bf16.mxu0 %vm16151_vm1, %v16542_v46 }
  0x82   : > { %15098 = vmatprep.subr.msk.bf16.mxu1 %vm16151_vm1, %v16546_v48 }
  0x86   : > { %14213 = vmatmul.mubr.msk.f32.vlgmr.msra.gmra.mrb[26].mxu0 %vm551_vm0, %v540_v55  ;;  %v16648_v55 = vld [vmem:[%s19084_s0 + $0x38] sm:$0xff] }
  0x87   : > { %14220 = vmatmul.mubr.msk.f32.vlgmr.msra.gmra.mrb[26].mxu1 %vm551_vm0, %v542_v58  ;;  %15095 = vmatpush3.bf16.xpose.msk.msra.mxu0 %vm16151_vm1, %v16542_v46 }
  0x88   : > { %15101 = vmatpush3.bf16.xpose.msk.msra.mxu1 %vm16151_vm1, %v16546_v48  ;;  %14226 = vmatprep.mubr.msk.f32.mxu0 %vm551_vm0, %v543_v59 }
  0x89   : > { %14233 = vmatprep.mubr.msk.f32.mxu1 %vm551_vm0, %v545_v63  ;;  %15110 = vmatprep.subr.msk.bf16.mxu1 %vm16151_vm1, %v16570_v60 }
  0x8a   : > { %15104 = vmatprep.subr.msk.bf16.mxu0 %vm16151_vm1, %v16574_v3 }
  0x8e   : > { %14227 = vmatmul.mubr.msk.f32.vlgmr.msra.gmra.mrb[28].mxu0 %vm551_vm0, %v544_v5  ;;  %v16660_v5 = vld [vmem:[%s19084_s0 + $0x20] sm:$0xff] }
  0x8f   : > { %14234 = vmatmul.mubr.msk.f32.vlgmr.msra.gmra.mrb[28].mxu1 %vm551_vm0, %v546_v6  ;;  %15107 = vmatpush3.bf16.xpose.msk.msra.mxu0 %vm16151_vm1, %v16574_v3 }
  0x90   : > { %15113 = vmatpush3.bf16.xpose.msk.msra.mxu1 %vm16151_vm1, %v16570_v60  ;;  %14247 = vmatprep.mubr.msk.f32.mxu1 %vm551_vm0, %v549_v8 }
  0x91   : > { %14240 = vmatprep.mubr.msk.f32.mxu0 %vm551_vm0, %v547_v9 }
  0x96   : > { %14241 = vmatmul.mubr.msk.f32.vlgmr.msra.gmra.mrb[30].mxu0 %vm551_vm0, %v548_v10 }
  0x97   : > { %14248 = vmatmul.mubr.msk.f32.vlgmr.msra.gmra.mrb[30].mxu1 %vm551_vm0, %v550_v13 }
  0xf1   : > { %v14032_v17 = vpop.f32.mrb[0].mxu0 }
  0xf2   : > { %v3337_v20 = vmul.f32 0.35355338, %v14032_v17  ;;  %v630_v21 = vpop.f32.mrb[1].mxu0  ;;  %v14039_v23 = vpop.f32.mrb[0].mxu1 }
  0xf3   : > { %v3336_v28 = vmul.f32 0.35355338, %v630_v21  ;;  %v3339_v29 = vmul.f32 0.35355338, %v14039_v23  ;;  %v717_v31 = vpop.f32.mrb[1].mxu1 }
  0xf4   : > { %v3338_v36 = vmul.f32 0.35355338, %v717_v31  ;;  %v16625_v38 = vadd.f32 %v3337_v20, %v16612_v19  ;;  %v16670_v20 = vld [vmem:[%s19084_s0 + $0x30] sm:$0xff] }
  0xf5   : > { %v16633_v41 = vadd.f32 %v3336_v28, %v16617_v26  ;;  %v16638_v45 = vadd.f32 %v3339_v29, %v16622_v35 }
  0xf6   : > { %v3468_v43 = vsel %vm3464_vm2, %v16625_v38, -inf  ;;  %v16643_v50 = vadd.f32 %v3338_v36, %v16630_v40 }
  0xf7   : > { %3469 = vmax.xlane.f32.xlu1 %v3468_v43  ;;  %v3465_v47 = vsel %vm3464_vm2, %v16633_v41, -inf  ;;  %v3474_v63 = vsel %vm3464_vm2, %v16638_v45, -inf }
  0xf8   : > { %3466 = vmax.xlane.f32.xlu0 %v3465_v47  ;;  %v3471_v10 = vsel %vm3464_vm2, %v16643_v50, -inf }
  0xf9   : > { %v14046_v53 = vpop.f32.mrb[2].mxu0 }
  0xfa   : > { %v3341_v57 = vmul.f32 0.35355338, %v14046_v53  ;;  %v14053_v58 = vpop.f32.mrb[2].mxu1  ;;  %v804_v59 = vpop.f32.mrb[3].mxu0 }
  0xfb   : > { %v3343_v6 = vmul.f32 0.35355338, %v14053_v58  ;;  %v3340_v8 = vmul.f32 0.35355338, %v804_v59  ;;  %v891_v9 = vpop.f32.mrb[3].mxu1  ;;  %3475 = vmax.xlane.f32.xlu1 %v3474_v63 }
  0xfc   : > { %v3342_v13 = vmul.f32 0.35355338, %v891_v9  ;;  %3472 = vmax.xlane.f32.xlu0 %v3471_v10  ;;  %v16665_v17 = vadd.f32 %v3341_v57, %v16653_v56 }
  0xfd   : > { %v16673_v21 = vadd.f32 %v3343_v6, %v16648_v55  ;;  %v16678_v28 = vadd.f32 %v3340_v8, %v16660_v5 }
  0xfe   : > { %v3480_v23 = vsel %vm3464_vm2, %v16665_v17, -inf  ;;  %v16683_v31 = vadd.f32 %v3342_v13, %v16670_v20 }
  0xff   : > { %v3486_v29 = vsel %vm3464_vm2, %v16673_v21, -inf  ;;  %v3477_v57 = vsel %vm3464_vm2, %v16678_v28, -inf }
 0x100   : > { %3487 = vmax.xlane.f32.xlu1 %v3486_v29  ;;  %3481 = vmax.xlane.f32.xlu0 %v3480_v23  ;;  %v3483_v6 = vsel %vm3464_vm2, %v16683_v31, -inf }
 0x101   : > { %v14060_v36 = vpop.f32.mrb[4].mxu0 }
 0x102   : > { %v3345_v43 = vmul.f32 0.35355338, %v14060_v36  ;;  %v14067_v47 = vpop.f32.mrb[4].mxu1  ;;  %v978_v53 = vpop.f32.mrb[5].mxu0 }
 0x103   : > { %v3347_v58 = vmul.f32 0.35355338, %v14067_v47  ;;  %v3344_v59 = vmul.f32 0.35355338, %v978_v53  ;;  %v1065_v63 = vpop.f32.mrb[5].mxu1 }
 0x104   : > { %v3346_v8 = vmul.f32 0.35355338, %v1065_v63  ;;  %3484 = vmax.xlane.f32.xlu1 %v3483_v6  ;;  %3478 = vmax.xlane.f32.xlu0 %v3477_v57  ;;  %v16690_v9 = vadd.f32 %v3345_v43, %v16612_v19 }
 0x105   : > { %v16693_v10 = vadd.f32 %v3347_v58, %v16622_v35  ;;  %v16698_v23 = vadd.f32 %v3344_v59, %v16617_v26 }
 0x106   : > { %v3492_v13 = vsel %vm3464_vm2, %v16690_v9, -inf  ;;  %v16703_v36 = vadd.f32 %v3346_v8, %v16630_v40 }
 0x107   : > { %v3498_v29 = vsel %vm3464_vm2, %v16693_v10, -inf  ;;  %v3489_v58 = vsel %vm3464_vm2, %v16698_v23, -inf }
 0x108   : > { %3499 = vmax.xlane.f32.xlu1 %v3498_v29  ;;  %3493 = vmax.xlane.f32.xlu0 %v3492_v13  ;;  %v3495_v59 = vsel %vm3464_vm2, %v16703_v36, -inf }
 0x109   : > { %v14074_v47 = vpop.f32.mrb[6].mxu0 }
 0x10a   : > { %v3349_v43 = vmul.f32 0.35355338, %v14074_v47  ;;  %v14081_v53 = vpop.f32.mrb[6].mxu1  ;;  %v1152_v57 = vpop.f32.mrb[7].mxu0 }
 0x10b   : > { %v3351_v63 = vmul.f32 0.35355338, %v14081_v53  ;;  %v3348_v6 = vmul.f32 0.35355338, %v1152_v57  ;;  %v1239_v3 = vpop.f32.mrb[7].mxu1 }
 0x10c   : > { %v3350_v60 = vmul.f32 0.35355338, %v1239_v3  ;;  %3496 = vmax.xlane.f32.xlu1 %v3495_v59  ;;  %3490 = vmax.xlane.f32.xlu0 %v3489_v58  ;;  %v16710_v8 = vadd.f32 %v3349_v43, %v16653_v56 }
 0x10d   : > { %v16713_v13 = vadd.f32 %v3351_v63, %v16648_v55  ;;  %v16718_v47 = vadd.f32 %v3348_v6, %v16660_v5 }
 0x10e   : > { %v3504_v29 = vsel %vm3464_vm2, %v16710_v8, -inf  ;;  %v16723_v57 = vadd.f32 %v3350_v60, %v16670_v20 }
 0x10f   : > { %v3510_v53 = vsel %vm3464_vm2, %v16713_v13, -inf  ;;  %v3501_v63 = vsel %vm3464_vm2, %v16718_v47, -inf }
 0x110   : > { %3511 = vmax.xlane.f32.xlu1 %v3510_v53  ;;  %3505 = vmax.xlane.f32.xlu0 %v3504_v29  ;;  %v3507_v6 = vsel %vm3464_vm2, %v16723_v57, -inf }
 0x111   : > { %v14088_v3 = vpop.f32.mrb[8].mxu0 }
 0x112   : > { %v3353_v43 = vmul.f32 0.35355338, %v14088_v3  ;;  %v14095_v58 = vpop.f32.mrb[8].mxu1  ;;  %v1326_v59 = vpop.f32.mrb[9].mxu0 }
 0x113   : > { %v3355_v46 = vmul.f32 0.35355338, %v14095_v58  ;;  %v3352_v48 = vmul.f32 0.35355338, %v1326_v59  ;;  %v1413_v30 = vpop.f32.mrb[9].mxu1 }
 0x114   : > { %v3354_v33 = vmul.f32 0.35355338, %v1413_v30  ;;  %3508 = vmax.xlane.f32.xlu1 %v3507_v6  ;;  %3502 = vmax.xlane.f32.xlu0 %v3501_v63  ;;  %v16730_v60 = vadd.f32 %v3353_v43, %v16612_v19 }
 0x115   : > { %v16733_v29 = vadd.f32 %v3355_v46, %v16622_v35  ;;  %v16738_v3 = vadd.f32 %v3352_v48, %v16617_v26 }
 0x116   : > { %v3516_v53 = vsel %vm3464_vm2, %v16730_v60, -inf  ;;  %v16743_v59 = vadd.f32 %v3354_v33, %v16630_v40 }
 0x117   : > { %v3522_v58 = vsel %vm3464_vm2, %v16733_v29, -inf  ;;  %v3513_v46 = vsel %vm3464_vm2, %v16738_v3, -inf }
 0x118   : > { %3523 = vmax.xlane.f32.xlu1 %v3522_v58  ;;  %3517 = vmax.xlane.f32.xlu0 %v3516_v53  ;;  %v3519_v48 = vsel %vm3464_vm2, %v16743_v59, -inf }
 0x119   : > { %v14102_v30 = vpop.f32.mrb[10].mxu0 }
 0x11a   : > { %v3357_v43 = vmul.f32 0.35355338, %v14102_v30  ;;  %v14109_v63 = vpop.f32.mrb[10].mxu1  ;;  %v1500_v6 = vpop.f32.mrb[11].mxu0 }
 0x11b   : > { %v3359_v16 = vmul.f32 0.35355338, %v14109_v63  ;;  %v3356_v18 = vmul.f32 0.35355338, %v1500_v6  ;;  %v1587_v61 = vpop.f32.mrb[11].mxu1 }
 0x11c   : > { %v3358_v2 = vmul.f32 0.35355338, %v1587_v61  ;;  %3520 = vmax.xlane.f32.xlu1 %v3519_v48  ;;  %3514 = vmax.xlane.f32.xlu0 %v3513_v46  ;;  %v16750_v33 = vadd.f32 %v3357_v43, %v16653_v56 }
 0x11d   : > { %v16753_v53 = vadd.f32 %v3359_v16, %v16648_v55  ;;  %v16758_v30 = vadd.f32 %v3356_v18, %v16660_v5 }
 0x11e   : > { %v3528_v58 = vsel %vm3464_vm2, %v16750_v33, -inf  ;;  %v16763_v6 = vadd.f32 %v3358_v2, %v16670_v20 }
 0x11f   : > { %v3534_v63 = vsel %vm3464_vm2, %v16753_v53, -inf  ;;  %v3525_v16 = vsel %vm3464_vm2, %v16758_v30, -inf }
 0x120   : > { %3535 = vmax.xlane.f32.xlu1 %v3534_v63  ;;  %3529 = vmax.xlane.f32.xlu0 %v3528_v58  ;;  %v3531_v18 = vsel %vm3464_vm2, %v16763_v6, -inf }
 0x121   : > { %v14116_v61 = vpop.f32.mrb[12].mxu0 }
 0x122   : > { %v3361_v43 = vmul.f32 0.35355338, %v14116_v61  ;;  %v14123_v46 = vpop.f32.mrb[12].mxu1  ;;  %v1674_v48 = vpop.f32.mrb[13].mxu0 }
 0x123   : > { %v3363_v49 = vmul.f32 0.35355338, %v14123_v46  ;;  %v3360_v51 = vmul.f32 0.35355338, %v1674_v48  ;;  %v1761_v37 = vpop.f32.mrb[13].mxu1 }
 0x124   : > { %v3362_v39 = vmul.f32 0.35355338, %v1761_v37  ;;  %3532 = vmax.xlane.f32.xlu1 %v3531_v18  ;;  %3526 = vmax.xlane.f32.xlu0 %v3525_v16  ;;  %v16770_v2 = vadd.f32 %v3361_v43, %v16612_v19 }
 0x125   : > { %v16773_v58 = vadd.f32 %v3363_v49, %v16622_v35  ;;  %v16778_v61 = vadd.f32 %v3360_v51, %v16617_v26 }
 0x126   : > { %v3540_v63 = vsel %vm3464_vm2, %v16770_v2, -inf  ;;  %v16783_v48 = vadd.f32 %v3362_v39, %v16630_v40 }
 0x127   : > { %v3546_v46 = vsel %vm3464_vm2, %v16773_v58, -inf  ;;  %v3537_v49 = vsel %vm3464_vm2, %v16778_v61, -inf }
 0x128   : > { %3547 = vmax.xlane.f32.xlu1 %v3546_v46  ;;  %3541 = vmax.xlane.f32.xlu0 %v3540_v63  ;;  %v3543_v51 = vsel %vm3464_vm2, %v16783_v48, -inf }
 0x129   : > { %v14130_v37 = vpop.f32.mrb[14].mxu0 }
 0x12a   : > { %v3365_v43 = vmul.f32 0.35355338, %v14130_v37  ;;  %v14137_v16 = vpop.f32.mrb[14].mxu1  ;;  %v1848_v18 = vpop.f32.mrb[15].mxu0 }
 0x12b   : > { %v3367_v25 = vmul.f32 0.35355338, %v14137_v16  ;;  %v3364_v27 = vmul.f32 0.35355338, %v1848_v18  ;;  %v1935_v12 = vpop.f32.mrb[15].mxu1 }
 0x12c   : > { %v3366_v15 = vmul.f32 0.35355338, %v1935_v12  ;;  %3544 = vmax.xlane.f32.xlu1 %v3543_v51  ;;  %3538 = vmax.xlane.f32.xlu0 %v3537_v49  ;;  %v16790_v39 = vadd.f32 %v3365_v43, %v16653_v56 }
 0x12d   : > { %v16793_v63 = vadd.f32 %v3367_v25, %v16648_v55  ;;  %v16798_v37 = vadd.f32 %v3364_v27, %v16660_v5 }
 0x12e   : > { %v3552_v46 = vsel %vm3464_vm2, %v16790_v39, -inf  ;;  %v16803_v18 = vadd.f32 %v3366_v15, %v16670_v20 }
 0x12f   : > { %v3558_v16 = vsel %vm3464_vm2, %v16793_v63, -inf  ;;  %v3549_v25 = vsel %vm3464_vm2, %v16798_v37, -inf }
 0x130   : > { %3559 = vmax.xlane.f32.xlu1 %v3558_v16  ;;  %3553 = vmax.xlane.f32.xlu0 %v3552_v46  ;;  %v3555_v27 = vsel %vm3464_vm2, %v16803_v18, -inf }
 0x131   : > { %v14144_v12 = vpop.f32.mrb[16].mxu0 }
 0x132   : > { %v3369_v43 = vmul.f32 0.35355338, %v14144_v12  ;;  %v14151_v49 = vpop.f32.mrb[16].mxu1  ;;  %v2022_v51 = vpop.f32.mrb[17].mxu0 }
 0x133   : > { %v3371_v62 = vmul.f32 0.35355338, %v14151_v49  ;;  %v3368_v1 = vmul.f32 0.35355338, %v2022_v51  ;;  %v2109_v52 = vpop.f32.mrb[17].mxu1 }
 0x134   : > { %v3370_v54 = vmul.f32 0.35355338, %v2109_v52  ;;  %3556 = vmax.xlane.f32.xlu1 %v3555_v27  ;;  %3550 = vmax.xlane.f32.xlu0 %v3549_v25  ;;  %v16810_v15 = vadd.f32 %v3369_v43, %v16612_v19 }
 0x135   : > { %v16813_v46 = vadd.f32 %v3371_v62, %v16622_v35  ;;  %v16818_v12 = vadd.f32 %v3368_v1, %v16617_v26 }
 0x136   : > { %v3564_v16 = vsel %vm3464_vm2, %v16810_v15, -inf  ;;  %v16823_v51 = vadd.f32 %v3370_v54, %v16630_v40 }
 0x137   : > { %v3570_v49 = vsel %vm3464_vm2, %v16813_v46, -inf  ;;  %v3561_v62 = vsel %vm3464_vm2, %v16818_v12, -inf }
 0x138   : > { %3571 = vmax.xlane.f32.xlu1 %v3570_v49  ;;  %3565 = vmax.xlane.f32.xlu0 %v3564_v16  ;;  %v3567_v1 = vsel %vm3464_vm2, %v16823_v51, -inf }
 0x139   : > { %v14158_v52 = vpop.f32.mrb[18].mxu0 }
 0x13a   : > { %v3373_v43 = vmul.f32 0.35355338, %v14158_v52  ;;  %v14165_v25 = vpop.f32.mrb[18].mxu1  ;;  %v2196_v27 = vpop.f32.mrb[19].mxu0 }
 0x13b   : > { %v3375_v42 = vmul.f32 0.35355338, %v14165_v25  ;;  %v3372_v44 = vmul.f32 0.35355338, %v2196_v27  ;;  %v2283_v32 = vpop.f32.mrb[19].mxu1 }
 0x13c   : > { %v3374_v34 = vmul.f32 0.35355338, %v2283_v32  ;;  %3568 = vmax.xlane.f32.xlu1 %v3567_v1  ;;  %3562 = vmax.xlane.f32.xlu0 %v3561_v62  ;;  %v16830_v54 = vadd.f32 %v3373_v43, %v16653_v56 }
 0x13d   : > { %v16833_v16 = vadd.f32 %v3375_v42, %v16648_v55  ;;  %v16838_v52 = vadd.f32 %v3372_v44, %v16660_v5 }
 0x13e   : > { %v3576_v49 = vsel %vm3464_vm2, %v16830_v54, -inf  ;;  %v16843_v27 = vadd.f32 %v3374_v34, %v16670_v20 }
 0x13f   : > { %v3582_v25 = vsel %vm3464_vm2, %v16833_v16, -inf  ;;  %v3573_v42 = vsel %vm3464_vm2, %v16838_v52, -inf }
 0x140   : > { %3583 = vmax.xlane.f32.xlu1 %v3582_v25  ;;  %3577 = vmax.xlane.f32.xlu0 %v3576_v49  ;;  %v3579_v44 = vsel %vm3464_vm2, %v16843_v27, -inf }
 0x141   : > { %v14172_v32 = vpop.f32.mrb[20].mxu0 }
 0x142   : > { %v3377_v43 = vmul.f32 0.35355338, %v14172_v32  ;;  %v14179_v62 = vpop.f32.mrb[20].mxu1  ;;  %v2370_v1 = vpop.f32.mrb[21].mxu0 }
 0x143   : > { %v3379_v22 = vmul.f32 0.35355338, %v14179_v62  ;;  %v3376_v24 = vmul.f32 0.35355338, %v2370_v1  ;;  %v2457_v11 = vpop.f32.mrb[21].mxu1 }
 0x144   : > { %v3378_v14 = vmul.f32 0.35355338, %v2457_v11  ;;  %3580 = vmax.xlane.f32.xlu1 %v3579_v44  ;;  %3574 = vmax.xlane.f32.xlu0 %v3573_v42  ;;  %v16850_v34 = vadd.f32 %v3377_v43, %v16612_v19 }
 0x145   : > { %v16853_v49 = vadd.f32 %v3379_v22, %v16622_v35  ;;  %v16858_v32 = vadd.f32 %v3376_v24, %v16617_v26 }
 0x146   : > { %19313 = vst [vmem:[#allocation35_spill] sm:$0xff] %v16850_v34  ;;  %v3588_v25 = vsel %vm3464_vm2, %v16850_v34, -inf  ;;  %v16863_v1 = vadd.f32 %v3378_v14, %v16630_v40 }
 0x147   : > { %19314 = vst [vmem:[#allocation36_spill] sm:$0xff] %v16853_v49  ;;  %19315 = vst [vmem:[#allocation37_spill] sm:$0xff] %v16858_v32  ;;  %v3594_v62 = vsel %vm3464_vm2, %v16853_v49, -inf  ;;  %v3585_v22 = vsel %vm3464_vm2, %v16858_v32, -inf }
 0x148   : > { %19316 = vst [vmem:[#allocation38_spill] sm:$0xff] %v16863_v1  ;;  %3595 = vmax.xlane.f32.xlu1 %v3594_v62  ;;  %3589 = vmax.xlane.f32.xlu0 %v3588_v25  ;;  %v3591_v24 = vsel %vm3464_vm2, %v16863_v1, -inf }
 0x149   : > { %v14186_v11 = vpop.f32.mrb[22].mxu0 }
 0x14a   : > { %v3381_v43 = vmul.f32 0.35355338, %v14186_v11  ;;  %v14193_v42 = vpop.f32.mrb[22].mxu1  ;;  %v2544_v44 = vpop.f32.mrb[23].mxu0 }
 0x14b   : > { %v3383_v4 = vmul.f32 0.35355338, %v14193_v42  ;;  %v3380_v0 = vmul.f32 0.35355338, %v2544_v44  ;;  %v2631_v7 = vpop.f32.mrb[23].mxu1 }
 0x14c   : > { %v3382_v34 = vmul.f32 0.35355338, %v2631_v7  ;;  %3592 = vmax.xlane.f32.xlu1 %v3591_v24  ;;  %3586 = vmax.xlane.f32.xlu0 %v3585_v22  ;;  %v16870_v14 = vadd.f32 %v3381_v43, %v16653_v56 }
 0x14d   : > { %v16873_v25 = vadd.f32 %v3383_v4, %v16648_v55  ;;  %v16878_v11 = vadd.f32 %v3380_v0, %v16660_v5 }
 0x14e   : > { %19317 = vst [vmem:[#allocation39_spill] sm:$0xff] %v16870_v14  ;;  %v3600_v62 = vsel %vm3464_vm2, %v16870_v14, -inf  ;;  %v16883_v44 = vadd.f32 %v3382_v34, %v16670_v20 }
 0x14f   : > { %19318 = vst [vmem:[#allocation40_spill] sm:$0xff] %v16873_v25  ;;  %19319 = vst [vmem:[#allocation41_spill] sm:$0xff] %v16878_v11  ;;  %v3606_v42 = vsel %vm3464_vm2, %v16873_v25, -inf  ;;  %v3597_v4 = vsel %vm3464_vm2, %v16878_v11, -inf }
 0x150   : > { %19320 = vst [vmem:[#allocation42_spill] sm:$0xff] %v16883_v44  ;;  %3607 = vmax.xlane.f32.xlu1 %v3606_v42  ;;  %3601 = vmax.xlane.f32.xlu0 %v3600_v62  ;;  %v3603_v0 = vsel %vm3464_vm2, %v16883_v44, -inf }
 0x151   : > { %v14200_v7 = vpop.f32.mrb[24].mxu0 }
 0x152   : > { %v3385_v43 = vmul.f32 0.35355338, %v14200_v7  ;;  %v14207_v22 = vpop.f32.mrb[24].mxu1  ;;  %v2718_v24 = vpop.f32.mrb[25].mxu0 }
 0x153   : > { %v3387_v32 = vmul.f32 0.35355338, %v14207_v22  ;;  %v3384_v14 = vmul.f32 0.35355338, %v2718_v24  ;;  %v2805_v1 = vpop.f32.mrb[25].mxu1 }
 0x154   : > { %v3386_v49 = vmul.f32 0.35355338, %v2805_v1  ;;  %3604 = vmax.xlane.f32.xlu1 %v3603_v0  ;;  %3598 = vmax.xlane.f32.xlu0 %v3597_v4  ;;  %v16890_v34 = vadd.f32 %v3385_v43, %v16612_v19 }
 0x155   : > { %v16893_v62 = vadd.f32 %v3387_v32, %v16622_v35  ;;  %v16898_v7 = vadd.f32 %v3384_v14, %v16617_v26 }
 0x156   : > { %19321 = vst [vmem:[#allocation43_spill] sm:$0xff] %v16890_v34  ;;  %v3612_v42 = vsel %vm3464_vm2, %v16890_v34, -inf  ;;  %v16903_v24 = vadd.f32 %v3386_v49, %v16630_v40 }
 0x157   : > { %19322 = vst [vmem:[#allocation44_spill] sm:$0xff] %v16893_v62  ;;  %19323 = vst [vmem:[#allocation45_spill] sm:$0xff] %v16898_v7  ;;  %v3618_v22 = vsel %vm3464_vm2, %v16893_v62, -inf  ;;  %v3609_v32 = vsel %vm3464_vm2, %v16898_v7, -inf }
 0x158   : > { %19324 = vst [vmem:[#allocation46_spill] sm:$0xff] %v16903_v24  ;;  %3619 = vmax.xlane.f32.xlu1 %v3618_v22  ;;  %3613 = vmax.xlane.f32.xlu0 %v3612_v42  ;;  %v3615_v14 = vsel %vm3464_vm2, %v16903_v24, -inf }
 0x159   : > { %v14214_v1 = vpop.f32.mrb[26].mxu0 }
 0x15a   : > { %v3389_v43 = vmul.f32 0.35355338, %v14214_v1  ;;  %v14221_v4 = vpop.f32.mrb[26].mxu1  ;;  %v2892_v0 = vpop.f32.mrb[27].mxu0 }
 0x15b   : > { %v3391_v11 = vmul.f32 0.35355338, %v14221_v4  ;;  %v3388_v34 = vmul.f32 0.35355338, %v2892_v0  ;;  %v2979_v44 = vpop.f32.mrb[27].mxu1 }
 0x15c   : > { %v3390_v25 = vmul.f32 0.35355338, %v2979_v44  ;;  %3616 = vmax.xlane.f32.xlu1 %v3615_v14  ;;  %3610 = vmax.xlane.f32.xlu0 %v3609_v32  ;;  %v16910_v49 = vadd.f32 %v3389_v43, %v16653_v56 }
 0x15d   : > { %v16913_v42 = vadd.f32 %v3391_v11, %v16648_v55  ;;  %v16918_v1 = vadd.f32 %v3388_v34, %v16660_v5 }
 0x15e   : > { %19325 = vst [vmem:[#allocation47_spill] sm:$0xff] %v16910_v49  ;;  %v3624_v22 = vsel %vm3464_vm2, %v16910_v49, -inf  ;;  %v16923_v0 = vadd.f32 %v3390_v25, %v16670_v20 }
 0x15f   : > { %v3630_v4 = vsel %vm3464_vm2, %v16913_v42, -inf  ;;  %v3621_v11 = vsel %vm3464_vm2, %v16918_v1, -inf }
 0x160   : > { %3631 = vmax.xlane.f32.xlu1 %v3630_v4  ;;  %3625 = vmax.xlane.f32.xlu0 %v3624_v22  ;;  %v3627_v34 = vsel %vm3464_vm2, %v16923_v0, -inf }
 0x161   : > { %v14228_v44 = vpop.f32.mrb[28].mxu0 }
 0x162   : > { %v3393_v43 = vmul.f32 0.35355338, %v14228_v44  ;;  %v14235_v32 = vpop.f32.mrb[28].mxu1  ;;  %v3066_v14 = vpop.f32.mrb[29].mxu0 }
 0x163   : > { %v3395_v7 = vmul.f32 0.35355338, %v14235_v32  ;;  %v3392_v49 = vmul.f32 0.35355338, %v3066_v14  ;;  %v3153_v24 = vpop.f32.mrb[29].mxu1 }
 0x164   : > { %v3394_v62 = vmul.f32 0.35355338, %v3153_v24  ;;  %3628 = vmax.xlane.f32.xlu1 %v3627_v34  ;;  %3622 = vmax.xlane.f32.xlu0 %v3621_v11  ;;  %v16930_v25 = vadd.f32 %v3393_v43, %v16612_v19 }
 0x165   : > { %v16933_v22 = vadd.f32 %v3395_v7, %v16622_v35  ;;  %v16938_v44 = vadd.f32 %v3392_v49, %v16617_v26 }
 0x166   : > { %19326 = vst [vmem:[#allocation48_spill] sm:$0xff] %v16930_v25  ;;  %v3636_v4 = vsel %vm3464_vm2, %v16930_v25, -inf  ;;  %v16943_v14 = vadd.f32 %v3394_v62, %v16630_v40 }
 0x167   : > { %v3642_v32 = vsel %vm3464_vm2, %v16933_v22, -inf  ;;  %v3633_v35 = vsel %vm3464_vm2, %v16938_v44, -inf }
 0x168   : > { %3643 = vmax.xlane.f32.xlu1 %v3642_v32  ;;  %3637 = vmax.xlane.f32.xlu0 %v3636_v4  ;;  %v3639_v26 = vsel %vm3464_vm2, %v16943_v14, -inf }
 0x169   : > { %v14242_v24 = vpop.f32.mrb[30].mxu0 }
 0x16a   : > { %v14249_v19 = vpop.f32.mrb[30].mxu1  ;;  %v3397_v43 = vmul.f32 0.35355338, %v14242_v24  ;;  %v3240_v11 = vpop.f32.mrb[31].mxu0 }
 0x16b   : > { %v3399_v7 = vmul.f32 0.35355338, %v14249_v19  ;;  %v3327_v34 = vpop.f32.mrb[31].mxu1  ;;  %v3396_v49 = vmul.f32 0.35355338, %v3240_v11 }
 0x16c   : > { %v3398_v25 = vmul.f32 0.35355338, %v3327_v34  ;;  %3640 = vmax.xlane.f32.xlu1 %v3639_v26  ;;  %3634 = vmax.xlane.f32.xlu0 %v3633_v35  ;;  %v16950_v40 = vadd.f32 %v3397_v43, %v16653_v56 }
 0x16d   : > { %v16953_v62 = vadd.f32 %v3399_v7, %v16648_v55  ;;  %v16963_v19 = vadd.f32 %v3396_v49, %v16660_v5 }
 0x16e   : > { %v3648_v4 = vsel %vm3464_vm2, %v16950_v40, -inf  ;;  %v16960_v24 = vadd.f32 %v3398_v25, %v16670_v20 }
 0x16f   : > { %v3654_v32 = vsel %vm3464_vm2, %v16953_v62, -inf  ;;  %v3645_v55 = vsel %vm3464_vm2, %v16963_v19, -inf }
 0x170   : > { %3655 = vmax.xlane.f32.xlu1 %v3654_v32  ;;  %3649 = vmax.xlane.f32.xlu0 %v3648_v4  ;;  %v3651_v56 = vsel %vm3464_vm2, %v16960_v24, -inf }
 0x174   : > { %3652 = vmax.xlane.f32.xlu1 %v3651_v56  ;;  %3646 = vmax.xlane.f32.xlu0 %v3645_v55 }
 0x184   : > { %v3470_v43 = vpop.xlane.xlu1 %3469 }
 0x185   : > { %v3658_v11 = vsub.f32 %v16625_v38, %v3470_v43  ;;  %v3467_v35 = vpop.xlane.xlu0 %3466 }
 0x186   : > { %v3657_v20 = vsub.f32 %v16633_v41, %v3467_v35 }
 0x187   : > { %v3723_v25 = vmul.f32 1.442695, %v3658_v11 }
 0x188   : > { %v3721_v7 = vmul.f32 1.442695, %v3657_v20  ;;  %v3476_v5 = vpop.xlane.xlu1 %3475 }
 0x189   : > { %15570 = vpow2.f32 %v3723_v25  ;;  %v3660_v34 = vsub.f32 %v16638_v45, %v3476_v5  ;;  %v3473_v26 = vpop.xlane.xlu0 %3472 }
 0x18a   : > { %v3659_v49 = vsub.f32 %v16643_v50, %v3473_v26  ;;  %15572 = vpow2.f32 %v3721_v7 }
 0x18b   : > { %v3727_v4 = vmul.f32 1.442695, %v3660_v34 }
 0x18c   : > { %v3725_v32 = vmul.f32 1.442695, %v3659_v49 }
 0x18d   : > { %15574 = vpow2.f32 %v3727_v4  ;;  %v3488_v56 = vpop.xlane.xlu1 %3487  ;;  %v3482_v55 = vpop.xlane.xlu0 %3481 }
 0x18e   : > { %v3664_v38 = vsub.f32 %v16673_v21, %v3488_v56  ;;  %v3662_v43 = vsub.f32 %v16665_v17, %v3482_v55  ;;  %15576 = vpow2.f32 %v3725_v32 }
 0x190   : > { %v3735_v41 = vmul.f32 1.442695, %v3664_v38  ;;  %v3731_v11 = vmul.f32 1.442695, %v3662_v43 }
 0x191   : > { %v3485_v35 = vpop.xlane.xlu1 %3484  ;;  %v3479_v20 = vpop.xlane.xlu0 %3478 }
 0x192   : > { %15578 = vpow2.f32 %v3735_v41  ;;  %v3663_v45 = vsub.f32 %v16683_v31, %v3485_v35  ;;  %v3661_v50 = vsub.f32 %v16678_v28, %v3479_v20 }
 0x193   : > { %v16977_v25 = vpop.eup %15570  ;;  %15580 = vpow2.f32 %v3731_v11 }
 0x194   : > { %v3733_v7 = vmul.f32 1.442695, %v3663_v45  ;;  %v3729_v5 = vmul.f32 1.442695, %v3661_v50  ;;  %v3852_v21 = vsel %vm3464_vm2, %v16977_v25, 0.0  ;;  %v16981_v34 = vpop.eup %15572 }
 0x195   : > { %v3500_v17 = vpop.xlane.xlu1 %3499  ;;  %v3494_v26 = vpop.xlane.xlu0 %3493  ;;  %3853 = vadd.xlane.f32.xlu0 %v3852_v21  ;;  %v3849_v55 = vsel %vm3464_vm2, %v16981_v34, 0.0 }
 0x196   : > { %15582 = vpow2.f32 %v3733_v7  ;;  %v3668_v49 = vsub.f32 %v16693_v10, %v3500_v17  ;;  %v3666_v31 = vsub.f32 %v16690_v9, %v3494_v26 }
 0x197   : > { %v16985_v4 = vpop.eup %15574  ;;  %15584 = vpow2.f32 %v3729_v5 }
 0x198   : > { %v3743_v28 = vmul.f32 1.442695, %v3668_v49  ;;  %v3739_v32 = vmul.f32 1.442695, %v3666_v31  ;;  %v3858_v56 = vsel %vm3464_vm2, %v16985_v4, 0.0  ;;  %v16991_v38 = vpop.eup %15576 }
 0x199   : > { %v3497_v43 = vpop.xlane.xlu1 %3496  ;;  %3859 = vadd.xlane.f32.xlu1 %v3858_v56  ;;  %v3491_v41 = vpop.xlane.xlu0 %3490  ;;  %3850 = vadd.xlane.f32.xlu0 %v3849_v55  ;;  %v3855_v45 = vsel %vm3464_vm2, %v16991_v38, 0.0 }
 0x19a   : > { %15586 = vpow2.f32 %v3743_v28  ;;  %v3667_v9 = vsub.f32 %v16703_v36, %v3497_v43  ;;  %v3665_v10 = vsub.f32 %v16698_v23, %v3491_v41 }
 0x19b   : > { %15588 = vpow2.f32 %v3739_v32 }
 0x19c   : > { %v16995_v11 = vpop.eup %15578  ;;  %v3741_v35 = vmul.f32 1.442695, %v3667_v9  ;;  %v3737_v20 = vmul.f32 1.442695, %v3665_v10 }
 0x19d   : > { %v16999_v50 = vpop.eup %15580  ;;  %v3512_v7 = vpop.xlane.xlu1 %3511  ;;  %3856 = vadd.xlane.f32.xlu1 %v3855_v45  ;;  %v3870_v31 = vsel %vm3464_vm2, %v16995_v11, 0.0 }
 0x19e   : > { %v3506_v5 = vpop.xlane.xlu0 %3505  ;;  %15590 = vpow2.f32 %v3741_v35  ;;  %v3672_v21 = vsub.f32 %v16713_v13, %v3512_v7  ;;  %v3864_v23 = vsel %vm3464_vm2, %v16999_v50, 0.0 }
 0x19f   : > { %v3670_v36 = vsub.f32 %v16710_v8, %v3506_v5  ;;  %15592 = vpow2.f32 %v3737_v20  ;;  %3865 = vadd.xlane.f32.xlu0 %v3864_v23 }
 0x1a0   : > { %v17005_v17 = vpop.eup %15582  ;;  %v3751_v26 = vmul.f32 1.442695, %v3672_v21 }
 0x1a1   : > { %v3747_v49 = vmul.f32 1.442695, %v3670_v36  ;;  %v17009_v28 = vpop.eup %15584  ;;  %v3509_v32 = vpop.xlane.xlu1 %3508  ;;  %3871 = vadd.xlane.f32.xlu1 %v3870_v31  ;;  %v3867_v10 = vsel %vm3464_vm2, %v17005_v17, 0.0 }
 0x1a2   : > { %v3503_v56 = vpop.xlane.xlu0 %3502  ;;  %15594 = vpow2.f32 %v3751_v26  ;;  %v3671_v8 = vsub.f32 %v16723_v57, %v3509_v32  ;;  %v3861_v55 = vsel %vm3464_vm2, %v17009_v28, 0.0 }
 0x1a3   : > { %v3669_v13 = vsub.f32 %v16718_v47, %v3503_v56  ;;  %15596 = vpow2.f32 %v3747_v49  ;;  %3862 = vadd.xlane.f32.xlu0 %v3861_v55 }
 0x1a4   : > { %v17015_v43 = vpop.eup %15586  ;;  %v3749_v41 = vmul.f32 1.442695, %v3671_v8 }
 0x1a5   : > { %v3745_v9 = vmul.f32 1.442695, %v3669_v13  ;;  %v17019_v35 = vpop.eup %15588  ;;  %v3524_v20 = vpop.xlane.xlu1 %3523  ;;  %3868 = vadd.xlane.f32.xlu1 %v3867_v10  ;;  %v3882_v23 = vsel %vm3464_vm2, %v17015_v43, 0.0 }
 0x1a6   : > { %v3518_v45 = vpop.xlane.xlu0 %3517  ;;  %15598 = vpow2.f32 %v3749_v41  ;;  %v3676_v47 = vsub.f32 %v16733_v29, %v3524_v20  ;;  %v3876_v7 = vsel %vm3464_vm2, %v17019_v35, 0.0 }
 0x1a7   : > { %v3674_v57 = vsub.f32 %v16730_v60, %v3518_v45  ;;  %15600 = vpow2.f32 %v3745_v9  ;;  %3877 = vadd.xlane.f32.xlu0 %v3876_v7  ;;  %v415_v45 = vld [vmem:[%s17049_s27] sm:$0xff] }
 0x1a8   : > { %v17025_v5 = vpop.eup %15590  ;;  %v3759_v21 = vmul.f32 1.442695, %v3676_v47  ;;  %v416_v47 = vld [vmem:[%s17049_s27 + $0x8] sm:$0xff] }
 0x1a9   : > { %v3755_v36 = vmul.f32 1.442695, %v3674_v57  ;;  %v17029_v26 = vpop.eup %15592  ;;  %v3521_v49 = vpop.xlane.xlu1 %3520  ;;  %3883 = vadd.xlane.f32.xlu1 %v3882_v23  ;;  %v3879_v55 = vsel %vm3464_vm2, %v17025_v5, 0.0 }
 0x1aa   : > { %v3515_v31 = vpop.xlane.xlu0 %3514  ;;  %15602 = vpow2.f32 %v3759_v21  ;;  %v3675_v60 = vsub.f32 %v16743_v59, %v3521_v49  ;;  %v3873_v32 = vsel %vm3464_vm2, %v17029_v26, 0.0  ;;  %v17057_v21 = vpack.c.bf16 %v416_v47, %v415_v45 }
 0x1ab   : > { %v3673_v29 = vsub.f32 %v16738_v3, %v3515_v31  ;;  %15604 = vpow2.f32 %v3755_v36  ;;  %3874 = vadd.xlane.f32.xlu0 %v3873_v32  ;;  %v417_v32 = vld [vmem:[%s17049_s27 + $0x10] sm:$0xff] }
 0x1ac   : > { %v17035_v56 = vpop.eup %15594  ;;  %v3757_v8 = vmul.f32 1.442695, %v3675_v60  ;;  %19327 = vst [vmem:[#allocation49_spill] sm:$0xff] %v17057_v21  ;;  %15115 = vmatprep.subr.bf16.mxu0 %v17057_v21 }
 0x1ad   : > { %v3753_v13 = vmul.f32 1.442695, %v3673_v29  ;;  %v17039_v41 = vpop.eup %15596  ;;  %v3536_v9 = vpop.xlane.xlu1 %3535  ;;  %3880 = vadd.xlane.f32.xlu1 %v3879_v55  ;;  %15117 = vmatpush3.bf16.msra.mxu0 %v17057_v21 }
 0x1ae   : > { %v3530_v59 = vpop.xlane.xlu0 %3529  ;;  %15606 = vpow2.f32 %v3757_v8  ;;  %v3680_v3 = vsub.f32 %v16753_v53, %v3536_v9  ;;  %v3888_v20 = vsel %vm3464_vm2, %v17039_v41, 0.0  ;;  %v418_v8 = vld [vmem:[%s17049_s27 + $0x18] sm:$0xff] }
 0x1af   : > { %v3678_v10 = vsub.f32 %v16750_v33, %v3530_v59  ;;  %15608 = vpow2.f32 %v3753_v13  ;;  %3889 = vadd.xlane.f32.xlu0 %v3888_v20  ;;  %v3894_v33 = vsel %vm3464_vm2, %v17035_v56, 0.0  ;;  %v17073_v59 = vpack.c.bf16 %v418_v8, %v417_v32 }
 0x1b0   : > { %v17053_v57 = vpop.eup %15598  ;;  %v3767_v7 = vmul.f32 1.442695, %v3680_v3 }
 0x1b1   : > { %v3763_v53 = vmul.f32 1.442695, %v3678_v10  ;;  %v17059_v36 = vpop.eup %15600  ;;  %v3533_v23 = vpop.xlane.xlu1 %3532  ;;  %3895 = vadd.xlane.f32.xlu1 %v3894_v33  ;;  %19328 = vst [vmem:[#allocation50_spill] sm:$0xff] %v17073_v59  ;;  %15119 = vmatprep.subr.bf16.mxu1 %v17073_v59 }
 0x1b2   : > { %v3527_v49 = vpop.xlane.xlu0 %3526  ;;  %15610 = vpow2.f32 %v3767_v7  ;;  %v3679_v31 = vsub.f32 %v16763_v6, %v3533_v23  ;;  %v3885_v29 = vsel %vm3464_vm2, %v17059_v36, 0.0  ;;  %v3891_v6 = vsel %vm3464_vm2, %v17053_v57, 0.0  ;;  %15121 = vmatpush3.bf16.msra.mxu1 %v17073_v59 }
 0x1b3   : > { %v3677_v60 = vsub.f32 %v16758_v30, %v3527_v49  ;;  %15612 = vpow2.f32 %v3763_v53  ;;  %3886 = vadd.xlane.f32.xlu0 %v3885_v29 }
 0x1b4   : > { %v17069_v13 = vpop.eup %15602  ;;  %v3765_v55 = vmul.f32 1.442695, %v3679_v31 }
 0x1b5   : > { %v3761_v9 = vmul.f32 1.442695, %v3677_v60  ;;  %v17075_v30 = vpop.eup %15604  ;;  %v3548_v3 = vpop.xlane.xlu1 %3547  ;;  %3892 = vadd.xlane.f32.xlu1 %v3891_v6  ;;  %v3906_v7 = vsel %vm3464_vm2, %v17069_v13, 0.0  ;;  %v422_v6 = vld [vmem:[%s17049_s27 + $0x38] sm:$0xff] }
 0x1b6   : > { %v3542_v10 = vpop.xlane.xlu0 %3541  ;;  %15614 = vpow2.f32 %v3765_v55  ;;  %v3684_v20 = vsub.f32 %v16773_v58, %v3548_v3  ;;  %v3900_v47 = vsel %vm3464_vm2, %v17075_v30, 0.0  ;;  %v419_v58 = vld [vmem:[%s17049_s27 + $0x20] sm:$0xff] }
 0x1b7   : > { %v3682_v45 = vsub.f32 %v16770_v2, %v3542_v10  ;;  %15616 = vpow2.f32 %v3761_v9  ;;  %3901 = vadd.xlane.f32.xlu0 %v3900_v47  ;;  %v420_v2 = vld [vmem:[%s17049_s27 + $0x28] sm:$0xff]  ;;  %v421_v9 = vld [vmem:[%s17049_s27 + $0x30] sm:$0xff] }
 0x1b8   : > { %v17085_v53 = vpop.eup %15606  ;;  %v3775_v33 = vmul.f32 1.442695, %v3684_v20  ;;  %v17091_v29 = vpack.c.bf16 %v420_v2, %v419_v58  ;;  %v17104_v47 = vpack.c.bf16 %v422_v6, %v421_v9 }
 0x1b9   : > { %v3771_v23 = vmul.f32 1.442695, %v3682_v45  ;;  %v17089_v49 = vpop.eup %15608  ;;  %v3545_v31 = vpop.xlane.xlu1 %3544  ;;  %3907 = vadd.xlane.f32.xlu1 %v3906_v7  ;;  %v3903_v45 = vsel %vm3464_vm2, %v17085_v53, 0.0 }
 0x1ba   : > { %v3539_v60 = vpop.xlane.xlu0 %3538  ;;  %19329 = vst [vmem:[#allocation51_spill] sm:$0xff] %v17091_v29  ;;  %15618 = vpow2.f32 %v3775_v33  ;;  %v3683_v32 = vsub.f32 %v16783_v48, %v3545_v31  ;;  %v3897_v55 = vsel %vm3464_vm2, %v17089_v49, 0.0  ;;  %15123 = vmatprep.subr.bf16.mxu0 %v17091_v29  ;;  %19330 = vst [vmem:[#allocation52_spill] sm:$0xff] %v17104_v47  ;;  %15127 = vmatprep.subr.bf16.mxu1 %v17104_v47 }
 0x1bb   : > { %v3681_v8 = vsub.f32 %v16778_v61, %v3539_v60  ;;  %15620 = vpow2.f32 %v3771_v23  ;;  %3898 = vadd.xlane.f32.xlu0 %v3897_v55 }
 0x1bc   : > { %v17100_v3 = vpop.eup %15610  ;;  %v3773_v10 = vmul.f32 1.442695, %v3683_v32 }
 0x1bd   : > { %v3769_v20 = vmul.f32 1.442695, %v3681_v8  ;;  %v17106_v48 = vpop.eup %15612  ;;  %v3560_v61 = vpop.xlane.xlu1 %3559  ;;  %3904 = vadd.xlane.f32.xlu1 %v3903_v45  ;;  %v3918_v32 = vsel %vm3464_vm2, %v17100_v3, 0.0 }
 0x1be   : > { %v3554_v7 = vpop.xlane.xlu0 %3553  ;;  %15622 = vpow2.f32 %v3773_v10  ;;  %v3688_v33 = vsub.f32 %v16793_v63, %v3560_v61  ;;  %v3912_v58 = vsel %vm3464_vm2, %v17106_v48, 0.0 }
 0x1bf   : > { %v3686_v23 = vsub.f32 %v16790_v39, %v3554_v7  ;;  %15624 = vpow2.f32 %v3769_v20  ;;  %3913 = vadd.xlane.f32.xlu0 %v3912_v58 }
 0x1c0   : > { %v17113_v2 = vpop.eup %15614  ;;  %v3783_v31 = vmul.f32 1.442695, %v3688_v33 }
 0x1c1   : > { %v3779_v60 = vmul.f32 1.442695, %v3686_v23  ;;  %v17117_v8 = vpop.eup %15616  ;;  %v3557_v55 = vpop.xlane.xlu1 %3556  ;;  %3919 = vadd.xlane.f32.xlu1 %v3918_v32  ;;  %v3915_v61 = vsel %vm3464_vm2, %v17113_v2, 0.0 }
 0x1c2   : > { %v3551_v63 = vpop.xlane.xlu0 %3550  ;;  %15626 = vpow2.f32 %v3783_v31  ;;  %v3687_v39 = vsub.f32 %v16803_v18, %v3557_v55  ;;  %v3909_v6 = vsel %vm3464_vm2, %v17117_v8, 0.0 }
 0x1c3   : > { %v3685_v9 = vsub.f32 %v16798_v37, %v3551_v63  ;;  %15628 = vpow2.f32 %v3779_v60  ;;  %3910 = vadd.xlane.f32.xlu0 %v3909_v6 }
 0x1c4   : > { %v17123_v10 = vpop.eup %15618  ;;  %v3781_v20 = vmul.f32 1.442695, %v3687_v39 }
 0x1c5   : > { %v3777_v45 = vmul.f32 1.442695, %v3685_v9  ;;  %v17127_v7 = vpop.eup %15620  ;;  %v3572_v33 = vpop.xlane.xlu1 %3571  ;;  %3916 = vadd.xlane.f32.xlu1 %v3915_v61  ;;  %v3930_v55 = vsel %vm3464_vm2, %v17123_v10, 0.0 }
 0x1c6   : > { %v3566_v23 = vpop.xlane.xlu0 %3565  ;;  %15630 = vpow2.f32 %v3781_v20  ;;  %v3692_v37 = vsub.f32 %v16813_v46, %v3572_v33  ;;  %v3924_v58 = vsel %vm3464_vm2, %v17127_v7, 0.0 }
 0x1c7   : > { %v3690_v18 = vsub.f32 %v16810_v15, %v3566_v23  ;;  %15632 = vpow2.f32 %v3777_v45  ;;  %3925 = vadd.xlane.f32.xlu0 %v3924_v58 }
 0x1c8   : > { %v17133_v31 = vpop.eup %15622  ;;  %v3791_v60 = vmul.f32 1.442695, %v3692_v37 }
 0x1c9   : > { %v3787_v32 = vmul.f32 1.442695, %v3690_v18  ;;  %v17137_v63 = vpop.eup %15624  ;;  %v3569_v39 = vpop.xlane.xlu1 %3568  ;;  %3931 = vadd.xlane.f32.xlu1 %v3930_v55  ;;  %v3927_v33 = vsel %vm3464_vm2, %v17133_v31, 0.0 }
 0x1ca   : > { %v3563_v9 = vpop.xlane.xlu0 %3562  ;;  %15634 = vpow2.f32 %v3791_v60  ;;  %v3691_v15 = vsub.f32 %v16823_v51, %v3569_v39  ;;  %v3921_v6 = vsel %vm3464_vm2, %v17137_v63, 0.0 }
 0x1cb   : > { %v3689_v46 = vsub.f32 %v16818_v12, %v3563_v9  ;;  %15636 = vpow2.f32 %v3787_v32  ;;  %3922 = vadd.xlane.f32.xlu0 %v3921_v6 }
 0x1cc   : > { %v17143_v20 = vpop.eup %15626  ;;  %v3789_v45 = vmul.f32 1.442695, %v3691_v15 }
 0x1cd   : > { %v3785_v61 = vmul.f32 1.442695, %v3689_v46  ;;  %v17147_v23 = vpop.eup %15628  ;;  %v3584_v37 = vpop.xlane.xlu1 %3583  ;;  %3928 = vadd.xlane.f32.xlu1 %v3927_v33  ;;  %v3942_v39 = vsel %vm3464_vm2, %v17143_v20, 0.0 }
 0x1ce   : > { %v3578_v18 = vpop.xlane.xlu0 %3577  ;;  %15638 = vpow2.f32 %v3789_v45  ;;  %v3696_v12 = vsub.f32 %v16833_v16, %v3584_v37  ;;  %v3936_v58 = vsel %vm3464_vm2, %v17147_v23, 0.0 }
 0x1cf   : > { %v3694_v51 = vsub.f32 %v16830_v54, %v3578_v18  ;;  %15640 = vpow2.f32 %v3785_v61  ;;  %3937 = vadd.xlane.f32.xlu0 %v3936_v58  ;;  %v19333_v58 = vld [vmem:[#allocation35_spill] sm:$0xff] }
 0x1d0   : > { %v17153_v60 = vpop.eup %15630  ;;  %v3799_v32 = vmul.f32 1.442695, %v3696_v12 }
 0x1d1   : > { %v3795_v55 = vmul.f32 1.442695, %v3694_v51  ;;  %v17157_v9 = vpop.eup %15632  ;;  %v3581_v15 = vpop.xlane.xlu1 %3580  ;;  %3943 = vadd.xlane.f32.xlu1 %v3942_v39  ;;  %v3939_v37 = vsel %vm3464_vm2, %v17153_v60, 0.0 }
 0x1d2   : > { %v3575_v46 = vpop.xlane.xlu0 %3574  ;;  %15642 = vpow2.f32 %v3799_v32  ;;  %v3695_v54 = vsub.f32 %v16843_v27, %v3581_v15  ;;  %v3933_v6 = vsel %vm3464_vm2, %v17157_v9, 0.0  ;;  %v19332_v27 = vld [vmem:[#allocation36_spill] sm:$0xff] }
 0x1d3   : > { %v3693_v16 = vsub.f32 %v16838_v52, %v3575_v46  ;;  %15644 = vpow2.f32 %v3795_v55  ;;  %3934 = vadd.xlane.f32.xlu0 %v3933_v6 }
 0x1d4   : > { %v17163_v45 = vpop.eup %15634  ;;  %v3797_v61 = vmul.f32 1.442695, %v3695_v54 }
 0x1d5   : > { %19331 = vst [vmem:[#allocation53_spill] sm:$0xff] %v17163_v45  ;;  %v3793_v33 = vmul.f32 1.442695, %v3693_v16  ;;  %v17167_v18 = vpop.eup %15636  ;;  %v3596_v12 = vpop.xlane.xlu1 %3595  ;;  %3940 = vadd.xlane.f32.xlu1 %v3939_v37  ;;  %v3954_v54 = vsel %vm3464_vm2, %v17163_v45, 0.0  ;;  %v19334_v37 = vld [vmem:[#allocation38_spill] sm:$0xff] }
 0x1d6   : > { %v3590_v51 = vpop.xlane.xlu0 %3589  ;;  %15646 = vpow2.f32 %v3797_v61  ;;  %v3700_v52 = vsub.f32 %v19332_v27, %v3596_v12  ;;  %v3948_v55 = vsel %vm3464_vm2, %v17167_v18, 0.0 }
 0x1d7   : > { %v3698_v32 = vsub.f32 %v19333_v58, %v3590_v51  ;;  %15648 = vpow2.f32 %v3793_v33  ;;  %3949 = vadd.xlane.f32.xlu0 %v3948_v55  ;;  %v19335_v51 = vld [vmem:[#allocation37_spill] sm:$0xff] }
 0x1d8   : > { %v17173_v39 = vpop.eup %15638  ;;  %v3807_v15 = vmul.f32 1.442695, %v3700_v52 }
 0x1d9   : > { %v3803_v46 = vmul.f32 1.442695, %v3698_v32  ;;  %v17177_v16 = vpop.eup %15640  ;;  %v3593_v6 = vpop.xlane.xlu1 %3592  ;;  %3955 = vadd.xlane.f32.xlu1 %v3954_v54  ;;  %v3951_v55 = vsel %vm3464_vm2, %v17173_v39, 0.0 }
 0x1da   : > { %v3587_v61 = vpop.xlane.xlu0 %3586  ;;  %15650 = vpow2.f32 %v3807_v15  ;;  %v3699_v12 = vsub.f32 %v19334_v37, %v3593_v6  ;;  %v3945_v33 = vsel %vm3464_vm2, %v17177_v16, 0.0  ;;  %v19338_v6 = vld [vmem:[#allocation40_spill] sm:$0xff]  ;;  %v19339_v37 = vld [vmem:[#allocation39_spill] sm:$0xff] }
 0x1db   : > { %v3697_v27 = vsub.f32 %v19335_v51, %v3587_v61  ;;  %15652 = vpow2.f32 %v3803_v46  ;;  %3946 = vadd.xlane.f32.xlu0 %v3945_v33 }
 0x1dc   : > { %v17183_v52 = vpop.eup %15642  ;;  %v3805_v58 = vmul.f32 1.442695, %v3699_v12 }
 0x1dd   : > { %19336 = vst [vmem:[#allocation36_spill] sm:$0xff] %v17183_v52  ;;  %v3801_v32 = vmul.f32 1.442695, %v3697_v27  ;;  %v17187_v21 = vpop.eup %15644  ;;  %v3608_v54 = vpop.xlane.xlu1 %3607  ;;  %3952 = vadd.xlane.f32.xlu1 %v3951_v55  ;;  %v3966_v59 = vsel %vm3464_vm2, %v17183_v52, 0.0 }
 0x1de   : > { %19337 = vst [vmem:[#allocation35_spill] sm:$0xff] %v17187_v21  ;;  %v3602_v15 = vpop.xlane.xlu0 %3601  ;;  %15654 = vpow2.f32 %v3805_v58  ;;  %v3704_v61 = vsub.f32 %v19338_v6, %v3608_v54  ;;  %v3960_v46 = vsel %vm3464_vm2, %v17187_v21, 0.0  ;;  %v19342_v54 = vld [vmem:[#allocation42_spill] sm:$0xff]  ;;  %v19343_v6 = vld [vmem:[#allocation41_spill] sm:$0xff] }
 0x1df   : > { %v3702_v51 = vsub.f32 %v19339_v37, %v3602_v15  ;;  %15656 = vpow2.f32 %v3801_v32  ;;  %3961 = vadd.xlane.f32.xlu0 %v3960_v46 }
 0x1e0   : > { %v17193_v12 = vpop.eup %15646  ;;  %v3815_v27 = vmul.f32 1.442695, %v3704_v61 }
 0x1e1   : > { %19340 = vst [vmem:[#allocation38_spill] sm:$0xff] %v17193_v12  ;;  %v3811_v33 = vmul.f32 1.442695, %v3702_v51  ;;  %v17197_v45 = vpop.eup %15648  ;;  %v3605_v55 = vpop.xlane.xlu1 %3604  ;;  %3967 = vadd.xlane.f32.xlu1 %v3966_v59  ;;  %v3963_v52 = vsel %vm3464_vm2, %v17193_v12, 0.0 }
 0x1e2   : > { %19341 = vst [vmem:[#allocation37_spill] sm:$0xff] %v17197_v45  ;;  %v3599_v58 = vpop.xlane.xlu0 %3598  ;;  %15658 = vpow2.f32 %v3815_v27  ;;  %v3703_v15 = vsub.f32 %v19342_v54, %v3605_v55  ;;  %v3957_v32 = vsel %vm3464_vm2, %v17197_v45, 0.0  ;;  %v19346_v55 = vld [vmem:[#allocation44_spill] sm:$0xff]  ;;  %v19347_v54 = vld [vmem:[#allocation43_spill] sm:$0xff] }
 0x1e3   : > { %v3701_v37 = vsub.f32 %v19343_v6, %v3599_v58  ;;  %15660 = vpow2.f32 %v3811_v33  ;;  %3958 = vadd.xlane.f32.xlu0 %v3957_v32 }
 0x1e4   : > { %v17203_v61 = vpop.eup %15650  ;;  %v3813_v51 = vmul.f32 1.442695, %v3703_v15 }
 0x1e5   : > { %19344 = vst [vmem:[#allocation40_spill] sm:$0xff] %v17203_v61  ;;  %v3809_v46 = vmul.f32 1.442695, %v3701_v37  ;;  %v17207_v21 = vpop.eup %15652  ;;  %v3620_v59 = vpop.xlane.xlu1 %3619  ;;  %3964 = vadd.xlane.f32.xlu1 %v3963_v52  ;;  %v3978_v12 = vsel %vm3464_vm2, %v17203_v61, 0.0 }
 0x1e6   : > { %19345 = vst [vmem:[#allocation39_spill] sm:$0xff] %v17207_v21  ;;  %v3614_v27 = vpop.xlane.xlu0 %3613  ;;  %15662 = vpow2.f32 %v3813_v51  ;;  %v3708_v58 = vsub.f32 %v19346_v55, %v3620_v59  ;;  %v3972_v33 = vsel %vm3464_vm2, %v17207_v21, 0.0  ;;  %v19349_v59 = vld [vmem:[#allocation46_spill] sm:$0xff]  ;;  %v19350_v55 = vld [vmem:[#allocation45_spill] sm:$0xff] }
 0x1e7   : > { %v3706_v6 = vsub.f32 %v19347_v54, %v3614_v27  ;;  %15664 = vpow2.f32 %v3809_v46  ;;  %3973 = vadd.xlane.f32.xlu0 %v3972_v33 }
 0x1e8   : > { %v17213_v15 = vpop.eup %15654  ;;  %v3823_v37 = vmul.f32 1.442695, %v3708_v58 }
 0x1e9   : > { %19348 = vst [vmem:[#allocation42_spill] sm:$0xff] %v17213_v15  ;;  %v3819_v32 = vmul.f32 1.442695, %v3706_v6  ;;  %v17217_v45 = vpop.eup %15656  ;;  %v3617_v52 = vpop.xlane.xlu1 %3616  ;;  %3979 = vadd.xlane.f32.xlu1 %v3978_v12  ;;  %v3975_v61 = vsel %vm3464_vm2, %v17213_v15, 0.0 }
 0x1ea   : > { %v3611_v51 = vpop.xlane.xlu0 %3610  ;;  %15666 = vpow2.f32 %v3823_v37  ;;  %v3707_v27 = vsub.f32 %v19349_v59, %v3617_v52  ;;  %v3969_v46 = vsel %vm3464_vm2, %v17217_v45, 0.0 }
 0x1eb   : > { %v3705_v54 = vsub.f32 %v19350_v55, %v3611_v51  ;;  %15668 = vpow2.f32 %v3819_v32  ;;  %3970 = vadd.xlane.f32.xlu0 %v3969_v46  ;;  %v19352_v51 = vld [vmem:[#allocation47_spill] sm:$0xff] }
 0x1ec   : > { %v17223_v58 = vpop.eup %15658  ;;  %v3821_v6 = vmul.f32 1.442695, %v3707_v27 }
 0x1ed   : > { %19351 = vst [vmem:[#allocation41_spill] sm:$0xff] %v17223_v58  ;;  %v3817_v33 = vmul.f32 1.442695, %v3705_v54  ;;  %v17227_v21 = vpop.eup %15660  ;;  %v3632_v12 = vpop.xlane.xlu1 %3631  ;;  %3976 = vadd.xlane.f32.xlu1 %v3975_v61  ;;  %v3990_v46 = vsel %vm3464_vm2, %v17223_v58, 0.0 }
 0x1ee   : > { %v3626_v37 = vpop.xlane.xlu0 %3625  ;;  %15670 = vpow2.f32 %v3821_v6  ;;  %v3712_v52 = vsub.f32 %v16913_v42, %v3632_v12  ;;  %v3984_v32 = vsel %vm3464_vm2, %v17227_v21, 0.0 }
 0x1ef   : > { %v3710_v59 = vsub.f32 %v19352_v51, %v3626_v37  ;;  %15672 = vpow2.f32 %v3817_v33  ;;  %3985 = vadd.xlane.f32.xlu0 %v3984_v32 }
 0x1f0   : > { %v17233_v27 = vpop.eup %15662  ;;  %v3831_v55 = vmul.f32 1.442695, %v3712_v52 }
 0x1f1   : > { %v3827_v54 = vmul.f32 1.442695, %v3710_v59  ;;  %v17237_v15 = vpop.eup %15664  ;;  %v3629_v61 = vpop.xlane.xlu1 %3628  ;;  %3991 = vadd.xlane.f32.xlu1 %v3990_v46  ;;  %v3987_v59 = vsel %vm3464_vm2, %v17233_v27, 0.0 }
 0x1f2   : > { %v3623_v6 = vpop.xlane.xlu0 %3622  ;;  %15674 = vpow2.f32 %v3831_v55  ;;  %v3711_v42 = vsub.f32 %v16923_v0, %v3629_v61  ;;  %v3981_v33 = vsel %vm3464_vm2, %v17237_v15, 0.0 }
 0x1f3   : > { %v3709_v12 = vsub.f32 %v16918_v1, %v3623_v6  ;;  %15676 = vpow2.f32 %v3827_v54  ;;  %3982 = vadd.xlane.f32.xlu0 %v3981_v33 }
 0x1f4   : > { %v17243_v37 = vpop.eup %15666  ;;  %v3829_v52 = vmul.f32 1.442695, %v3711_v42  ;;  %v19355_v42 = vld [vmem:[#allocation48_spill] sm:$0xff] }
 0x1f5   : > { %19353 = vst [vmem:[#allocation44_spill] sm:$0xff] %v17243_v37  ;;  %v3825_v51 = vmul.f32 1.442695, %v3709_v12  ;;  %v17247_v32 = vpop.eup %15668  ;;  %v3644_v46 = vpop.xlane.xlu1 %3643  ;;  %3988 = vadd.xlane.f32.xlu1 %v3987_v59  ;;  %v4002_v61 = vsel %vm3464_vm2, %v17243_v37, 0.0 }
 0x1f6   : > { %19354 = vst [vmem:[#allocation43_spill] sm:$0xff] %v17247_v32  ;;  %v3638_v55 = vpop.xlane.xlu0 %3637  ;;  %15678 = vpow2.f32 %v3829_v52  ;;  %v3996_v1 = vsel %vm3464_vm2, %v17247_v32, 0.0  ;;  %v3716_v0 = vsub.f32 %v16933_v22, %v3644_v46 }
 0x1f7   : > { %15680 = vpow2.f32 %v3825_v51  ;;  %3997 = vadd.xlane.f32.xlu0 %v3996_v1  ;;  %v3714_v12 = vsub.f32 %v19355_v42, %v3638_v55 }
 0x1f8   : > { %v17252_v54 = vpop.eup %15670  ;;  %v3839_v51 = vmul.f32 1.442695, %v3716_v0 }
 0x1f9   : > { %v17256_v6 = vpop.eup %15672  ;;  %v3641_v33 = vpop.xlane.xlu1 %3640  ;;  %4003 = vadd.xlane.f32.xlu1 %v4002_v61  ;;  %v3999_v58 = vsel %vm3464_vm2, %v17252_v54, 0.0  ;;  %v3835_v61 = vmul.f32 1.442695, %v3714_v12 }
 0x1fa   : > { %v3635_v59 = vpop.xlane.xlu0 %3634  ;;  %v3715_v52 = vsub.f32 %v16943_v14, %v3641_v33  ;;  %v3993_v22 = vsel %vm3464_vm2, %v17256_v6, 0.0 }
 0x1fb   : > { %v3713_v32 = vsub.f32 %v16938_v44, %v3635_v59  ;;  %3994 = vadd.xlane.f32.xlu0 %v3993_v22 }
 0x1fc   : > { %v17263_v46 = vpop.eup %15674  ;;  %v3837_v1 = vmul.f32 1.442695, %v3715_v52 }
 0x1fd   : > { %v3833_v37 = vmul.f32 1.442695, %v3713_v32  ;;  %v17267_v55 = vpop.eup %15676  ;;  %v3656_v42 = vpop.xlane.xlu1 %3655  ;;  %4000 = vadd.xlane.f32.xlu1 %v3999_v58  ;;  %v4014_v32 = vsel %vm3464_vm2, %v17263_v46, 0.0 }
 0x1fe   : > { %v3650_v14 = vpop.xlane.xlu0 %3649  ;;  %15682 = vpow2.f32 %v3837_v1  ;;  %v4008_v44 = vsel %vm3464_vm2, %v17267_v55, 0.0  ;;  %v3720_v0 = vsub.f32 %v16953_v62, %v3656_v42 }
 0x1ff   : > { %15684 = vpow2.f32 %v3833_v37  ;;  %4009 = vadd.xlane.f32.xlu0 %v4008_v44  ;;  %v3718_v58 = vsub.f32 %v16950_v40, %v3650_v14 }
 0x200   : > { %v17272_v33 = vpop.eup %15678  ;;  %15686 = vpow2.f32 %v3839_v51  ;;  %v3847_v1 = vmul.f32 1.442695, %v3720_v0 }
 0x201   : > { %v17276_v59 = vpop.eup %15680  ;;  %15688 = vpow2.f32 %v3835_v61  ;;  %v3653_v12 = vpop.xlane.xlu1 %3652  ;;  %4015 = vadd.xlane.f32.xlu1 %v4014_v32  ;;  %v4011_v44 = vsel %vm3464_vm2, %v17272_v33, 0.0  ;;  %v3843_v61 = vmul.f32 1.442695, %v3718_v58 }
 0x202   : > { %v3647_v52 = vpop.xlane.xlu0 %3646  ;;  %v3719_v22 = vsub.f32 %v16960_v24, %v3653_v12  ;;  %v4005_v62 = vsel %vm3464_vm2, %v17276_v59, 0.0 }
 0x203   : > { %v3717_v37 = vsub.f32 %v16963_v19, %v3647_v52  ;;  %4006 = vadd.xlane.f32.xlu0 %v4005_v62 }
 0x204   : > { %v3845_v51 = vmul.f32 1.442695, %v3719_v22 }
 0x205   : > { %v3841_v42 = vmul.f32 1.442695, %v3717_v37  ;;  %4012 = vadd.xlane.f32.xlu1 %v4011_v44 }
 0x206   : > { %15690 = vpow2.f32 %v3845_v51 }
 0x207   : > { %15692 = vpow2.f32 %v3841_v42 }
 0x208   : > { %v17285_v40 = vpop.eup %15682  ;;  %15694 = vpow2.f32 %v3847_v1 }
 0x209   : > { %v17287_v24 = vpop.eup %15684  ;;  %15696 = vpow2.f32 %v3843_v61  ;;  %v4023_v19 = vsel %vm3464_vm2, %v17285_v40, 0.0 }
 0x20a   : > { %v17291_v14 = vpop.eup %15686  ;;  %4024 = vadd.xlane.f32.xlu1 %v4023_v19  ;;  %v4017_v0 = vsel %vm3464_vm2, %v17287_v24, 0.0 }
 0x20b   : > { %19356 = vst [vmem:[#allocation46_spill] sm:$0xff] %v17291_v14  ;;  %v17295_v32 = vpop.eup %15688  ;;  %4018 = vadd.xlane.f32.xlu0 %v4017_v0  ;;  %v4026_v58 = vsel %vm3464_vm2, %v17291_v14, 0.0 }
 0x20c   : > { %19357 = vst [vmem:[#allocation45_spill] sm:$0xff] %v17295_v32  ;;  %v4020_v12 = vsel %vm3464_vm2, %v17295_v32, 0.0  ;;  %v425_v32 = vld [vmem:[%s17049_s27 + $0x50] sm:$0xff] }
 0x20e   : > { %4027 = vadd.xlane.f32.xlu1 %v4026_v58 }
 0x20f   : > { %4021 = vadd.xlane.f32.xlu0 %v4020_v12 }
 0x210   : > { %v17301_v52 = vpop.eup %15690 }
 0x211   : > { %19358 = vst [vmem:[#allocation47_spill] sm:$0xff] %v17301_v52  ;;  %v17303_v22 = vpop.eup %15692  ;;  %v4035_v37 = vsel %vm3464_vm2, %v17301_v52, 0.0 }
 0x212   : > { %19359 = vst [vmem:[#allocation48_spill] sm:$0xff] %v17303_v22  ;;  %v17307_v62 = vpop.eup %15694  ;;  %4036 = vadd.xlane.f32.xlu1 %v4035_v37  ;;  %v4029_v1 = vsel %vm3464_vm2, %v17303_v22, 0.0 }
 0x213   : > { %19360 = vst [vmem:[#allocation54_spill] sm:$0xff] %v17307_v62  ;;  %v17311_v51 = vpop.eup %15696  ;;  %4030 = vadd.xlane.f32.xlu0 %v4029_v1  ;;  %v4038_v42 = vsel %vm3464_vm2, %v17307_v62, 0.0  ;;  %v424_v62 = vld [vmem:[%s17049_s27 + $0x48] sm:$0xff] }
 0x214   : > { %19361 = vst [vmem:[#allocation55_spill] sm:$0xff] %v17311_v51  ;;  %v4032_v44 = vsel %vm3464_vm2, %v17311_v51, 0.0  ;;  %v423_v51 = vld [vmem:[%s17049_s27 + $0x40] sm:$0xff] }
 0x215   : > { %v17321_v52 = vpack.c.bf16 %v424_v62, %v423_v51 }
 0x216   : > { %4039 = vadd.xlane.f32.xlu1 %v4038_v42 }
 0x217   : > { %4033 = vadd.xlane.f32.xlu0 %v4032_v44  ;;  %19362 = vst [vmem:[#allocation56_spill] sm:$0xff] %v17321_v52 }
 0x222   : > { %v3854_v61 = vpop.xlane.xlu0 %3853 }
 0x223   : > { %15698 = vrcp.f32 %v3854_v61 }
 0x226   : > { %v3860_v19 = vpop.xlane.xlu1 %3859  ;;  %v3851_v0 = vpop.xlane.xlu0 %3850 }
 0x227   : > { %15700 = vrcp.f32 %v3851_v0 }
 0x228   : > { %15702 = vrcp.f32 %v3860_v19 }
 0x22a   : > { %v3857_v58 = vpop.xlane.xlu1 %3856 }
 0x22b   : > { %15704 = vrcp.f32 %v3857_v58 }
 0x22c   : > { %v3866_v12 = vpop.xlane.xlu0 %3865 }
 0x22d   : > { %15706 = vrcp.f32 %v3866_v12  ;;  %v15699_v42 = vpop.eup %15698  ;;  %v426_v12 = vld [vmem:[%s17049_s27 + $0x58] sm:$0xff] }
 0x22e   : > { %v3872_v37 = vpop.xlane.xlu1 %3871  ;;  %v4044_v58 = vmul.f32 %v15699_v42, %v16977_v25 }
 0x230   : > { %v3863_v1 = vpop.xlane.xlu0 %3862 }
 0x231   : > { %15708 = vrcp.f32 %v3863_v1  ;;  %v15701_v44 = vpop.eup %15700 }
 0x232   : > { %15710 = vrcp.f32 %v3872_v37  ;;  %v3869_v22 = vpop.xlane.xlu1 %3868  ;;  %v4042_v61 = vmul.f32 %v15701_v44, %v16981_v34  ;;  %v15703_v0 = vpop.eup %15702  ;;  %v17330_v37 = vpack.c.bf16 %v426_v12, %v425_v32 }
 0x233   : > { %15712 = vrcp.f32 %v3869_v22  ;;  %v4048_v34 = vmul.f32 %v15703_v0, %v16985_v4  ;;  %v427_v4 = vld [vmem:[%s17049_s27 + $0x60] sm:$0xff]  ;;  %v430_v0 = vld [vmem:[%s17049_s27 + $0x78] sm:$0xff] }
 0x234   : > { %v3878_v19 = vpop.xlane.xlu0 %3877  ;;  %14254 = vmatprep.mubr.msk.f32.mxu0 %vm3464_vm2, %v4042_v61  ;;  %19363 = vst [vmem:[#allocation57_spill] sm:$0xff] %v17330_v37  ;;  %v429_v61 = vld [vmem:[%s17049_s27 + $0x70] sm:$0xff] }
 0x235   : > { %v15705_v14 = vpop.eup %15704  ;;  %14255 = vmatmul.mubr.msk.f32.vlgmr.msra.gmra.mrb[32].mxu0 %vm3464_vm2, %v4044_v58  ;;  %15714 = vrcp.f32 %v3878_v19 }
 0x236   : > { %v3884_v1 = vpop.xlane.xlu1 %3883  ;;  %v4046_v22 = vmul.f32 %v15705_v14, %v16991_v38  ;;  %15125 = vmatpush3.bf16.msra.mxu0 %v17091_v29  ;;  %v428_v14 = vld [vmem:[%s17049_s27 + $0x68] sm:$0xff] }
 0x237   : > { %15131 = vmatprep.subr.bf16.mxu0 %v17321_v52  ;;  %v15707_v62 = vpop.eup %15706  ;;  %v17343_v12 = vpack.c.bf16 %v428_v14, %v427_v4 }
 0x238   : > { %v3875_v25 = vpop.xlane.xlu0 %3874  ;;  %14261 = vmatprep.mubr.msk.f32.mxu1 %vm3464_vm2, %v4046_v22  ;;  %v4052_v58 = vmul.f32 %v15707_v62, %v16999_v50  ;;  %v432_v62 = vld [vmem:[%s17049_s27 + $0x88] sm:$0xff] }
 0x239   : > { %15716 = vrcp.f32 %v3875_v25  ;;  %14262 = vmatmul.mubr.msk.f32.vlgmr.msra.gmra.mrb[32].mxu1 %vm3464_vm2, %v4048_v34  ;;  %19364 = vst [vmem:[#allocation58_spill] sm:$0xff] %v17343_v12  ;;  %v17349_v25 = vpack.c.bf16 %v430_v0, %v429_v61 }
 0x23a   : > { %15718 = vrcp.f32 %v3884_v1  ;;  %v3881_v38 = vpop.xlane.xlu1 %3880  ;;  %15129 = vmatpush3.bf16.msra.mxu1 %v17104_v47 }
 0x23b   : > { %v15709_v32 = vpop.eup %15708  ;;  %15720 = vrcp.f32 %v3881_v38  ;;  %15135 = vmatprep.subr.bf16.mxu1 %v17330_v37  ;;  %19365 = vst [vmem:[#allocation59_spill] sm:$0xff] %v17349_v25 }
 0x23c   : > { %v15711_v51 = vpop.eup %15710  ;;  %v3890_v42 = vpop.xlane.xlu0 %3889  ;;  %v4050_v44 = vmul.f32 %v15709_v32, %v17009_v28 }
 0x23d   : > { %v15713_v19 = vpop.eup %15712  ;;  %v4056_v34 = vmul.f32 %v15711_v51, %v16995_v11  ;;  %15722 = vrcp.f32 %v3890_v42  ;;  %v431_v11 = vld [vmem:[%s17049_s27 + $0x80] sm:$0xff]  ;;  %v433_v51 = vld [vmem:[%s17049_s27 + $0x90] sm:$0xff]  ;;  %v434_v42 = vld [vmem:[%s17049_s27 + $0x98] sm:$0xff] }
 0x23e   : > { %14268 = vmatprep.mubr.msk.f32.mxu0 %vm3464_vm2, %v4050_v44  ;;  %v3896_v1 = vpop.xlane.xlu1 %3895  ;;  %v4054_v22 = vmul.f32 %v15713_v19, %v17005_v17  ;;  %v17363_v0 = vpack.c.bf16 %v432_v62, %v431_v11  ;;  %v437_v62 = vld [vmem:[%s17049_s27 + $0xb0] sm:$0xff] }
 0x23f   : > { %14269 = vmatmul.mubr.msk.f32.vlgmr.msra.gmra.mrb[34].mxu0 %vm3464_vm2, %v4052_v58  ;;  %v15715_v50 = vpop.eup %15714 }
 0x240   : > { %v3887_v28 = vpop.xlane.xlu0 %3886  ;;  %14275 = vmatprep.mubr.msk.f32.mxu1 %vm3464_vm2, %v4054_v22  ;;  %15133 = vmatpush3.bf16.msra.mxu0 %v17321_v52  ;;  %v4060_v61 = vmul.f32 %v15715_v50, %v17019_v35  ;;  %19366 = vst [vmem:[#allocation60_spill] sm:$0xff] %v17363_v0  ;;  %v17369_v22 = vpack.c.bf16 %v434_v42, %v433_v51 }
 0x241   : > { %15724 = vrcp.f32 %v3887_v28  ;;  %14276 = vmatmul.mubr.msk.f32.vlgmr.msra.gmra.mrb[34].mxu1 %vm3464_vm2, %v4056_v34  ;;  %15139 = vmatprep.subr.bf16.mxu0 %v17343_v12  ;;  %v436_v34 = vld [vmem:[%s17049_s27 + $0xa8] sm:$0xff] }
 0x242   : > { %15726 = vrcp.f32 %v3896_v1  ;;  %v3893_v17 = vpop.xlane.xlu1 %3892  ;;  %15137 = vmatpush3.bf16.msra.mxu1 %v17330_v37  ;;  %19367 = vst [vmem:[#allocation61_spill] sm:$0xff] %v17369_v22 }
 0x243   : > { %v15717_v38 = vpop.eup %15716  ;;  %15728 = vrcp.f32 %v3893_v17  ;;  %15143 = vmatprep.subr.bf16.mxu1 %v17349_v25 }
 0x244   : > { %v15719_v4 = vpop.eup %15718  ;;  %v3902_v14 = vpop.xlane.xlu0 %3901  ;;  %v4058_v32 = vmul.f32 %v15717_v38, %v17029_v26  ;;  %v438_v38 = vld [vmem:[%s17049_s27 + $0xb8] sm:$0xff] }
 0x245   : > { %v15721_v44 = vpop.eup %15720  ;;  %v4064_v1 = vmul.f32 %v15719_v4, %v17015_v43  ;;  %15730 = vrcp.f32 %v3902_v14  ;;  %v435_v43 = vld [vmem:[%s17049_s27 + $0xa0] sm:$0xff] }
 0x246   : > { %14282 = vmatprep.mubr.msk.f32.mxu0 %vm3464_vm2, %v4058_v32  ;;  %v3908_v19 = vpop.xlane.xlu1 %3907  ;;  %v4062_v58 = vmul.f32 %v15721_v44, %v17025_v5  ;;  %v17383_v32 = vpack.c.bf16 %v436_v34, %v435_v43  ;;  %v442_v43 = vld [vmem:[%s17049_s27 + $0xd8] sm:$0xff] }
 0x247   : > { %14283 = vmatmul.mubr.msk.f32.vlgmr.msra.gmra.mrb[36].mxu0 %vm3464_vm2, %v4060_v61  ;;  %v15723_v35 = vpop.eup %15722  ;;  %v17389_v61 = vpack.c.bf16 %v438_v38, %v437_v62 }
 0x248   : > { %v3899_v26 = vpop.xlane.xlu0 %3898  ;;  %14289 = vmatprep.mubr.msk.f32.mxu1 %vm3464_vm2, %v4062_v58  ;;  %15141 = vmatpush3.bf16.msra.mxu0 %v17343_v12  ;;  %v4068_v14 = vmul.f32 %v15723_v35, %v17039_v41  ;;  %19368 = vst [vmem:[#allocation62_spill] sm:$0xff] %v17383_v32 }
 0x249   : > { %15732 = vrcp.f32 %v3899_v26  ;;  %14290 = vmatmul.mubr.msk.f32.vlgmr.msra.gmra.mrb[36].mxu1 %vm3464_vm2, %v4064_v1  ;;  %15147 = vmatprep.subr.bf16.mxu0 %v17363_v0  ;;  %19369 = vst [vmem:[#allocation63_spill] sm:$0xff] %v17389_v61 }
 0x24a   : > { %15734 = vrcp.f32 %v3908_v19  ;;  %v3905_v5 = vpop.xlane.xlu1 %3904  ;;  %15145 = vmatpush3.bf16.msra.mxu1 %v17349_v25  ;;  %v440_v19 = vld [vmem:[%s17049_s27 + $0xc8] sm:$0xff] }
 0x24b   : > { %v15725_v28 = vpop.eup %15724  ;;  %15736 = vrcp.f32 %v3905_v5  ;;  %15151 = vmatprep.subr.bf16.mxu1 %v17369_v22  ;;  %v441_v5 = vld [vmem:[%s17049_s27 + $0xd0] sm:$0xff] }
 0x24c   : > { %v15727_v50 = vpop.eup %15726  ;;  %v3914_v17 = vpop.xlane.xlu0 %3913  ;;  %v4066_v11 = vmul.f32 %v15725_v28, %v17059_v36  ;;  %v17409_v38 = vpack.c.bf16 %v442_v43, %v441_v5  ;;  %v448_v5 = vld [vmem:[%s17049_s27 + $0x108] sm:$0xff] }
 0x24d   : > { %v15729_v4 = vpop.eup %15728  ;;  %v4072_v44 = vmul.f32 %v15727_v50, %v17035_v56  ;;  %15738 = vrcp.f32 %v3914_v17  ;;  %v439_v56 = vld [vmem:[%s17049_s27 + $0xc0] sm:$0xff] }
 0x24e   : > { %14296 = vmatprep.mubr.msk.f32.mxu0 %vm3464_vm2, %v4066_v11  ;;  %v3920_v51 = vpop.xlane.xlu1 %3919  ;;  %v4070_v42 = vmul.f32 %v15729_v4, %v17053_v57  ;;  %v17403_v50 = vpack.c.bf16 %v440_v19, %v439_v56  ;;  %19371 = vst [vmem:[#allocation65_spill] sm:$0xff] %v17409_v38  ;;  %v444_v4 = vld [vmem:[%s17049_s27 + $0xe8] sm:$0xff] }
 0x24f   : > { %14297 = vmatmul.mubr.msk.f32.vlgmr.msra.gmra.mrb[38].mxu0 %vm3464_vm2, %v4068_v14  ;;  %v15731_v41 = vpop.eup %15730 }
 0x250   : > { %v3911_v36 = vpop.xlane.xlu0 %3910  ;;  %14303 = vmatprep.mubr.msk.f32.mxu1 %vm3464_vm2, %v4070_v42  ;;  %15149 = vmatpush3.bf16.msra.mxu0 %v17363_v0  ;;  %v4076_v28 = vmul.f32 %v15731_v41, %v17075_v30  ;;  %19370 = vst [vmem:[#allocation64_spill] sm:$0xff] %v17403_v50  ;;  %v446_v41 = vld [vmem:[%s17049_s27 + $0xf8] sm:$0xff] }
 0x251   : > { %15740 = vrcp.f32 %v3911_v36  ;;  %14304 = vmatmul.mubr.msk.f32.vlgmr.msra.gmra.mrb[38].mxu1 %vm3464_vm2, %v4072_v44  ;;  %15155 = vmatprep.subr.bf16.mxu0 %v17383_v32  ;;  %v445_v36 = vld [vmem:[%s17049_s27 + $0xf0] sm:$0xff] }
 0x252   : > { %15742 = vrcp.f32 %v3920_v51  ;;  %v3917_v57 = vpop.xlane.xlu1 %3916  ;;  %15153 = vmatpush3.bf16.msra.mxu1 %v17369_v22 }
 0x253   : > { %v15733_v58 = vpop.eup %15732  ;;  %15744 = vrcp.f32 %v3917_v57  ;;  %15159 = vmatprep.subr.bf16.mxu1 %v17389_v61 }
 0x254   : > { %v15735_v1 = vpop.eup %15734  ;;  %v3926_v26 = vpop.xlane.xlu0 %3925  ;;  %v4074_v35 = vmul.f32 %v15733_v58, %v17089_v49 }
 0x255   : > { %v15737_v34 = vpop.eup %15736  ;;  %v4080_v62 = vmul.f32 %v15735_v1, %v17069_v13  ;;  %15746 = vrcp.f32 %v3926_v26  ;;  %v443_v13 = vld [vmem:[%s17049_s27 + $0xe0] sm:$0xff] }
 0x256   : > { %14310 = vmatprep.mubr.msk.f32.mxu0 %vm3464_vm2, %v4074_v35  ;;  %v3932_v17 = vpop.xlane.xlu1 %3931  ;;  %v4078_v11 = vmul.f32 %v15737_v34, %v17085_v53  ;;  %v17423_v19 = vpack.c.bf16 %v444_v4, %v443_v13  ;;  %v17429_v35 = vpack.c.bf16 %v446_v41, %v445_v36 }
 0x257   : > { %14311 = vmatmul.mubr.msk.f32.vlgmr.msra.gmra.mrb[40].mxu0 %vm3464_vm2, %v4076_v28  ;;  %v15739_v30 = vpop.eup %15738 }
 0x258   : > { %v3923_v49 = vpop.xlane.xlu0 %3922  ;;  %14317 = vmatprep.mubr.msk.f32.mxu1 %vm3464_vm2, %v4078_v11  ;;  %15157 = vmatpush3.bf16.msra.mxu0 %v17383_v32  ;;  %v4084_v56 = vmul.f32 %v15739_v30, %v17106_v48  ;;  %19372 = vst [vmem:[#allocation66_spill] sm:$0xff] %v17423_v19  ;;  %19373 = vst [vmem:[#allocation67_spill] sm:$0xff] %v17429_v35  ;;  %v449_v11 = vld [vmem:[%s17049_s27 + $0x110] sm:$0xff] }
 0x259   : > { %15748 = vrcp.f32 %v3923_v49  ;;  %14318 = vmatmul.mubr.msk.f32.vlgmr.msra.gmra.mrb[40].mxu1 %vm3464_vm2, %v4080_v62  ;;  %15163 = vmatprep.subr.bf16.mxu0 %v17403_v50  ;;  %v450_v62 = vld [vmem:[%s17049_s27 + $0x118] sm:$0xff] }
 0x25a   : > { %15750 = vrcp.f32 %v3932_v17  ;;  %v3929_v53 = vpop.xlane.xlu1 %3928  ;;  %15161 = vmatpush3.bf16.msra.mxu1 %v17389_v61 }
 0x25b   : > { %v15741_v14 = vpop.eup %15740  ;;  %15752 = vrcp.f32 %v3929_v53  ;;  %15167 = vmatprep.subr.bf16.mxu1 %v17409_v38 }
 0x25c   : > { %v15743_v51 = vpop.eup %15742  ;;  %v3938_v42 = vpop.xlane.xlu0 %3937  ;;  %v4082_v44 = vmul.f32 %v15741_v14, %v17117_v8 }
 0x25d   : > { %v15745_v57 = vpop.eup %15744  ;;  %v4088_v26 = vmul.f32 %v15743_v51, %v17100_v3  ;;  %15754 = vrcp.f32 %v3938_v42  ;;  %v447_v3 = vld [vmem:[%s17049_s27 + $0x100] sm:$0xff]  ;;  %v17449_v51 = vpack.c.bf16 %v450_v62, %v449_v11  ;;  %v452_v42 = vld [vmem:[%s17049_s27 + $0x128] sm:$0xff]  ;;  %v457_v62 = vld [vmem:[%s17049_s27 + $0x150] sm:$0xff] }
 0x25e   : > { %14324 = vmatprep.mubr.msk.f32.mxu0 %vm3464_vm2, %v4082_v44  ;;  %v3944_v58 = vpop.xlane.xlu1 %3943  ;;  %v4086_v1 = vmul.f32 %v15745_v57, %v17113_v2  ;;  %v17443_v53 = vpack.c.bf16 %v448_v5, %v447_v3 }
 0x25f   : > { %14325 = vmatmul.mubr.msk.f32.vlgmr.msra.gmra.mrb[42].mxu0 %vm3464_vm2, %v4084_v56  ;;  %v15747_v48 = vpop.eup %15746  ;;  %19375 = vst [vmem:[#allocation69_spill] sm:$0xff] %v17449_v51  ;;  %v453_v56 = vld [vmem:[%s17049_s27 + $0x130] sm:$0xff] }
 0x260   : > { %v3935_v8 = vpop.xlane.xlu0 %3934  ;;  %14331 = vmatprep.mubr.msk.f32.mxu1 %vm3464_vm2, %v4086_v1  ;;  %15165 = vmatpush3.bf16.msra.mxu0 %v17403_v50  ;;  %v4092_v30 = vmul.f32 %v15747_v48, %v17127_v7  ;;  %19374 = vst [vmem:[#allocation68_spill] sm:$0xff] %v17443_v53 }
 0x261   : > { %15756 = vrcp.f32 %v3935_v8  ;;  %14332 = vmatmul.mubr.msk.f32.vlgmr.msra.gmra.mrb[42].mxu1 %vm3464_vm2, %v4088_v26  ;;  %15171 = vmatprep.subr.bf16.mxu0 %v17423_v19 }
 0x262   : > { %15758 = vrcp.f32 %v3944_v58  ;;  %v3941_v2 = vpop.xlane.xlu1 %3940  ;;  %15169 = vmatpush3.bf16.msra.mxu1 %v17409_v38  ;;  %v454_v58 = vld [vmem:[%s17049_s27 + $0x138] sm:$0xff] }
 0x263   : > { %v15749_v43 = vpop.eup %15748  ;;  %15760 = vrcp.f32 %v3941_v2  ;;  %15175 = vmatprep.subr.bf16.mxu1 %v17429_v35  ;;  %v17469_v5 = vpack.c.bf16 %v454_v58, %v453_v56  ;;  %v19381_v56 = vld [vmem:[#allocation37_spill] sm:$0xff] }
 0x264   : > { %v15751_v34 = vpop.eup %15750  ;;  %v3950_v28 = vpop.xlane.xlu0 %3949  ;;  %v4090_v17 = vmul.f32 %v15749_v43, %v17137_v63  ;;  %v456_v43 = vld [vmem:[%s17049_s27 + $0x148] sm:$0xff] }
 0x265   : > { %v15753_v49 = vpop.eup %15752  ;;  %v4096_v14 = vmul.f32 %v15751_v34, %v17123_v10  ;;  %15762 = vrcp.f32 %v3950_v28  ;;  %v451_v10 = vld [vmem:[%s17049_s27 + $0x120] sm:$0xff]  ;;  %19377 = vst [vmem:[#allocation71_spill] sm:$0xff] %v17469_v5 }
 0x266   : > { %14338 = vmatprep.mubr.msk.f32.mxu0 %vm3464_vm2, %v4090_v17  ;;  %v3956_v13 = vpop.xlane.xlu1 %3955  ;;  %v4094_v4 = vmul.f32 %v15753_v49, %v17133_v31  ;;  %v17463_v8 = vpack.c.bf16 %v452_v42, %v451_v10  ;;  %v458_v49 = vld [vmem:[%s17049_s27 + $0x158] sm:$0xff]  ;;  %v459_v42 = vld [vmem:[%s17049_s27 + $0x160] sm:$0xff] }
 0x267   : > { %14339 = vmatmul.mubr.msk.f32.vlgmr.msra.gmra.mrb[44].mxu0 %vm3464_vm2, %v4092_v30  ;;  %v15755_v7 = vpop.eup %15754  ;;  %v17489_v10 = vpack.c.bf16 %v458_v49, %v457_v62  ;;  %v463_v49 = vld [vmem:[%s17049_s27 + $0x180] sm:$0xff] }
 0x268   : > { %v3947_v63 = vpop.xlane.xlu0 %3946  ;;  %14345 = vmatprep.mubr.msk.f32.mxu1 %vm3464_vm2, %v4094_v4  ;;  %15173 = vmatpush3.bf16.msra.mxu0 %v17423_v19  ;;  %v4100_v26 = vmul.f32 %v15755_v7, %v17147_v23  ;;  %19376 = vst [vmem:[#allocation70_spill] sm:$0xff] %v17463_v8  ;;  %v19379_v7 = vld [vmem:[#allocation53_spill] sm:$0xff] }
 0x269   : > { %15764 = vrcp.f32 %v3947_v63  ;;  %14346 = vmatmul.mubr.msk.f32.vlgmr.msra.gmra.mrb[44].mxu1 %vm3464_vm2, %v4096_v14  ;;  %15179 = vmatprep.subr.bf16.mxu0 %v17443_v53  ;;  %19380 = vst [vmem:[#allocation53_spill] sm:$0xff] %v17489_v10 }
 0x26a   : > { %15766 = vrcp.f32 %v3956_v13  ;;  %v3953_v31 = vpop.xlane.xlu1 %3952  ;;  %15177 = vmatpush3.bf16.msra.mxu1 %v17429_v35 }
 0x26b   : > { %v15757_v44 = vpop.eup %15756  ;;  %15768 = vrcp.f32 %v3953_v31  ;;  %15183 = vmatprep.subr.bf16.mxu1 %v17449_v51 }
 0x26c   : > { %v15759_v36 = vpop.eup %15758  ;;  %v3962_v41 = vpop.xlane.xlu0 %3961  ;;  %v4098_v57 = vmul.f32 %v15757_v44, %v17157_v9  ;;  %v460_v44 = vld [vmem:[%s17049_s27 + $0x168] sm:$0xff] }
 0x26d   : > { %v15761_v1 = vpop.eup %15760  ;;  %v4104_v3 = vmul.f32 %v15759_v36, %v17143_v20  ;;  %15770 = vrcp.f32 %v3962_v41  ;;  %v455_v20 = vld [vmem:[%s17049_s27 + $0x140] sm:$0xff] }
 0x26e   : > { %14352 = vmatprep.mubr.msk.f32.mxu0 %vm3464_vm2, %v4098_v57  ;;  %v3968_v48 = vpop.xlane.xlu1 %3967  ;;  %v4102_v2 = vmul.f32 %v15761_v1, %v17153_v60  ;;  %v17483_v4 = vpack.c.bf16 %v456_v43, %v455_v20  ;;  %v461_v1 = vld [vmem:[%s17049_s27 + $0x170] sm:$0xff] }
 0x26f   : > { %14353 = vmatmul.mubr.msk.f32.vlgmr.msra.gmra.mrb[46].mxu0 %vm3464_vm2, %v4100_v26  ;;  %v15763_v23 = vpop.eup %15762  ;;  %v462_v26 = vld [vmem:[%s17049_s27 + $0x178] sm:$0xff]  ;;  %v19385_v43 = vld [vmem:[#allocation36_spill] sm:$0xff] }
 0x270   : > { %v3959_v9 = vpop.xlane.xlu0 %3958  ;;  %14359 = vmatprep.mubr.msk.f32.mxu1 %vm3464_vm2, %v4102_v2  ;;  %15181 = vmatpush3.bf16.msra.mxu0 %v17443_v53  ;;  %v4108_v13 = vmul.f32 %v15763_v23, %v17167_v18  ;;  %19378 = vst [vmem:[#allocation72_spill] sm:$0xff] %v17483_v4  ;;  %v19382_v2 = vld [vmem:[#allocation35_spill] sm:$0xff] }
 0x271   : > { %15772 = vrcp.f32 %v3959_v9  ;;  %14360 = vmatmul.mubr.msk.f32.vlgmr.msra.gmra.mrb[46].mxu1 %vm3464_vm2, %v4104_v3  ;;  %15187 = vmatprep.subr.bf16.mxu0 %v17463_v8  ;;  %v17503_v9 = vpack.c.bf16 %v460_v44, %v459_v42 }
 0x272   : > { %15774 = vrcp.f32 %v3968_v48  ;;  %v3965_v60 = vpop.xlane.xlu1 %3964  ;;  %15185 = vmatpush3.bf16.msra.mxu1 %v17449_v51 }
 0x273   : > { %v15765_v34 = vpop.eup %15764  ;;  %15776 = vrcp.f32 %v3965_v60  ;;  %15191 = vmatprep.subr.bf16.mxu1 %v17469_v5  ;;  %19383 = vst [vmem:[#allocation37_spill] sm:$0xff] %v17503_v9  ;;  %v19384_v60 = vld [vmem:[#allocation38_spill] sm:$0xff] }
 0x274   : > { %v15767_v28 = vpop.eup %15766  ;;  %v3974_v17 = vpop.xlane.xlu0 %3973  ;;  %v4106_v11 = vmul.f32 %v15765_v34, %v17177_v16 }
 0x275   : > { %v15769_v30 = vpop.eup %15768  ;;  %v4112_v31 = vmul.f32 %v15767_v28, %v19379_v7  ;;  %15778 = vrcp.f32 %v3974_v17  ;;  %v17509_v28 = vpack.c.bf16 %v462_v26, %v461_v1 }
 0x276   : > { %14366 = vmatprep.mubr.msk.f32.mxu0 %vm3464_vm2, %v4106_v11  ;;  %v3980_v14 = vpop.xlane.xlu1 %3979  ;;  %v4110_v63 = vmul.f32 %v15769_v30, %v17173_v39  ;;  %v464_v30 = vld [vmem:[%s17049_s27 + $0x188] sm:$0xff] }
 0x277   : > { %14367 = vmatmul.mubr.msk.f32.vlgmr.msra.gmra.mrb[48].mxu0 %vm3464_vm2, %v4108_v13  ;;  %v15771_v18 = vpop.eup %15770  ;;  %19386 = vst [vmem:[#allocation35_spill] sm:$0xff] %v17509_v28  ;;  %v17523_v44 = vpack.c.bf16 %v464_v30, %v463_v49 }
 0x278   : > { %v3971_v16 = vpop.xlane.xlu0 %3970  ;;  %14373 = vmatprep.mubr.msk.f32.mxu1 %vm3464_vm2, %v4110_v63  ;;  %15189 = vmatpush3.bf16.msra.mxu0 %v17463_v8  ;;  %v4116_v3 = vmul.f32 %v15771_v18, %v19382_v2  ;;  %v467_v2 = vld [vmem:[%s17049_s27 + $0x1a0] sm:$0xff] }
 0x279   : > { %15780 = vrcp.f32 %v3971_v16  ;;  %14374 = vmatmul.mubr.msk.f32.vlgmr.msra.gmra.mrb[48].mxu1 %vm3464_vm2, %v4112_v31  ;;  %15195 = vmatprep.subr.bf16.mxu0 %v17483_v4  ;;  %v465_v31 = vld [vmem:[%s17049_s27 + $0x190] sm:$0xff]  ;;  %v466_v16 = vld [vmem:[%s17049_s27 + $0x198] sm:$0xff]  ;;  %19388 = vst [vmem:[#allocation38_spill] sm:$0xff] %v17523_v44 }
 0x27a   : > { %15782 = vrcp.f32 %v3980_v14  ;;  %v3977_v39 = vpop.xlane.xlu1 %3976  ;;  %15193 = vmatpush3.bf16.msra.mxu1 %v17469_v5  ;;  %v17529_v1 = vpack.c.bf16 %v466_v16, %v465_v31  ;;  %v471_v31 = vld [vmem:[%s17049_s27 + $0x1c0] sm:$0xff]  ;;  %v472_v16 = vld [vmem:[%s17049_s27 + $0x1c8] sm:$0xff] }
 0x27b   : > { %v15773_v36 = vpop.eup %15772  ;;  %15784 = vrcp.f32 %v3977_v39  ;;  %15199 = vmatprep.subr.bf16.mxu1 %v17489_v10  ;;  %v19387_v39 = vld [vmem:[#allocation39_spill] sm:$0xff] }
 0x27c   : > { %v15775_v41 = vpop.eup %15774  ;;  %v3986_v57 = vpop.xlane.xlu0 %3985  ;;  %v4114_v58 = vmul.f32 %v15773_v36, %v19381_v56  ;;  %v19390_v56 = vld [vmem:[#allocation40_spill] sm:$0xff]  ;;  %19391 = vst [vmem:[#allocation36_spill] sm:$0xff] %v17529_v1 }
 0x27d   : > { %v15777_v48 = vpop.eup %15776  ;;  %v4120_v34 = vmul.f32 %v15775_v41, %v19385_v43  ;;  %15786 = vrcp.f32 %v3986_v57  ;;  %v19389_v41 = vld [vmem:[#allocation42_spill] sm:$0xff] }
 0x27e   : > { %14380 = vmatprep.mubr.msk.f32.mxu0 %vm3464_vm2, %v4114_v58  ;;  %v3992_v23 = vpop.xlane.xlu1 %3991  ;;  %v4118_v20 = vmul.f32 %v15777_v48, %v19384_v60 }
 0x27f   : > { %14381 = vmatmul.mubr.msk.f32.vlgmr.msra.gmra.mrb[50].mxu0 %vm3464_vm2, %v4116_v3  ;;  %v15779_v11 = vpop.eup %15778  ;;  %v468_v3 = vld [vmem:[%s17049_s27 + $0x1a8] sm:$0xff] }
 0x280   : > { %v3983_v17 = vpop.xlane.xlu0 %3982  ;;  %14387 = vmatprep.mubr.msk.f32.mxu1 %vm3464_vm2, %v4118_v20  ;;  %15197 = vmatpush3.bf16.msra.mxu0 %v17483_v4  ;;  %v4124_v42 = vmul.f32 %v15779_v11, %v19387_v39  ;;  %v17543_v49 = vpack.c.bf16 %v468_v3, %v467_v2  ;;  %v19397_v2 = vld [vmem:[#allocation44_spill] sm:$0xff] }
 0x281   : > { %15788 = vrcp.f32 %v3983_v17  ;;  %14388 = vmatmul.mubr.msk.f32.vlgmr.msra.gmra.mrb[50].mxu1 %vm3464_vm2, %v4120_v34  ;;  %15203 = vmatprep.subr.bf16.mxu0 %v17503_v9  ;;  %v469_v34 = vld [vmem:[%s17049_s27 + $0x1b0] sm:$0xff]  ;;  %v470_v17 = vld [vmem:[%s17049_s27 + $0x1b8] sm:$0xff] }
 0x282   : > { %15790 = vrcp.f32 %v3992_v23  ;;  %v3989_v62 = vpop.xlane.xlu1 %3988  ;;  %15201 = vmatpush3.bf16.msra.mxu1 %v17489_v10  ;;  %19392 = vst [vmem:[#allocation39_spill] sm:$0xff] %v17543_v49 }
 0x283   : > { %v15781_v13 = vpop.eup %15780  ;;  %15792 = vrcp.f32 %v3989_v62  ;;  %15207 = vmatprep.subr.bf16.mxu1 %v17509_v28 }
 0x284   : > { %v15783_v14 = vpop.eup %15782  ;;  %v3998_v63 = vpop.xlane.xlu0 %3997  ;;  %v4122_v7 = vmul.f32 %v15781_v13, %v17217_v45 }
 0x285   : > { %v15785_v18 = vpop.eup %15784  ;;  %v4128_v58 = vmul.f32 %v15783_v14, %v19390_v56  ;;  %15794 = vrcp.f32 %v3998_v63  ;;  %v19393_v14 = vld [vmem:[#allocation41_spill] sm:$0xff]  ;;  %v19395_v56 = vld [vmem:[#allocation43_spill] sm:$0xff] }
 0x286   : > { %14394 = vmatprep.mubr.msk.f32.mxu0 %vm3464_vm2, %v4122_v7  ;;  %v4004_v36 = vpop.xlane.xlu1 %4003  ;;  %v4126_v57 = vmul.f32 %v15785_v18, %v19389_v41  ;;  %v17549_v7 = vpack.c.bf16 %v470_v17, %v469_v34  ;;  %v474_v41 = vld [vmem:[%s17049_s27 + $0x1d8] sm:$0xff] }
 0x287   : > { %14395 = vmatmul.mubr.msk.f32.vlgmr.msra.gmra.mrb[52].mxu0 %vm3464_vm2, %v4124_v42  ;;  %v15787_v26 = vpop.eup %15786 }
 0x288   : > { %v3995_v45 = vpop.xlane.xlu0 %3994  ;;  %14401 = vmatprep.mubr.msk.f32.mxu1 %vm3464_vm2, %v4126_v57  ;;  %15205 = vmatpush3.bf16.msra.mxu0 %v17503_v9  ;;  %v4132_v62 = vmul.f32 %v15787_v26, %v17227_v21  ;;  %19394 = vst [vmem:[#allocation42_spill] sm:$0xff] %v17549_v7 }
 0x289   : > { %15796 = vrcp.f32 %v3995_v45  ;;  %14402 = vmatmul.mubr.msk.f32.vlgmr.msra.gmra.mrb[52].mxu1 %vm3464_vm2, %v4128_v58  ;;  %15211 = vmatprep.subr.bf16.mxu0 %v17523_v44  ;;  %v17563_v45 = vpack.c.bf16 %v472_v16, %v471_v31 }
 0x28a   : > { %15798 = vrcp.f32 %v4004_v36  ;;  %v4001_v48 = vpop.xlane.xlu1 %4000  ;;  %15209 = vmatpush3.bf16.msra.mxu1 %v17509_v28  ;;  %v473_v36 = vld [vmem:[%s17049_s27 + $0x1d0] sm:$0xff] }
 0x28b   : > { %v15789_v23 = vpop.eup %15788  ;;  %15800 = vrcp.f32 %v4001_v48  ;;  %15215 = vmatprep.subr.bf16.mxu1 %v17529_v1  ;;  %19396 = vst [vmem:[#allocation40_spill] sm:$0xff] %v17563_v45 }
 0x28c   : > { %v15791_v60 = vpop.eup %15790  ;;  %v4010_v20 = vpop.xlane.xlu0 %4009  ;;  %v4130_v43 = vmul.f32 %v15789_v23, %v17237_v15  ;;  %v17569_v23 = vpack.c.bf16 %v474_v41, %v473_v36 }
 0x28d   : > { %v15793_v11 = vpop.eup %15792  ;;  %v4136_v63 = vmul.f32 %v15791_v60, %v19393_v14  ;;  %15802 = vrcp.f32 %v4010_v20  ;;  %v475_v60 = vld [vmem:[%s17049_s27 + $0x1e0] sm:$0xff]  ;;  %v476_v20 = vld [vmem:[%s17049_s27 + $0x1e8] sm:$0xff] }
 0x28e   : > { %14408 = vmatprep.mubr.msk.f32.mxu0 %vm3464_vm2, %v4130_v43  ;;  %v4016_v30 = vpop.xlane.xlu1 %4015  ;;  %v4134_v13 = vmul.f32 %v15793_v11, %v17233_v27  ;;  %19398 = vst [vmem:[#allocation41_spill] sm:$0xff] %v17569_v23 }
 0x28f   : > { %14409 = vmatmul.mubr.msk.f32.vlgmr.msra.gmra.mrb[54].mxu0 %vm3464_vm2, %v4132_v62  ;;  %v15795_v21 = vpop.eup %15794 }
 0x290   : > { %v4007_v15 = vpop.xlane.xlu0 %4006  ;;  %14415 = vmatprep.mubr.msk.f32.mxu1 %vm3464_vm2, %v4134_v13  ;;  %15213 = vmatpush3.bf16.msra.mxu0 %v17523_v44  ;;  %v4140_v58 = vmul.f32 %v15795_v21, %v19395_v56  ;;  %v478_v13 = vld [vmem:[%s17049_s27 + $0x1f8] sm:$0xff] }
 0x291   : > { %15804 = vrcp.f32 %v4007_v15  ;;  %14416 = vmatmul.mubr.msk.f32.vlgmr.msra.gmra.mrb[54].mxu1 %vm3464_vm2, %v4136_v63  ;;  %15219 = vmatprep.subr.bf16.mxu0 %v17543_v49  ;;  %v17583_v15 = vpack.c.bf16 %v476_v20, %v475_v60  ;;  %v19407_v20 = vld [vmem:[#allocation3_spill] sm:$0xff] }
 0x292   : > { %15806 = vrcp.f32 %v4016_v30  ;;  %v4013_v27 = vpop.xlane.xlu1 %4012  ;;  %15217 = vmatpush3.bf16.msra.mxu1 %v17529_v1  ;;  %v477_v30 = vld [vmem:[%s17049_s27 + $0x1f0] sm:$0xff] }
 0x293   : > { %v15797_v18 = vpop.eup %15796  ;;  %15808 = vrcp.f32 %v4013_v27  ;;  %15223 = vmatprep.subr.bf16.mxu1 %v17549_v7  ;;  %19399 = vst [vmem:[#allocation43_spill] sm:$0xff] %v17583_v15  ;;  %v17589_v16 = vpack.c.bf16 %v478_v13, %v477_v30  ;;  %v19409_v30 = vld [vmem:[#allocation55_spill] sm:$0xff] }
 0x294   : > { %v15799_v39 = vpop.eup %15798  ;;  %v4138_v42 = vmul.f32 %v15797_v18, %v17256_v6 }
 0x295   : > { %v15801_v57 = vpop.eup %15800  ;;  %v4144_v3 = vmul.f32 %v15799_v39, %v19397_v2  ;;  %19400 = vst [vmem:[#allocation44_spill] sm:$0xff] %v17589_v16 }
 0x296   : > { %14422 = vmatprep.mubr.msk.f32.mxu0 %vm3464_vm2, %v4138_v42  ;;  %v4142_v26 = vmul.f32 %v15801_v57, %v17252_v54  ;;  %v19401_v57 = vld [vmem:[#allocation46_spill] sm:$0xff] }
 0x297   : > { %v4025_v48 = vpop.xlane.xlu1 %4024  ;;  %14423 = vmatmul.mubr.msk.f32.vlgmr.msra.gmra.mrb[56].mxu0 %vm3464_vm2, %v4140_v58  ;;  %v15803_v54 = vpop.eup %15802  ;;  %v19402_v58 = vld [vmem:[#allocation45_spill] sm:$0xff] }
 0x298   : > { %15810 = vrcp.f32 %v4025_v48  ;;  %v4019_v6 = vpop.xlane.xlu0 %4018  ;;  %14429 = vmatprep.mubr.msk.f32.mxu1 %vm3464_vm2, %v4142_v26  ;;  %15221 = vmatpush3.bf16.msra.mxu0 %v17543_v49  ;;  %v4148_v63 = vmul.f32 %v15803_v54, %v17267_v55  ;;  %v19403_v48 = vld [vmem:[#allocation47_spill] sm:$0xff]  ;;  %v19406_v54 = vld [vmem:[#allocation48_spill] sm:$0xff] }
 0x299   : > { %15812 = vrcp.f32 %v4019_v6  ;;  %14430 = vmatmul.mubr.msk.f32.vlgmr.msra.gmra.mrb[56].mxu1 %vm3464_vm2, %v4144_v3  ;;  %15227 = vmatprep.subr.bf16.mxu0 %v17563_v45  ;;  %v19404_v3 = vld [vmem:[#allocation4_spill] sm:$0xff]  ;;  %v6886_v6 = vld [vmem:[%s17619_s30 + $0x1e8] sm:$0xff] }
 0x29a   : > { %15225 = vmatpush3.bf16.msra.mxu1 %v17549_v7 }
 0x29b   : > { %v15805_v43 = vpop.eup %15804  ;;  %v4028_v34 = vpop.xlane.xlu1 %4027  ;;  %15231 = vmatprep.subr.bf16.mxu1 %v17569_v23 }
 0x29c   : > { %v15807_v17 = vpop.eup %15806  ;;  %15814 = vrcp.f32 %v4028_v34  ;;  %v4022_v11 = vpop.xlane.xlu0 %4021  ;;  %v4146_v62 = vmul.f32 %v15805_v43, %v17276_v59 }
 0x29d   : > { %v15809_v14 = vpop.eup %15808  ;;  %15816 = vrcp.f32 %v4022_v11  ;;  %v4152_v31 = vmul.f32 %v15807_v17, %v17263_v46  ;;  %v19408_v17 = vld [vmem:[#allocation54_spill] sm:$0xff] }
 0x29e   : > { %14436 = vmatprep.mubr.msk.f32.mxu0 %vm3464_vm2, %v4146_v62  ;;  %v4150_v21 = vmul.f32 %v15809_v14, %v17272_v33  ;;  %v6827_v62 = vld [vmem:[%s17619_s30 + $0x10] sm:$0xff]  ;;  %v6825_v14 = vld [vmem:[%s17619_s30] sm:$0xff] }
 0x29f   : > { %v4037_v27 = vpop.xlane.xlu1 %4036  ;;  %14437 = vmatmul.mubr.msk.f32.vlgmr.msra.gmra.mrb[58].mxu0 %vm3464_vm2, %v4148_v63  ;;  %v19410_v63 = vld [vmem:[#allocation6_spill] sm:$0xff] }
 0x2a0   : > { %15818 = vrcp.f32 %v4037_v27  ;;  %v4031_v59 = vpop.xlane.xlu0 %4030  ;;  %14443 = vmatprep.mubr.msk.f32.mxu1 %vm3464_vm2, %v4150_v21  ;;  %15229 = vmatpush3.bf16.msra.mxu0 %v17563_v45  ;;  %v19411_v21 = vld [vmem:[#allocation5_spill] sm:$0xff] }
 0x2a1   : > { %15820 = vrcp.f32 %v4031_v59  ;;  %14444 = vmatmul.mubr.msk.f32.vlgmr.msra.gmra.mrb[58].mxu1 %vm3464_vm2, %v4152_v31  ;;  %15235 = vmatprep.subr.bf16.mxu0 %v17583_v15  ;;  %v6828_v27 = vld [vmem:[%s17619_s30 + $0x18] sm:$0xff]  ;;  %v6826_v31 = vld [vmem:[%s17619_s30 + $0x8] sm:$0xff]  ;;  %v6831_v59 = vld [vmem:[%s17619_s30 + $0x30] sm:$0xff] }
 0x2a2   : > { %v15811_v55 = vpop.eup %15810  ;;  %15233 = vmatpush3.bf16.msra.mxu1 %v17569_v23 }
 0x2a3   : > { %v15813_v33 = vpop.eup %15812  ;;  %v4040_v18 = vpop.xlane.xlu1 %4039  ;;  %v4158_v46 = vmul.f32 %v15811_v55, %v17285_v40  ;;  %15239 = vmatprep.subr.bf16.mxu1 %v17589_v16  ;;  %v6829_v55 = vld [vmem:[%s17619_s30 + $0x20] sm:$0xff] }
 0x2a4   : > { %15822 = vrcp.f32 %v4040_v18  ;;  %v4034_v39 = vpop.xlane.xlu0 %4033  ;;  %v4154_v42 = vmul.f32 %v15813_v33, %v17287_v24  ;;  %v19412_v33 = vld [vmem:[#allocation8_spill] sm:$0xff]  ;;  %v19413_v18 = vld [vmem:[#allocation7_spill] sm:$0xff] }
 0x2a5   : > { %15824 = vrcp.f32 %v4034_v39  ;;  %14457 = vmatprep.mubr.msk.f32.mxu1 %vm3464_vm2, %v4158_v46  ;;  %v6832_v46 = vld [vmem:[%s17619_s30 + $0x38] sm:$0xff]  ;;  %v6830_v39 = vld [vmem:[%s17619_s30 + $0x28] sm:$0xff] }
 0x2a6   : > { %v15815_v36 = vpop.eup %15814  ;;  %14450 = vmatprep.mubr.msk.f32.mxu0 %vm3464_vm2, %v4154_v42  ;;  %v6835_v42 = vld [vmem:[%s17619_s30 + $0x50] sm:$0xff] }
 0x2a7   : > { %v15817_v41 = vpop.eup %15816  ;;  %v4160_v56 = vmul.f32 %v15815_v36, %v19401_v57  ;;  %v6833_v36 = vld [vmem:[%s17619_s30 + $0x40] sm:$0xff]  ;;  %v19415_v57 = vld [vmem:[#allocation9_spill] sm:$0xff] }
 0x2a8   : > { %v4156_v26 = vmul.f32 %v15817_v41, %v19402_v58  ;;  %v19414_v41 = vld [vmem:[#allocation10_spill] sm:$0xff]  ;;  %v6834_v58 = vld [vmem:[%s17619_s30 + $0x48] sm:$0xff] }
 0x2a9   : > { %14458 = vmatmul.mubr.msk.f32.vlgmr.msra.gmra.mrb[60].mxu1 %vm3464_vm2, %v4160_v56  ;;  %v6836_v56 = vld [vmem:[%s17619_s30 + $0x58] sm:$0xff] }
 0x2aa   : > { %v15819_v40 = vpop.eup %15818  ;;  %15241 = vmatpush3.bf16.msra.mxu1 %v17589_v16  ;;  %14451 = vmatmul.mubr.msk.f32.vlgmr.msra.gmra.mrb[60].mxu0 %vm3464_vm2, %v4156_v26  ;;  %v6839_v26 = vld [vmem:[%s17619_s30 + $0x70] sm:$0xff] }
 0x2ab   : > { %v15821_v24 = vpop.eup %15820  ;;  %15237 = vmatpush3.bf16.msra.mxu0 %v17583_v15  ;;  %v4166_v2 = vmul.f32 %v15819_v40, %v19403_v48  ;;  %15250 = vmatprep.subr.msk.bf16.mxu1 %vm16151_vm1, %v19404_v3  ;;  %v6837_v40 = vld [vmem:[%s17619_s30 + $0x60] sm:$0xff]  ;;  %v19417_v48 = vld [vmem:[#allocation11_spill] sm:$0xff] }
 0x2ac   : > { %v4162_v60 = vmul.f32 %v15821_v24, %v19406_v54  ;;  %15244 = vmatprep.subr.msk.bf16.mxu0 %vm16151_vm1, %v19407_v20  ;;  %v19416_v24 = vld [vmem:[#allocation12_spill] sm:$0xff] }
 0x2ad   : > { %14471 = vmatprep.mubr.msk.f32.mxu1 %vm3464_vm2, %v4166_v2  ;;  %v6840_v2 = vld [vmem:[%s17619_s30 + $0x78] sm:$0xff]  ;;  %v6843_v54 = vld [vmem:[%s17619_s30 + $0x90] sm:$0xff] }
 0x2ae   : > { %v15823_v43 = vpop.eup %15822  ;;  %14464 = vmatprep.mubr.msk.f32.mxu0 %vm3464_vm2, %v4162_v60  ;;  %v6841_v60 = vld [vmem:[%s17619_s30 + $0x80] sm:$0xff] }
 0x2af   : > { %v15825_v34 = vpop.eup %15824  ;;  %v4168_v11 = vmul.f32 %v15823_v43, %v19408_v17  ;;  %v19419_v43 = vld [vmem:[#allocation13_spill] sm:$0xff]  ;;  %v6842_v17 = vld [vmem:[%s17619_s30 + $0x88] sm:$0xff] }
 0x2b0   : > { %v4164_v13 = vmul.f32 %v15825_v34, %v19409_v30  ;;  %v6844_v34 = vld [vmem:[%s17619_s30 + $0x98] sm:$0xff]  ;;  %v19420_v30 = vld [vmem:[#allocation16_spill] sm:$0xff] }
 0x2b1   : > { %14472 = vmatmul.mubr.msk.f32.vlgmr.msra.gmra.mrb[62].mxu1 %vm3464_vm2, %v4168_v11  ;;  %v6847_v11 = vld [vmem:[%s17619_s30 + $0xb0] sm:$0xff] }
 0x2b2   : > { %14465 = vmatmul.mubr.msk.f32.vlgmr.msra.gmra.mrb[62].mxu0 %vm3464_vm2, %v4164_v13  ;;  %14485 = vmatprep.mubr.msk.f32.mxu1 %vm551_vm0, %v6827_v62  ;;  %v6845_v62 = vld [vmem:[%s17619_s30 + $0xa0] sm:$0xff]  ;;  %v19421_v13 = vld [vmem:[#allocation15_spill] sm:$0xff] }
 0x2b3   : > { %15253 = vmatpush3.bf16.xpose.msk.msra.mxu1 %vm16151_vm1, %v19404_v3  ;;  %14478 = vmatprep.mubr.msk.f32.mxu0 %vm551_vm0, %v6825_v14  ;;  %v6838_v3 = vld [vmem:[%s17619_s30 + $0x68] sm:$0xff]  ;;  %v6848_v14 = vld [vmem:[%s17619_s30 + $0xb8] sm:$0xff] }
 0x2b4   : > { %15247 = vmatpush3.bf16.xpose.msk.msra.mxu0 %vm16151_vm1, %v19407_v20  ;;  %15262 = vmatprep.subr.msk.bf16.mxu1 %vm16151_vm1, %v19410_v63  ;;  %v19418_v20 = vld [vmem:[#allocation14_spill] sm:$0xff] }
 0x2b5   : > { %15256 = vmatprep.subr.msk.bf16.mxu0 %vm16151_vm1, %v19411_v21 }
 0x2ba   : > { %14486 = vmatmul.mubr.msk.f32.vlgmr.msra.gmra.mrb[64].mxu1 %vm551_vm0, %v6828_v27  ;;  %v6849_v27 = vld [vmem:[%s17619_s30 + $0xc0] sm:$0xff] }
 0x2bb   : > { %14479 = vmatmul.mubr.msk.f32.vlgmr.msra.gmra.mrb[64].mxu0 %vm551_vm0, %v6826_v31  ;;  %15265 = vmatpush3.bf16.xpose.msk.msra.mxu1 %vm16151_vm1, %v19410_v63  ;;  %v6846_v63 = vld [vmem:[%s17619_s30 + $0xa8] sm:$0xff]  ;;  %v19422_v31 = vld [vmem:[#allocation18_spill] sm:$0xff] }
 0x2bc   : > { %15259 = vmatpush3.bf16.xpose.msk.msra.mxu0 %vm16151_vm1, %v19411_v21  ;;  %14499 = vmatprep.mubr.msk.f32.mxu1 %vm551_vm0, %v6831_v59  ;;  %v6851_v21 = vld [vmem:[%s17619_s30 + $0xd0] sm:$0xff]  ;;  %v19423_v59 = vld [vmem:[#allocation17_spill] sm:$0xff] }
 0x2bd   : > { %14492 = vmatprep.mubr.msk.f32.mxu0 %vm551_vm0, %v6829_v55  ;;  %15274 = vmatprep.subr.msk.bf16.mxu1 %vm16151_vm1, %v19412_v33  ;;  %v6852_v55 = vld [vmem:[%s17619_s30 + $0xd8] sm:$0xff] }
 0x2be   : > { %15268 = vmatprep.subr.msk.bf16.mxu0 %vm16151_vm1, %v19413_v18 }
 0x2c2   : > { %14500 = vmatmul.mubr.msk.f32.vlgmr.msra.gmra.mrb[66].mxu1 %vm551_vm0, %v6832_v46  ;;  %v6853_v46 = vld [vmem:[%s17619_s30 + $0xe0] sm:$0xff] }
 0x2c3   : > { %14493 = vmatmul.mubr.msk.f32.vlgmr.msra.gmra.mrb[66].mxu0 %vm551_vm0, %v6830_v39  ;;  %15277 = vmatpush3.bf16.xpose.msk.msra.mxu1 %vm16151_vm1, %v19412_v33  ;;  %v6850_v33 = vld [vmem:[%s17619_s30 + $0xc8] sm:$0xff]  ;;  %v19424_v39 = vld [vmem:[#allocation20_spill] sm:$0xff] }
 0x2c4   : > { %15271 = vmatpush3.bf16.xpose.msk.msra.mxu0 %vm16151_vm1, %v19413_v18  ;;  %14513 = vmatprep.mubr.msk.f32.mxu1 %vm551_vm0, %v6835_v42  ;;  %v6855_v18 = vld [vmem:[%s17619_s30 + $0xf0] sm:$0xff]  ;;  %v19425_v42 = vld [vmem:[#allocation19_spill] sm:$0xff] }
 0x2c5   : > { %14506 = vmatprep.mubr.msk.f32.mxu0 %vm551_vm0, %v6833_v36  ;;  %15286 = vmatprep.subr.msk.bf16.mxu1 %vm16151_vm1, %v19414_v41  ;;  %v6856_v36 = vld [vmem:[%s17619_s30 + $0xf8] sm:$0xff] }
 0x2c6   : > { %15280 = vmatprep.subr.msk.bf16.mxu0 %vm16151_vm1, %v19415_v57 }
 0x2ca   : > { %14514 = vmatmul.mubr.msk.f32.vlgmr.msra.gmra.mrb[68].mxu1 %vm551_vm0, %v6836_v56  ;;  %v6857_v56 = vld [vmem:[%s17619_s30 + $0x100] sm:$0xff] }
 0x2cb   : > { %14507 = vmatmul.mubr.msk.f32.vlgmr.msra.gmra.mrb[68].mxu0 %vm551_vm0, %v6834_v58  ;;  %15289 = vmatpush3.bf16.xpose.msk.msra.mxu1 %vm16151_vm1, %v19414_v41  ;;  %v6854_v41 = vld [vmem:[%s17619_s30 + $0xe8] sm:$0xff]  ;;  %v19426_v58 = vld [vmem:[#allocation22_spill] sm:$0xff] }
 0x2cc   : > { %15283 = vmatpush3.bf16.xpose.msk.msra.mxu0 %vm16151_vm1, %v19415_v57  ;;  %14527 = vmatprep.mubr.msk.f32.mxu1 %vm551_vm0, %v6839_v26  ;;  %v6859_v57 = vld [vmem:[%s17619_s30 + $0x110] sm:$0xff]  ;;  %v19427_v26 = vld [vmem:[#allocation21_spill] sm:$0xff] }
 0x2cd   : > { %14520 = vmatprep.mubr.msk.f32.mxu0 %vm551_vm0, %v6837_v40  ;;  %15298 = vmatprep.subr.msk.bf16.mxu1 %vm16151_vm1, %v19416_v24  ;;  %v6860_v40 = vld [vmem:[%s17619_s30 + $0x118] sm:$0xff] }
 0x2ce   : > { %15292 = vmatprep.subr.msk.bf16.mxu0 %vm16151_vm1, %v19417_v48 }
 0x2d2   : > { %14528 = vmatmul.mubr.msk.f32.vlgmr.msra.gmra.mrb[70].mxu1 %vm551_vm0, %v6840_v2  ;;  %v6861_v2 = vld [vmem:[%s17619_s30 + $0x120] sm:$0xff] }
 0x2d3   : > { %14521 = vmatmul.mubr.msk.f32.vlgmr.msra.gmra.mrb[70].mxu0 %vm551_vm0, %v6838_v3  ;;  %15301 = vmatpush3.bf16.xpose.msk.msra.mxu1 %vm16151_vm1, %v19416_v24  ;;  %v6858_v24 = vld [vmem:[%s17619_s30 + $0x108] sm:$0xff]  ;;  %v19428_v3 = vld [vmem:[#allocation24_spill] sm:$0xff] }
 0x2d4   : > { %15295 = vmatpush3.bf16.xpose.msk.msra.mxu0 %vm16151_vm1, %v19417_v48  ;;  %14541 = vmatprep.mubr.msk.f32.mxu1 %vm551_vm0, %v6843_v54  ;;  %v6863_v48 = vld [vmem:[%s17619_s30 + $0x130] sm:$0xff]  ;;  %v19429_v54 = vld [vmem:[#allocation23_spill] sm:$0xff] }
 0x2d5   : > { %14534 = vmatprep.mubr.msk.f32.mxu0 %vm551_vm0, %v6841_v60  ;;  %15310 = vmatprep.subr.msk.bf16.mxu1 %vm16151_vm1, %v19418_v20  ;;  %v6864_v60 = vld [vmem:[%s17619_s30 + $0x138] sm:$0xff] }
 0x2d6   : > { %15304 = vmatprep.subr.msk.bf16.mxu0 %vm16151_vm1, %v19419_v43 }
 0x2da   : > { %14542 = vmatmul.mubr.msk.f32.vlgmr.msra.gmra.mrb[72].mxu1 %vm551_vm0, %v6844_v34  ;;  %v6865_v34 = vld [vmem:[%s17619_s30 + $0x140] sm:$0xff] }
 0x2db   : > { %14535 = vmatmul.mubr.msk.f32.vlgmr.msra.gmra.mrb[72].mxu0 %vm551_vm0, %v6842_v17  ;;  %15313 = vmatpush3.bf16.xpose.msk.msra.mxu1 %vm16151_vm1, %v19418_v20  ;;  %v6862_v20 = vld [vmem:[%s17619_s30 + $0x128] sm:$0xff]  ;;  %v19430_v17 = vld [vmem:[#allocation26_spill] sm:$0xff] }
 0x2dc   : > { %15307 = vmatpush3.bf16.xpose.msk.msra.mxu0 %vm16151_vm1, %v19419_v43  ;;  %14555 = vmatprep.mubr.msk.f32.mxu1 %vm551_vm0, %v6847_v11  ;;  %v6867_v43 = vld [vmem:[%s17619_s30 + $0x150] sm:$0xff]  ;;  %v19431_v11 = vld [vmem:[#allocation25_spill] sm:$0xff] }
 0x2dd   : > { %14548 = vmatprep.mubr.msk.f32.mxu0 %vm551_vm0, %v6845_v62  ;;  %15322 = vmatprep.subr.msk.bf16.mxu1 %vm16151_vm1, %v19420_v30  ;;  %v6868_v62 = vld [vmem:[%s17619_s30 + $0x158] sm:$0xff] }
 0x2de   : > { %15316 = vmatprep.subr.msk.bf16.mxu0 %vm16151_vm1, %v19421_v13 }
 0x2e2   : > { %14556 = vmatmul.mubr.msk.f32.vlgmr.msra.gmra.mrb[74].mxu1 %vm551_vm0, %v6848_v14  ;;  %v6871_v14 = vld [vmem:[%s17619_s30 + $0x170] sm:$0xff] }
 0x2e3   : > { %14549 = vmatmul.mubr.msk.f32.vlgmr.msra.gmra.mrb[74].mxu0 %vm551_vm0, %v6846_v63  ;;  %15325 = vmatpush3.bf16.xpose.msk.msra.mxu1 %vm16151_vm1, %v19420_v30  ;;  %v6866_v30 = vld [vmem:[%s17619_s30 + $0x148] sm:$0xff] }
 0x2e4   : > { %15319 = vmatpush3.bf16.xpose.msk.msra.mxu0 %vm16151_vm1, %v19421_v13  ;;  %14569 = vmatprep.mubr.msk.f32.mxu1 %vm551_vm0, %v6851_v21  ;;  %v6869_v21 = vld [vmem:[%s17619_s30 + $0x160] sm:$0xff] }
 0x2e5   : > { %14562 = vmatprep.mubr.msk.f32.mxu0 %vm551_vm0, %v6849_v27  ;;  %15334 = vmatprep.subr.msk.bf16.mxu1 %vm16151_vm1, %v19422_v31 }
 0x2e6   : > { %15328 = vmatprep.subr.msk.bf16.mxu0 %vm16151_vm1, %v19423_v59 }
 0x2ea   : > { %14570 = vmatmul.mubr.msk.f32.vlgmr.msra.gmra.mrb[76].mxu1 %vm551_vm0, %v6852_v55  ;;  %v19433_v55 = vld [vmem:[#allocation27_spill] sm:$0xff] }
 0x2eb   : > { %14563 = vmatmul.mubr.msk.f32.vlgmr.msra.gmra.mrb[76].mxu0 %vm551_vm0, %v6850_v33  ;;  %15337 = vmatpush3.bf16.xpose.msk.msra.mxu1 %vm16151_vm1, %v19422_v31  ;;  %v6872_v33 = vld [vmem:[%s17619_s30 + $0x178] sm:$0xff] }
 0x2ec   : > { %15331 = vmatpush3.bf16.xpose.msk.msra.mxu0 %vm16151_vm1, %v19423_v59  ;;  %14583 = vmatprep.mubr.msk.f32.mxu1 %vm551_vm0, %v6855_v18  ;;  %v19432_v59 = vld [vmem:[#allocation28_spill] sm:$0xff]  ;;  %v6870_v18 = vld [vmem:[%s17619_s30 + $0x168] sm:$0xff] }
 0x2ed   : > { %14576 = vmatprep.mubr.msk.f32.mxu0 %vm551_vm0, %v6853_v46  ;;  %15346 = vmatprep.subr.msk.bf16.mxu1 %vm16151_vm1, %v19424_v39  ;;  %v6875_v46 = vld [vmem:[%s17619_s30 + $0x190] sm:$0xff] }
 0x2ee   : > { %15340 = vmatprep.subr.msk.bf16.mxu0 %vm16151_vm1, %v19425_v42 }
 0x2f2   : > { %14584 = vmatmul.mubr.msk.f32.vlgmr.msra.gmra.mrb[78].mxu1 %vm551_vm0, %v6856_v36 }
 0x2f3   : > { %14577 = vmatmul.mubr.msk.f32.vlgmr.msra.gmra.mrb[78].mxu0 %vm551_vm0, %v6854_v41  ;;  %15349 = vmatpush3.bf16.xpose.msk.msra.mxu1 %vm16151_vm1, %v19424_v39 }
 0x2f4   : > { %15343 = vmatpush3.bf16.xpose.msk.msra.mxu0 %vm16151_vm1, %v19425_v42  ;;  %14597 = vmatprep.mubr.msk.f32.mxu1 %vm551_vm0, %v6859_v57  ;;  %v6873_v42 = vld [vmem:[%s17619_s30 + $0x180] sm:$0xff] }
 0x2f5   : > { %14590 = vmatprep.mubr.msk.f32.mxu0 %vm551_vm0, %v6857_v56  ;;  %15358 = vmatprep.subr.msk.bf16.mxu1 %vm16151_vm1, %v19426_v58  ;;  %v19434_v56 = vld [vmem:[#allocation30_spill] sm:$0xff] }
 0x2f6   : > { %15352 = vmatprep.subr.msk.bf16.mxu0 %vm16151_vm1, %v19427_v26 }
 0x2fa   : > { %14598 = vmatmul.mubr.msk.f32.vlgmr.msra.gmra.mrb[80].mxu1 %vm551_vm0, %v6860_v40  ;;  %v6874_v40 = vld [vmem:[%s17619_s30 + $0x188] sm:$0xff] }
 0x2fb   : > { %14591 = vmatmul.mubr.msk.f32.vlgmr.msra.gmra.mrb[80].mxu0 %vm551_vm0, %v6858_v24  ;;  %15361 = vmatpush3.bf16.xpose.msk.msra.mxu1 %vm16151_vm1, %v19426_v58  ;;  %v19435_v58 = vld [vmem:[#allocation29_spill] sm:$0xff]  ;;  %v6879_v24 = vld [vmem:[%s17619_s30 + $0x1b0] sm:$0xff] }
 0x2fc   : > { %15355 = vmatpush3.bf16.xpose.msk.msra.mxu0 %vm16151_vm1, %v19427_v26  ;;  %14611 = vmatprep.mubr.msk.f32.mxu1 %vm551_vm0, %v6863_v48  ;;  %v6876_v26 = vld [vmem:[%s17619_s30 + $0x198] sm:$0xff] }
 0x2fd   : > { %14604 = vmatprep.mubr.msk.f32.mxu0 %vm551_vm0, %v6861_v2  ;;  %15370 = vmatprep.subr.msk.bf16.mxu1 %vm16151_vm1, %v19428_v3  ;;  %v6877_v2 = vld [vmem:[%s17619_s30 + $0x1a0] sm:$0xff] }
 0x2fe   : > { %15364 = vmatprep.subr.msk.bf16.mxu0 %vm16151_vm1, %v19429_v54 }
 0x302   : > { %14612 = vmatmul.mubr.msk.f32.vlgmr.msra.gmra.mrb[82].mxu1 %vm551_vm0, %v6864_v60 }
 0x303   : > { %14605 = vmatmul.mubr.msk.f32.vlgmr.msra.gmra.mrb[82].mxu0 %vm551_vm0, %v6862_v20  ;;  %15373 = vmatpush3.bf16.xpose.msk.msra.mxu1 %vm16151_vm1, %v19428_v3  ;;  %v19436_v20 = vld [vmem:[#allocation32_spill] sm:$0xff] }
 0x304   : > { %15367 = vmatpush3.bf16.xpose.msk.msra.mxu0 %vm16151_vm1, %v19429_v54  ;;  %14625 = vmatprep.mubr.msk.f32.mxu1 %vm551_vm0, %v6867_v43  ;;  %v19437_v43 = vld [vmem:[#allocation31_spill] sm:$0xff] }
 0x305   : > { %14618 = vmatprep.mubr.msk.f32.mxu0 %vm551_vm0, %v6865_v34  ;;  %15382 = vmatprep.subr.msk.bf16.mxu1 %vm16151_vm1, %v19430_v17  ;;  %v6880_v34 = vld [vmem:[%s17619_s30 + $0x1b8] sm:$0xff] }
 0x306   : > { %15376 = vmatprep.subr.msk.bf16.mxu0 %vm16151_vm1, %v19431_v11 }
 0x308   : > { %v14256_v13 = vpop.f32.mrb[32].mxu0 }
 0x309   : > { %6762 = vst.msk [vmem:[%s17847_s9 + $0x8] sm:$0xff] %vm551_vm0, %v14256_v13  ;;  %v4241_v63 = vpop.f32.mrb[33].mxu0 }
 0x30a   : > { %14626 = vmatmul.mubr.msk.f32.vlgmr.msra.gmra.mrb[84].mxu1 %vm551_vm0, %v6868_v62  ;;  %6761 = vst.msk [vmem:[%s17847_s9] sm:$0xff] %vm551_vm0, %v4241_v63 }
 0x30b   : > { %14619 = vmatmul.mubr.msk.f32.vlgmr.msra.gmra.mrb[84].mxu0 %vm551_vm0, %v6866_v30  ;;  %15385 = vmatpush3.bf16.xpose.msk.msra.mxu1 %vm16151_vm1, %v19430_v17  ;;  %v6878_v17 = vld [vmem:[%s17619_s30 + $0x1a8] sm:$0xff]  ;;  %v6881_v30 = vld [vmem:[%s17619_s30 + $0x1c0] sm:$0xff] }
 0x30c   : > { %15379 = vmatpush3.bf16.xpose.msk.msra.mxu0 %vm16151_vm1, %v19431_v11  ;;  %v14263_v27 = vpop.f32.mrb[32].mxu1  ;;  %14639 = vmatprep.mubr.msk.f32.mxu1 %vm551_vm0, %v6871_v14  ;;  %v6883_v11 = vld [vmem:[%s17619_s30 + $0x1d0] sm:$0xff] }
 0x30d   : > { %6764 = vst.msk [vmem:[%s17847_s9 + $0x18] sm:$0xff] %vm551_vm0, %v14263_v27  ;;  %v4322_v31 = vpop.f32.mrb[33].mxu1  ;;  %14632 = vmatprep.mubr.msk.f32.mxu0 %vm551_vm0, %v6869_v21  ;;  %15394 = vmatprep.subr.msk.bf16.mxu1 %vm16151_vm1, %v19432_v59  ;;  %v19438_v21 = vld [vmem:[#allocation33_spill] sm:$0xff]  ;;  %v19439_v27 = vld [vmem:[#allocation34_spill] sm:$0xff] }
 0x30e   : > { %6763 = vst.msk [vmem:[%s17847_s9 + $0x10] sm:$0xff] %vm551_vm0, %v4322_v31  ;;  %15388 = vmatprep.subr.msk.bf16.mxu0 %vm16151_vm1, %v19433_v55  ;;  %v6884_v31 = vld [vmem:[%s17619_s30 + $0x1d8] sm:$0xff] }
 0x312   : > { %14640 = vmatmul.mubr.msk.f32.vlgmr.msra.gmra.mrb[86].mxu1 %vm551_vm0, %v6872_v33  ;;  %v14270_v39 = vpop.f32.mrb[34].mxu0 }
 0x313   : > { %6766 = vst.msk [vmem:[%s17847_s9 + $0x28] sm:$0xff] %vm551_vm0, %v14270_v39  ;;  %14633 = vmatmul.mubr.msk.f32.vlgmr.msra.gmra.mrb[86].mxu0 %vm551_vm0, %v6870_v18  ;;  %15397 = vmatpush3.bf16.xpose.msk.msra.mxu1 %vm16151_vm1, %v19432_v59  ;;  %v4403_v36 = vpop.f32.mrb[35].mxu0  ;;  %v6882_v59 = vld [vmem:[%s17619_s30 + $0x1c8] sm:$0xff]  ;;  %v6885_v18 = vld [vmem:[%s17619_s30 + $0x1e0] sm:$0xff] }
 0x314   : > { %6765 = vst.msk [vmem:[%s17847_s9 + $0x20] sm:$0xff] %vm551_vm0, %v4403_v36  ;;  %15391 = vmatpush3.bf16.xpose.msk.msra.mxu0 %vm16151_vm1, %v19433_v55  ;;  %v14277_v41 = vpop.f32.mrb[34].mxu1  ;;  %14653 = vmatprep.mubr.msk.f32.mxu1 %vm551_vm0, %v6875_v46  ;;  %v6887_v55 = vld [vmem:[%s17619_s30 + $0x1f0] sm:$0xff]  ;;  %v19440_v36 = vld [vmem:[#allocation50_spill] sm:$0xff] }
 0x315   : > { %6768 = vst.msk [vmem:[%s17847_s9 + $0x38] sm:$0xff] %vm551_vm0, %v14277_v41  ;;  %v4484_v57 = vpop.f32.mrb[35].mxu1  ;;  %14646 = vmatprep.mubr.msk.f32.mxu0 %vm551_vm0, %v6873_v42  ;;  %15406 = vmatprep.subr.msk.bf16.mxu1 %vm16151_vm1, %v19434_v56  ;;  %v19441_v41 = vld [vmem:[#allocation49_spill] sm:$0xff] }
 0x316   : > { %6767 = vst.msk [vmem:[%s17847_s9 + $0x30] sm:$0xff] %vm551_vm0, %v4484_v57  ;;  %15400 = vmatprep.subr.msk.bf16.mxu0 %vm16151_vm1, %v19435_v58  ;;  %v6888_v57 = vld [vmem:[%s17619_s30 + $0x1f8] sm:$0xff]  ;;  %s18951_s30 = scalar_lea.vmem %s19090_s6, %s16141_s24 }
 0x31a   : > { %14654 = vmatmul.mubr.msk.f32.vlgmr.msra.gmra.mrb[88].mxu1 %vm551_vm0, %v6876_v26  ;;  %v14284_v48 = vpop.f32.mrb[36].mxu0 }
 0x31b   : > { %6770 = vst.msk [vmem:[%s17847_s9 + $0x48] sm:$0xff] %vm551_vm0, %v14284_v48  ;;  %14647 = vmatmul.mubr.msk.f32.vlgmr.msra.gmra.mrb[88].mxu0 %vm551_vm0, %v6874_v40  ;;  %15409 = vmatpush3.bf16.xpose.msk.msra.mxu1 %vm16151_vm1, %v19434_v56  ;;  %v4565_v3 = vpop.f32.mrb[37].mxu0 }
 0x31c   : > { %6769 = vst.msk [vmem:[%s17847_s9 + $0x40] sm:$0xff] %vm551_vm0, %v4565_v3  ;;  %15403 = vmatpush3.bf16.xpose.msk.msra.mxu0 %vm16151_vm1, %v19435_v58  ;;  %v14291_v54 = vpop.f32.mrb[36].mxu1  ;;  %14667 = vmatprep.mubr.msk.f32.mxu1 %vm551_vm0, %v6879_v24 }
 0x31d   : > { %6772 = vst.msk [vmem:[%s17847_s9 + $0x58] sm:$0xff] %vm551_vm0, %v14291_v54  ;;  %v4646_v60 = vpop.f32.mrb[37].mxu1  ;;  %14660 = vmatprep.mubr.msk.f32.mxu0 %vm551_vm0, %v6877_v2  ;;  %15418 = vmatprep.subr.msk.bf16.mxu1 %vm16151_vm1, %v19436_v20 }
 0x31e   : > { %6771 = vst.msk [vmem:[%s17847_s9 + $0x50] sm:$0xff] %vm551_vm0, %v4646_v60  ;;  %15412 = vmatprep.subr.msk.bf16.mxu0 %vm16151_vm1, %v19437_v43 }
 0x322   : > { %14668 = vmatmul.mubr.msk.f32.vlgmr.msra.gmra.mrb[90].mxu1 %vm551_vm0, %v6880_v34  ;;  %v14298_v62 = vpop.f32.mrb[38].mxu0 }
 0x323   : > { %6774 = vst.msk [vmem:[%s17847_s9 + $0x68] sm:$0xff] %vm551_vm0, %v14298_v62  ;;  %14661 = vmatmul.mubr.msk.f32.vlgmr.msra.gmra.mrb[90].mxu0 %vm551_vm0, %v6878_v17  ;;  %15421 = vmatpush3.bf16.xpose.msk.msra.mxu1 %vm16151_vm1, %v19436_v20  ;;  %v4727_v13 = vpop.f32.mrb[39].mxu0 }
 0x324   : > { %6773 = vst.msk [vmem:[%s17847_s9 + $0x60] sm:$0xff] %vm551_vm0, %v4727_v13  ;;  %15415 = vmatpush3.bf16.xpose.msk.msra.mxu0 %vm16151_vm1, %v19437_v43  ;;  %v14305_v14 = vpop.f32.mrb[38].mxu1  ;;  %14681 = vmatprep.mubr.msk.f32.mxu1 %vm551_vm0, %v6883_v11 }
 0x325   : > { %6776 = vst.msk [vmem:[%s17847_s9 + $0x78] sm:$0xff] %vm551_vm0, %v14305_v14  ;;  %v4808_v63 = vpop.f32.mrb[39].mxu1  ;;  %14674 = vmatprep.mubr.msk.f32.mxu0 %vm551_vm0, %v6881_v30  ;;  %15430 = vmatprep.subr.msk.bf16.mxu1 %vm16151_vm1, %v19438_v21 }
 0x326   : > { %6775 = vst.msk [vmem:[%s17847_s9 + $0x70] sm:$0xff] %vm551_vm0, %v4808_v63  ;;  %15424 = vmatprep.subr.msk.bf16.mxu0 %vm16151_vm1, %v19439_v27 }
 0x32a   : > { %14682 = vmatmul.mubr.msk.f32.vlgmr.msra.gmra.mrb[92].mxu1 %vm551_vm0, %v6884_v31  ;;  %v14312_v33 = vpop.f32.mrb[40].mxu0 }
 0x32b   : > { %6778 = vst.msk [vmem:[%s17847_s9 + $0x88] sm:$0xff] %vm551_vm0, %v14312_v33  ;;  %14675 = vmatmul.mubr.msk.f32.vlgmr.msra.gmra.mrb[92].mxu0 %vm551_vm0, %v6882_v59  ;;  %15433 = vmatpush3.bf16.xpose.msk.msra.mxu1 %vm16151_vm1, %v19438_v21  ;;  %v4889_v46 = vpop.f32.mrb[41].mxu0 }
 0x32c   : > { %6777 = vst.msk [vmem:[%s17847_s9 + $0x80] sm:$0xff] %vm551_vm0, %v4889_v46  ;;  %15427 = vmatpush3.bf16.xpose.msk.msra.mxu0 %vm16151_vm1, %v19439_v27  ;;  %v14319_v39 = vpop.f32.mrb[40].mxu1  ;;  %14695 = vmatprep.mubr.msk.f32.mxu1 %vm551_vm0, %v6887_v55 }
 0x32d   : > { %6780 = vst.msk [vmem:[%s17847_s9 + $0x98] sm:$0xff] %vm551_vm0, %v14319_v39  ;;  %v4970_v42 = vpop.f32.mrb[41].mxu1  ;;  %14688 = vmatprep.mubr.msk.f32.mxu0 %vm551_vm0, %v6885_v18  ;;  %15439 = vmatprep.subr.bf16.mxu1 %v19440_v36 }
 0x32e   : > { %6779 = vst.msk [vmem:[%s17847_s9 + $0x90] sm:$0xff] %vm551_vm0, %v4970_v42  ;;  %15435 = vmatprep.subr.bf16.mxu0 %v19441_v41 }
 0x332   : > { %14696 = vmatmul.mubr.msk.f32.vlgmr.msra.gmra.mrb[94].mxu1 %vm551_vm0, %v6888_v57  ;;  %v14326_v56 = vpop.f32.mrb[42].mxu0 }
 0x333   : > { %6782 = vst.msk [vmem:[%s17847_s9 + $0xa8] sm:$0xff] %vm551_vm0, %v14326_v56  ;;  %14689 = vmatmul.mubr.msk.f32.vlgmr.msra.gmra.mrb[94].mxu0 %vm551_vm0, %v6886_v6  ;;  %v5051_v58 = vpop.f32.mrb[43].mxu0  ;;  %15441 = vmatpush3.bf16.msra.mxu1 %v19440_v36 }
 0x334   : > { %6781 = vst.msk [vmem:[%s17847_s9 + $0xa0] sm:$0xff] %vm551_vm0, %v5051_v58  ;;  %v14333_v26 = vpop.f32.mrb[42].mxu1  ;;  %15437 = vmatpush3.bf16.msra.mxu0 %v19441_v41  ;;  %15447 = vmatprep.subr.bf16.mxu1 %v17104_v47 }
 0x335   : > { %6784 = vst.msk [vmem:[%s17847_s9 + $0xb8] sm:$0xff] %vm551_vm0, %v14333_v26  ;;  %v5132_v40 = vpop.f32.mrb[43].mxu1  ;;  %15443 = vmatprep.subr.bf16.mxu0 %v17091_v29 }
 0x336   : > { %6783 = vst.msk [vmem:[%s17847_s9 + $0xb0] sm:$0xff] %vm551_vm0, %v5132_v40 }
 0x33a   : > { %v14340_v24 = vpop.f32.mrb[44].mxu0 }
 0x33b   : > { %6786 = vst.msk [vmem:[%s17847_s9 + $0xc8] sm:$0xff] %vm551_vm0, %v14340_v24  ;;  %v5213_v48 = vpop.f32.mrb[45].mxu0 }
 0x33c   : > { %6785 = vst.msk [vmem:[%s17847_s9 + $0xc0] sm:$0xff] %vm551_vm0, %v5213_v48  ;;  %v14347_v2 = vpop.f32.mrb[44].mxu1 }
 0x33d   : > { %6788 = vst.msk [vmem:[%s17847_s9 + $0xd8] sm:$0xff] %vm551_vm0, %v14347_v2  ;;  %v5294_v3 = vpop.f32.mrb[45].mxu1 }
 0x33e   : > { %6787 = vst.msk [vmem:[%s17847_s9 + $0xd0] sm:$0xff] %vm551_vm0, %v5294_v3 }
 0x342   : > { %v14354_v54 = vpop.f32.mrb[46].mxu0 }
 0x343   : > { %6790 = vst.msk [vmem:[%s17847_s9 + $0xe8] sm:$0xff] %vm551_vm0, %v14354_v54  ;;  %v5375_v60 = vpop.f32.mrb[47].mxu0 }
 0x344   : > { %6789 = vst.msk [vmem:[%s17847_s9 + $0xe0] sm:$0xff] %vm551_vm0, %v5375_v60  ;;  %v14361_v20 = vpop.f32.mrb[46].mxu1 }
 0x345   : > { %6792 = vst.msk [vmem:[%s17847_s9 + $0xf8] sm:$0xff] %vm551_vm0, %v14361_v20  ;;  %v5456_v43 = vpop.f32.mrb[47].mxu1 }
 0x346   : > { %6791 = vst.msk [vmem:[%s17847_s9 + $0xf0] sm:$0xff] %vm551_vm0, %v5456_v43 }
 0x34a   : > { %v14368_v34 = vpop.f32.mrb[48].mxu0 }
 0x34b   : > { %6794 = vst.msk [vmem:[%s17847_s9 + $0x108] sm:$0xff] %vm551_vm0, %v14368_v34  ;;  %v5537_v17 = vpop.f32.mrb[49].mxu0 }
 0x34c   : > { %6793 = vst.msk [vmem:[%s17847_s9 + $0x100] sm:$0xff] %vm551_vm0, %v5537_v17  ;;  %v14375_v11 = vpop.f32.mrb[48].mxu1 }
 0x34d   : > { %6796 = vst.msk [vmem:[%s17847_s9 + $0x118] sm:$0xff] %vm551_vm0, %v14375_v11  ;;  %v5618_v62 = vpop.f32.mrb[49].mxu1 }
 0x34e   : > { %6795 = vst.msk [vmem:[%s17847_s9 + $0x110] sm:$0xff] %vm551_vm0, %v5618_v62 }
 0x352   : > { %v14382_v30 = vpop.f32.mrb[50].mxu0 }
 0x353   : > { %6798 = vst.msk [vmem:[%s17847_s9 + $0x128] sm:$0xff] %vm551_vm0, %v14382_v30  ;;  %v5699_v13 = vpop.f32.mrb[51].mxu0 }
 0x354   : > { %6797 = vst.msk [vmem:[%s17847_s9 + $0x120] sm:$0xff] %vm551_vm0, %v5699_v13  ;;  %v14389_v14 = vpop.f32.mrb[50].mxu1  ;;  %v18084_v13 = vld [vmem:[%s19084_s0 + $0x18] sm:$0xff] }
 0x355   : > { %6800 = vst.msk [vmem:[%s17847_s9 + $0x138] sm:$0xff] %vm551_vm0, %v14389_v14  ;;  %v5780_v63 = vpop.f32.mrb[51].mxu1 }
 0x356   : > { %6799 = vst.msk [vmem:[%s17847_s9 + $0x130] sm:$0xff] %vm551_vm0, %v5780_v63 }
 0x35a   : > { %v14396_v21 = vpop.f32.mrb[52].mxu0 }
 0x35b   : > { %6802 = vst.msk [vmem:[%s17847_s9 + $0x148] sm:$0xff] %vm551_vm0, %v14396_v21  ;;  %v5861_v27 = vpop.f32.mrb[53].mxu0  ;;  %v18092_v21 = vld [vmem:[%s19084_s0 + $0x8] sm:$0xff] }
 0x35c   : > { %6801 = vst.msk [vmem:[%s17847_s9 + $0x140] sm:$0xff] %vm551_vm0, %v5861_v27  ;;  %v14403_v31 = vpop.f32.mrb[52].mxu1 }
 0x35d   : > { %6804 = vst.msk [vmem:[%s17847_s9 + $0x158] sm:$0xff] %vm551_vm0, %v14403_v31  ;;  %v5942_v59 = vpop.f32.mrb[53].mxu1  ;;  %v18100_v31 = vld [vmem:[%s19084_s0 + $0x10] sm:$0xff] }
 0x35e   : > { %6803 = vst.msk [vmem:[%s17847_s9 + $0x150] sm:$0xff] %vm551_vm0, %v5942_v59 }
 0x362   : > { %v14410_v55 = vpop.f32.mrb[54].mxu0 }
 0x363   : > { %6806 = vst.msk [vmem:[%s17847_s9 + $0x168] sm:$0xff] %vm551_vm0, %v14410_v55  ;;  %v6023_v33 = vpop.f32.mrb[55].mxu0 }
 0x364   : > { %6805 = vst.msk [vmem:[%s17847_s9 + $0x160] sm:$0xff] %vm551_vm0, %v6023_v33  ;;  %v14417_v18 = vpop.f32.mrb[54].mxu1  ;;  %v18110_v33 = vld [vmem:[%s19084_s0] sm:$0xff] }
 0x365   : > { %6808 = vst.msk [vmem:[%s17847_s9 + $0x178] sm:$0xff] %vm551_vm0, %v14417_v18  ;;  %v6104_v46 = vpop.f32.mrb[55].mxu1 }
 0x366   : > { %6807 = vst.msk [vmem:[%s17847_s9 + $0x170] sm:$0xff] %vm551_vm0, %v6104_v46 }
 0x36a   : > { %v14424_v39 = vpop.f32.mrb[56].mxu0 }
 0x36b   : > { %6810 = vst.msk [vmem:[%s17847_s9 + $0x188] sm:$0xff] %vm551_vm0, %v14424_v39  ;;  %v6185_v42 = vpop.f32.mrb[57].mxu0 }
 0x36c   : > { %6809 = vst.msk [vmem:[%s17847_s9 + $0x180] sm:$0xff] %vm551_vm0, %v6185_v42  ;;  %v14431_v36 = vpop.f32.mrb[56].mxu1 }
 0x36d   : > { %6812 = vst.msk [vmem:[%s17847_s9 + $0x198] sm:$0xff] %vm551_vm0, %v14431_v36  ;;  %v6266_v41 = vpop.f32.mrb[57].mxu1 }
 0x36e   : > { %6811 = vst.msk [vmem:[%s17847_s9 + $0x190] sm:$0xff] %vm551_vm0, %v6266_v41 }
 0x372   : > { %v14438_v57 = vpop.f32.mrb[58].mxu0 }
 0x373   : > { %6814 = vst.msk [vmem:[%s17847_s9 + $0x1a8] sm:$0xff] %vm551_vm0, %v14438_v57  ;;  %v6347_v6 = vpop.f32.mrb[59].mxu0 }
 0x374   : > { %6813 = vst.msk [vmem:[%s17847_s9 + $0x1a0] sm:$0xff] %vm551_vm0, %v6347_v6  ;;  %v14445_v56 = vpop.f32.mrb[58].mxu1 }
 0x375   : > { %6816 = vst.msk [vmem:[%s17847_s9 + $0x1b8] sm:$0xff] %vm551_vm0, %v14445_v56  ;;  %v6428_v58 = vpop.f32.mrb[59].mxu1 }
 0x376   : > { %6815 = vst.msk [vmem:[%s17847_s9 + $0x1b0] sm:$0xff] %vm551_vm0, %v6428_v58 }
 0x37c   : > { %v14459_v26 = vpop.f32.mrb[60].mxu1 }
 0x37d   : > { %6820 = vst.msk [vmem:[%s17847_s9 + $0x1d8] sm:$0xff] %vm551_vm0, %v14459_v26  ;;  %v14452_v40 = vpop.f32.mrb[60].mxu0  ;;  %v6590_v24 = vpop.f32.mrb[61].mxu1 }
 0x37e   : > { %6818 = vst.msk [vmem:[%s17847_s9 + $0x1c8] sm:$0xff] %vm551_vm0, %v14452_v40  ;;  %6819 = vst.msk [vmem:[%s17847_s9 + $0x1d0] sm:$0xff] %vm551_vm0, %v6590_v24  ;;  %v6509_v48 = vpop.f32.mrb[61].mxu0  ;;  %v18124_v40 = vld [vmem:[%s19084_s0 + $0x38] sm:$0xff] }
 0x37f   : > { %6817 = vst.msk [vmem:[%s17847_s9 + $0x1c0] sm:$0xff] %vm551_vm0, %v6509_v48 }
 0x384   : > { %v14473_v2 = vpop.f32.mrb[62].mxu1 }
 0x385   : > { %6824 = vst.msk [vmem:[%s17847_s9 + $0x1f8] sm:$0xff] %vm551_vm0, %v14473_v2  ;;  %v14466_v3 = vpop.f32.mrb[62].mxu0  ;;  %v6752_v54 = vpop.f32.mrb[63].mxu1  ;;  %v18132_v2 = vld [vmem:[%s19084_s0 + $0x28] sm:$0xff] }
 0x386   : > { %6822 = vst.msk [vmem:[%s17847_s9 + $0x1e8] sm:$0xff] %vm551_vm0, %v14466_v3  ;;  %6823 = vst.msk [vmem:[%s17847_s9 + $0x1f0] sm:$0xff] %vm551_vm0, %v6752_v54  ;;  %v6671_v60 = vpop.f32.mrb[63].mxu0  ;;  %v18140_v54 = vld [vmem:[%s19084_s0 + $0x30] sm:$0xff] }
 0x387   : > { %6821 = vst.msk [vmem:[%s17847_s9 + $0x1e0] sm:$0xff] %vm551_vm0, %v6671_v60 }
 0x38d   : > { %v14487_v20 = vpop.f32.mrb[64].mxu1 }
 0x38e   : > { %v9484_v43 = vmul.f32 0.35355338, %v14487_v20  ;;  %v14480_v34 = vpop.f32.mrb[64].mxu0  ;;  %v7042_v17 = vpop.f32.mrb[65].mxu1 }
 0x38f   : > { %v9482_v11 = vmul.f32 0.35355338, %v14480_v34  ;;  %v9483_v62 = vmul.f32 0.35355338, %v7042_v17  ;;  %v6961_v30 = vpop.f32.mrb[65].mxu0 }
 0x390   : > { %v18087_v14 = vadd.f32 %v18084_v13, %v9484_v43  ;;  %v9481_v63 = vmul.f32 0.35355338, %v6961_v30  ;;  %v18150_v43 = vld [vmem:[%s19084_s0 + $0x20] sm:$0xff] }
 0x391   : > { %v18095_v27 = vadd.f32 %v18092_v21, %v9482_v11  ;;  %v18103_v59 = vadd.f32 %v18100_v31, %v9483_v62 }
 0x392   : > { %v9618_v55 = vsel %vm3464_vm2, %v18087_v14, -inf  ;;  %v18113_v18 = vadd.f32 %v18110_v33, %v9481_v63 }
 0x393   : > { %9619 = vmax.xlane.f32.xlu1 %v9618_v55  ;;  %v9612_v46 = vsel %vm3464_vm2, %v18095_v27, -inf  ;;  %v9615_v57 = vsel %vm3464_vm2, %v18103_v59, -inf }
 0x394   : > { %9613 = vmax.xlane.f32.xlu0 %v9612_v46  ;;  %v9609_v26 = vsel %vm3464_vm2, %v18113_v18, -inf }
 0x395   : > { %v14501_v39 = vpop.f32.mrb[66].mxu1 }
 0x396   : > { %v9488_v42 = vmul.f32 0.35355338, %v14501_v39  ;;  %v14494_v36 = vpop.f32.mrb[66].mxu0  ;;  %v7204_v41 = vpop.f32.mrb[67].mxu1 }
 0x397   : > { %v9486_v6 = vmul.f32 0.35355338, %v14494_v36  ;;  %v9487_v56 = vmul.f32 0.35355338, %v7204_v41  ;;  %9616 = vmax.xlane.f32.xlu1 %v9615_v57  ;;  %v7123_v58 = vpop.f32.mrb[67].mxu0 }
 0x398   : > { %v18127_v24 = vadd.f32 %v18124_v40, %v9488_v42  ;;  %v9485_v48 = vmul.f32 0.35355338, %v7123_v58  ;;  %9610 = vmax.xlane.f32.xlu0 %v9609_v26 }
 0x399   : > { %v18135_v3 = vadd.f32 %v18132_v2, %v9486_v6  ;;  %v18143_v60 = vadd.f32 %v18140_v54, %v9487_v56 }
 0x39a   : > { %v9630_v20 = vsel %vm3464_vm2, %v18127_v24, -inf  ;;  %v18153_v34 = vadd.f32 %v18150_v43, %v9485_v48 }
 0x39b   : > { %9631 = vmax.xlane.f32.xlu1 %v9630_v20  ;;  %v9624_v17 = vsel %vm3464_vm2, %v18135_v3, -inf  ;;  %v9627_v55 = vsel %vm3464_vm2, %v18143_v60, -inf }
 0x39c   : > { %9625 = vmax.xlane.f32.xlu0 %v9624_v17  ;;  %v9621_v36 = vsel %vm3464_vm2, %v18153_v34, -inf }
 0x39d   : > { %v14515_v11 = vpop.f32.mrb[68].mxu1 }
 0x39e   : > { %v9492_v62 = vmul.f32 0.35355338, %v14515_v11  ;;  %v14508_v30 = vpop.f32.mrb[68].mxu0  ;;  %v7366_v63 = vpop.f32.mrb[69].mxu1 }
 0x39f   : > { %v9490_v46 = vmul.f32 0.35355338, %v14508_v30  ;;  %v9491_v39 = vmul.f32 0.35355338, %v7366_v63  ;;  %9628 = vmax.xlane.f32.xlu1 %v9627_v55  ;;  %v7285_v42 = vpop.f32.mrb[69].mxu0 }
 0x3a0   : > { %v18162_v41 = vadd.f32 %v18084_v13, %v9492_v62  ;;  %v9489_v57 = vmul.f32 0.35355338, %v7285_v42  ;;  %9622 = vmax.xlane.f32.xlu0 %v9621_v36 }
 0x3a1   : > { %v18165_v6 = vadd.f32 %v18092_v21, %v9490_v46  ;;  %v18168_v56 = vadd.f32 %v18100_v31, %v9491_v39 }
 0x3a2   : > { %v9642_v58 = vsel %vm3464_vm2, %v18162_v41, -inf  ;;  %v18173_v26 = vadd.f32 %v18110_v33, %v9489_v57 }
 0x3a3   : > { %9643 = vmax.xlane.f32.xlu1 %v9642_v58  ;;  %v9636_v48 = vsel %vm3464_vm2, %v18165_v6, -inf  ;;  %v9639_v30 = vsel %vm3464_vm2, %v18168_v56, -inf }
 0x3a4   : > { %9637 = vmax.xlane.f32.xlu0 %v9636_v48  ;;  %v9633_v39 = vsel %vm3464_vm2, %v18173_v26, -inf }
 0x3a5   : > { %v14529_v20 = vpop.f32.mrb[70].mxu1 }
 0x3a6   : > { %v9496_v17 = vmul.f32 0.35355338, %v14529_v20  ;;  %v14522_v11 = vpop.f32.mrb[70].mxu0  ;;  %v7528_v62 = vpop.f32.mrb[71].mxu1 }
 0x3a7   : > { %v9494_v63 = vmul.f32 0.35355338, %v14522_v11  ;;  %v9495_v55 = vmul.f32 0.35355338, %v7528_v62  ;;  %9640 = vmax.xlane.f32.xlu1 %v9639_v30  ;;  %v7447_v46 = vpop.f32.mrb[71].mxu0 }
 0x3a8   : > { %v18182_v42 = vadd.f32 %v18124_v40, %v9496_v17  ;;  %v9493_v36 = vmul.f32 0.35355338, %v7447_v46  ;;  %9634 = vmax.xlane.f32.xlu0 %v9633_v39 }
 0x3a9   : > { %v18185_v57 = vadd.f32 %v18132_v2, %v9494_v63  ;;  %v18188_v58 = vadd.f32 %v18140_v54, %v9495_v55 }
 0x3aa   : > { %v9654_v48 = vsel %vm3464_vm2, %v18182_v42, -inf  ;;  %v18193_v20 = vadd.f32 %v18150_v43, %v9493_v36 }
 0x3ab   : > { %9655 = vmax.xlane.f32.xlu1 %v9654_v48  ;;  %v9648_v11 = vsel %vm3464_vm2, %v18185_v57, -inf  ;;  %v9651_v63 = vsel %vm3464_vm2, %v18188_v58, -inf }
 0x3ac   : > { %9649 = vmax.xlane.f32.xlu0 %v9648_v11  ;;  %v9645_v36 = vsel %vm3464_vm2, %v18193_v20, -inf }
 0x3ad   : > { %v14543_v17 = vpop.f32.mrb[72].mxu1 }
 0x3ae   : > { %v9500_v62 = vmul.f32 0.35355338, %v14543_v17  ;;  %v14536_v30 = vpop.f32.mrb[72].mxu0  ;;  %v7690_v46 = vpop.f32.mrb[73].mxu1 }
 0x3af   : > { %v9498_v55 = vmul.f32 0.35355338, %v14536_v30  ;;  %v9499_v39 = vmul.f32 0.35355338, %v7690_v46  ;;  %9652 = vmax.xlane.f32.xlu1 %v9651_v63  ;;  %v7609_v15 = vpop.f32.mrb[73].mxu0 }
 0x3b0   : > { %v18202_v48 = vadd.f32 %v18084_v13, %v9500_v62  ;;  %v9497_v16 = vmul.f32 0.35355338, %v7609_v15  ;;  %9646 = vmax.xlane.f32.xlu0 %v9645_v36 }
 0x3b1   : > { %v18205_v11 = vadd.f32 %v18092_v21, %v9498_v55  ;;  %v18208_v17 = vadd.f32 %v18100_v31, %v9499_v39 }
 0x3b2   : > { %v9666_v30 = vsel %vm3464_vm2, %v18202_v48, -inf  ;;  %v18213_v46 = vadd.f32 %v18110_v33, %v9497_v16 }
 0x3b3   : > { %9667 = vmax.xlane.f32.xlu1 %v9666_v30  ;;  %v9660_v63 = vsel %vm3464_vm2, %v18205_v11, -inf  ;;  %v9663_v55 = vsel %vm3464_vm2, %v18208_v17, -inf }
 0x3b4   : > { %9661 = vmax.xlane.f32.xlu0 %v9660_v63  ;;  %v9657_v16 = vsel %vm3464_vm2, %v18213_v46, -inf }
 0x3b5   : > { %v14557_v62 = vpop.f32.mrb[74].mxu1 }
 0x3b6   : > { %v9504_v15 = vmul.f32 0.35355338, %v14557_v62  ;;  %v14550_v36 = vpop.f32.mrb[74].mxu0  ;;  %v7852_v45 = vpop.f32.mrb[75].mxu1 }
 0x3b7   : > { %v9502_v39 = vmul.f32 0.35355338, %v14550_v36  ;;  %v9503_v23 = vmul.f32 0.35355338, %v7852_v45  ;;  %9664 = vmax.xlane.f32.xlu1 %v9663_v55  ;;  %v7771_v49 = vpop.f32.mrb[75].mxu0 }
 0x3b8   : > { %v18222_v30 = vadd.f32 %v18124_v40, %v9504_v15  ;;  %v9501_v7 = vmul.f32 0.35355338, %v7771_v49  ;;  %9658 = vmax.xlane.f32.xlu0 %v9657_v16 }
 0x3b9   : > { %v18225_v63 = vadd.f32 %v18132_v2, %v9502_v39  ;;  %v18228_v62 = vadd.f32 %v18140_v54, %v9503_v23 }
 0x3ba   : > { %v9678_v36 = vsel %vm3464_vm2, %v18222_v30, -inf  ;;  %v18233_v45 = vadd.f32 %v18150_v43, %v9501_v7 }
 0x3bb   : > { %9679 = vmax.xlane.f32.xlu1 %v9678_v36  ;;  %v9672_v55 = vsel %vm3464_vm2, %v18225_v63, -inf  ;;  %v9675_v39 = vsel %vm3464_vm2, %v18228_v62, -inf }
 0x3bc   : > { %9673 = vmax.xlane.f32.xlu0 %v9672_v55  ;;  %v9669_v7 = vsel %vm3464_vm2, %v18233_v45, -inf }
 0x3bd   : > { %v14571_v15 = vpop.f32.mrb[76].mxu1 }
 0x3be   : > { %v9508_v49 = vmul.f32 0.35355338, %v14571_v15  ;;  %v14564_v16 = vpop.f32.mrb[76].mxu0  ;;  %v8014_v44 = vpop.f32.mrb[77].mxu1 }
 0x3bf   : > { %v9506_v23 = vmul.f32 0.35355338, %v14564_v16  ;;  %v9507_v1 = vmul.f32 0.35355338, %v8014_v44  ;;  %9676 = vmax.xlane.f32.xlu1 %v9675_v39  ;;  %v7933_v9 = vpop.f32.mrb[77].mxu0 }
 0x3c0   : > { %v18242_v36 = vadd.f32 %v18084_v13, %v9508_v49  ;;  %v9505_v28 = vmul.f32 0.35355338, %v7933_v9  ;;  %9670 = vmax.xlane.f32.xlu0 %v9669_v7 }
 0x3c1   : > { %v18245_v55 = vadd.f32 %v18092_v21, %v9506_v23  ;;  %v18248_v15 = vadd.f32 %v18100_v31, %v9507_v1 }
 0x3c2   : > { %v9690_v16 = vsel %vm3464_vm2, %v18242_v36, -inf  ;;  %v18253_v44 = vadd.f32 %v18110_v33, %v9505_v28 }
 0x3c3   : > { %9691 = vmax.xlane.f32.xlu1 %v9690_v16  ;;  %v9684_v39 = vsel %vm3464_vm2, %v18245_v55, -inf  ;;  %v9687_v23 = vsel %vm3464_vm2, %v18248_v15, -inf }
 0x3c4   : > { %9685 = vmax.xlane.f32.xlu0 %v9684_v39  ;;  %v9681_v28 = vsel %vm3464_vm2, %v18253_v44, -inf }
 0x3c5   : > { %v14585_v49 = vpop.f32.mrb[78].mxu1 }
 0x3c6   : > { %v9512_v9 = vmul.f32 0.35355338, %v14585_v49  ;;  %v14578_v7 = vpop.f32.mrb[78].mxu0  ;;  %v8176_v4 = vpop.f32.mrb[79].mxu1 }
 0x3c7   : > { %v9510_v1 = vmul.f32 0.35355338, %v14578_v7  ;;  %v9511_v10 = vmul.f32 0.35355338, %v8176_v4  ;;  %9688 = vmax.xlane.f32.xlu1 %v9687_v23  ;;  %v8095_v8 = vpop.f32.mrb[79].mxu0 }
 0x3c8   : > { %v18262_v16 = vadd.f32 %v18124_v40, %v9512_v9  ;;  %v9509_v5 = vmul.f32 0.35355338, %v8095_v8  ;;  %9682 = vmax.xlane.f32.xlu0 %v9681_v28 }
 0x3c9   : > { %v18265_v39 = vadd.f32 %v18132_v2, %v9510_v1  ;;  %v18268_v49 = vadd.f32 %v18140_v54, %v9511_v10 }
 0x3ca   : > { %v9702_v7 = vsel %vm3464_vm2, %v18262_v16, -inf  ;;  %v18273_v4 = vadd.f32 %v18150_v43, %v9509_v5 }
 0x3cb   : > { %9703 = vmax.xlane.f32.xlu1 %v9702_v7  ;;  %v9696_v23 = vsel %vm3464_vm2, %v18265_v39, -inf  ;;  %v9699_v1 = vsel %vm3464_vm2, %v18268_v49, -inf }
 0x3cc   : > { %9697 = vmax.xlane.f32.xlu0 %v9696_v23  ;;  %v9693_v5 = vsel %vm3464_vm2, %v18273_v4, -inf }
 0x3cd   : > { %v14599_v9 = vpop.f32.mrb[80].mxu1 }
 0x3ce   : > { %v9516_v8 = vmul.f32 0.35355338, %v14599_v9  ;;  %v14592_v28 = vpop.f32.mrb[80].mxu0  ;;  %v8338_v53 = vpop.f32.mrb[81].mxu1 }
 0x3cf   : > { %v9514_v10 = vmul.f32 0.35355338, %v14592_v28  ;;  %v9515_v51 = vmul.f32 0.35355338, %v8338_v53  ;;  %9700 = vmax.xlane.f32.xlu1 %v9699_v1  ;;  %v8257_v19 = vpop.f32.mrb[81].mxu0 }
 0x3d0   : > { %v18282_v7 = vadd.f32 %v18084_v13, %v9516_v8  ;;  %v9513_v35 = vmul.f32 0.35355338, %v8257_v19  ;;  %9694 = vmax.xlane.f32.xlu0 %v9693_v5 }
 0x3d1   : > { %v18285_v23 = vadd.f32 %v18092_v21, %v9514_v10  ;;  %v18288_v9 = vadd.f32 %v18100_v31, %v9515_v51 }
 0x3d2   : > { %v9714_v28 = vsel %vm3464_vm2, %v18282_v7, -inf  ;;  %v18293_v53 = vadd.f32 %v18110_v33, %v9513_v35 }
 0x3d3   : > { %9715 = vmax.xlane.f32.xlu1 %v9714_v28  ;;  %v9708_v1 = vsel %vm3464_vm2, %v18285_v23, -inf  ;;  %v9711_v10 = vsel %vm3464_vm2, %v18288_v9, -inf }
 0x3d4   : > { %9709 = vmax.xlane.f32.xlu0 %v9708_v1  ;;  %v9705_v35 = vsel %vm3464_vm2, %v18293_v53, -inf }
 0x3d5   : > { %v14613_v8 = vpop.f32.mrb[82].mxu1 }
 0x3d6   : > { %v9520_v19 = vmul.f32 0.35355338, %v14613_v8  ;;  %v14606_v5 = vpop.f32.mrb[82].mxu0  ;;  %v8500_v50 = vpop.f32.mrb[83].mxu1 }
 0x3d7   : > { %v9518_v51 = vmul.f32 0.35355338, %v14606_v5  ;;  %v9519_v38 = vmul.f32 0.35355338, %v8500_v50  ;;  %9712 = vmax.xlane.f32.xlu1 %v9711_v10  ;;  %v8419_v32 = vpop.f32.mrb[83].mxu0 }
 0x3d8   : > { %v18302_v28 = vadd.f32 %v18124_v40, %v9520_v19  ;;  %v9517_v61 = vmul.f32 0.35355338, %v8419_v32  ;;  %9706 = vmax.xlane.f32.xlu0 %v9705_v35 }
 0x3d9   : > { %v18305_v1 = vadd.f32 %v18132_v2, %v9518_v51  ;;  %v18308_v8 = vadd.f32 %v18140_v54, %v9519_v38 }
 0x3da   : > { %v9726_v5 = vsel %vm3464_vm2, %v18302_v28, -inf  ;;  %v18313_v50 = vadd.f32 %v18150_v43, %v9517_v61 }
 0x3db   : > { %9727 = vmax.xlane.f32.xlu1 %v9726_v5  ;;  %v9720_v10 = vsel %vm3464_vm2, %v18305_v1, -inf  ;;  %v9723_v51 = vsel %vm3464_vm2, %v18308_v8, -inf }
 0x3dc   : > { %9721 = vmax.xlane.f32.xlu0 %v9720_v10  ;;  %v9717_v61 = vsel %vm3464_vm2, %v18313_v50, -inf }
 0x3dd   : > { %v14627_v19 = vpop.f32.mrb[84].mxu1 }
 0x3de   : > { %v9524_v32 = vmul.f32 0.35355338, %v14627_v19  ;;  %v14620_v35 = vpop.f32.mrb[84].mxu0  ;;  %v8662_v0 = vpop.f32.mrb[85].mxu1 }
 0x3df   : > { %v9522_v38 = vmul.f32 0.35355338, %v14620_v35  ;;  %v9523_v22 = vmul.f32 0.35355338, %v8662_v0  ;;  %9724 = vmax.xlane.f32.xlu1 %v9723_v51  ;;  %v8581_v12 = vpop.f32.mrb[85].mxu0 }
 0x3e0   : > { %v18322_v5 = vadd.f32 %v18084_v13, %v9524_v32  ;;  %v9521_v25 = vmul.f32 0.35355338, %v8581_v12  ;;  %9718 = vmax.xlane.f32.xlu0 %v9717_v61 }
 0x3e1   : > { %v18325_v10 = vadd.f32 %v18092_v21, %v9522_v38  ;;  %v18328_v19 = vadd.f32 %v18100_v31, %v9523_v22 }
 0x3e2   : > { %v9738_v35 = vsel %vm3464_vm2, %v18322_v5, -inf  ;;  %v18333_v0 = vadd.f32 %v18110_v33, %v9521_v25 }
 0x3e3   : > { %19442 = vst [vmem:[#allocation46_spill] sm:$0xff] %v18325_v10  ;;  %19443 = vst [vmem:[#allocation45_spill] sm:$0xff] %v18328_v19  ;;  %9739 = vmax.xlane.f32.xlu1 %v9738_v35  ;;  %v9732_v51 = vsel %vm3464_vm2, %v18325_v10, -inf  ;;  %v9735_v38 = vsel %vm3464_vm2, %v18328_v19, -inf }
 0x3e4   : > { %19444 = vst [vmem:[#allocation47_spill] sm:$0xff] %v18333_v0  ;;  %9733 = vmax.xlane.f32.xlu0 %v9732_v51  ;;  %v9729_v25 = vsel %vm3464_vm2, %v18333_v0, -inf }
 0x3e5   : > { %v14641_v32 = vpop.f32.mrb[86].mxu1 }
 0x3e6   : > { %v9528_v12 = vmul.f32 0.35355338, %v14641_v32  ;;  %v14634_v61 = vpop.f32.mrb[86].mxu0  ;;  %v8824_v52 = vpop.f32.mrb[87].mxu1 }
 0x3e7   : > { %v9526_v22 = vmul.f32 0.35355338, %v14634_v61  ;;  %v9527_v37 = vmul.f32 0.35355338, %v8824_v52  ;;  %9736 = vmax.xlane.f32.xlu1 %v9735_v38  ;;  %v8743_v29 = vpop.f32.mrb[87].mxu0 }
 0x3e8   : > { %v18342_v35 = vadd.f32 %v18124_v40, %v9528_v12  ;;  %v9525_v47 = vmul.f32 0.35355338, %v8743_v29  ;;  %9730 = vmax.xlane.f32.xlu0 %v9729_v25 }
 0x3e9   : > { %v18345_v51 = vadd.f32 %v18132_v2, %v9526_v22  ;;  %v18348_v32 = vadd.f32 %v18140_v54, %v9527_v37 }
 0x3ea   : > { %19445 = vst [vmem:[#allocation4_spill] sm:$0xff] %v18342_v35  ;;  %v9750_v61 = vsel %vm3464_vm2, %v18342_v35, -inf  ;;  %v18353_v52 = vadd.f32 %v18150_v43, %v9525_v47 }
 0x3eb   : > { %19446 = vst [vmem:[#allocation2_spill] sm:$0xff] %v18345_v51  ;;  %19447 = vst [vmem:[#allocation48_spill] sm:$0xff] %v18348_v32  ;;  %9751 = vmax.xlane.f32.xlu1 %v9750_v61  ;;  %v9744_v38 = vsel %vm3464_vm2, %v18345_v51, -inf  ;;  %v9747_v22 = vsel %vm3464_vm2, %v18348_v32, -inf }
 0x3ec   : > { %19448 = vst [vmem:[#allocation3_spill] sm:$0xff] %v18353_v52  ;;  %9745 = vmax.xlane.f32.xlu0 %v9744_v38  ;;  %v9741_v47 = vsel %vm3464_vm2, %v18353_v52, -inf }
 0x3ed   : > { %v14655_v12 = vpop.f32.mrb[88].mxu1 }
 0x3ee   : > { %v9532_v29 = vmul.f32 0.35355338, %v14655_v12  ;;  %v14648_v25 = vpop.f32.mrb[88].mxu0  ;;  %v8986_v0 = vpop.f32.mrb[89].mxu1 }
 0x3ef   : > { %v9530_v37 = vmul.f32 0.35355338, %v14648_v25  ;;  %v9531_v19 = vmul.f32 0.35355338, %v8986_v0  ;;  %9748 = vmax.xlane.f32.xlu1 %v9747_v22  ;;  %v8905_v10 = vpop.f32.mrb[89].mxu0 }
 0x3f0   : > { %v18362_v61 = vadd.f32 %v18084_v13, %v9532_v29  ;;  %v9529_v35 = vmul.f32 0.35355338, %v8905_v10  ;;  %9742 = vmax.xlane.f32.xlu0 %v9741_v47 }
 0x3f1   : > { %v18365_v38 = vadd.f32 %v18092_v21, %v9530_v37  ;;  %v18368_v12 = vadd.f32 %v18100_v31, %v9531_v19 }
 0x3f2   : > { %19449 = vst [vmem:[#allocation54_spill] sm:$0xff] %v18362_v61  ;;  %v9762_v25 = vsel %vm3464_vm2, %v18362_v61, -inf  ;;  %v18373_v0 = vadd.f32 %v18110_v33, %v9529_v35 }
 0x3f3   : > { %19450 = vst [vmem:[#allocation55_spill] sm:$0xff] %v18365_v38  ;;  %19451 = vst [vmem:[#allocation6_spill] sm:$0xff] %v18368_v12  ;;  %9763 = vmax.xlane.f32.xlu1 %v9762_v25  ;;  %v9756_v22 = vsel %vm3464_vm2, %v18365_v38, -inf  ;;  %v9759_v37 = vsel %vm3464_vm2, %v18368_v12, -inf }
 0x3f4   : > { %19452 = vst [vmem:[#allocation5_spill] sm:$0xff] %v18373_v0  ;;  %9757 = vmax.xlane.f32.xlu0 %v9756_v22  ;;  %v9753_v35 = vsel %vm3464_vm2, %v18373_v0, -inf }
 0x3f5   : > { %v14669_v29 = vpop.f32.mrb[90].mxu1 }
 0x3f6   : > { %v9536_v10 = vmul.f32 0.35355338, %v14669_v29  ;;  %v14662_v47 = vpop.f32.mrb[90].mxu0  ;;  %v9148_v52 = vpop.f32.mrb[91].mxu1 }
 0x3f7   : > { %v9534_v19 = vmul.f32 0.35355338, %v14662_v47  ;;  %v9535_v32 = vmul.f32 0.35355338, %v9148_v52  ;;  %9760 = vmax.xlane.f32.xlu1 %v9759_v37  ;;  %v9067_v51 = vpop.f32.mrb[91].mxu0 }
 0x3f8   : > { %v18382_v25 = vadd.f32 %v18124_v40, %v9536_v10  ;;  %v9533_v61 = vmul.f32 0.35355338, %v9067_v51  ;;  %9754 = vmax.xlane.f32.xlu0 %v9753_v35 }
 0x3f9   : > { %v18385_v22 = vadd.f32 %v18132_v2, %v9534_v19  ;;  %v18388_v29 = vadd.f32 %v18140_v54, %v9535_v32 }
 0x3fa   : > { %19453 = vst [vmem:[#allocation8_spill] sm:$0xff] %v18382_v25  ;;  %v9774_v47 = vsel %vm3464_vm2, %v18382_v25, -inf  ;;  %v18393_v52 = vadd.f32 %v18150_v43, %v9533_v61 }
 0x3fb   : > { %9775 = vmax.xlane.f32.xlu1 %v9774_v47  ;;  %v9768_v37 = vsel %vm3464_vm2, %v18385_v22, -inf  ;;  %v9771_v19 = vsel %vm3464_vm2, %v18388_v29, -inf }
 0x3fc   : > { %9769 = vmax.xlane.f32.xlu0 %v9768_v37  ;;  %v9765_v61 = vsel %vm3464_vm2, %v18393_v52, -inf }
 0x3fd   : > { %v14683_v10 = vpop.f32.mrb[92].mxu1 }
 0x3fe   : > { %v9540_v51 = vmul.f32 0.35355338, %v14683_v10  ;;  %v14676_v35 = vpop.f32.mrb[92].mxu0  ;;  %v9310_v0 = vpop.f32.mrb[93].mxu1 }
 0x3ff   : > { %v9538_v32 = vmul.f32 0.35355338, %v14676_v35  ;;  %v9539_v12 = vmul.f32 0.35355338, %v9310_v0  ;;  %9772 = vmax.xlane.f32.xlu1 %v9771_v19  ;;  %v9229_v38 = vpop.f32.mrb[93].mxu0 }
 0x400   : > { %v18402_v47 = vadd.f32 %v18084_v13, %v9540_v51  ;;  %v9537_v25 = vmul.f32 0.35355338, %v9229_v38  ;;  %9766 = vmax.xlane.f32.xlu0 %v9765_v61 }
 0x401   : > { %v18405_v37 = vadd.f32 %v18092_v21, %v9538_v32  ;;  %v18408_v10 = vadd.f32 %v18100_v31, %v9539_v12 }
 0x402   : > { %v9786_v35 = vsel %vm3464_vm2, %v18402_v47, -inf  ;;  %v18413_v0 = vadd.f32 %v18110_v33, %v9537_v25 }
 0x403   : > { %9787 = vmax.xlane.f32.xlu1 %v9786_v35  ;;  %v9780_v19 = vsel %vm3464_vm2, %v18405_v37, -inf  ;;  %v9783_v21 = vsel %vm3464_vm2, %v18408_v10, -inf }
 0x404   : > { %9781 = vmax.xlane.f32.xlu0 %v9780_v19  ;;  %v9777_v33 = vsel %vm3464_vm2, %v18413_v0, -inf }
 0x405   : > { %v14697_v13 = vpop.f32.mrb[94].mxu1 }
 0x406   : > { %v9544_v38 = vmul.f32 0.35355338, %v14697_v13  ;;  %v14690_v51 = vpop.f32.mrb[94].mxu0  ;;  %v9472_v61 = vpop.f32.mrb[95].mxu1 }
 0x407   : > { %v9542_v31 = vmul.f32 0.35355338, %v14690_v51  ;;  %v9543_v12 = vmul.f32 0.35355338, %v9472_v61  ;;  %9784 = vmax.xlane.f32.xlu1 %v9783_v21  ;;  %v9391_v32 = vpop.f32.mrb[95].mxu0 }
 0x408   : > { %v18422_v25 = vadd.f32 %v18124_v40, %v9544_v38  ;;  %v9541_v35 = vmul.f32 0.35355338, %v9391_v32  ;;  %9778 = vmax.xlane.f32.xlu0 %v9777_v33 }
 0x409   : > { %v18425_v19 = vadd.f32 %v18132_v2, %v9542_v31  ;;  %v18428_v13 = vadd.f32 %v18140_v54, %v9543_v12 }
 0x40a   : > { %v9798_v51 = vsel %vm3464_vm2, %v18422_v25, -inf  ;;  %v18433_v61 = vadd.f32 %v18150_v43, %v9541_v35 }
 0x40b   : > { %19454 = vst [vmem:[#allocation7_spill] sm:$0xff] %v18428_v13  ;;  %9799 = vmax.xlane.f32.xlu1 %v9798_v51  ;;  %v9792_v21 = vsel %vm3464_vm2, %v18425_v19, -inf  ;;  %v9795_v40 = vsel %vm3464_vm2, %v18428_v13, -inf }
 0x40c   : > { %19455 = vst [vmem:[#allocation10_spill] sm:$0xff] %v18433_v61  ;;  %9793 = vmax.xlane.f32.xlu0 %v9792_v21  ;;  %v9789_v2 = vsel %vm3464_vm2, %v18433_v61, -inf }
 0x40f   : > { %9796 = vmax.xlane.f32.xlu1 %v9795_v40 }
 0x410   : > { %9790 = vmax.xlane.f32.xlu0 %v9789_v2 }
 0x420   : > { %v9620_v54 = vpop.xlane.xlu1 %9619 }
 0x421   : > { %v9804_v38 = vsub.f32 %v18087_v14, %v9620_v54  ;;  %v9614_v31 = vpop.xlane.xlu0 %9613 }
 0x422   : > { %v9802_v43 = vsub.f32 %v18095_v27, %v9614_v31 }
 0x423   : > { %v9871_v12 = vmul.f32 1.442695, %v9804_v38 }
 0x424   : > { %v9867_v32 = vmul.f32 1.442695, %v9802_v43  ;;  %v9617_v33 = vpop.xlane.xlu1 %9616 }
 0x425   : > { %15826 = vpow2.f32 %v9871_v12  ;;  %v9803_v35 = vsub.f32 %v18103_v59, %v9617_v33  ;;  %v9611_v51 = vpop.xlane.xlu0 %9610 }
 0x426   : > { %15828 = vpow2.f32 %v9867_v32  ;;  %v9801_v21 = vsub.f32 %v18113_v18, %v9611_v51 }
 0x427   : > { %v9869_v40 = vmul.f32 1.442695, %v9803_v35 }
 0x428   : > { %v9865_v13 = vmul.f32 1.442695, %v9801_v21  ;;  %v9632_v61 = vpop.xlane.xlu1 %9631 }
 0x429   : > { %15830 = vpow2.f32 %v9869_v40  ;;  %v9808_v2 = vsub.f32 %v18127_v24, %v9632_v61  ;;  %v9626_v14 = vpop.xlane.xlu0 %9625 }
 0x42a   : > { %15832 = vpow2.f32 %v9865_v13  ;;  %v9806_v27 = vsub.f32 %v18135_v3, %v9626_v14 }
 0x42b   : > { %v9879_v54 = vmul.f32 1.442695, %v9808_v2 }
 0x42c   : > { %v9875_v38 = vmul.f32 1.442695, %v9806_v27  ;;  %v9629_v31 = vpop.xlane.xlu1 %9628 }
 0x42d   : > { %15834 = vpow2.f32 %v9879_v54  ;;  %v9807_v59 = vsub.f32 %v18143_v60, %v9629_v31  ;;  %v9623_v43 = vpop.xlane.xlu0 %9622 }
 0x42e   : > { %15836 = vpow2.f32 %v9875_v38  ;;  %v9805_v18 = vsub.f32 %v18153_v34, %v9623_v43 }
 0x42f   : > { %v18449_v12 = vpop.eup %15826  ;;  %v9877_v32 = vmul.f32 1.442695, %v9807_v59 }
 0x430   : > { %v18451_v33 = vpop.eup %15828  ;;  %v9873_v24 = vmul.f32 1.442695, %v9805_v18  ;;  %v9644_v61 = vpop.xlane.xlu1 %9643  ;;  %v10002_v3 = vsel %vm3464_vm2, %v18449_v12, 0.0 }
 0x431   : > { %15838 = vpow2.f32 %v9877_v32  ;;  %v9812_v13 = vsub.f32 %v18162_v41, %v9644_v61  ;;  %10003 = vadd.xlane.f32.xlu1 %v10002_v3  ;;  %v9638_v35 = vpop.xlane.xlu0 %9637  ;;  %v9996_v60 = vsel %vm3464_vm2, %v18451_v33, 0.0 }
 0x432   : > { %15840 = vpow2.f32 %v9873_v24  ;;  %v9810_v34 = vsub.f32 %v18165_v6, %v9638_v35  ;;  %9997 = vadd.xlane.f32.xlu0 %v9996_v60 }
 0x433   : > { %v18459_v51 = vpop.eup %15830  ;;  %v9887_v21 = vmul.f32 1.442695, %v9812_v13 }
 0x434   : > { %v18461_v40 = vpop.eup %15832  ;;  %v9883_v2 = vmul.f32 1.442695, %v9810_v34  ;;  %v9641_v14 = vpop.xlane.xlu1 %9640  ;;  %v9999_v27 = vsel %vm3464_vm2, %v18459_v51, 0.0 }
 0x435   : > { %15842 = vpow2.f32 %v9887_v21  ;;  %v9811_v41 = vsub.f32 %v18168_v56, %v9641_v14  ;;  %10000 = vadd.xlane.f32.xlu1 %v9999_v27  ;;  %v9635_v54 = vpop.xlane.xlu0 %9634  ;;  %v9993_v38 = vsel %vm3464_vm2, %v18461_v40, 0.0 }
 0x436   : > { %15844 = vpow2.f32 %v9883_v2  ;;  %v9809_v6 = vsub.f32 %v18173_v26, %v9635_v54  ;;  %9994 = vadd.xlane.f32.xlu0 %v9993_v38 }
 0x437   : > { %v18469_v31 = vpop.eup %15834  ;;  %v9885_v59 = vmul.f32 1.442695, %v9811_v41 }
 0x438   : > { %v18471_v43 = vpop.eup %15836  ;;  %v9881_v18 = vmul.f32 1.442695, %v9809_v6  ;;  %v9656_v32 = vpop.xlane.xlu1 %9655  ;;  %v10014_v24 = vsel %vm3464_vm2, %v18469_v31, 0.0 }
 0x439   : > { %15846 = vpow2.f32 %v9885_v59  ;;  %v9816_v56 = vsub.f32 %v18182_v42, %v9656_v32  ;;  %10015 = vadd.xlane.f32.xlu1 %v10014_v24  ;;  %v9650_v61 = vpop.xlane.xlu0 %9649  ;;  %v10008_v3 = vsel %vm3464_vm2, %v18471_v43, 0.0 }
 0x43a   : > { %15848 = vpow2.f32 %v9881_v18  ;;  %v9814_v26 = vsub.f32 %v18185_v57, %v9650_v61  ;;  %10009 = vadd.xlane.f32.xlu0 %v10008_v3 }
 0x43b   : > { %v18479_v13 = vpop.eup %15838  ;;  %v9895_v35 = vmul.f32 1.442695, %v9816_v56 }
 0x43c   : > { %v18481_v60 = vpop.eup %15840  ;;  %v9891_v34 = vmul.f32 1.442695, %v9814_v26  ;;  %v9653_v21 = vpop.xlane.xlu1 %9652  ;;  %v10011_v2 = vsel %vm3464_vm2, %v18479_v13, 0.0 }
 0x43d   : > { %15850 = vpow2.f32 %v9895_v35  ;;  %v9815_v42 = vsub.f32 %v18188_v58, %v9653_v21  ;;  %10012 = vadd.xlane.f32.xlu1 %v10011_v2  ;;  %v9647_v14 = vpop.xlane.xlu0 %9646  ;;  %v10005_v27 = vsel %vm3464_vm2, %v18481_v60, 0.0 }
 0x43e   : > { %15852 = vpow2.f32 %v9891_v34  ;;  %v9813_v57 = vsub.f32 %v18193_v20, %v9647_v14  ;;  %10006 = vadd.xlane.f32.xlu0 %v10005_v27 }
 0x43f   : > { %v18489_v41 = vpop.eup %15842  ;;  %v9893_v54 = vmul.f32 1.442695, %v9815_v42 }
 0x440   : > { %v18491_v38 = vpop.eup %15844  ;;  %v9889_v6 = vmul.f32 1.442695, %v9813_v57  ;;  %v9668_v59 = vpop.xlane.xlu1 %9667  ;;  %v10026_v18 = vsel %vm3464_vm2, %v18489_v41, 0.0 }
 0x441   : > { %15854 = vpow2.f32 %v9893_v54  ;;  %v9820_v58 = vsub.f32 %v18202_v48, %v9668_v59  ;;  %10027 = vadd.xlane.f32.xlu1 %v10026_v18  ;;  %v9662_v32 = vpop.xlane.xlu0 %9661  ;;  %v10020_v24 = vsel %vm3464_vm2, %v18491_v38, 0.0 }
 0x442   : > { %15856 = vpow2.f32 %v9889_v6  ;;  %v9818_v20 = vsub.f32 %v18205_v11, %v9662_v32  ;;  %10021 = vadd.xlane.f32.xlu0 %v10020_v24 }
 0x443   : > { %v18499_v56 = vpop.eup %15846  ;;  %v9903_v61 = vmul.f32 1.442695, %v9820_v58 }
 0x444   : > { %v18501_v3 = vpop.eup %15848  ;;  %v9899_v26 = vmul.f32 1.442695, %v9818_v20  ;;  %v9665_v35 = vpop.xlane.xlu1 %9664  ;;  %v10023_v34 = vsel %vm3464_vm2, %v18499_v56, 0.0 }
 0x445   : > { %15858 = vpow2.f32 %v9903_v61  ;;  %v9819_v48 = vsub.f32 %v18208_v17, %v9665_v35  ;;  %10024 = vadd.xlane.f32.xlu1 %v10023_v34  ;;  %v9659_v21 = vpop.xlane.xlu0 %9658  ;;  %v10017_v2 = vsel %vm3464_vm2, %v18501_v3, 0.0 }
 0x446   : > { %15860 = vpow2.f32 %v9899_v26  ;;  %v9817_v11 = vsub.f32 %v18213_v46, %v9659_v21  ;;  %10018 = vadd.xlane.f32.xlu0 %v10017_v2 }
 0x447   : > { %v18509_v42 = vpop.eup %15850  ;;  %v9901_v14 = vmul.f32 1.442695, %v9819_v48 }
 0x448   : > { %v18511_v27 = vpop.eup %15852  ;;  %v9897_v57 = vmul.f32 1.442695, %v9817_v11  ;;  %v9680_v54 = vpop.xlane.xlu1 %9679  ;;  %v10038_v6 = vsel %vm3464_vm2, %v18509_v42, 0.0 }
 0x449   : > { %15862 = vpow2.f32 %v9901_v14  ;;  %v9824_v17 = vsub.f32 %v18222_v30, %v9680_v54  ;;  %10039 = vadd.xlane.f32.xlu1 %v10038_v6  ;;  %v9674_v59 = vpop.xlane.xlu0 %9673  ;;  %v10032_v18 = vsel %vm3464_vm2, %v18511_v27, 0.0 }
 0x44a   : > { %15864 = vpow2.f32 %v9897_v57  ;;  %v9822_v46 = vsub.f32 %v18225_v63, %v9674_v59  ;;  %10033 = vadd.xlane.f32.xlu0 %v10032_v18 }
 0x44b   : > { %v18519_v58 = vpop.eup %15854  ;;  %v9911_v32 = vmul.f32 1.442695, %v9824_v17 }
 0x44c   : > { %v18521_v24 = vpop.eup %15856  ;;  %v9907_v20 = vmul.f32 1.442695, %v9822_v46  ;;  %v9677_v61 = vpop.xlane.xlu1 %9676  ;;  %v10035_v26 = vsel %vm3464_vm2, %v18519_v58, 0.0 }
 0x44d   : > { %15866 = vpow2.f32 %v9911_v32  ;;  %v9823_v30 = vsub.f32 %v18228_v62, %v9677_v61  ;;  %10036 = vadd.xlane.f32.xlu1 %v10035_v26  ;;  %v9671_v35 = vpop.xlane.xlu0 %9670  ;;  %v10029_v34 = vsel %vm3464_vm2, %v18521_v24, 0.0 }
 0x44e   : > { %15868 = vpow2.f32 %v9907_v20  ;;  %v9821_v63 = vsub.f32 %v18233_v45, %v9671_v35  ;;  %10030 = vadd.xlane.f32.xlu0 %v10029_v34 }
 0x44f   : > { %v18529_v48 = vpop.eup %15858  ;;  %v9909_v21 = vmul.f32 1.442695, %v9823_v30 }
 0x450   : > { %v18531_v2 = vpop.eup %15860  ;;  %v9905_v11 = vmul.f32 1.442695, %v9821_v63  ;;  %v9692_v14 = vpop.xlane.xlu1 %9691  ;;  %v10050_v57 = vsel %vm3464_vm2, %v18529_v48, 0.0 }
 0x451   : > { %15870 = vpow2.f32 %v9909_v21  ;;  %v9828_v62 = vsub.f32 %v18242_v36, %v9692_v14  ;;  %10051 = vadd.xlane.f32.xlu1 %v10050_v57  ;;  %v9686_v54 = vpop.xlane.xlu0 %9685  ;;  %v10044_v6 = vsel %vm3464_vm2, %v18531_v2, 0.0 }
 0x452   : > { %15872 = vpow2.f32 %v9905_v11  ;;  %v9826_v45 = vsub.f32 %v18245_v55, %v9686_v54  ;;  %10045 = vadd.xlane.f32.xlu0 %v10044_v6 }
 0x453   : > { %v18539_v17 = vpop.eup %15862  ;;  %v9919_v59 = vmul.f32 1.442695, %v9828_v62 }
 0x454   : > { %v18541_v18 = vpop.eup %15864  ;;  %v9915_v46 = vmul.f32 1.442695, %v9826_v45  ;;  %v9689_v32 = vpop.xlane.xlu1 %9688  ;;  %v10047_v20 = vsel %vm3464_vm2, %v18539_v17, 0.0 }
 0x455   : > { %15874 = vpow2.f32 %v9919_v59  ;;  %v9827_v36 = vsub.f32 %v18248_v15, %v9689_v32  ;;  %10048 = vadd.xlane.f32.xlu1 %v10047_v20  ;;  %v9683_v61 = vpop.xlane.xlu0 %9682  ;;  %v10041_v26 = vsel %vm3464_vm2, %v18541_v18, 0.0 }
 0x456   : > { %15876 = vpow2.f32 %v9915_v46  ;;  %v9825_v55 = vsub.f32 %v18253_v44, %v9683_v61  ;;  %10042 = vadd.xlane.f32.xlu0 %v10041_v26 }
 0x457   : > { %v18549_v30 = vpop.eup %15866  ;;  %v9917_v35 = vmul.f32 1.442695, %v9827_v36 }
 0x458   : > { %v18551_v34 = vpop.eup %15868  ;;  %v9913_v63 = vmul.f32 1.442695, %v9825_v55  ;;  %v9704_v21 = vpop.xlane.xlu1 %9703  ;;  %v10062_v11 = vsel %vm3464_vm2, %v18549_v30, 0.0 }
 0x459   : > { %15878 = vpow2.f32 %v9917_v35  ;;  %v9832_v15 = vsub.f32 %v18262_v16, %v9704_v21  ;;  %10063 = vadd.xlane.f32.xlu1 %v10062_v11  ;;  %v9698_v14 = vpop.xlane.xlu0 %9697  ;;  %v10056_v57 = vsel %vm3464_vm2, %v18551_v34, 0.0 }
 0x45a   : > { %15880 = vpow2.f32 %v9913_v63  ;;  %v9830_v44 = vsub.f32 %v18265_v39, %v9698_v14  ;;  %10057 = vadd.xlane.f32.xlu0 %v10056_v57 }
 0x45b   : > { %v18559_v62 = vpop.eup %15870  ;;  %v9927_v54 = vmul.f32 1.442695, %v9832_v15 }
 0x45c   : > { %v18561_v6 = vpop.eup %15872  ;;  %v9923_v45 = vmul.f32 1.442695, %v9830_v44  ;;  %v9701_v59 = vpop.xlane.xlu1 %9700  ;;  %v10059_v46 = vsel %vm3464_vm2, %v18559_v62, 0.0 }
 0x45d   : > { %15882 = vpow2.f32 %v9927_v54  ;;  %v9831_v16 = vsub.f32 %v18268_v49, %v9701_v59  ;;  %10060 = vadd.xlane.f32.xlu1 %v10059_v46  ;;  %v9695_v32 = vpop.xlane.xlu0 %9694  ;;  %v10053_v20 = vsel %vm3464_vm2, %v18561_v6, 0.0 }
 0x45e   : > { %15884 = vpow2.f32 %v9923_v45  ;;  %v9829_v39 = vsub.f32 %v18273_v4, %v9695_v32  ;;  %10054 = vadd.xlane.f32.xlu0 %v10053_v20 }
 0x45f   : > { %v18569_v36 = vpop.eup %15874  ;;  %v9925_v61 = vmul.f32 1.442695, %v9831_v16 }
 0x460   : > { %v18571_v26 = vpop.eup %15876  ;;  %v9921_v55 = vmul.f32 1.442695, %v9829_v39  ;;  %v9716_v35 = vpop.xlane.xlu1 %9715  ;;  %v10074_v63 = vsel %vm3464_vm2, %v18569_v36, 0.0 }
 0x461   : > { %15886 = vpow2.f32 %v9925_v61  ;;  %v9836_v49 = vsub.f32 %v18282_v7, %v9716_v35  ;;  %10075 = vadd.xlane.f32.xlu1 %v10074_v63  ;;  %v9710_v21 = vpop.xlane.xlu0 %9709  ;;  %v10068_v11 = vsel %vm3464_vm2, %v18571_v26, 0.0 }
 0x462   : > { %15888 = vpow2.f32 %v9921_v55  ;;  %v9834_v4 = vsub.f32 %v18285_v23, %v9710_v21  ;;  %10069 = vadd.xlane.f32.xlu0 %v10068_v11 }
 0x463   : > { %v18579_v15 = vpop.eup %15878  ;;  %v9935_v14 = vmul.f32 1.442695, %v9836_v49 }
 0x464   : > { %v18581_v57 = vpop.eup %15880  ;;  %v9931_v44 = vmul.f32 1.442695, %v9834_v4  ;;  %v9713_v54 = vpop.xlane.xlu1 %9712  ;;  %v10071_v45 = vsel %vm3464_vm2, %v18579_v15, 0.0 }
 0x465   : > { %15890 = vpow2.f32 %v9935_v14  ;;  %v9835_v7 = vsub.f32 %v18288_v9, %v9713_v54  ;;  %10072 = vadd.xlane.f32.xlu1 %v10071_v45  ;;  %v9707_v59 = vpop.xlane.xlu0 %9706  ;;  %v10065_v46 = vsel %vm3464_vm2, %v18581_v57, 0.0 }
 0x466   : > { %15892 = vpow2.f32 %v9931_v44  ;;  %v9833_v23 = vsub.f32 %v18293_v53, %v9707_v59  ;;  %10066 = vadd.xlane.f32.xlu0 %v10065_v46 }
 0x467   : > { %v18589_v16 = vpop.eup %15882  ;;  %v9933_v32 = vmul.f32 1.442695, %v9835_v7 }
 0x468   : > { %v18591_v20 = vpop.eup %15884  ;;  %v9929_v39 = vmul.f32 1.442695, %v9833_v23  ;;  %v9728_v61 = vpop.xlane.xlu1 %9727  ;;  %v10086_v55 = vsel %vm3464_vm2, %v18589_v16, 0.0 }
 0x469   : > { %15894 = vpow2.f32 %v9933_v32  ;;  %v9840_v9 = vsub.f32 %v18302_v28, %v9728_v61  ;;  %10087 = vadd.xlane.f32.xlu1 %v10086_v55  ;;  %v9722_v35 = vpop.xlane.xlu0 %9721  ;;  %v10080_v63 = vsel %vm3464_vm2, %v18591_v20, 0.0 }
 0x46a   : > { %15896 = vpow2.f32 %v9929_v39  ;;  %v9838_v53 = vsub.f32 %v18305_v1, %v9722_v35  ;;  %10081 = vadd.xlane.f32.xlu0 %v10080_v63 }
 0x46b   : > { %v18599_v49 = vpop.eup %15886  ;;  %v9943_v21 = vmul.f32 1.442695, %v9840_v9 }
 0x46c   : > { %v18601_v11 = vpop.eup %15888  ;;  %v9939_v4 = vmul.f32 1.442695, %v9838_v53  ;;  %v9725_v14 = vpop.xlane.xlu1 %9724  ;;  %v10083_v44 = vsel %vm3464_vm2, %v18599_v49, 0.0 }
 0x46d   : > { %15898 = vpow2.f32 %v9943_v21  ;;  %v9839_v28 = vsub.f32 %v18308_v8, %v9725_v14  ;;  %10084 = vadd.xlane.f32.xlu1 %v10083_v44  ;;  %v9719_v54 = vpop.xlane.xlu0 %9718  ;;  %v10077_v45 = vsel %vm3464_vm2, %v18601_v11, 0.0 }
 0x46e   : > { %15900 = vpow2.f32 %v9939_v4  ;;  %v9837_v1 = vsub.f32 %v18313_v50, %v9719_v54  ;;  %10078 = vadd.xlane.f32.xlu0 %v10077_v45  ;;  %v19456_v50 = vld [vmem:[#allocation46_spill] sm:$0xff]  ;;  %v19458_v45 = vld [vmem:[#allocation47_spill] sm:$0xff] }
 0x46f   : > { %v18609_v7 = vpop.eup %15890  ;;  %v9941_v59 = vmul.f32 1.442695, %v9839_v28 }
 0x470   : > { %v18611_v46 = vpop.eup %15892  ;;  %v9937_v23 = vmul.f32 1.442695, %v9837_v1  ;;  %v9740_v32 = vpop.xlane.xlu1 %9739  ;;  %v10098_v39 = vsel %vm3464_vm2, %v18609_v7, 0.0 }
 0x471   : > { %15902 = vpow2.f32 %v9941_v59  ;;  %v9844_v8 = vsub.f32 %v18322_v5, %v9740_v32  ;;  %10099 = vadd.xlane.f32.xlu1 %v10098_v39  ;;  %v9734_v61 = vpop.xlane.xlu0 %9733  ;;  %v10092_v55 = vsel %vm3464_vm2, %v18611_v46, 0.0  ;;  %v19457_v5 = vld [vmem:[#allocation45_spill] sm:$0xff] }
 0x472   : > { %15904 = vpow2.f32 %v9937_v23  ;;  %v9842_v9 = vsub.f32 %v19456_v50, %v9734_v61  ;;  %10093 = vadd.xlane.f32.xlu0 %v10092_v55  ;;  %v19460_v55 = vld [vmem:[#allocation4_spill] sm:$0xff] }
 0x473   : > { %v18619_v35 = vpop.eup %15894  ;;  %v9951_v63 = vmul.f32 1.442695, %v9844_v8 }
 0x474   : > { %v18621_v53 = vpop.eup %15896  ;;  %v9947_v21 = vmul.f32 1.442695, %v9842_v9  ;;  %v9737_v4 = vpop.xlane.xlu1 %9736  ;;  %v10095_v14 = vsel %vm3464_vm2, %v18619_v35, 0.0 }
 0x475   : > { %15906 = vpow2.f32 %v9951_v63  ;;  %v9843_v44 = vsub.f32 %v19457_v5, %v9737_v4  ;;  %10096 = vadd.xlane.f32.xlu1 %v10095_v14  ;;  %v9731_v28 = vpop.xlane.xlu0 %9730  ;;  %v10089_v54 = vsel %vm3464_vm2, %v18621_v53, 0.0 }
 0x476   : > { %15908 = vpow2.f32 %v9947_v21  ;;  %v9841_v1 = vsub.f32 %v19458_v45, %v9731_v28  ;;  %10090 = vadd.xlane.f32.xlu0 %v10089_v54  ;;  %v19461_v21 = vld [vmem:[#allocation2_spill] sm:$0xff] }
 0x477   : > { %v18629_v59 = vpop.eup %15898  ;;  %v9949_v23 = vmul.f32 1.442695, %v9843_v44 }
 0x478   : > { %v18631_v32 = vpop.eup %15900  ;;  %v9945_v39 = vmul.f32 1.442695, %v9841_v1  ;;  %v9752_v8 = vpop.xlane.xlu1 %9751  ;;  %v10110_v61 = vsel %vm3464_vm2, %v18629_v59, 0.0  ;;  %v19463_v1 = vld [vmem:[#allocation48_spill] sm:$0xff] }
 0x479   : > { %19459 = vst [vmem:[#allocation9_spill] sm:$0xff] %v18631_v32  ;;  %15910 = vpow2.f32 %v9949_v23  ;;  %v9848_v50 = vsub.f32 %v19460_v55, %v9752_v8  ;;  %10111 = vadd.xlane.f32.xlu1 %v10110_v61  ;;  %v9746_v9 = vpop.xlane.xlu0 %9745  ;;  %v10104_v63 = vsel %vm3464_vm2, %v18631_v32, 0.0  ;;  %v19464_v61 = vld [vmem:[#allocation3_spill] sm:$0xff] }
 0x47a   : > { %15912 = vpow2.f32 %v9945_v39  ;;  %v9846_v4 = vsub.f32 %v19461_v21, %v9746_v9  ;;  %10105 = vadd.xlane.f32.xlu0 %v10104_v63 }
 0x47b   : > { %v18639_v14 = vpop.eup %15902  ;;  %v9959_v5 = vmul.f32 1.442695, %v9848_v50 }
 0x47c   : > { %v18641_v44 = vpop.eup %15904  ;;  %v9955_v28 = vmul.f32 1.442695, %v9846_v4  ;;  %v9749_v54 = vpop.xlane.xlu1 %9748  ;;  %v10107_v45 = vsel %vm3464_vm2, %v18639_v14, 0.0 }
 0x47d   : > { %19462 = vst [vmem:[#allocation12_spill] sm:$0xff] %v18641_v44  ;;  %15914 = vpow2.f32 %v9959_v5  ;;  %v9847_v23 = vsub.f32 %v19463_v1, %v9749_v54  ;;  %10108 = vadd.xlane.f32.xlu1 %v10107_v45  ;;  %v9743_v8 = vpop.xlane.xlu0 %9742  ;;  %v10101_v39 = vsel %vm3464_vm2, %v18641_v44, 0.0  ;;  %v19467_v54 = vld [vmem:[#allocation54_spill] sm:$0xff] }
 0x47e   : > { %15916 = vpow2.f32 %v9955_v28  ;;  %v9845_v55 = vsub.f32 %v19464_v61, %v9743_v8  ;;  %10102 = vadd.xlane.f32.xlu0 %v10101_v39  ;;  %v19468_v8 = vld [vmem:[#allocation55_spill] sm:$0xff] }
 0x47f   : > { %v18649_v50 = vpop.eup %15906  ;;  %v9957_v9 = vmul.f32 1.442695, %v9847_v23 }
 0x480   : > { %19465 = vst [vmem:[#allocation11_spill] sm:$0xff] %v18649_v50  ;;  %v18651_v63 = vpop.eup %15908  ;;  %v9953_v21 = vmul.f32 1.442695, %v9845_v55  ;;  %v9764_v4 = vpop.xlane.xlu1 %9763  ;;  %v10122_v5 = vsel %vm3464_vm2, %v18649_v50, 0.0 }
 0x481   : > { %19466 = vst [vmem:[#allocation14_spill] sm:$0xff] %v18651_v63  ;;  %15918 = vpow2.f32 %v9957_v9  ;;  %v9852_v45 = vsub.f32 %v19467_v54, %v9764_v4  ;;  %10123 = vadd.xlane.f32.xlu1 %v10122_v5  ;;  %v9758_v1 = vpop.xlane.xlu0 %9757  ;;  %v10116_v28 = vsel %vm3464_vm2, %v18651_v63, 0.0  ;;  %v19470_v4 = vld [vmem:[#allocation6_spill] sm:$0xff] }
 0x482   : > { %15920 = vpow2.f32 %v9953_v21  ;;  %v9850_v39 = vsub.f32 %v19468_v8, %v9758_v1  ;;  %10117 = vadd.xlane.f32.xlu0 %v10116_v28  ;;  %v19471_v1 = vld [vmem:[#allocation5_spill] sm:$0xff] }
 0x483   : > { %v18659_v23 = vpop.eup %15910  ;;  %v9967_v61 = vmul.f32 1.442695, %v9852_v45 }
 0x484   : > { %v18661_v55 = vpop.eup %15912  ;;  %v9963_v32 = vmul.f32 1.442695, %v9850_v39  ;;  %v9761_v44 = vpop.xlane.xlu1 %9760  ;;  %v10119_v9 = vsel %vm3464_vm2, %v18659_v23, 0.0 }
 0x485   : > { %19469 = vst [vmem:[#allocation13_spill] sm:$0xff] %v18661_v55  ;;  %15922 = vpow2.f32 %v9967_v61  ;;  %v9851_v5 = vsub.f32 %v19470_v4, %v9761_v44  ;;  %10120 = vadd.xlane.f32.xlu1 %v10119_v9  ;;  %v9755_v54 = vpop.xlane.xlu0 %9754  ;;  %v10113_v21 = vsel %vm3464_vm2, %v18661_v55, 0.0  ;;  %v19472_v44 = vld [vmem:[#allocation8_spill] sm:$0xff] }
 0x486   : > { %15924 = vpow2.f32 %v9963_v32  ;;  %v9849_v28 = vsub.f32 %v19471_v1, %v9755_v54  ;;  %10114 = vadd.xlane.f32.xlu0 %v10113_v21 }
 0x487   : > { %v18669_v45 = vpop.eup %15914  ;;  %v9965_v8 = vmul.f32 1.442695, %v9851_v5 }
 0x488   : > { %v18671_v39 = vpop.eup %15916  ;;  %v9961_v63 = vmul.f32 1.442695, %v9849_v28  ;;  %v9776_v50 = vpop.xlane.xlu1 %9775  ;;  %v10134_v61 = vsel %vm3464_vm2, %v18669_v45, 0.0 }
 0x489   : > { %15926 = vpow2.f32 %v9965_v8  ;;  %v9856_v9 = vsub.f32 %v19472_v44, %v9776_v50  ;;  %10135 = vadd.xlane.f32.xlu1 %v10134_v61  ;;  %v9770_v4 = vpop.xlane.xlu0 %9769  ;;  %v10128_v32 = vsel %vm3464_vm2, %v18671_v39, 0.0 }
 0x48a   : > { %15928 = vpow2.f32 %v9961_v63  ;;  %v9854_v54 = vsub.f32 %v18385_v22, %v9770_v4  ;;  %10129 = vadd.xlane.f32.xlu0 %v10128_v32 }
 0x48b   : > { %v18679_v5 = vpop.eup %15918  ;;  %v9975_v21 = vmul.f32 1.442695, %v9856_v9 }
 0x48c   : > { %v18681_v1 = vpop.eup %15920  ;;  %v9971_v28 = vmul.f32 1.442695, %v9854_v54  ;;  %v9773_v55 = vpop.xlane.xlu1 %9772  ;;  %v10131_v8 = vsel %vm3464_vm2, %v18679_v5, 0.0 }
 0x48d   : > { %15930 = vpow2.f32 %v9975_v21  ;;  %v9855_v50 = vsub.f32 %v18388_v29, %v9773_v55  ;;  %10132 = vadd.xlane.f32.xlu1 %v10131_v8  ;;  %v9767_v61 = vpop.xlane.xlu0 %9766  ;;  %v10125_v63 = vsel %vm3464_vm2, %v18681_v1, 0.0 }
 0x48e   : > { %15932 = vpow2.f32 %v9971_v28  ;;  %v9853_v22 = vsub.f32 %v18393_v52, %v9767_v61  ;;  %10126 = vadd.xlane.f32.xlu0 %v10125_v63 }
 0x48f   : > { %v18689_v44 = vpop.eup %15922  ;;  %v9973_v9 = vmul.f32 1.442695, %v9855_v50 }
 0x490   : > { %v18691_v4 = vpop.eup %15924  ;;  %v9969_v32 = vmul.f32 1.442695, %v9853_v22  ;;  %v9788_v54 = vpop.xlane.xlu1 %9787  ;;  %v10146_v21 = vsel %vm3464_vm2, %v18689_v44, 0.0 }
 0x491   : > { %19473 = vst [vmem:[#allocation16_spill] sm:$0xff] %v18691_v4  ;;  %15934 = vpow2.f32 %v9973_v9  ;;  %v9860_v29 = vsub.f32 %v18402_v47, %v9788_v54  ;;  %10147 = vadd.xlane.f32.xlu1 %v10146_v21  ;;  %v9782_v55 = vpop.xlane.xlu0 %9781  ;;  %v10140_v28 = vsel %vm3464_vm2, %v18691_v4, 0.0 }
 0x492   : > { %15936 = vpow2.f32 %v9969_v32  ;;  %v9858_v52 = vsub.f32 %v18405_v37, %v9782_v55  ;;  %10141 = vadd.xlane.f32.xlu0 %v10140_v28 }
 0x493   : > { %v18699_v8 = vpop.eup %15926  ;;  %v9983_v50 = vmul.f32 1.442695, %v9860_v29 }
 0x494   : > { %v18701_v61 = vpop.eup %15928  ;;  %v9979_v63 = vmul.f32 1.442695, %v9858_v52  ;;  %v9785_v22 = vpop.xlane.xlu1 %9784  ;;  %v10143_v9 = vsel %vm3464_vm2, %v18699_v8, 0.0 }
 0x495   : > { %15938 = vpow2.f32 %v9983_v50  ;;  %v9859_v47 = vsub.f32 %v18408_v10, %v9785_v22  ;;  %10144 = vadd.xlane.f32.xlu1 %v10143_v9  ;;  %v9779_v54 = vpop.xlane.xlu0 %9778  ;;  %v10137_v32 = vsel %vm3464_vm2, %v18701_v61, 0.0 }
 0x496   : > { %15940 = vpow2.f32 %v9979_v63  ;;  %v9857_v37 = vsub.f32 %v18413_v0, %v9779_v54  ;;  %10138 = vadd.xlane.f32.xlu0 %v10137_v32 }
 0x497   : > { %v18709_v21 = vpop.eup %15930  ;;  %v9981_v29 = vmul.f32 1.442695, %v9859_v47 }
 0x498   : > { %19474 = vst [vmem:[#allocation15_spill] sm:$0xff] %v18709_v21  ;;  %v18711_v55 = vpop.eup %15932  ;;  %v9977_v28 = vmul.f32 1.442695, %v9857_v37  ;;  %v9800_v52 = vpop.xlane.xlu1 %9799  ;;  %v10158_v50 = vsel %vm3464_vm2, %v18709_v21, 0.0  ;;  %v19477_v37 = vld [vmem:[#allocation7_spill] sm:$0xff] }
 0x499   : > { %19475 = vst [vmem:[#allocation18_spill] sm:$0xff] %v18711_v55  ;;  %15942 = vpow2.f32 %v9981_v29  ;;  %10159 = vadd.xlane.f32.xlu1 %v10158_v50  ;;  %v9794_v10 = vpop.xlane.xlu0 %9793  ;;  %v10152_v22 = vsel %vm3464_vm2, %v18711_v55, 0.0  ;;  %v9864_v63 = vsub.f32 %v18422_v25, %v9800_v52 }
 0x49a   : > { %15944 = vpow2.f32 %v9977_v28  ;;  %10153 = vadd.xlane.f32.xlu0 %v10152_v22  ;;  %v9862_v47 = vsub.f32 %v18425_v19, %v9794_v10  ;;  %v19478_v22 = vld [vmem:[#allocation10_spill] sm:$0xff] }
 0x49b   : > { %v18717_v0 = vpop.eup %15934  ;;  %v9991_v25 = vmul.f32 1.442695, %v9864_v63 }
 0x49c   : > { %19476 = vst [vmem:[#allocation17_spill] sm:$0xff] %v18717_v0  ;;  %v18720_v9 = vpop.eup %15936  ;;  %v9797_v54 = vpop.xlane.xlu1 %9796  ;;  %v10155_v32 = vsel %vm3464_vm2, %v18717_v0, 0.0  ;;  %v9987_v19 = vmul.f32 1.442695, %v9862_v47 }
 0x49d   : > { %v9863_v29 = vsub.f32 %v19477_v37, %v9797_v54  ;;  %10156 = vadd.xlane.f32.xlu1 %v10155_v32  ;;  %v9791_v50 = vpop.xlane.xlu0 %9790  ;;  %v10149_v28 = vsel %vm3464_vm2, %v18720_v9, 0.0 }
 0x49e   : > { %v9861_v55 = vsub.f32 %v19478_v22, %v9791_v50  ;;  %10150 = vadd.xlane.f32.xlu0 %v10149_v28 }
 0x49f   : > { %v18729_v21 = vpop.eup %15938  ;;  %v9989_v52 = vmul.f32 1.442695, %v9863_v29 }
 0x4a0   : > { %v18731_v4 = vpop.eup %15940  ;;  %v9985_v10 = vmul.f32 1.442695, %v9861_v55  ;;  %v10170_v0 = vsel %vm3464_vm2, %v18729_v21, 0.0 }
 0x4a1   : > { %19479 = vst [vmem:[#allocation20_spill] sm:$0xff] %v18731_v4  ;;  %15946 = vpow2.f32 %v9989_v52  ;;  %10171 = vadd.xlane.f32.xlu1 %v10170_v0  ;;  %v10164_v54 = vsel %vm3464_vm2, %v18731_v4, 0.0 }
 0x4a2   : > { %15948 = vpow2.f32 %v9985_v10  ;;  %10165 = vadd.xlane.f32.xlu0 %v10164_v54 }
 0x4a3   : > { %v18737_v32 = vpop.eup %15942  ;;  %15950 = vpow2.f32 %v9991_v25 }
 0x4a4   : > { %v18739_v37 = vpop.eup %15944  ;;  %15952 = vpow2.f32 %v9987_v19  ;;  %v10167_v63 = vsel %vm3464_vm2, %v18737_v32, 0.0 }
 0x4a5   : > { %10168 = vadd.xlane.f32.xlu1 %v10167_v63  ;;  %v10161_v55 = vsel %vm3464_vm2, %v18739_v37, 0.0 }
 0x4a6   : > { %10162 = vadd.xlane.f32.xlu0 %v10161_v55 }
 0x4ab   : > { %v18745_v0 = vpop.eup %15946 }
 0x4ac   : > { %19480 = vst [vmem:[#allocation19_spill] sm:$0xff] %v18745_v0  ;;  %v18747_v47 = vpop.eup %15948  ;;  %v10179_v29 = vsel %vm3464_vm2, %v18745_v0, 0.0 }
 0x4ad   : > { %19481 = vst [vmem:[#allocation22_spill] sm:$0xff] %v18747_v47  ;;  %v18751_v50 = vpop.eup %15950  ;;  %10180 = vadd.xlane.f32.xlu1 %v10179_v29  ;;  %v10173_v28 = vsel %vm3464_vm2, %v18747_v47, 0.0 }
 0x4ae   : > { %19482 = vst [vmem:[#allocation21_spill] sm:$0xff] %v18751_v50  ;;  %v18755_v22 = vpop.eup %15952  ;;  %10174 = vadd.xlane.f32.xlu0 %v10173_v28  ;;  %v10182_v25 = vsel %vm3464_vm2, %v18751_v50, 0.0 }
 0x4af   : > { %19483 = vst [vmem:[#allocation24_spill] sm:$0xff] %v18755_v22  ;;  %v10176_v52 = vsel %vm3464_vm2, %v18755_v22, 0.0 }
 0x4b1   : > { %10183 = vadd.xlane.f32.xlu1 %v10182_v25 }
 0x4b2   : > { %10177 = vadd.xlane.f32.xlu0 %v10176_v52 }
 0x4be   : > { %v10004_v19 = vpop.xlane.xlu1 %10003 }
 0x4bf   : > { %v9998_v10 = vpop.xlane.xlu0 %9997  ;;  %15954 = vrcp.f32 %v10004_v19 }
 0x4c0   : > { %15956 = vrcp.f32 %v9998_v10 }
 0x4c2   : > { %v10001_v54 = vpop.xlane.xlu1 %10000 }
 0x4c3   : > { %15958 = vrcp.f32 %v10001_v54  ;;  %v9995_v63 = vpop.xlane.xlu0 %9994 }
 0x4c4   : > { %15960 = vrcp.f32 %v9995_v63 }
 0x4c6   : > { %v10016_v55 = vpop.xlane.xlu1 %10015 }
 0x4c7   : > { %v10010_v29 = vpop.xlane.xlu0 %10009  ;;  %15962 = vrcp.f32 %v10016_v55 }
 0x4c8   : > { %15964 = vrcp.f32 %v10010_v29  ;;  %v19484_v29 = vld [vmem:[#allocation52_spill] sm:$0xff] }
 0x4c9   : > { %v15955_v47 = vpop.eup %15954 }
 0x4ca   : > { %v10013_v28 = vpop.xlane.xlu1 %10012  ;;  %v15957_v50 = vpop.eup %15956  ;;  %v10192_v10 = vmul.f32 %v15955_v47, %v18449_v12  ;;  %v19485_v47 = vld [vmem:[#allocation51_spill] sm:$0xff] }
 0x4cb   : > { %15966 = vrcp.f32 %v10013_v28  ;;  %v10007_v25 = vpop.xlane.xlu0 %10006  ;;  %v10188_v4 = vmul.f32 %v15957_v50, %v18451_v33 }
 0x4cc   : > { %15968 = vrcp.f32 %v10007_v25 }
 0x4cd   : > { %v15959_v22 = vpop.eup %15958 }
 0x4ce   : > { %v15961_v52 = vpop.eup %15960  ;;  %v10028_v0 = vpop.xlane.xlu1 %10027  ;;  %v10190_v19 = vmul.f32 %v15959_v22, %v18459_v51 }
 0x4cf   : > { %v10022_v54 = vpop.xlane.xlu0 %10021  ;;  %v10186_v63 = vmul.f32 %v15961_v52, %v18461_v40  ;;  %15970 = vrcp.f32 %v10028_v0  ;;  %v19486_v40 = vld [vmem:[#allocation57_spill] sm:$0xff]  ;;  %v19487_v0 = vld [vmem:[#allocation56_spill] sm:$0xff] }
 0x4d0   : > { %14709 = vmatprep.mubr.msk.f32.mxu1 %vm3464_vm2, %v10190_v19  ;;  %15972 = vrcp.f32 %v10022_v54 }
 0x4d1   : > { %14702 = vmatprep.mubr.msk.f32.mxu0 %vm3464_vm2, %v10186_v63  ;;  %14710 = vmatmul.mubr.msk.f32.vlgmr.msra.gmra.mrb[96].mxu1 %vm3464_vm2, %v10192_v10  ;;  %v15963_v51 = vpop.eup %15962  ;;  %v19489_v63 = vld [vmem:[#allocation58_spill] sm:$0xff] }
 0x4d2   : > { %v10025_v55 = vpop.xlane.xlu1 %10024  ;;  %14703 = vmatmul.mubr.msk.f32.vlgmr.msra.gmra.mrb[96].mxu0 %vm3464_vm2, %v10188_v4  ;;  %15449 = vmatpush3.bf16.msra.mxu1 %v19484_v29  ;;  %v15965_v33 = vpop.eup %15964  ;;  %v10200_v4 = vmul.f32 %v15963_v51, %v18469_v31 }
 0x4d3   : > { %15974 = vrcp.f32 %v10025_v55  ;;  %v10019_v12 = vpop.xlane.xlu0 %10018  ;;  %15445 = vmatpush3.bf16.msra.mxu0 %v19485_v47  ;;  %15455 = vmatprep.subr.bf16.mxu1 %v19486_v40  ;;  %v10196_v10 = vmul.f32 %v15965_v33, %v18471_v43 }
 0x4d4   : > { %15976 = vrcp.f32 %v10019_v12  ;;  %15451 = vmatprep.subr.bf16.mxu0 %v19487_v0 }
 0x4d5   : > { %v15967_v50 = vpop.eup %15966 }
 0x4d6   : > { %v15969_v22 = vpop.eup %15968  ;;  %v10040_v28 = vpop.xlane.xlu1 %10039  ;;  %v10198_v25 = vmul.f32 %v15967_v50, %v18479_v13 }
 0x4d7   : > { %v10034_v52 = vpop.xlane.xlu0 %10033  ;;  %v10194_v19 = vmul.f32 %v15969_v22, %v18481_v60  ;;  %15978 = vrcp.f32 %v10040_v28  ;;  %v19488_v60 = vld [vmem:[#allocation59_spill] sm:$0xff]  ;;  %v19491_v22 = vld [vmem:[#allocation60_spill] sm:$0xff] }
 0x4d8   : > { %14723 = vmatprep.mubr.msk.f32.mxu1 %vm3464_vm2, %v10198_v25  ;;  %15980 = vrcp.f32 %v10034_v52 }
 0x4d9   : > { %14716 = vmatprep.mubr.msk.f32.mxu0 %vm3464_vm2, %v10194_v19  ;;  %14724 = vmatmul.mubr.msk.f32.vlgmr.msra.gmra.mrb[98].mxu1 %vm3464_vm2, %v10200_v4  ;;  %v15971_v13 = vpop.eup %15970 }
 0x4da   : > { %v10037_v54 = vpop.xlane.xlu1 %10036  ;;  %14717 = vmatmul.mubr.msk.f32.vlgmr.msra.gmra.mrb[98].mxu0 %vm3464_vm2, %v10196_v10  ;;  %15457 = vmatpush3.bf16.msra.mxu1 %v19486_v40  ;;  %v15973_v43 = vpop.eup %15972  ;;  %v10208_v47 = vmul.f32 %v15971_v13, %v18489_v41 }
 0x4db   : > { %15982 = vrcp.f32 %v10037_v54  ;;  %v10031_v31 = vpop.xlane.xlu0 %10030  ;;  %15453 = vmatpush3.bf16.msra.mxu0 %v19487_v0  ;;  %15463 = vmatprep.subr.bf16.mxu1 %v19488_v60  ;;  %v10204_v50 = vmul.f32 %v15973_v43, %v18491_v38 }
 0x4dc   : > { %15984 = vrcp.f32 %v10031_v31  ;;  %15459 = vmatprep.subr.bf16.mxu0 %v19489_v63 }
 0x4dd   : > { %v15975_v55 = vpop.eup %15974 }
 0x4de   : > { %v15977_v29 = vpop.eup %15976  ;;  %v10052_v51 = vpop.xlane.xlu1 %10051  ;;  %v10206_v12 = vmul.f32 %v15975_v55, %v18499_v56 }
 0x4df   : > { %v10046_v33 = vpop.xlane.xlu0 %10045  ;;  %v10202_v40 = vmul.f32 %v15977_v29, %v18501_v3  ;;  %15986 = vrcp.f32 %v10052_v51  ;;  %v19490_v3 = vld [vmem:[#allocation61_spill] sm:$0xff] }
 0x4e0   : > { %14737 = vmatprep.mubr.msk.f32.mxu1 %vm3464_vm2, %v10206_v12  ;;  %15988 = vrcp.f32 %v10046_v33 }
 0x4e1   : > { %14730 = vmatprep.mubr.msk.f32.mxu0 %vm3464_vm2, %v10202_v40  ;;  %14738 = vmatmul.mubr.msk.f32.vlgmr.msra.gmra.mrb[100].mxu1 %vm3464_vm2, %v10208_v47  ;;  %v15979_v56 = vpop.eup %15978 }
 0x4e2   : > { %v10049_v0 = vpop.xlane.xlu1 %10048  ;;  %14731 = vmatmul.mubr.msk.f32.vlgmr.msra.gmra.mrb[100].mxu0 %vm3464_vm2, %v10204_v50  ;;  %15465 = vmatpush3.bf16.msra.mxu1 %v19488_v60  ;;  %v15981_v38 = vpop.eup %15980  ;;  %v10216_v19 = vmul.f32 %v15979_v56, %v18509_v42  ;;  %v19493_v60 = vld [vmem:[#allocation62_spill] sm:$0xff]  ;;  %v19495_v50 = vld [vmem:[#allocation64_spill] sm:$0xff] }
 0x4e3   : > { %15990 = vrcp.f32 %v10049_v0  ;;  %v10043_v41 = vpop.xlane.xlu0 %10042  ;;  %15461 = vmatpush3.bf16.msra.mxu0 %v19489_v63  ;;  %15471 = vmatprep.subr.bf16.mxu1 %v19490_v3  ;;  %v10212_v13 = vmul.f32 %v15981_v38, %v18511_v27 }
 0x4e4   : > { %15992 = vrcp.f32 %v10043_v41  ;;  %15467 = vmatprep.subr.bf16.mxu0 %v19491_v22 }
 0x4e5   : > { %v15983_v28 = vpop.eup %15982 }
 0x4e6   : > { %v15985_v25 = vpop.eup %15984  ;;  %v10064_v4 = vpop.xlane.xlu1 %10063  ;;  %v10214_v52 = vmul.f32 %v15983_v28, %v18519_v58 }
 0x4e7   : > { %v10058_v10 = vpop.xlane.xlu0 %10057  ;;  %v10210_v54 = vmul.f32 %v15985_v25, %v18521_v24  ;;  %15994 = vrcp.f32 %v10064_v4  ;;  %v19492_v24 = vld [vmem:[#allocation63_spill] sm:$0xff] }
 0x4e8   : > { %14751 = vmatprep.mubr.msk.f32.mxu1 %vm3464_vm2, %v10214_v52  ;;  %15996 = vrcp.f32 %v10058_v10  ;;  %v19497_v52 = vld [vmem:[#allocation66_spill] sm:$0xff] }
 0x4e9   : > { %14744 = vmatprep.mubr.msk.f32.mxu0 %vm3464_vm2, %v10210_v54  ;;  %14752 = vmatmul.mubr.msk.f32.vlgmr.msra.gmra.mrb[102].mxu1 %vm3464_vm2, %v10216_v19  ;;  %v15987_v58 = vpop.eup %15986 }
 0x4ea   : > { %v10061_v31 = vpop.xlane.xlu1 %10060  ;;  %14745 = vmatmul.mubr.msk.f32.vlgmr.msra.gmra.mrb[102].mxu0 %vm3464_vm2, %v10212_v13  ;;  %15473 = vmatpush3.bf16.msra.mxu1 %v19490_v3  ;;  %v15989_v27 = vpop.eup %15988  ;;  %v10224_v51 = vmul.f32 %v15987_v58, %v18529_v48 }
 0x4eb   : > { %15998 = vrcp.f32 %v10061_v31  ;;  %v10055_v42 = vpop.xlane.xlu0 %10054  ;;  %15469 = vmatpush3.bf16.msra.mxu0 %v19491_v22  ;;  %15479 = vmatprep.subr.bf16.mxu1 %v19492_v24  ;;  %v10220_v33 = vmul.f32 %v15989_v27, %v18531_v2 }
 0x4ec   : > { %16000 = vrcp.f32 %v10055_v42  ;;  %15475 = vmatprep.subr.bf16.mxu0 %v19493_v60 }
 0x4ed   : > { %v15991_v43 = vpop.eup %15990 }
 0x4ee   : > { %v15993_v63 = vpop.eup %15992  ;;  %v10076_v55 = vpop.xlane.xlu1 %10075  ;;  %v10222_v29 = vmul.f32 %v15991_v43, %v18539_v17 }
 0x4ef   : > { %v10070_v12 = vpop.xlane.xlu0 %10069  ;;  %v10218_v47 = vmul.f32 %v15993_v63, %v18541_v18  ;;  %16002 = vrcp.f32 %v10076_v55  ;;  %v19494_v18 = vld [vmem:[#allocation65_spill] sm:$0xff] }
 0x4f0   : > { %14765 = vmatprep.mubr.msk.f32.mxu1 %vm3464_vm2, %v10222_v29  ;;  %16004 = vrcp.f32 %v10070_v12 }
 0x4f1   : > { %14758 = vmatprep.mubr.msk.f32.mxu0 %vm3464_vm2, %v10218_v47  ;;  %14766 = vmatmul.mubr.msk.f32.vlgmr.msra.gmra.mrb[104].mxu1 %vm3464_vm2, %v10224_v51  ;;  %v15995_v17 = vpop.eup %15994 }
 0x4f2   : > { %v10073_v40 = vpop.xlane.xlu1 %10072  ;;  %14759 = vmatmul.mubr.msk.f32.vlgmr.msra.gmra.mrb[104].mxu0 %vm3464_vm2, %v10220_v33  ;;  %15481 = vmatpush3.bf16.msra.mxu1 %v19492_v24  ;;  %v15997_v2 = vpop.eup %15996  ;;  %v10232_v38 = vmul.f32 %v15995_v17, %v18549_v30  ;;  %v19501_v17 = vld [vmem:[#allocation70_spill] sm:$0xff] }
 0x4f3   : > { %16006 = vrcp.f32 %v10073_v40  ;;  %v10067_v48 = vpop.xlane.xlu0 %10066  ;;  %15477 = vmatpush3.bf16.msra.mxu0 %v19493_v60  ;;  %15487 = vmatprep.subr.bf16.mxu1 %v19494_v18  ;;  %v10228_v25 = vmul.f32 %v15997_v2, %v18551_v34  ;;  %v19499_v60 = vld [vmem:[#allocation68_spill] sm:$0xff] }
 0x4f4   : > { %16008 = vrcp.f32 %v10067_v48  ;;  %15483 = vmatprep.subr.bf16.mxu0 %v19495_v50 }
 0x4f5   : > { %v15999_v0 = vpop.eup %15998 }
 0x4f6   : > { %v16001_v56 = vpop.eup %16000  ;;  %v10088_v41 = vpop.xlane.xlu1 %10087  ;;  %v10230_v3 = vmul.f32 %v15999_v0, %v18559_v62 }
 0x4f7   : > { %v10082_v22 = vpop.xlane.xlu0 %10081  ;;  %v10226_v28 = vmul.f32 %v16001_v56, %v18561_v6  ;;  %16010 = vrcp.f32 %v10088_v41  ;;  %v19496_v6 = vld [vmem:[#allocation67_spill] sm:$0xff] }
 0x4f8   : > { %14779 = vmatprep.mubr.msk.f32.mxu1 %vm3464_vm2, %v10230_v3  ;;  %16012 = vrcp.f32 %v10082_v22  ;;  %v19503_v22 = vld [vmem:[#allocation72_spill] sm:$0xff] }
 0x4f9   : > { %14772 = vmatprep.mubr.msk.f32.mxu0 %vm3464_vm2, %v10226_v28  ;;  %14780 = vmatmul.mubr.msk.f32.vlgmr.msra.gmra.mrb[106].mxu1 %vm3464_vm2, %v10232_v38  ;;  %v16003_v62 = vpop.eup %16002 }
 0x4fa   : > { %v10085_v4 = vpop.xlane.xlu1 %10084  ;;  %14773 = vmatmul.mubr.msk.f32.vlgmr.msra.gmra.mrb[106].mxu0 %vm3464_vm2, %v10228_v25  ;;  %15489 = vmatpush3.bf16.msra.mxu1 %v19494_v18  ;;  %v16005_v34 = vpop.eup %16004  ;;  %v10240_v31 = vmul.f32 %v16003_v62, %v18569_v36 }
 0x4fb   : > { %16014 = vrcp.f32 %v10085_v4  ;;  %v10079_v30 = vpop.xlane.xlu0 %10078  ;;  %15485 = vmatpush3.bf16.msra.mxu0 %v19495_v50  ;;  %15495 = vmatprep.subr.bf16.mxu1 %v19496_v6  ;;  %v10236_v24 = vmul.f32 %v16005_v34, %v18571_v26  ;;  %v19504_v34 = vld [vmem:[#allocation12_spill] sm:$0xff] }
 0x4fc   : > { %16016 = vrcp.f32 %v10079_v30  ;;  %15491 = vmatprep.subr.bf16.mxu0 %v19497_v52 }
 0x4fd   : > { %v16007_v19 = vpop.eup %16006 }
 0x4fe   : > { %v16009_v10 = vpop.eup %16008  ;;  %v10100_v54 = vpop.xlane.xlu1 %10099  ;;  %v10238_v13 = vmul.f32 %v16007_v19, %v18579_v15  ;;  %v19505_v19 = vld [vmem:[#allocation9_spill] sm:$0xff] }
 0x4ff   : > { %v10094_v58 = vpop.xlane.xlu0 %10093  ;;  %v10234_v42 = vmul.f32 %v16009_v10, %v18581_v57  ;;  %16018 = vrcp.f32 %v10100_v54  ;;  %v19498_v57 = vld [vmem:[#allocation69_spill] sm:$0xff] }
 0x500   : > { %14793 = vmatprep.mubr.msk.f32.mxu1 %vm3464_vm2, %v10238_v13  ;;  %16020 = vrcp.f32 %v10094_v58  ;;  %v19506_v13 = vld [vmem:[#allocation35_spill] sm:$0xff]  ;;  %v19507_v58 = vld [vmem:[#allocation37_spill] sm:$0xff] }
 0x501   : > { %14786 = vmatprep.mubr.msk.f32.mxu0 %vm3464_vm2, %v10234_v42  ;;  %14794 = vmatmul.mubr.msk.f32.vlgmr.msra.gmra.mrb[108].mxu1 %vm3464_vm2, %v10240_v31  ;;  %v16011_v15 = vpop.eup %16010 }
 0x502   : > { %v10097_v27 = vpop.xlane.xlu1 %10096  ;;  %14787 = vmatmul.mubr.msk.f32.vlgmr.msra.gmra.mrb[108].mxu0 %vm3464_vm2, %v10236_v24  ;;  %15497 = vmatpush3.bf16.msra.mxu1 %v19496_v6  ;;  %v16013_v26 = vpop.eup %16012  ;;  %v10248_v51 = vmul.f32 %v16011_v15, %v18589_v16 }
 0x503   : > { %16022 = vrcp.f32 %v10097_v27  ;;  %v10091_v36 = vpop.xlane.xlu0 %10090  ;;  %15493 = vmatpush3.bf16.msra.mxu0 %v19497_v52  ;;  %15503 = vmatprep.subr.bf16.mxu1 %v19498_v57  ;;  %v10244_v33 = vmul.f32 %v16013_v26, %v18591_v20 }
 0x504   : > { %16024 = vrcp.f32 %v10091_v36  ;;  %15499 = vmatprep.subr.bf16.mxu0 %v19499_v60  ;;  %v19508_v36 = vld [vmem:[#allocation11_spill] sm:$0xff] }
 0x505   : > { %v16015_v43 = vpop.eup %16014 }
 0x506   : > { %v16017_v63 = vpop.eup %16016  ;;  %v10112_v55 = vpop.xlane.xlu1 %10111  ;;  %v10246_v29 = vmul.f32 %v16015_v43, %v18599_v49 }
 0x507   : > { %v10106_v12 = vpop.xlane.xlu0 %10105  ;;  %v10242_v47 = vmul.f32 %v16017_v63, %v18601_v11  ;;  %16026 = vrcp.f32 %v10112_v55  ;;  %v19500_v11 = vld [vmem:[#allocation71_spill] sm:$0xff]  ;;  %v19510_v63 = vld [vmem:[#allocation14_spill] sm:$0xff] }
 0x508   : > { %14807 = vmatprep.mubr.msk.f32.mxu1 %vm3464_vm2, %v10246_v29  ;;  %16028 = vrcp.f32 %v10106_v12  ;;  %v19511_v12 = vld [vmem:[#allocation36_spill] sm:$0xff] }
 0x509   : > { %14800 = vmatprep.mubr.msk.f32.mxu0 %vm3464_vm2, %v10242_v47  ;;  %14808 = vmatmul.mubr.msk.f32.vlgmr.msra.gmra.mrb[110].mxu1 %vm3464_vm2, %v10248_v51  ;;  %v16019_v49 = vpop.eup %16018 }
 0x50a   : > { %v10109_v40 = vpop.xlane.xlu1 %10108  ;;  %14801 = vmatmul.mubr.msk.f32.vlgmr.msra.gmra.mrb[110].mxu0 %vm3464_vm2, %v10244_v33  ;;  %15505 = vmatpush3.bf16.msra.mxu1 %v19498_v57  ;;  %v16021_v20 = vpop.eup %16020  ;;  %v10256_v0 = vmul.f32 %v16019_v49, %v18609_v7  ;;  %v19512_v33 = vld [vmem:[#allocation38_spill] sm:$0xff] }
 0x50b   : > { %16030 = vrcp.f32 %v10109_v40  ;;  %v10103_v16 = vpop.xlane.xlu0 %10102  ;;  %15501 = vmatpush3.bf16.msra.mxu0 %v19499_v60  ;;  %15511 = vmatprep.subr.bf16.mxu1 %v19500_v11  ;;  %v10252_v3 = vmul.f32 %v16021_v20, %v18611_v46  ;;  %v19509_v60 = vld [vmem:[#allocation13_spill] sm:$0xff] }
 0x50c   : > { %16032 = vrcp.f32 %v10103_v16  ;;  %15507 = vmatprep.subr.bf16.mxu0 %v19501_v17 }
 0x50d   : > { %v16023_v48 = vpop.eup %16022 }
 0x50e   : > { %v16025_v18 = vpop.eup %16024  ;;  %v10124_v2 = vpop.xlane.xlu1 %10123  ;;  %v10254_v50 = vmul.f32 %v16023_v48, %v18619_v35 }
 0x50f   : > { %v10118_v56 = vpop.xlane.xlu0 %10117  ;;  %v10250_v41 = vmul.f32 %v16025_v18, %v18621_v53  ;;  %16034 = vrcp.f32 %v10124_v2  ;;  %v19502_v53 = vld [vmem:[#allocation53_spill] sm:$0xff] }
 0x510   : > { %14821 = vmatprep.mubr.msk.f32.mxu1 %vm3464_vm2, %v10254_v50  ;;  %16036 = vrcp.f32 %v10118_v56  ;;  %v19514_v50 = vld [vmem:[#allocation39_spill] sm:$0xff] }
 0x511   : > { %14814 = vmatprep.mubr.msk.f32.mxu0 %vm3464_vm2, %v10250_v41  ;;  %14822 = vmatmul.mubr.msk.f32.vlgmr.msra.gmra.mrb[112].mxu1 %vm3464_vm2, %v10256_v0  ;;  %v16027_v35 = vpop.eup %16026 }
 0x512   : > { %v10121_v38 = vpop.xlane.xlu1 %10120  ;;  %14815 = vmatmul.mubr.msk.f32.vlgmr.msra.gmra.mrb[112].mxu0 %vm3464_vm2, %v10252_v3  ;;  %15513 = vmatpush3.bf16.msra.mxu1 %v19500_v11  ;;  %v16029_v46 = vpop.eup %16028  ;;  %v10264_v30 = vmul.f32 %v16027_v35, %v18629_v59 }
 0x513   : > { %16038 = vrcp.f32 %v10121_v38  ;;  %v10115_v7 = vpop.xlane.xlu0 %10114  ;;  %15509 = vmatpush3.bf16.msra.mxu0 %v19501_v17  ;;  %15519 = vmatprep.subr.bf16.mxu1 %v19502_v53  ;;  %v10260_v10 = vmul.f32 %v16029_v46, %v19505_v19 }
 0x514   : > { %16040 = vrcp.f32 %v10115_v7  ;;  %15515 = vmatprep.subr.bf16.mxu0 %v19503_v22 }
 0x515   : > { %v16031_v28 = vpop.eup %16030 }
 0x516   : > { %v16033_v25 = vpop.eup %16032  ;;  %v10136_v4 = vpop.xlane.xlu1 %10135  ;;  %v10262_v62 = vmul.f32 %v16031_v28, %v18639_v14 }
 0x517   : > { %v10130_v6 = vpop.xlane.xlu0 %10129  ;;  %v10258_v52 = vmul.f32 %v16033_v25, %v19504_v34  ;;  %16042 = vrcp.f32 %v10136_v4  ;;  %v19517_v25 = vld [vmem:[#allocation40_spill] sm:$0xff]  ;;  %v19519_v34 = vld [vmem:[#allocation15_spill] sm:$0xff] }
 0x518   : > { %14835 = vmatprep.mubr.msk.f32.mxu1 %vm3464_vm2, %v10262_v62  ;;  %16044 = vrcp.f32 %v10130_v6 }
 0x519   : > { %14828 = vmatprep.mubr.msk.f32.mxu0 %vm3464_vm2, %v10258_v52  ;;  %14836 = vmatmul.mubr.msk.f32.vlgmr.msra.gmra.mrb[114].mxu1 %vm3464_vm2, %v10264_v30  ;;  %v16035_v14 = vpop.eup %16034  ;;  %v19518_v30 = vld [vmem:[#allocation17_spill] sm:$0xff] }
 0x51a   : > { %v10133_v54 = vpop.xlane.xlu1 %10132  ;;  %14829 = vmatmul.mubr.msk.f32.vlgmr.msra.gmra.mrb[114].mxu0 %vm3464_vm2, %v10260_v10  ;;  %15521 = vmatpush3.bf16.msra.mxu1 %v19502_v53  ;;  %v16037_v31 = vpop.eup %16036  ;;  %v10272_v57 = vmul.f32 %v16035_v14, %v19508_v36  ;;  %v19515_v53 = vld [vmem:[#allocation16_spill] sm:$0xff]  ;;  %v19520_v10 = vld [vmem:[#allocation18_spill] sm:$0xff] }
 0x51b   : > { %16046 = vrcp.f32 %v10133_v54  ;;  %v10127_v59 = vpop.xlane.xlu0 %10126  ;;  %15517 = vmatpush3.bf16.msra.mxu0 %v19503_v22  ;;  %15527 = vmatprep.subr.bf16.mxu1 %v19506_v13  ;;  %v10268_v55 = vmul.f32 %v16037_v31, %v19510_v63  ;;  %v19521_v31 = vld [vmem:[#allocation44_spill] sm:$0xff]  ;;  %v19524_v63 = vld [vmem:[#allocation19_spill] sm:$0xff] }
 0x51c   : > { %16048 = vrcp.f32 %v10127_v59  ;;  %15523 = vmatprep.subr.bf16.mxu0 %v19507_v58 }
 0x51d   : > { %v16039_v42 = vpop.eup %16038 }
 0x51e   : > { %v16041_v24 = vpop.eup %16040  ;;  %v10148_v27 = vpop.xlane.xlu1 %10147  ;;  %v10270_v15 = vmul.f32 %v16039_v42, %v18659_v23 }
 0x51f   : > { %v10142_v26 = vpop.xlane.xlu0 %10141  ;;  %v10266_v43 = vmul.f32 %v16041_v24, %v19509_v60  ;;  %16050 = vrcp.f32 %v10148_v27  ;;  %v19523_v60 = vld [vmem:[#allocation20_spill] sm:$0xff] }
 0x520   : > { %14849 = vmatprep.mubr.msk.f32.mxu1 %vm3464_vm2, %v10270_v15  ;;  %16052 = vrcp.f32 %v10142_v26 }
 0x521   : > { %14842 = vmatprep.mubr.msk.f32.mxu0 %vm3464_vm2, %v10266_v43  ;;  %14850 = vmatmul.mubr.msk.f32.vlgmr.msra.gmra.mrb[116].mxu1 %vm3464_vm2, %v10272_v57  ;;  %v16043_v23 = vpop.eup %16042 }
 0x522   : > { %v10145_v29 = vpop.xlane.xlu1 %10144  ;;  %14843 = vmatmul.mubr.msk.f32.vlgmr.msra.gmra.mrb[116].mxu0 %vm3464_vm2, %v10268_v55  ;;  %15529 = vmatpush3.bf16.msra.mxu1 %v19506_v13  ;;  %v16045_v47 = vpop.eup %16044  ;;  %v10280_v20 = vmul.f32 %v16043_v23, %v18669_v45  ;;  %v19525_v55 = vld [vmem:[#allocation22_spill] sm:$0xff] }
 0x523   : > { %16054 = vrcp.f32 %v10145_v29  ;;  %v10139_v51 = vpop.xlane.xlu0 %10138  ;;  %15525 = vmatpush3.bf16.msra.mxu0 %v19507_v58  ;;  %15535 = vmatprep.subr.bf16.mxu1 %v19511_v12  ;;  %v10276_v18 = vmul.f32 %v16045_v47, %v18671_v39  ;;  %v19522_v58 = vld [vmem:[#allocation43_spill] sm:$0xff] }
 0x524   : > { %16056 = vrcp.f32 %v10139_v51  ;;  %15531 = vmatprep.subr.bf16.mxu0 %v19512_v33 }
 0x525   : > { %v16047_v40 = vpop.eup %16046 }
 0x526   : > { %v16049_v49 = vpop.eup %16048  ;;  %v10160_v16 = vpop.xlane.xlu1 %10159  ;;  %v10278_v11 = vmul.f32 %v16047_v40, %v18679_v5 }
 0x527   : > { %v10154_v17 = vpop.xlane.xlu0 %10153  ;;  %v10274_v48 = vmul.f32 %v16049_v49, %v18681_v1  ;;  %16058 = vrcp.f32 %v10160_v16  ;;  %v19513_v1 = vld [vmem:[#allocation42_spill] sm:$0xff] }
 0x528   : > { %14863 = vmatprep.mubr.msk.f32.mxu1 %vm3464_vm2, %v10278_v11  ;;  %16060 = vrcp.f32 %v10154_v17 }
 0x529   : > { %14856 = vmatprep.mubr.msk.f32.mxu0 %vm3464_vm2, %v10274_v48  ;;  %14864 = vmatmul.mubr.msk.f32.vlgmr.msra.gmra.mrb[118].mxu1 %vm3464_vm2, %v10280_v20  ;;  %v16051_v5 = vpop.eup %16050 }
 0x52a   : > { %v10157_v2 = vpop.xlane.xlu1 %10156  ;;  %14857 = vmatmul.mubr.msk.f32.vlgmr.msra.gmra.mrb[118].mxu0 %vm3464_vm2, %v10276_v18  ;;  %15537 = vmatpush3.bf16.msra.mxu1 %v19511_v12  ;;  %v16053_v39 = vpop.eup %16052  ;;  %v10288_v38 = vmul.f32 %v16051_v5, %v18689_v44  ;;  %v19526_v12 = vld [vmem:[#allocation21_spill] sm:$0xff] }
 0x52b   : > { %16062 = vrcp.f32 %v10157_v2  ;;  %v10151_v45 = vpop.xlane.xlu0 %10150  ;;  %15533 = vmatpush3.bf16.msra.mxu0 %v19512_v33  ;;  %15543 = vmatprep.subr.bf16.mxu1 %v19513_v1  ;;  %v10284_v46 = vmul.f32 %v16053_v39, %v19515_v53  ;;  %v19527_v33 = vld [vmem:[#allocation24_spill] sm:$0xff] }
 0x52c   : > { %16064 = vrcp.f32 %v10151_v45  ;;  %15539 = vmatprep.subr.bf16.mxu0 %v19514_v50 }
 0x52d   : > { %v16055_v0 = vpop.eup %16054 }
 0x52e   : > { %v16057_v56 = vpop.eup %16056  ;;  %v10172_v41 = vpop.xlane.xlu1 %10171  ;;  %v10286_v3 = vmul.f32 %v16055_v0, %v18699_v8 }
 0x52f   : > { %v10166_v35 = vpop.xlane.xlu0 %10165  ;;  %v10282_v7 = vmul.f32 %v16057_v56, %v18701_v61  ;;  %16066 = vrcp.f32 %v10172_v41  ;;  %v19516_v61 = vld [vmem:[#allocation41_spill] sm:$0xff] }
 0x530   : > { %14877 = vmatprep.mubr.msk.f32.mxu1 %vm3464_vm2, %v10286_v3  ;;  %16068 = vrcp.f32 %v10166_v35 }
 0x531   : > { %14870 = vmatprep.mubr.msk.f32.mxu0 %vm3464_vm2, %v10282_v7  ;;  %14878 = vmatmul.mubr.msk.f32.vlgmr.msra.gmra.mrb[120].mxu1 %vm3464_vm2, %v10288_v38  ;;  %v16059_v8 = vpop.eup %16058 }
 0x532   : > { %v10169_v22 = vpop.xlane.xlu1 %10168  ;;  %14871 = vmatmul.mubr.msk.f32.vlgmr.msra.gmra.mrb[120].mxu0 %vm3464_vm2, %v10284_v46  ;;  %15545 = vmatpush3.bf16.msra.mxu1 %v19513_v1  ;;  %v16061_v28 = vpop.eup %16060  ;;  %v10296_v52 = vmul.f32 %v16059_v8, %v19519_v34 }
 0x533   : > { %16070 = vrcp.f32 %v10169_v22  ;;  %v10163_v44 = vpop.xlane.xlu0 %10162  ;;  %15541 = vmatpush3.bf16.msra.mxu0 %v19514_v50  ;;  %15551 = vmatprep.subr.bf16.mxu1 %v19516_v61  ;;  %v10292_v54 = vmul.f32 %v16061_v28, %v19520_v10 }
 0x534   : > { %16072 = vrcp.f32 %v10163_v44  ;;  %15547 = vmatprep.subr.bf16.mxu0 %v19517_v25 }
 0x535   : > { %v16063_v4 = vpop.eup %16062 }
 0x536   : > { %v16065_v62 = vpop.eup %16064  ;;  %v10294_v6 = vmul.f32 %v16063_v4, %v19518_v30 }
 0x537   : > { %v10290_v19 = vmul.f32 %v16065_v62, %v18720_v9 }
 0x538   : > { %14891 = vmatprep.mubr.msk.f32.mxu1 %vm3464_vm2, %v10294_v6 }
 0x539   : > { %14884 = vmatprep.mubr.msk.f32.mxu0 %vm3464_vm2, %v10290_v19  ;;  %14892 = vmatmul.mubr.msk.f32.vlgmr.msra.gmra.mrb[122].mxu1 %vm3464_vm2, %v10296_v52  ;;  %v16067_v59 = vpop.eup %16066 }
 0x53a   : > { %v10181_v14 = vpop.xlane.xlu1 %10180  ;;  %14885 = vmatmul.mubr.msk.f32.vlgmr.msra.gmra.mrb[122].mxu0 %vm3464_vm2, %v10292_v54  ;;  %15553 = vmatpush3.bf16.msra.mxu1 %v19516_v61  ;;  %v16069_v9 = vpop.eup %16068  ;;  %v10304_v36 = vmul.f32 %v16067_v59, %v18729_v21 }
 0x53b   : > { %16074 = vrcp.f32 %v10181_v14  ;;  %v10175_v13 = vpop.xlane.xlu0 %10174  ;;  %15549 = vmatpush3.bf16.msra.mxu0 %v19517_v25  ;;  %15559 = vmatprep.subr.bf16.mxu1 %v19521_v31  ;;  %v10300_v43 = vmul.f32 %v16069_v9, %v19523_v60 }
 0x53c   : > { %16076 = vrcp.f32 %v10175_v13  ;;  %15555 = vmatprep.subr.bf16.mxu0 %v19522_v58 }
 0x53d   : > { %v16071_v42 = vpop.eup %16070 }
 0x53e   : > { %v16073_v24 = vpop.eup %16072  ;;  %v10184_v27 = vpop.xlane.xlu1 %10183  ;;  %v10302_v15 = vmul.f32 %v16071_v42, %v18737_v32 }
 0x53f   : > { %16078 = vrcp.f32 %v10184_v27  ;;  %v10178_v57 = vpop.xlane.xlu0 %10177  ;;  %v10298_v26 = vmul.f32 %v16073_v24, %v18739_v37 }
 0x540   : > { %16080 = vrcp.f32 %v10178_v57  ;;  %14905 = vmatprep.mubr.msk.f32.mxu1 %vm3464_vm2, %v10302_v15 }
 0x541   : > { %14898 = vmatprep.mubr.msk.f32.mxu0 %vm3464_vm2, %v10298_v26  ;;  %14906 = vmatmul.mubr.msk.f32.vlgmr.msra.gmra.mrb[124].mxu1 %vm3464_vm2, %v10304_v36 }
 0x542   : > { %14899 = vmatmul.mubr.msk.f32.vlgmr.msra.gmra.mrb[124].mxu0 %vm3464_vm2, %v10300_v43  ;;  %15561 = vmatpush3.bf16.msra.mxu1 %v19521_v31 }
 0x543   : > { %15557 = vmatpush3.bf16.msra.mxu0 %v19522_v58 }
 0x545   : > { %v16075_v21 = vpop.eup %16074 }
 0x546   : > { %v16077_v32 = vpop.eup %16076  ;;  %v10310_v37 = vmul.f32 %v16075_v21, %v19524_v63 }
 0x547   : > { %v10306_v29 = vmul.f32 %v16077_v32, %v19525_v55 }
 0x548   : > { %14919 = vmatprep.mubr.msk.f32.mxu1 %vm3464_vm2, %v10310_v37 }
 0x549   : > { %v16079_v23 = vpop.eup %16078  ;;  %14912 = vmatprep.mubr.msk.f32.mxu0 %vm3464_vm2, %v10306_v29 }
 0x54a   : > { %v16081_v51 = vpop.eup %16080  ;;  %v10312_v47 = vmul.f32 %v16079_v23, %v19526_v12 }
 0x54b   : > { %v10308_v40 = vmul.f32 %v16081_v51, %v19527_v33 }
 0x54c   : > { %14920 = vmatmul.mubr.msk.f32.vlgmr.msra.gmra.mrb[126].mxu1 %vm3464_vm2, %v10312_v47 }
 0x54d   : > { %14913 = vmatmul.mubr.msk.f32.vlgmr.msra.gmra.mrb[126].mxu0 %vm3464_vm2, %v10308_v40 }
 0x5a4   : > { %v14711_v49 = vpop.f32.mrb[96].mxu1 }
 0x5a5   : > { %12908 = vst.msk [vmem:[%s18951_s30 + $0x18] sm:$0xff] %vm551_vm0, %v14711_v49  ;;  %v14704_v16 = vpop.f32.mrb[96].mxu0  ;;  %v10466_v11 = vpop.f32.mrb[97].mxu1 }
 0x5a6   : > { %12906 = vst.msk [vmem:[%s18951_s30 + $0x8] sm:$0xff] %vm551_vm0, %v14704_v16  ;;  %12907 = vst.msk [vmem:[%s18951_s30 + $0x10] sm:$0xff] %vm551_vm0, %v10466_v11  ;;  %v10385_v20 = vpop.f32.mrb[97].mxu0 }
 0x5a7   : > { %12905 = vst.msk [vmem:[%s18951_s30] sm:$0xff] %vm551_vm0, %v10385_v20 }
 0x5ac   : > { %v14725_v17 = vpop.f32.mrb[98].mxu1 }
 0x5ad   : > { %12912 = vst.msk [vmem:[%s18951_s30 + $0x38] sm:$0xff] %vm551_vm0, %v14725_v17  ;;  %v14718_v48 = vpop.f32.mrb[98].mxu0  ;;  %v10628_v18 = vpop.f32.mrb[99].mxu1 }
 0x5ae   : > { %12910 = vst.msk [vmem:[%s18951_s30 + $0x28] sm:$0xff] %vm551_vm0, %v14718_v48  ;;  %12911 = vst.msk [vmem:[%s18951_s30 + $0x30] sm:$0xff] %vm551_vm0, %v10628_v18  ;;  %v10547_v2 = vpop.f32.mrb[99].mxu0 }
 0x5af   : > { %12909 = vst.msk [vmem:[%s18951_s30 + $0x20] sm:$0xff] %vm551_vm0, %v10547_v2 }
 0x5b4   : > { %v14739_v5 = vpop.f32.mrb[100].mxu1 }
 0x5b5   : > { %12916 = vst.msk [vmem:[%s18951_s30 + $0x58] sm:$0xff] %vm551_vm0, %v14739_v5  ;;  %v14732_v45 = vpop.f32.mrb[100].mxu0  ;;  %v10790_v1 = vpop.f32.mrb[101].mxu1 }
 0x5b6   : > { %12914 = vst.msk [vmem:[%s18951_s30 + $0x48] sm:$0xff] %vm551_vm0, %v14732_v45  ;;  %12915 = vst.msk [vmem:[%s18951_s30 + $0x50] sm:$0xff] %vm551_vm0, %v10790_v1  ;;  %v10709_v39 = vpop.f32.mrb[101].mxu0 }
 0x5b7   : > { %12913 = vst.msk [vmem:[%s18951_s30 + $0x40] sm:$0xff] %vm551_vm0, %v10709_v39 }
 0x5bc   : > { %v14753_v50 = vpop.f32.mrb[102].mxu1 }
 0x5bd   : > { %12920 = vst.msk [vmem:[%s18951_s30 + $0x78] sm:$0xff] %vm551_vm0, %v14753_v50  ;;  %v14746_v0 = vpop.f32.mrb[102].mxu0  ;;  %v10952_v56 = vpop.f32.mrb[103].mxu1 }
 0x5be   : > { %12918 = vst.msk [vmem:[%s18951_s30 + $0x68] sm:$0xff] %vm551_vm0, %v14746_v0  ;;  %12919 = vst.msk [vmem:[%s18951_s30 + $0x70] sm:$0xff] %vm551_vm0, %v10952_v56  ;;  %v10871_v41 = vpop.f32.mrb[103].mxu0 }
 0x5bf   : > { %12917 = vst.msk [vmem:[%s18951_s30 + $0x60] sm:$0xff] %vm551_vm0, %v10871_v41 }
 0x5c4   : > { %v14767_v3 = vpop.f32.mrb[104].mxu1 }
 0x5c5   : > { %12924 = vst.msk [vmem:[%s18951_s30 + $0x98] sm:$0xff] %vm551_vm0, %v14767_v3  ;;  %v14760_v38 = vpop.f32.mrb[104].mxu0  ;;  %v11114_v35 = vpop.f32.mrb[105].mxu1 }
 0x5c6   : > { %12922 = vst.msk [vmem:[%s18951_s30 + $0x88] sm:$0xff] %vm551_vm0, %v14760_v38  ;;  %12923 = vst.msk [vmem:[%s18951_s30 + $0x90] sm:$0xff] %vm551_vm0, %v11114_v35  ;;  %v11033_v7 = vpop.f32.mrb[105].mxu0 }
 0x5c7   : > { %12921 = vst.msk [vmem:[%s18951_s30 + $0x80] sm:$0xff] %vm551_vm0, %v11033_v7 }
 0x5cc   : > { %v14781_v53 = vpop.f32.mrb[106].mxu1 }
 0x5cd   : > { %12928 = vst.msk [vmem:[%s18951_s30 + $0xb8] sm:$0xff] %vm551_vm0, %v14781_v53  ;;  %v14774_v46 = vpop.f32.mrb[106].mxu0  ;;  %v11276_v22 = vpop.f32.mrb[107].mxu1 }
 0x5ce   : > { %12926 = vst.msk [vmem:[%s18951_s30 + $0xa8] sm:$0xff] %vm551_vm0, %v14774_v46  ;;  %12927 = vst.msk [vmem:[%s18951_s30 + $0xb0] sm:$0xff] %vm551_vm0, %v11276_v22  ;;  %v11195_v8 = vpop.f32.mrb[107].mxu0 }
 0x5cf   : > { %12925 = vst.msk [vmem:[%s18951_s30 + $0xa0] sm:$0xff] %vm551_vm0, %v11195_v8 }
 0x5d4   : > { %v14795_v44 = vpop.f32.mrb[108].mxu1 }
 0x5d5   : > { %12932 = vst.msk [vmem:[%s18951_s30 + $0xd8] sm:$0xff] %vm551_vm0, %v14795_v44  ;;  %v14788_v61 = vpop.f32.mrb[108].mxu0  ;;  %v11438_v28 = vpop.f32.mrb[109].mxu1 }
 0x5d6   : > { %12930 = vst.msk [vmem:[%s18951_s30 + $0xc8] sm:$0xff] %vm551_vm0, %v14788_v61  ;;  %12931 = vst.msk [vmem:[%s18951_s30 + $0xd0] sm:$0xff] %vm551_vm0, %v11438_v28  ;;  %v11357_v25 = vpop.f32.mrb[109].mxu0 }
 0x5d7   : > { %12929 = vst.msk [vmem:[%s18951_s30 + $0xc0] sm:$0xff] %vm551_vm0, %v11357_v25 }
 0x5dc   : > { %v14809_v4 = vpop.f32.mrb[110].mxu1 }
 0x5dd   : > { %12936 = vst.msk [vmem:[%s18951_s30 + $0xf8] sm:$0xff] %vm551_vm0, %v14809_v4  ;;  %v14802_v62 = vpop.f32.mrb[110].mxu0  ;;  %v11600_v30 = vpop.f32.mrb[111].mxu1 }
 0x5de   : > { %12934 = vst.msk [vmem:[%s18951_s30 + $0xe8] sm:$0xff] %vm551_vm0, %v14802_v62  ;;  %12935 = vst.msk [vmem:[%s18951_s30 + $0xf0] sm:$0xff] %vm551_vm0, %v11600_v30  ;;  %v11519_v6 = vpop.f32.mrb[111].mxu0 }
 0x5df   : > { %12933 = vst.msk [vmem:[%s18951_s30 + $0xe0] sm:$0xff] %vm551_vm0, %v11519_v6 }
 0x5e4   : > { %v14823_v34 = vpop.f32.mrb[112].mxu1 }
 0x5e5   : > { %12940 = vst.msk [vmem:[%s18951_s30 + $0x118] sm:$0xff] %vm551_vm0, %v14823_v34  ;;  %v14816_v52 = vpop.f32.mrb[112].mxu0  ;;  %v11762_v19 = vpop.f32.mrb[113].mxu1 }
 0x5e6   : > { %12938 = vst.msk [vmem:[%s18951_s30 + $0x108] sm:$0xff] %vm551_vm0, %v14816_v52  ;;  %12939 = vst.msk [vmem:[%s18951_s30 + $0x110] sm:$0xff] %vm551_vm0, %v11762_v19  ;;  %v11681_v10 = vpop.f32.mrb[113].mxu0 }
 0x5e7   : > { %12937 = vst.msk [vmem:[%s18951_s30 + $0x100] sm:$0xff] %vm551_vm0, %v11681_v10 }
 0x5ec   : > { %v14837_v54 = vpop.f32.mrb[114].mxu1 }
 0x5ed   : > { %12944 = vst.msk [vmem:[%s18951_s30 + $0x138] sm:$0xff] %vm551_vm0, %v14837_v54  ;;  %v14830_v14 = vpop.f32.mrb[114].mxu0  ;;  %v11924_v59 = vpop.f32.mrb[115].mxu1 }
 0x5ee   : > { %12942 = vst.msk [vmem:[%s18951_s30 + $0x128] sm:$0xff] %vm551_vm0, %v14830_v14  ;;  %12943 = vst.msk [vmem:[%s18951_s30 + $0x130] sm:$0xff] %vm551_vm0, %v11924_v59  ;;  %v11843_v13 = vpop.f32.mrb[115].mxu0 }
 0x5ef   : > { %12941 = vst.msk [vmem:[%s18951_s30 + $0x120] sm:$0xff] %vm551_vm0, %v11843_v13 }
 0x5f4   : > { %v14851_v31 = vpop.f32.mrb[116].mxu1 }
 0x5f5   : > { %12948 = vst.msk [vmem:[%s18951_s30 + $0x158] sm:$0xff] %vm551_vm0, %v14851_v31  ;;  %v14844_v9 = vpop.f32.mrb[116].mxu0  ;;  %v12086_v58 = vpop.f32.mrb[117].mxu1 }
 0x5f6   : > { %12946 = vst.msk [vmem:[%s18951_s30 + $0x148] sm:$0xff] %vm551_vm0, %v14844_v9  ;;  %12947 = vst.msk [vmem:[%s18951_s30 + $0x150] sm:$0xff] %vm551_vm0, %v12086_v58  ;;  %v12005_v42 = vpop.f32.mrb[117].mxu0 }
 0x5f7   : > { %12945 = vst.msk [vmem:[%s18951_s30 + $0x140] sm:$0xff] %vm551_vm0, %v12005_v42 }
 0x5fc   : > { %v14865_v24 = vpop.f32.mrb[118].mxu1 }
 0x5fd   : > { %12952 = vst.msk [vmem:[%s18951_s30 + $0x178] sm:$0xff] %vm551_vm0, %v14865_v24  ;;  %v14858_v27 = vpop.f32.mrb[118].mxu0  ;;  %v12248_v15 = vpop.f32.mrb[119].mxu1 }
 0x5fe   : > { %12950 = vst.msk [vmem:[%s18951_s30 + $0x168] sm:$0xff] %vm551_vm0, %v14858_v27  ;;  %12951 = vst.msk [vmem:[%s18951_s30 + $0x170] sm:$0xff] %vm551_vm0, %v12248_v15  ;;  %v12167_v36 = vpop.f32.mrb[119].mxu0 }
 0x5ff   : > { %12949 = vst.msk [vmem:[%s18951_s30 + $0x160] sm:$0xff] %vm551_vm0, %v12167_v36 }
 0x604   : > { %v14879_v57 = vpop.f32.mrb[120].mxu1 }
 0x605   : > { %12956 = vst.msk [vmem:[%s18951_s30 + $0x198] sm:$0xff] %vm551_vm0, %v14879_v57  ;;  %v14872_v26 = vpop.f32.mrb[120].mxu0  ;;  %v12410_v60 = vpop.f32.mrb[121].mxu1 }
 0x606   : > { %12954 = vst.msk [vmem:[%s18951_s30 + $0x188] sm:$0xff] %vm551_vm0, %v14872_v26  ;;  %12955 = vst.msk [vmem:[%s18951_s30 + $0x190] sm:$0xff] %vm551_vm0, %v12410_v60  ;;  %v12329_v43 = vpop.f32.mrb[121].mxu0 }
 0x607   : > { %12953 = vst.msk [vmem:[%s18951_s30 + $0x180] sm:$0xff] %vm551_vm0, %v12329_v43 }
 0x60c   : > { %v14893_v21 = vpop.f32.mrb[122].mxu1 }
 0x60d   : > { %12960 = vst.msk [vmem:[%s18951_s30 + $0x1b8] sm:$0xff] %vm551_vm0, %v14893_v21  ;;  %v14886_v32 = vpop.f32.mrb[122].mxu0  ;;  %v12572_v63 = vpop.f32.mrb[123].mxu1 }
 0x60e   : > { %12958 = vst.msk [vmem:[%s18951_s30 + $0x1a8] sm:$0xff] %vm551_vm0, %v14886_v32  ;;  %12959 = vst.msk [vmem:[%s18951_s30 + $0x1b0] sm:$0xff] %vm551_vm0, %v12572_v63  ;;  %v12491_v37 = vpop.f32.mrb[123].mxu0 }
 0x60f   : > { %12957 = vst.msk [vmem:[%s18951_s30 + $0x1a0] sm:$0xff] %vm551_vm0, %v12491_v37 }
 0x614   : > { %v14907_v55 = vpop.f32.mrb[124].mxu1 }
 0x615   : > { %12964 = vst.msk [vmem:[%s18951_s30 + $0x1d8] sm:$0xff] %vm551_vm0, %v14907_v55  ;;  %v14900_v29 = vpop.f32.mrb[124].mxu0  ;;  %v12734_v23 = vpop.f32.mrb[125].mxu1 }
 0x616   : > { %12962 = vst.msk [vmem:[%s18951_s30 + $0x1c8] sm:$0xff] %vm551_vm0, %v14900_v29  ;;  %12963 = vst.msk [vmem:[%s18951_s30 + $0x1d0] sm:$0xff] %vm551_vm0, %v12734_v23  ;;  %v12653_v51 = vpop.f32.mrb[125].mxu0 }
 0x617   : > { %12961 = vst.msk [vmem:[%s18951_s30 + $0x1c0] sm:$0xff] %vm551_vm0, %v12653_v51 }
 0x61f   : > { %v14921_v12 = vpop.f32.mrb[126].mxu1 }
 0x620   : > { %12968 = vst.msk [vmem:[%s18951_s30 + $0x1f8] sm:$0xff] %vm551_vm0, %v14921_v12  ;;  %v14914_v47 = vpop.f32.mrb[126].mxu0  ;;  %v12896_v33 = vpop.f32.mrb[127].mxu1 }
 0x621   : > { %12966 = vst.msk [vmem:[%s18951_s30 + $0x1e8] sm:$0xff] %vm551_vm0, %v14914_v47  ;;  %12967 = vst.msk [vmem:[%s18951_s30 + $0x1f0] sm:$0xff] %vm551_vm0, %v12896_v33  ;;  %v12815_v40 = vpop.f32.mrb[127].mxu0 }
 0x622   : > { %12965 = vst.msk [vmem:[%s18951_s30 + $0x1e0] sm:$0xff] %vm551_vm0, %v12815_v40 }
 0x623 PF: > { %s17_s21 = sadd.s32 1, %s16096_s21  }
 0x624   : > { %p14_p4 = scmp.ge.s32.totalorder %s17_s21, 6  }
 0x626   :  { %16 = sbr.rel (!%p14_p4) target bundleno = 1 (0x1), region = 91 }

// kernel: _lambda_.7
= control target key start
LH: loop header
LB: loop body
LE: loop exit
PB: predicated region body
PF: predicated region fallthrough
CT: control target
= control target key end

     0   :  { %vm263_vm0 = vcmask 261120   ;;  %s1265_s0 = inlined_call_operand.vmem [shape: bf16[512,32], index: 0, kind: input, shape index: {}]   ;;  %s1266_s1 = inlined_call_operand.vmem [shape: bf16[32,32], index: 1, kind: input, shape index: {}]   ;;  %s1267_s2 = inlined_call_operand.vmem [shape: f32[1,32], index: 2, kind: input, shape index: {}]   ;;  %s1268_s3 = inlined_call_operand.hbm [shape: f32[512,32], index: 3, kind: output, shape index: {}]  }
   0x1   :  { %v905_v0 = vld [vmem:[%s1266_s1] sm:$0xff]   ;;  %v906_v1 = vld [vmem:[%s1266_s1 + $0x8] sm:$0xff]   ;;  %v911_v6 = vld [vmem:[%s1265_s0 + $0x10] sm:$0xff]  }
   0x2   :  { %830 = vmatprep.subr.bf16.mxu0 %v905_v0  ;;  %898 = vmatprep.subr.bf16.mxu1 %v905_v0  ;;  %v907_v2 = vld [vmem:[%s1265_s0] sm:$0xff]   ;;  %v909_v4 = vld [vmem:[%s1265_s0 + $0x8] sm:$0xff]   ;;  %v912_v7 = vld [vmem:[%s1265_s0 + $0x90] sm:$0xff]  }
   0x3   :  { %831 = vmatpush3.bf16.msra.mxu0 %v905_v0  ;;  %900 = vmatpush3.bf16.msra.mxu1 %v905_v0  ;;  %v908_v3 = vld [vmem:[%s1265_s0 + $0x80] sm:$0xff]   ;;  %v910_v5 = vld [vmem:[%s1265_s0 + $0x88] sm:$0xff]   ;;  %v913_v8 = vld [vmem:[%s1265_s0 + $0x18] sm:$0xff]  }
   0x4   :  { %832 = vmatprep.subr.bf16.mxu0 %v906_v1  ;;  %899 = vmatprep.subr.bf16.mxu1 %v906_v1  ;;  %v914_v9 = vld [vmem:[%s1265_s0 + $0x98] sm:$0xff]   ;;  %v915_v10 = vld [vmem:[%s1265_s0 + $0x20] sm:$0xff]   ;;  %v917_v12 = vld [vmem:[%s1265_s0 + $0x28] sm:$0xff]  }
   0x5   :  { %834 = vmatprep.mubr.msk.bf16.mxu0 %vm263_vm0, %v907_v2  ;;  %866 = vmatprep.mubr.msk.bf16.mxu1 %vm263_vm0, %v908_v3  ;;  %v916_v11 = vld [vmem:[%s1265_s0 + $0xa0] sm:$0xff]   ;;  %v918_v13 = vld [vmem:[%s1265_s0 + $0xa8] sm:$0xff]   ;;  %v919_v14 = vld [vmem:[%s1265_s0 + $0x30] sm:$0xff]  }
   0x6   :  { %v920_v15 = vld [vmem:[%s1265_s0 + $0xb0] sm:$0xff]   ;;  %v921_v16 = vld [vmem:[%s1265_s0 + $0x38] sm:$0xff]   ;;  %v923_v18 = vld [vmem:[%s1265_s0 + $0x40] sm:$0xff]  }
   0x7   :  { %833 = vmatpush3.bf16.msra.mxu0 %v906_v1  ;;  %901 = vmatpush3.bf16.msra.mxu1 %v906_v1  ;;  %v922_v17 = vld [vmem:[%s1265_s0 + $0xb8] sm:$0xff]   ;;  %v924_v19 = vld [vmem:[%s1265_s0 + $0xc0] sm:$0xff]  }
   0xa   :  { %835 = vmatmul.mubr.msk.bf16.vlgmr.msra.gmra.mrb[0].mxu0 %vm263_vm0, %v909_v4  ;;  %867 = vmatmul.mubr.msk.bf16.vlgmr.msra.gmra.mrb[0].mxu1 %vm263_vm0, %v910_v5 }
   0xb   :  { %838 = vmatprep.mubr.msk.bf16.mxu0 %vm263_vm0, %v911_v6  ;;  %870 = vmatprep.mubr.msk.bf16.mxu1 %vm263_vm0, %v912_v7 }
  0x12   :  { %839 = vmatmul.mubr.msk.bf16.gmra.mrb[4].mxu0 %vm263_vm0, %v913_v8  ;;  %871 = vmatmul.mubr.msk.bf16.gmra.mrb[4].mxu1 %vm263_vm0, %v914_v9 }
  0x13   :  { %842 = vmatprep.mubr.msk.bf16.mxu0 %vm263_vm0, %v915_v10  ;;  %874 = vmatprep.mubr.msk.bf16.mxu1 %vm263_vm0, %v916_v11 }
  0x1a   :  { %843 = vmatmul.mubr.msk.bf16.gmra.mrb[8].mxu0 %vm263_vm0, %v917_v12  ;;  %875 = vmatmul.mubr.msk.bf16.gmra.mrb[8].mxu1 %vm263_vm0, %v918_v13 }
  0x1b   :  { %846 = vmatprep.mubr.msk.bf16.mxu0 %vm263_vm0, %v919_v14  ;;  %878 = vmatprep.mubr.msk.bf16.mxu1 %vm263_vm0, %v920_v15 }
  0x22   :  { %847 = vmatmul.mubr.msk.bf16.gmra.mrb[12].mxu0 %vm263_vm0, %v921_v16  ;;  %879 = vmatmul.mubr.msk.bf16.gmra.mrb[12].mxu1 %vm263_vm0, %v922_v17 }
  0x23   :  { %8 = vsyncpa [#allocation3], 0  ;;  %850 = vmatprep.mubr.msk.bf16.mxu0 %vm263_vm0, %v923_v18  ;;  %882 = vmatprep.mubr.msk.bf16.mxu1 %vm263_vm0, %v924_v19  ;;  %v925_v20 = vld [vmem:[%s1265_s0 + $0x48] sm:$0xff]   ;;  %v927_v22 = vld [vmem:[%s1265_s0 + $0x50] sm:$0xff]  }
  0x24   :  { %v926_v21 = vld [vmem:[%s1265_s0 + $0xc8] sm:$0xff]   ;;  %v928_v23 = vld [vmem:[%s1265_s0 + $0xd0] sm:$0xff]   ;;  %v929_v24 = vld [vmem:[%s1265_s0 + $0x58] sm:$0xff]  }
  0x25   :  { %v930_v25 = vld [vmem:[%s1265_s0 + $0xd8] sm:$0xff]   ;;  %v931_v26 = vld [vmem:[%s1265_s0 + $0x60] sm:$0xff]   ;;  %v933_v28 = vld [vmem:[%s1265_s0 + $0x68] sm:$0xff]  }
  0x26   :  { %v932_v27 = vld [vmem:[%s1265_s0 + $0xe0] sm:$0xff]   ;;  %v934_v29 = vld [vmem:[%s1265_s0 + $0xe8] sm:$0xff]   ;;  %v935_v30 = vld [vmem:[%s1265_s0 + $0x70] sm:$0xff]  }
  0x27   :  { %v936_v31 = vld [vmem:[%s1265_s0 + $0xf0] sm:$0xff]   ;;  %v937_v32 = vld [vmem:[%s1265_s0 + $0x78] sm:$0xff]   ;;  %v1123_v34 = vld [vmem:[%s1267_s2] ss:$0 sm:$0xff] }
  0x28   :  { %v938_v33 = vld [vmem:[%s1265_s0 + $0xf8] sm:$0xff]   ;;  %s963_s0 = smov [#allocation2]  }
  0x29   :  { %s718_s2 = sshll.u32 %s963_s0, 4  ;;  %s719_s2 = int_to_ptr.vmem [resolvable:$true] %s718_s2 }
  0x2a   :  { %851 = vmatmul.mubr.msk.bf16.gmra.mrb[16].mxu0 %vm263_vm0, %v925_v20  ;;  %883 = vmatmul.mubr.msk.bf16.gmra.mrb[16].mxu1 %vm263_vm0, %v926_v21  ;;  %s939_s25 = scalar_lea.vmem %s719_s2, 8192  ;;  %p944_p1 = scmp.lt.s32.totalorder %s719_s2, %s719_s2 }
  0x2b   :  { %854 = vmatprep.mubr.msk.bf16.mxu0 %vm263_vm0, %v927_v22  ;;  %886 = vmatprep.mubr.msk.bf16.mxu1 %vm263_vm0, %v928_v23  ;;  %p940_p0 = scmp.ne.s32.totalorder %s719_s2, %s939_s25  ;;  %p945_p2 = scmp.lt.s32.totalorder %s939_s25, %s939_s25 }
  0x2d   :  { %p946_p3 = por %p945_p2, %p944_p1 }
  0x2f   :  { %p947_p4 = pnand %p946_p3, %p940_p0 }
  0x32   :  { %855 = vmatmul.mubr.msk.bf16.gmra.mrb[20].mxu0 %vm263_vm0, %v929_v24  ;;  %887 = vmatmul.mubr.msk.bf16.gmra.mrb[20].mxu1 %vm263_vm0, %v930_v25 }
  0x33   :  { %858 = vmatprep.mubr.msk.bf16.mxu0 %vm263_vm0, %v931_v26  ;;  %890 = vmatprep.mubr.msk.bf16.mxu1 %vm263_vm0, %v932_v27 }
  0x3a   :  { %859 = vmatmul.mubr.msk.bf16.gmra.mrb[24].mxu0 %vm263_vm0, %v933_v28  ;;  %891 = vmatmul.mubr.msk.bf16.gmra.mrb[24].mxu1 %vm263_vm0, %v934_v29 }
  0x3b   :  { %862 = vmatprep.mubr.msk.bf16.mxu0 %vm263_vm0, %v935_v30  ;;  %894 = vmatprep.mubr.msk.bf16.mxu1 %vm263_vm0, %v936_v31 }
  0x42   :  { %863 = vmatmul.mubr.msk.bf16.gmra.mrb[28].mxu0 %vm263_vm0, %v937_v32  ;;  %895 = vmatmul.mubr.msk.bf16.gmra.mrb[28].mxu1 %vm263_vm0, %v938_v33 }
  0xdd   :  { %v836_v35 = vpop.f32.mrb[0].mxu0  ;;  %v868_v36 = vpop.f32.mrb[0].mxu1 }
  0xde   :  { %v403_v37 = vadd.f32 %v836_v35, %v1123_v34  ;;  %v531_v38 = vadd.f32 %v868_v36, %v1123_v34  ;;  %v394_v39 = vpop.f32.mrb[1].mxu0  ;;  %v522_v40 = vpop.f32.mrb[1].mxu1 }
  0xdf   :  { %v395_v41 = vadd.f32 %v1123_v34, %v394_v39  ;;  %v523_v42 = vadd.f32 %v1123_v34, %v522_v40  ;;  %v837_v43 = vpop.f32.mrb[2].mxu0  ;;  %v869_v44 = vpop.f32.mrb[2].mxu1 }
  0xe0   :  { %651 = vst.msk [vmem:[#allocation2 + $0x10] sm:$0xff] %vm263_vm0, %v403_v37  ;;  %683 = vst.msk [vmem:[#allocation2 + $0x110] sm:$0xff] %vm263_vm0, %v531_v38  ;;  %v406_v45 = vadd.f32 %v837_v43, %v1123_v34  ;;  %v534_v46 = vadd.f32 %v869_v44, %v1123_v34  ;;  %v397_v47 = vpop.f32.mrb[3].mxu0  ;;  %v525_v48 = vpop.f32.mrb[3].mxu1 }
  0xe1   :  { %649 = vst.msk [vmem:[#allocation2] sm:$0xff] %vm263_vm0, %v395_v41  ;;  %681 = vst.msk [vmem:[#allocation2 + $0x100] sm:$0xff] %vm263_vm0, %v523_v42  ;;  %v398_v49 = vadd.f32 %v1123_v34, %v397_v47  ;;  %v526_v50 = vadd.f32 %v1123_v34, %v525_v48 }
  0xe2   :  { %652 = vst.msk [vmem:[#allocation2 + $0x18] sm:$0xff] %vm263_vm0, %v406_v45  ;;  %684 = vst.msk [vmem:[#allocation2 + $0x118] sm:$0xff] %vm263_vm0, %v534_v46 }
  0xe3   :  { %650 = vst.msk [vmem:[#allocation2 + $0x8] sm:$0xff] %vm263_vm0, %v398_v49  ;;  %682 = vst.msk [vmem:[#allocation2 + $0x108] sm:$0xff] %vm263_vm0, %v526_v50 }
  0xe5   :  { %v840_v51 = vpop.f32.mrb[4].mxu0  ;;  %v872_v52 = vpop.f32.mrb[4].mxu1 }
  0xe6   :  { %v419_v53 = vadd.f32 %v840_v51, %v1123_v34  ;;  %v547_v54 = vadd.f32 %v872_v52, %v1123_v34  ;;  %v410_v55 = vpop.f32.mrb[5].mxu0  ;;  %v538_v56 = vpop.f32.mrb[5].mxu1 }
  0xe7   :  { %v411_v57 = vadd.f32 %v1123_v34, %v410_v55  ;;  %v539_v58 = vadd.f32 %v1123_v34, %v538_v56  ;;  %v841_v59 = vpop.f32.mrb[6].mxu0  ;;  %v873_v60 = vpop.f32.mrb[6].mxu1 }
  0xe8   :  { %655 = vst.msk [vmem:[#allocation2 + $0x30] sm:$0xff] %vm263_vm0, %v419_v53  ;;  %687 = vst.msk [vmem:[#allocation2 + $0x130] sm:$0xff] %vm263_vm0, %v547_v54  ;;  %v422_v61 = vadd.f32 %v841_v59, %v1123_v34  ;;  %v550_v62 = vadd.f32 %v873_v60, %v1123_v34  ;;  %v413_v63 = vpop.f32.mrb[7].mxu0  ;;  %v541_v0 = vpop.f32.mrb[7].mxu1 }
  0xe9   :  { %653 = vst.msk [vmem:[#allocation2 + $0x20] sm:$0xff] %vm263_vm0, %v411_v57  ;;  %685 = vst.msk [vmem:[#allocation2 + $0x120] sm:$0xff] %vm263_vm0, %v539_v58  ;;  %v414_v1 = vadd.f32 %v1123_v34, %v413_v63  ;;  %v542_v2 = vadd.f32 %v1123_v34, %v541_v0 }
  0xea   :  { %656 = vst.msk [vmem:[#allocation2 + $0x38] sm:$0xff] %vm263_vm0, %v422_v61  ;;  %688 = vst.msk [vmem:[#allocation2 + $0x138] sm:$0xff] %vm263_vm0, %v550_v62 }
  0xeb   :  { %654 = vst.msk [vmem:[#allocation2 + $0x28] sm:$0xff] %vm263_vm0, %v414_v1  ;;  %686 = vst.msk [vmem:[#allocation2 + $0x128] sm:$0xff] %vm263_vm0, %v542_v2 }
  0xed   :  { %v844_v3 = vpop.f32.mrb[8].mxu0  ;;  %v876_v4 = vpop.f32.mrb[8].mxu1 }
  0xee   :  { %v435_v5 = vadd.f32 %v844_v3, %v1123_v34  ;;  %v563_v6 = vadd.f32 %v876_v4, %v1123_v34  ;;  %v426_v7 = vpop.f32.mrb[9].mxu0  ;;  %v554_v8 = vpop.f32.mrb[9].mxu1 }
  0xef   :  { %v427_v9 = vadd.f32 %v1123_v34, %v426_v7  ;;  %v555_v10 = vadd.f32 %v1123_v34, %v554_v8  ;;  %v845_v11 = vpop.f32.mrb[10].mxu0  ;;  %v877_v12 = vpop.f32.mrb[10].mxu1 }
  0xf0   :  { %659 = vst.msk [vmem:[#allocation2 + $0x50] sm:$0xff] %vm263_vm0, %v435_v5  ;;  %691 = vst.msk [vmem:[#allocation2 + $0x150] sm:$0xff] %vm263_vm0, %v563_v6  ;;  %v438_v13 = vadd.f32 %v845_v11, %v1123_v34  ;;  %v566_v14 = vadd.f32 %v877_v12, %v1123_v34  ;;  %v429_v15 = vpop.f32.mrb[11].mxu0  ;;  %v557_v16 = vpop.f32.mrb[11].mxu1 }
  0xf1   :  { %657 = vst.msk [vmem:[#allocation2 + $0x40] sm:$0xff] %vm263_vm0, %v427_v9  ;;  %689 = vst.msk [vmem:[#allocation2 + $0x140] sm:$0xff] %vm263_vm0, %v555_v10  ;;  %v430_v17 = vadd.f32 %v1123_v34, %v429_v15  ;;  %v558_v18 = vadd.f32 %v1123_v34, %v557_v16 }
  0xf2   :  { %660 = vst.msk [vmem:[#allocation2 + $0x58] sm:$0xff] %vm263_vm0, %v438_v13  ;;  %692 = vst.msk [vmem:[#allocation2 + $0x158] sm:$0xff] %vm263_vm0, %v566_v14 }
  0xf3   :  { %658 = vst.msk [vmem:[#allocation2 + $0x48] sm:$0xff] %vm263_vm0, %v430_v17  ;;  %690 = vst.msk [vmem:[#allocation2 + $0x148] sm:$0xff] %vm263_vm0, %v558_v18 }
  0xf5   :  { %v848_v19 = vpop.f32.mrb[12].mxu0  ;;  %v880_v20 = vpop.f32.mrb[12].mxu1 }
  0xf6   :  { %v451_v21 = vadd.f32 %v848_v19, %v1123_v34  ;;  %v579_v22 = vadd.f32 %v880_v20, %v1123_v34  ;;  %v442_v23 = vpop.f32.mrb[13].mxu0  ;;  %v570_v24 = vpop.f32.mrb[13].mxu1 }
  0xf7   :  { %v443_v25 = vadd.f32 %v1123_v34, %v442_v23  ;;  %v571_v26 = vadd.f32 %v1123_v34, %v570_v24  ;;  %v849_v27 = vpop.f32.mrb[14].mxu0  ;;  %v881_v28 = vpop.f32.mrb[14].mxu1 }
  0xf8   :  { %663 = vst.msk [vmem:[#allocation2 + $0x70] sm:$0xff] %vm263_vm0, %v451_v21  ;;  %695 = vst.msk [vmem:[#allocation2 + $0x170] sm:$0xff] %vm263_vm0, %v579_v22  ;;  %v454_v29 = vadd.f32 %v849_v27, %v1123_v34  ;;  %v582_v30 = vadd.f32 %v881_v28, %v1123_v34  ;;  %v445_v31 = vpop.f32.mrb[15].mxu0  ;;  %v573_v32 = vpop.f32.mrb[15].mxu1 }
  0xf9   :  { %661 = vst.msk [vmem:[#allocation2 + $0x60] sm:$0xff] %vm263_vm0, %v443_v25  ;;  %693 = vst.msk [vmem:[#allocation2 + $0x160] sm:$0xff] %vm263_vm0, %v571_v26  ;;  %v446_v33 = vadd.f32 %v1123_v34, %v445_v31  ;;  %v574_v35 = vadd.f32 %v1123_v34, %v573_v32 }
  0xfa   :  { %664 = vst.msk [vmem:[#allocation2 + $0x78] sm:$0xff] %vm263_vm0, %v454_v29  ;;  %696 = vst.msk [vmem:[#allocation2 + $0x178] sm:$0xff] %vm263_vm0, %v582_v30 }
  0xfb   :  { %662 = vst.msk [vmem:[#allocation2 + $0x68] sm:$0xff] %vm263_vm0, %v446_v33  ;;  %694 = vst.msk [vmem:[#allocation2 + $0x168] sm:$0xff] %vm263_vm0, %v574_v35 }
  0xfd   :  { %v852_v36 = vpop.f32.mrb[16].mxu0  ;;  %v884_v37 = vpop.f32.mrb[16].mxu1 }
  0xfe   :  { %v467_v38 = vadd.f32 %v852_v36, %v1123_v34  ;;  %v595_v39 = vadd.f32 %v884_v37, %v1123_v34  ;;  %v458_v40 = vpop.f32.mrb[17].mxu0  ;;  %v586_v41 = vpop.f32.mrb[17].mxu1 }
  0xff   :  { %v459_v42 = vadd.f32 %v1123_v34, %v458_v40  ;;  %v587_v43 = vadd.f32 %v1123_v34, %v586_v41  ;;  %v853_v44 = vpop.f32.mrb[18].mxu0  ;;  %v885_v45 = vpop.f32.mrb[18].mxu1 }
 0x100   :  { %667 = vst.msk [vmem:[#allocation2 + $0x90] sm:$0xff] %vm263_vm0, %v467_v38  ;;  %699 = vst.msk [vmem:[#allocation2 + $0x190] sm:$0xff] %vm263_vm0, %v595_v39  ;;  %v470_v46 = vadd.f32 %v853_v44, %v1123_v34  ;;  %v598_v47 = vadd.f32 %v885_v45, %v1123_v34  ;;  %v461_v48 = vpop.f32.mrb[19].mxu0  ;;  %v589_v49 = vpop.f32.mrb[19].mxu1 }
 0x101   :  { %665 = vst.msk [vmem:[#allocation2 + $0x80] sm:$0xff] %vm263_vm0, %v459_v42  ;;  %697 = vst.msk [vmem:[#allocation2 + $0x180] sm:$0xff] %vm263_vm0, %v587_v43  ;;  %v462_v50 = vadd.f32 %v1123_v34, %v461_v48  ;;  %v590_v51 = vadd.f32 %v1123_v34, %v589_v49 }
 0x102   :  { %668 = vst.msk [vmem:[#allocation2 + $0x98] sm:$0xff] %vm263_vm0, %v470_v46  ;;  %700 = vst.msk [vmem:[#allocation2 + $0x198] sm:$0xff] %vm263_vm0, %v598_v47 }
 0x103   :  { %666 = vst.msk [vmem:[#allocation2 + $0x88] sm:$0xff] %vm263_vm0, %v462_v50  ;;  %698 = vst.msk [vmem:[#allocation2 + $0x188] sm:$0xff] %vm263_vm0, %v590_v51 }
 0x105   :  { %v856_v52 = vpop.f32.mrb[20].mxu0  ;;  %v888_v53 = vpop.f32.mrb[20].mxu1 }
 0x106   :  { %v483_v54 = vadd.f32 %v856_v52, %v1123_v34  ;;  %v611_v55 = vadd.f32 %v888_v53, %v1123_v34  ;;  %v474_v56 = vpop.f32.mrb[21].mxu0  ;;  %v602_v57 = vpop.f32.mrb[21].mxu1 }
 0x107   :  { %v475_v58 = vadd.f32 %v1123_v34, %v474_v56  ;;  %v603_v59 = vadd.f32 %v1123_v34, %v602_v57  ;;  %v857_v60 = vpop.f32.mrb[22].mxu0  ;;  %v889_v61 = vpop.f32.mrb[22].mxu1 }
 0x108   :  { %671 = vst.msk [vmem:[#allocation2 + $0xb0] sm:$0xff] %vm263_vm0, %v483_v54  ;;  %703 = vst.msk [vmem:[#allocation2 + $0x1b0] sm:$0xff] %vm263_vm0, %v611_v55  ;;  %v486_v62 = vadd.f32 %v857_v60, %v1123_v34  ;;  %v614_v63 = vadd.f32 %v889_v61, %v1123_v34  ;;  %v477_v0 = vpop.f32.mrb[23].mxu0  ;;  %v605_v1 = vpop.f32.mrb[23].mxu1 }
 0x109   :  { %669 = vst.msk [vmem:[#allocation2 + $0xa0] sm:$0xff] %vm263_vm0, %v475_v58  ;;  %701 = vst.msk [vmem:[#allocation2 + $0x1a0] sm:$0xff] %vm263_vm0, %v603_v59  ;;  %v478_v2 = vadd.f32 %v1123_v34, %v477_v0  ;;  %v606_v3 = vadd.f32 %v1123_v34, %v605_v1 }
 0x10a   :  { %672 = vst.msk [vmem:[#allocation2 + $0xb8] sm:$0xff] %vm263_vm0, %v486_v62  ;;  %704 = vst.msk [vmem:[#allocation2 + $0x1b8] sm:$0xff] %vm263_vm0, %v614_v63 }
 0x10b   :  { %670 = vst.msk [vmem:[#allocation2 + $0xa8] sm:$0xff] %vm263_vm0, %v478_v2  ;;  %702 = vst.msk [vmem:[#allocation2 + $0x1a8] sm:$0xff] %vm263_vm0, %v606_v3 }
 0x10d   :  { %v860_v4 = vpop.f32.mrb[24].mxu0  ;;  %v892_v5 = vpop.f32.mrb[24].mxu1 }
 0x10e   :  { %v499_v6 = vadd.f32 %v860_v4, %v1123_v34  ;;  %v627_v7 = vadd.f32 %v892_v5, %v1123_v34  ;;  %v490_v8 = vpop.f32.mrb[25].mxu0  ;;  %v618_v9 = vpop.f32.mrb[25].mxu1 }
 0x10f   :  { %v491_v10 = vadd.f32 %v1123_v34, %v490_v8  ;;  %v619_v11 = vadd.f32 %v1123_v34, %v618_v9  ;;  %v861_v12 = vpop.f32.mrb[26].mxu0  ;;  %v893_v13 = vpop.f32.mrb[26].mxu1 }
 0x110   :  { %675 = vst.msk [vmem:[#allocation2 + $0xd0] sm:$0xff] %vm263_vm0, %v499_v6  ;;  %707 = vst.msk [vmem:[#allocation2 + $0x1d0] sm:$0xff] %vm263_vm0, %v627_v7  ;;  %v502_v14 = vadd.f32 %v861_v12, %v1123_v34  ;;  %v630_v15 = vadd.f32 %v893_v13, %v1123_v34  ;;  %v493_v16 = vpop.f32.mrb[27].mxu0  ;;  %v621_v17 = vpop.f32.mrb[27].mxu1 }
 0x111   :  { %673 = vst.msk [vmem:[#allocation2 + $0xc0] sm:$0xff] %vm263_vm0, %v491_v10  ;;  %705 = vst.msk [vmem:[#allocation2 + $0x1c0] sm:$0xff] %vm263_vm0, %v619_v11  ;;  %v494_v18 = vadd.f32 %v1123_v34, %v493_v16  ;;  %v622_v19 = vadd.f32 %v1123_v34, %v621_v17 }
 0x112   :  { %676 = vst.msk [vmem:[#allocation2 + $0xd8] sm:$0xff] %vm263_vm0, %v502_v14  ;;  %708 = vst.msk [vmem:[#allocation2 + $0x1d8] sm:$0xff] %vm263_vm0, %v630_v15 }
 0x113   :  { %674 = vst.msk [vmem:[#allocation2 + $0xc8] sm:$0xff] %vm263_vm0, %v494_v18  ;;  %706 = vst.msk [vmem:[#allocation2 + $0x1c8] sm:$0xff] %vm263_vm0, %v622_v19 }
 0x115   :  { %v864_v20 = vpop.f32.mrb[28].mxu0  ;;  %v896_v21 = vpop.f32.mrb[28].mxu1 }
 0x116   :  { %v515_v22 = vadd.f32 %v864_v20, %v1123_v34  ;;  %v643_v23 = vadd.f32 %v896_v21, %v1123_v34  ;;  %v506_v24 = vpop.f32.mrb[29].mxu0  ;;  %v634_v25 = vpop.f32.mrb[29].mxu1 }
 0x117   :  { %v507_v26 = vadd.f32 %v1123_v34, %v506_v24  ;;  %v635_v27 = vadd.f32 %v1123_v34, %v634_v25  ;;  %v865_v28 = vpop.f32.mrb[30].mxu0  ;;  %v897_v29 = vpop.f32.mrb[30].mxu1 }
 0x118   :  { %679 = vst.msk [vmem:[#allocation2 + $0xf0] sm:$0xff] %vm263_vm0, %v515_v22  ;;  %711 = vst.msk [vmem:[#allocation2 + $0x1f0] sm:$0xff] %vm263_vm0, %v643_v23  ;;  %v518_v30 = vadd.f32 %v865_v28, %v1123_v34  ;;  %v646_v31 = vadd.f32 %v897_v29, %v1123_v34  ;;  %v509_v32 = vpop.f32.mrb[31].mxu0  ;;  %v637_v33 = vpop.f32.mrb[31].mxu1 }
 0x119   :  { %677 = vst.msk [vmem:[#allocation2 + $0xe0] sm:$0xff] %vm263_vm0, %v507_v26  ;;  %709 = vst.msk [vmem:[#allocation2 + $0x1e0] sm:$0xff] %vm263_vm0, %v635_v27  ;;  %v510_v35 = vadd.f32 %v1123_v34, %v509_v32  ;;  %v638_v36 = vadd.f32 %v1123_v34, %v637_v33 }
 0x11a   :  { %680 = vst.msk [vmem:[#allocation2 + $0xf8] sm:$0xff] %vm263_vm0, %v518_v30  ;;  %712 = vst.msk [vmem:[#allocation2 + $0x1f8] sm:$0xff] %vm263_vm0, %v646_v31 }
 0x11b   :  { %678 = vst.msk [vmem:[#allocation2 + $0xe8] sm:$0xff] %vm263_vm0, %v510_v35  ;;  %710 = vst.msk [vmem:[#allocation2 + $0x1e8] sm:$0xff] %vm263_vm0, %v638_v36 }
 0x11c   :  { %950 = shalt.err (!%p947_p4)
}
 0x11d   :  { %s951_s28 = scalar_lea.hbm %s1268_s3, 8192 }
 0x11e   :  { %p952_p5 = scmp.ne.s32.totalorder %s1268_s3, %s951_s28  ;;  %p955_p6 = scmp.lt.u32.totalorder %s951_s28, %s1268_s3 }
 0x120   :  { %p957_p7 = pnand %p955_p6, %p952_p5 }
 0x122   :  { %960 = shalt.err (!%p957_p7)
}
 0x123   :  { %s964_s6 = smov 128   ;;  %s965_s7 = smov 8  }
 0x124   :  { %724 = dma.vmem_to_hbm [thread:$0]  %s719_s2, 8192, %s1268_s3, [#allocation3], %s964_s6, %s964_s6, %s965_s7  }
 0x125   :  { %961 = dma.done.wait [#allocation3], 8192  }
 0x126   :  { %962 = vsyncadd [#allocation3], 4294959104 }
 0x127   :  { %728 = vsyncpa [#allocation3], 1 }

</bundles_post_ra>
